<compile_context>
chip_gen: v6e
topology: v6e:2x2x1
jax: 0.10.0
libtpu: 0.0.40
codegen_flags: <defaults>
</compile_context>

<pallas_src>
import jax
import jax.numpy as jnp
from jax.experimental import pallas as pl
from jax.experimental.pallas import tpu as pltpu


def _pick_tile(n, candidates=(512, 256, 128)):
    for c in candidates:
        if n % c == 0:
            return c
    return n


def make_t5_self_attention(*, dim, heads, dim_head, seq_len,
                           tq=None, tkv=None, tp=None):
    D, H, dh, N = dim, heads, dim_head, seq_len
    inner = H * dh
    scale = dh ** -0.5
    tq = tq or _pick_tile(N)
    tkv = tkv or _pick_tile(N)
    tp = tp or _pick_tile(N)
    assert N % tq == 0 and N % tkv == 0 and N % tp == 0, \
        "seq_len must divide the chosen tiles"
    nq_tiles, nkv_tiles, np_tiles = N // tq, N // tkv, N // tp

    # -------------------- kernel 1: fused QKV projection --------------------
    def proj_kernel(x_ref, wq_ref, wk_ref, wv_ref, q_ref, k_ref, v_ref):
        x = x_ref[0]                                     # (tp, D), input dtype
        for h in range(H):                               # static unroll; weights resident
            q_ref[0, h] = jnp.dot(
                x, wq_ref[h], preferred_element_type=jnp.float32).astype(q_ref.dtype)
            k_ref[0, h] = jnp.dot(
                x, wk_ref[h], preferred_element_type=jnp.float32).astype(k_ref.dtype)
            v_ref[0, h] = jnp.dot(
                x, wv_ref[h], preferred_element_type=jnp.float32).astype(v_ref.dtype)

    # ---------- kernel 2: flash attention + deferred output projection ----------
    def attn_kernel(q_ref, k_ref, v_ref, wo_ref, o_ref,
                    m_sc, l_sc, acc_sc, ctx_sc):
        ki = pl.program_id(2)
        nkv = pl.num_programs(2)

        # New (b, q-tile) block: reset the online-softmax state for all heads.
        @pl.when(ki == 0)
        def _():
            m_sc[...] = jnp.full_like(m_sc, -jnp.inf)
            l_sc[...] = jnp.zeros_like(l_sc)
            acc_sc[...] = jnp.zeros_like(acc_sc)

        for h in range(H):                               # static unroll over heads
            q = q_ref[0, h]                              # (tq, dh)
            k = k_ref[0, h]                              # (tkv, dh)
            v = v_ref[0, h]                              # (tkv, dh)

            # q k^T without materializing a transpose: contract the last dims.
            s = jax.lax.dot_general(
                q, k, (((1,), (1,)), ((), ())),
                preferred_element_type=jnp.float32)      # (tq, tkv) f32

            m_prev = m_sc[h]
            m_new = jnp.maximum(m_prev, s.max(axis=-1, keepdims=True))
            alpha = jnp.exp(m_prev - m_new)
            p = jnp.exp(s - m_new)
            l_sc[h] = alpha * l_sc[h] + p.sum(axis=-1, keepdims=True)
            acc_sc[h] = alpha * acc_sc[h] + jnp.dot(
                p.astype(v.dtype), v, preferred_element_type=jnp.float32)
            m_sc[h] = m_new

        # Last kv tile: normalize every head (EUP reciprocal), build the
        # (tq, inner) context, and do ONE full-depth output projection.
        @pl.when(ki == nkv - 1)
        def _():
            for h in range(H):                           # static lane slices only
                head_out = acc_sc[h] * pl.reciprocal(l_sc[h], approx=True)
                ctx_sc[:, h * dh:(h + 1) * dh] = head_out.astype(ctx_sc.dtype)
            o_ref[0] = jnp.dot(ctx_sc[...], wo_ref[...],
                               preferred_element_type=jnp.float32
                               ).astype(o_ref.dtype)

    # ------------------------------ wrappers ------------------------------
    def prepare_weights(wq, wk, wv, wo):
        """One-time weight re-arrangement (wrapper side, not per tile)."""
        wq_r = (wq * scale).reshape(D, H, dh).transpose(1, 0, 2)   # [H, D, dh]
        wk_r = wk.reshape(D, H, dh).transpose(1, 0, 2)             # [H, D, dh]
        wv_r = wv.reshape(D, H, dh).transpose(1, 0, 2)             # [H, D, dh]
        return wq_r, wk_r, wv_r, wo                                # wo: [inner, D]

    def _project(x, wq_r, wk_r, wv_r):
        B = x.shape[0]
        dt = x.dtype
        return pl.pallas_call(
            proj_kernel,
            out_shape=(
                jax.ShapeDtypeStruct((B, H, N, dh), dt),
                jax.ShapeDtypeStruct((B, H, N, dh), dt),
                jax.ShapeDtypeStruct((B, H, N, dh), dt),
            ),
            grid_spec=pltpu.PrefetchScalarGridSpec(
                num_scalar_prefetch=0,
                grid=(B, np_tiles),
                in_specs=[
                    pl.BlockSpec((1, tp, D), lambda b, i: (b, i, 0)),
                    pl.BlockSpec((H, D, dh), lambda b, i: (0, 0, 0)),  # resident
                    pl.BlockSpec((H, D, dh), lambda b, i: (0, 0, 0)),  # resident
                    pl.BlockSpec((H, D, dh), lambda b, i: (0, 0, 0)),  # resident
                ],
                out_specs=[
                    pl.BlockSpec((1, H, tp, dh), lambda b, i: (b, 0, i, 0)),
                    pl.BlockSpec((1, H, tp, dh), lambda b, i: (b, 0, i, 0)),
                    pl.BlockSpec((1, H, tp, dh), lambda b, i: (b, 0, i, 0)),
                ],
            ),
            compiler_params=pltpu.CompilerParams(
                dimension_semantics=("parallel", "parallel"),
                vmem_limit_bytes=48 * 1024 * 1024,
            ),
        )(x, wq_r, wk_r, wv_r)

    def _attend(q, k, v, wo):
        B = q.shape[0]
        dt = q.dtype
        return pl.pallas_call(
            attn_kernel,
            out_shape=jax.ShapeDtypeStruct((B, N, D), dt),
            grid_spec=pltpu.PrefetchScalarGridSpec(
                num_scalar_prefetch=0,
                # (batch, q-tile) parallel; kv-tile reduces into VMEM scratch.
                grid=(B, nq_tiles, nkv_tiles),
                in_specs=[
                    pl.BlockSpec((1, H, tq, dh), lambda b, qi, ki: (b, 0, qi, 0)),
                    pl.BlockSpec((1, H, tkv, dh), lambda b, qi, ki: (b, 0, ki, 0)),
                    pl.BlockSpec((1, H, tkv, dh), lambda b, qi, ki: (b, 0, ki, 0)),
                    pl.BlockSpec((inner, D), lambda b, qi, ki: (0, 0)),  # resident wo
                ],
                out_specs=pl.BlockSpec((1, tq, D), lambda b, qi, ki: (b, qi, 0)),
                scratch_shapes=[
                    pltpu.VMEM((H, tq, 1), jnp.float32),   # running max
                    pltpu.VMEM((H, tq, 1), jnp.float32),   # running denominator
                    pltpu.VMEM((H, tq, dh), jnp.float32),  # attention accumulator
                    pltpu.VMEM((tq, inner), dt),           # all-head context for out proj
                ],
            ),
            compiler_params=pltpu.CompilerParams(
                dimension_semantics=("parallel", "parallel", "arbitrary"),
                vmem_limit_bytes=48 * 1024 * 1024,
            ),
        )(q, k, v, wo)

    def forward(x, wq_r, wk_r, wv_r, wo):
        B = x.shape[0]
        assert x.shape == (B, N, D)
        q, k, v = _project(x, wq_r, wk_r, wv_r)
        return _attend(q, k, v, wo)

    return forward, prepare_weights


def reference(x, wq, wk, wv, wo, heads, dim_head):
    B, N, D = x.shape
    scale = dim_head ** -0.5
    q = (x @ wq) * scale
    k = x @ wk
    v = x @ wv

    def split(t):
        return t.reshape(B, N, heads, dim_head).transpose(0, 2, 1, 3)

    q, k, v = split(q), split(k), split(v)
    sim = jnp.einsum('bhid,bhjd->bhij', q, k)
    attn = jax.nn.softmax(sim, axis=-1)
    out = jnp.einsum('bhij,bhjd->bhid', attn, v)
    out = out.transpose(0, 2, 1, 3).reshape(B, N, heads * dim_head)
    return out @ wo


if __name__ == "__main__":
    # N=1024 with the default 512 tiles -> 2 q-tiles x 2 kv-tiles, so both the
    # q-tiling and the kv-streaming (online softmax) paths are exercised while
    # keeping large, lane-dense tiles.  B * nq = 4 parallel grid units.
    B, N, D = 2, 1024, 128
    HEADS, DIM_HEAD = 4, 64
    INNER = HEADS * DIM_HEAD

    key = jax.random.PRNGKey(0)
    kx, kq, kk, kv_, ko = jax.random.split(key, 5)

    x  = jax.random.normal(kx, (B, N, D), dtype=jnp.float32)
    wq = jax.random.normal(kq, (D, INNER), dtype=jnp.float32) * 0.05
    wk = jax.random.normal(kk, (D, INNER), dtype=jnp.float32) * 0.05
    wv = jax.random.normal(kv_, (D, INNER), dtype=jnp.float32) * 0.05
    wo = jax.random.normal(ko, (INNER, D), dtype=jnp.float32) * 0.05

    forward, prepare_weights = make_t5_self_attention(
        dim=D, heads=HEADS, dim_head=DIM_HEAD, seq_len=N)
    wq_r, wk_r, wv_r, wo_r = prepare_weights(wq, wk, wv, wo)

    out = forward(x, wq_r, wk_r, wv_r, wo_r)
    out = jax.block_until_ready(out)

    ref = reference(x, wq, wk, wv, wo, HEADS, DIM_HEAD)
    assert out.shape == (B, N, D)
    # approx reciprocal in the softmax normalization => slightly relaxed tol.
    assert jnp.allclose(out, ref, atol=5e-3, rtol=5e-3), "mismatch vs JAX reference"

    print("KERNEL_OK")
</pallas_src>

<mosaic_0001>
module attributes {stable_mosaic.version = 11 : i64} {
  func.func @proj_kernel(%arg0: i32, %arg1: i32, %arg2: memref<1x512x128xf32, #tpu.memory_space<vmem>>, %arg3: memref<4x128x64xf32, #tpu.memory_space<vmem>>, %arg4: memref<4x128x64xf32, #tpu.memory_space<vmem>>, %arg5: memref<4x128x64xf32, #tpu.memory_space<vmem>>, %arg6: memref<1x4x512x64xf32, #tpu.memory_space<vmem>>, %arg7: memref<1x4x512x64xf32, #tpu.memory_space<vmem>>, %arg8: memref<1x4x512x64xf32, #tpu.memory_space<vmem>>) attributes {dimension_semantics = [#tpu.dimension_semantics<parallel>, #tpu.dimension_semantics<parallel>], iteration_bounds = array<i64: 2, 2>, scalar_prefetch = 0 : i64, scratch_operands = 0 : i64, tpu.core_type = #tpu.core_type<tc>, window_params = [{transform_indices = @transform_0, window_bounds = array<i64: 1, 512, 128>}, {pipeline_mode = #tpu.pipeline_mode<synchronous>, transform_indices = @transform_1, window_bounds = array<i64: 4, 128, 64>}, {pipeline_mode = #tpu.pipeline_mode<synchronous>, transform_indices = @transform_2, window_bounds = array<i64: 4, 128, 64>}, {pipeline_mode = #tpu.pipeline_mode<synchronous>, transform_indices = @transform_3, window_bounds = array<i64: 4, 128, 64>}, {transform_indices = @transform_4, window_bounds = array<i64: 1, 4, 512, 64>}, {transform_indices = @transform_5, window_bounds = array<i64: 1, 4, 512, 64>}, {transform_indices = @transform_6, window_bounds = array<i64: 1, 4, 512, 64>}]} {
    %c0 = arith.constant 0 : index
    %c0_0 = arith.constant 0 : index
    %c0_1 = arith.constant 0 : index
    %0 = vector.load %arg2[%c0, %c0_0, %c0_1] : memref<1x512x128xf32, #tpu.memory_space<vmem>>, vector<1x512x128xf32>
    %1 = vector.shape_cast %0 : vector<1x512x128xf32> to vector<512x128xf32>
    %c0_2 = arith.constant 0 : index
    %c0_3 = arith.constant 0 : index
    %c0_4 = arith.constant 0 : index
    %2 = vector.load %arg3[%c0_2, %c0_3, %c0_4] : memref<4x128x64xf32, #tpu.memory_space<vmem>>, vector<1x128x64xf32>
    %3 = vector.shape_cast %2 : vector<1x128x64xf32> to vector<128x64xf32>
    %cst = arith.constant dense<0.000000e+00> : vector<512x64xf32>
    %4 = tpu.matmul %1, %3, %cst {dimension_numbers = #tpu.dot_dimension_numbers<[1], [0], [0], [1], [0, 0, 1, 1], [], []>} : vector<512x128xf32>, vector<128x64xf32>, vector<512x64xf32> -> vector<512x64xf32>
    %c0_5 = arith.constant 0 : index
    %c0_6 = arith.constant 0 : index
    %c0_7 = arith.constant 0 : index
    %c0_8 = arith.constant 0 : index
    %5 = vector.load %arg6[%c0_5, %c0_6, %c0_7, %c0_8] : memref<1x4x512x64xf32, #tpu.memory_space<vmem>>, vector<1x1x512x64xf32>
    %6 = vector.shape_cast %5 : vector<1x1x512x64xf32> to vector<512x64xf32>
    %7 = vector.shape_cast %4 : vector<512x64xf32> to vector<1x1x512x64xf32>
    tpu.vector_store %arg6[%c0_5, %c0_6, %c0_7, %c0_8], %7 {strides = array<i32>} : memref<1x4x512x64xf32, #tpu.memory_space<vmem>>, vector<1x1x512x64xf32>,
    %c0_9 = arith.constant 0 : index
    %c0_10 = arith.constant 0 : index
    %c0_11 = arith.constant 0 : index
    %8 = vector.load %arg4[%c0_9, %c0_10, %c0_11] : memref<4x128x64xf32, #tpu.memory_space<vmem>>, vector<1x128x64xf32>
    %9 = vector.shape_cast %8 : vector<1x128x64xf32> to vector<128x64xf32>
    %cst_12 = arith.constant dense<0.000000e+00> : vector<512x64xf32>
    %10 = tpu.matmul %1, %9, %cst_12 {dimension_numbers = #tpu.dot_dimension_numbers<[1], [0], [0], [1], [0, 0, 1, 1], [], []>} : vector<512x128xf32>, vector<128x64xf32>, vector<512x64xf32> -> vector<512x64xf32>
    %c0_13 = arith.constant 0 : index
    %c0_14 = arith.constant 0 : index
    %c0_15 = arith.constant 0 : index
    %c0_16 = arith.constant 0 : index
    %11 = vector.load %arg7[%c0_13, %c0_14, %c0_15, %c0_16] : memref<1x4x512x64xf32, #tpu.memory_space<vmem>>, vector<1x1x512x64xf32>
    %12 = vector.shape_cast %11 : vector<1x1x512x64xf32> to vector<512x64xf32>
    %13 = vector.shape_cast %10 : vector<512x64xf32> to vector<1x1x512x64xf32>
    tpu.vector_store %arg7[%c0_13, %c0_14, %c0_15, %c0_16], %13 {strides = array<i32>} : memref<1x4x512x64xf32, #tpu.memory_space<vmem>>, vector<1x1x512x64xf32>,
    %c0_17 = arith.constant 0 : index
    %c0_18 = arith.constant 0 : index
    %c0_19 = arith.constant 0 : index
    %14 = vector.load %arg5[%c0_17, %c0_18, %c0_19] : memref<4x128x64xf32, #tpu.memory_space<vmem>>, vector<1x128x64xf32>
    %15 = vector.shape_cast %14 : vector<1x128x64xf32> to vector<128x64xf32>
    %cst_20 = arith.constant dense<0.000000e+00> : vector<512x64xf32>
    %16 = tpu.matmul %1, %15, %cst_20 {dimension_numbers = #tpu.dot_dimension_numbers<[1], [0], [0], [1], [0, 0, 1, 1], [], []>} : vector<512x128xf32>, vector<128x64xf32>, vector<512x64xf32> -> vector<512x64xf32>
    %c0_21 = arith.constant 0 : index
    %c0_22 = arith.constant 0 : index
    %c0_23 = arith.constant 0 : index
    %c0_24 = arith.constant 0 : index
    %17 = vector.load %arg8[%c0_21, %c0_22, %c0_23, %c0_24] : memref<1x4x512x64xf32, #tpu.memory_space<vmem>>, vector<1x1x512x64xf32>
    %18 = vector.shape_cast %17 : vector<1x1x512x64xf32> to vector<512x64xf32>
    %19 = vector.shape_cast %16 : vector<512x64xf32> to vector<1x1x512x64xf32>
    tpu.vector_store %arg8[%c0_21, %c0_22, %c0_23, %c0_24], %19 {strides = array<i32>} : memref<1x4x512x64xf32, #tpu.memory_space<vmem>>, vector<1x1x512x64xf32>,
    %c1 = arith.constant 1 : index
    %c0_25 = arith.constant 0 : index
    %c0_26 = arith.constant 0 : index
    %20 = vector.load %arg3[%c1, %c0_25, %c0_26] : memref<4x128x64xf32, #tpu.memory_space<vmem>>, vector<1x128x64xf32>
    %21 = vector.shape_cast %20 : vector<1x128x64xf32> to vector<128x64xf32>
    %cst_27 = arith.constant dense<0.000000e+00> : vector<512x64xf32>
    %22 = tpu.matmul %1, %21, %cst_27 {dimension_numbers = #tpu.dot_dimension_numbers<[1], [0], [0], [1], [0, 0, 1, 1], [], []>} : vector<512x128xf32>, vector<128x64xf32>, vector<512x64xf32> -> vector<512x64xf32>
    %c0_28 = arith.constant 0 : index
    %c1_29 = arith.constant 1 : index
    %c0_30 = arith.constant 0 : index
    %c0_31 = arith.constant 0 : index
    %23 = vector.load %arg6[%c0_28, %c1_29, %c0_30, %c0_31] : memref<1x4x512x64xf32, #tpu.memory_space<vmem>>, vector<1x1x512x64xf32>
    %24 = vector.shape_cast %23 : vector<1x1x512x64xf32> to vector<512x64xf32>
    %25 = vector.shape_cast %22 : vector<512x64xf32> to vector<1x1x512x64xf32>
    tpu.vector_store %arg6[%c0_28, %c1_29, %c0_30, %c0_31], %25 {strides = array<i32>} : memref<1x4x512x64xf32, #tpu.memory_space<vmem>>, vector<1x1x512x64xf32>,
    %c1_32 = arith.constant 1 : index
    %c0_33 = arith.constant 0 : index
    %c0_34 = arith.constant 0 : index
    %26 = vector.load %arg4[%c1_32, %c0_33, %c0_34] : memref<4x128x64xf32, #tpu.memory_space<vmem>>, vector<1x128x64xf32>
    %27 = vector.shape_cast %26 : vector<1x128x64xf32> to vector<128x64xf32>
    %cst_35 = arith.constant dense<0.000000e+00> : vector<512x64xf32>
    %28 = tpu.matmul %1, %27, %cst_35 {dimension_numbers = #tpu.dot_dimension_numbers<[1], [0], [0], [1], [0, 0, 1, 1], [], []>} : vector<512x128xf32>, vector<128x64xf32>, vector<512x64xf32> -> vector<512x64xf32>
    %c0_36 = arith.constant 0 : index
    %c1_37 = arith.constant 1 : index
    %c0_38 = arith.constant 0 : index
    %c0_39 = arith.constant 0 : index
    %29 = vector.load %arg7[%c0_36, %c1_37, %c0_38, %c0_39] : memref<1x4x512x64xf32, #tpu.memory_space<vmem>>, vector<1x1x512x64xf32>
    %30 = vector.shape_cast %29 : vector<1x1x512x64xf32> to vector<512x64xf32>
    %31 = vector.shape_cast %28 : vector<512x64xf32> to vector<1x1x512x64xf32>
    tpu.vector_store %arg7[%c0_36, %c1_37, %c0_38, %c0_39], %31 {strides = array<i32>} : memref<1x4x512x64xf32, #tpu.memory_space<vmem>>, vector<1x1x512x64xf32>,
    %c1_40 = arith.constant 1 : index
    %c0_41 = arith.constant 0 : index
    %c0_42 = arith.constant 0 : index
    %32 = vector.load %arg5[%c1_40, %c0_41, %c0_42] : memref<4x128x64xf32, #tpu.memory_space<vmem>>, vector<1x128x64xf32>
    %33 = vector.shape_cast %32 : vector<1x128x64xf32> to vector<128x64xf32>
    %cst_43 = arith.constant dense<0.000000e+00> : vector<512x64xf32>
    %34 = tpu.matmul %1, %33, %cst_43 {dimension_numbers = #tpu.dot_dimension_numbers<[1], [0], [0], [1], [0, 0, 1, 1], [], []>} : vector<512x128xf32>, vector<128x64xf32>, vector<512x64xf32> -> vector<512x64xf32>
    %c0_44 = arith.constant 0 : index
    %c1_45 = arith.constant 1 : index
    %c0_46 = arith.constant 0 : index
    %c0_47 = arith.constant 0 : index
    %35 = vector.load %arg8[%c0_44, %c1_45, %c0_46, %c0_47] : memref<1x4x512x64xf32, #tpu.memory_space<vmem>>, vector<1x1x512x64xf32>
    %36 = vector.shape_cast %35 : vector<1x1x512x64xf32> to vector<512x64xf32>
    %37 = vector.shape_cast %34 : vector<512x64xf32> to vector<1x1x512x64xf32>
    tpu.vector_store %arg8[%c0_44, %c1_45, %c0_46, %c0_47], %37 {strides = array<i32>} : memref<1x4x512x64xf32, #tpu.memory_space<vmem>>, vector<1x1x512x64xf32>,
    %c2 = arith.constant 2 : index
    %c0_48 = arith.constant 0 : index
    %c0_49 = arith.constant 0 : index
    %38 = vector.load %arg3[%c2, %c0_48, %c0_49] : memref<4x128x64xf32, #tpu.memory_space<vmem>>, vector<1x128x64xf32>
    %39 = vector.shape_cast %38 : vector<1x128x64xf32> to vector<128x64xf32>
    %cst_50 = arith.constant dense<0.000000e+00> : vector<512x64xf32>
    %40 = tpu.matmul %1, %39, %cst_50 {dimension_numbers = #tpu.dot_dimension_numbers<[1], [0], [0], [1], [0, 0, 1, 1], [], []>} : vector<512x128xf32>, vector<128x64xf32>, vector<512x64xf32> -> vector<512x64xf32>
    %c0_51 = arith.constant 0 : index
    %c2_52 = arith.constant 2 : index
    %c0_53 = arith.constant 0 : index
    %c0_54 = arith.constant 0 : index
    %41 = vector.load %arg6[%c0_51, %c2_52, %c0_53, %c0_54] : memref<1x4x512x64xf32, #tpu.memory_space<vmem>>, vector<1x1x512x64xf32>
    %42 = vector.shape_cast %41 : vector<1x1x512x64xf32> to vector<512x64xf32>
    %43 = vector.shape_cast %40 : vector<512x64xf32> to vector<1x1x512x64xf32>
    tpu.vector_store %arg6[%c0_51, %c2_52, %c0_53, %c0_54], %43 {strides = array<i32>} : memref<1x4x512x64xf32, #tpu.memory_space<vmem>>, vector<1x1x512x64xf32>,
    %c2_55 = arith.constant 2 : index
    %c0_56 = arith.constant 0 : index
    %c0_57 = arith.constant 0 : index
    %44 = vector.load %arg4[%c2_55, %c0_56, %c0_57] : memref<4x128x64xf32, #tpu.memory_space<vmem>>, vector<1x128x64xf32>
    %45 = vector.shape_cast %44 : vector<1x128x64xf32> to vector<128x64xf32>
    %cst_58 = arith.constant dense<0.000000e+00> : vector<512x64xf32>
    %46 = tpu.matmul %1, %45, %cst_58 {dimension_numbers = #tpu.dot_dimension_numbers<[1], [0], [0], [1], [0, 0, 1, 1], [], []>} : vector<512x128xf32>, vector<128x64xf32>, vector<512x64xf32> -> vector<512x64xf32>
    %c0_59 = arith.constant 0 : index
    %c2_60 = arith.constant 2 : index
    %c0_61 = arith.constant 0 : index
    %c0_62 = arith.constant 0 : index
    %47 = vector.load %arg7[%c0_59, %c2_60, %c0_61, %c0_62] : memref<1x4x512x64xf32, #tpu.memory_space<vmem>>, vector<1x1x512x64xf32>
    %48 = vector.shape_cast %47 : vector<1x1x512x64xf32> to vector<512x64xf32>
    %49 = vector.shape_cast %46 : vector<512x64xf32> to vector<1x1x512x64xf32>
    tpu.vector_store %arg7[%c0_59, %c2_60, %c0_61, %c0_62], %49 {strides = array<i32>} : memref<1x4x512x64xf32, #tpu.memory_space<vmem>>, vector<1x1x512x64xf32>,
    %c2_63 = arith.constant 2 : index
    %c0_64 = arith.constant 0 : index
    %c0_65 = arith.constant 0 : index
    %50 = vector.load %arg5[%c2_63, %c0_64, %c0_65] : memref<4x128x64xf32, #tpu.memory_space<vmem>>, vector<1x128x64xf32>
    %51 = vector.shape_cast %50 : vector<1x128x64xf32> to vector<128x64xf32>
    %cst_66 = arith.constant dense<0.000000e+00> : vector<512x64xf32>
    %52 = tpu.matmul %1, %51, %cst_66 {dimension_numbers = #tpu.dot_dimension_numbers<[1], [0], [0], [1], [0, 0, 1, 1], [], []>} : vector<512x128xf32>, vector<128x64xf32>, vector<512x64xf32> -> vector<512x64xf32>
    %c0_67 = arith.constant 0 : index
    %c2_68 = arith.constant 2 : index
    %c0_69 = arith.constant 0 : index
    %c0_70 = arith.constant 0 : index
    %53 = vector.load %arg8[%c0_67, %c2_68, %c0_69, %c0_70] : memref<1x4x512x64xf32, #tpu.memory_space<vmem>>, vector<1x1x512x64xf32>
    %54 = vector.shape_cast %53 : vector<1x1x512x64xf32> to vector<512x64xf32>
    %55 = vector.shape_cast %52 : vector<512x64xf32> to vector<1x1x512x64xf32>
    tpu.vector_store %arg8[%c0_67, %c2_68, %c0_69, %c0_70], %55 {strides = array<i32>} : memref<1x4x512x64xf32, #tpu.memory_space<vmem>>, vector<1x1x512x64xf32>,
    %c3 = arith.constant 3 : index
    %c0_71 = arith.constant 0 : index
    %c0_72 = arith.constant 0 : index
    %56 = vector.load %arg3[%c3, %c0_71, %c0_72] : memref<4x128x64xf32, #tpu.memory_space<vmem>>, vector<1x128x64xf32>
    %57 = vector.shape_cast %56 : vector<1x128x64xf32> to vector<128x64xf32>
    %cst_73 = arith.constant dense<0.000000e+00> : vector<512x64xf32>
    %58 = tpu.matmul %1, %57, %cst_73 {dimension_numbers = #tpu.dot_dimension_numbers<[1], [0], [0], [1], [0, 0, 1, 1], [], []>} : vector<512x128xf32>, vector<128x64xf32>, vector<512x64xf32> -> vector<512x64xf32>
    %c0_74 = arith.constant 0 : index
    %c3_75 = arith.constant 3 : index
    %c0_76 = arith.constant 0 : index
    %c0_77 = arith.constant 0 : index
    %59 = vector.load %arg6[%c0_74, %c3_75, %c0_76, %c0_77] : memref<1x4x512x64xf32, #tpu.memory_space<vmem>>, vector<1x1x512x64xf32>
    %60 = vector.shape_cast %59 : vector<1x1x512x64xf32> to vector<512x64xf32>
    %61 = vector.shape_cast %58 : vector<512x64xf32> to vector<1x1x512x64xf32>
    tpu.vector_store %arg6[%c0_74, %c3_75, %c0_76, %c0_77], %61 {strides = array<i32>} : memref<1x4x512x64xf32, #tpu.memory_space<vmem>>, vector<1x1x512x64xf32>,
    %c3_78 = arith.constant 3 : index
    %c0_79 = arith.constant 0 : index
    %c0_80 = arith.constant 0 : index
    %62 = vector.load %arg4[%c3_78, %c0_79, %c0_80] : memref<4x128x64xf32, #tpu.memory_space<vmem>>, vector<1x128x64xf32>
    %63 = vector.shape_cast %62 : vector<1x128x64xf32> to vector<128x64xf32>
    %cst_81 = arith.constant dense<0.000000e+00> : vector<512x64xf32>
    %64 = tpu.matmul %1, %63, %cst_81 {dimension_numbers = #tpu.dot_dimension_numbers<[1], [0], [0], [1], [0, 0, 1, 1], [], []>} : vector<512x128xf32>, vector<128x64xf32>, vector<512x64xf32> -> vector<512x64xf32>
    %c0_82 = arith.constant 0 : index
    %c3_83 = arith.constant 3 : index
    %c0_84 = arith.constant 0 : index
    %c0_85 = arith.constant 0 : index
    %65 = vector.load %arg7[%c0_82, %c3_83, %c0_84, %c0_85] : memref<1x4x512x64xf32, #tpu.memory_space<vmem>>, vector<1x1x512x64xf32>
    %66 = vector.shape_cast %65 : vector<1x1x512x64xf32> to vector<512x64xf32>
    %67 = vector.shape_cast %64 : vector<512x64xf32> to vector<1x1x512x64xf32>
    tpu.vector_store %arg7[%c0_82, %c3_83, %c0_84, %c0_85], %67 {strides = array<i32>} : memref<1x4x512x64xf32, #tpu.memory_space<vmem>>, vector<1x1x512x64xf32>,
    %c3_86 = arith.constant 3 : index
    %c0_87 = arith.constant 0 : index
    %c0_88 = arith.constant 0 : index
    %68 = vector.load %arg5[%c3_86, %c0_87, %c0_88] : memref<4x128x64xf32, #tpu.memory_space<vmem>>, vector<1x128x64xf32>
    %69 = vector.shape_cast %68 : vector<1x128x64xf32> to vector<128x64xf32>
    %cst_89 = arith.constant dense<0.000000e+00> : vector<512x64xf32>
    %70 = tpu.matmul %1, %69, %cst_89 {dimension_numbers = #tpu.dot_dimension_numbers<[1], [0], [0], [1], [0, 0, 1, 1], [], []>} : vector<512x128xf32>, vector<128x64xf32>, vector<512x64xf32> -> vector<512x64xf32>
    %c0_90 = arith.constant 0 : index
    %c3_91 = arith.constant 3 : index
    %c0_92 = arith.constant 0 : index
    %c0_93 = arith.constant 0 : index
    %71 = vector.load %arg8[%c0_90, %c3_91, %c0_92, %c0_93] : memref<1x4x512x64xf32, #tpu.memory_space<vmem>>, vector<1x1x512x64xf32>
    %72 = vector.shape_cast %71 : vector<1x1x512x64xf32> to vector<512x64xf32>
    %73 = vector.shape_cast %70 : vector<512x64xf32> to vector<1x1x512x64xf32>
    tpu.vector_store %arg8[%c0_90, %c3_91, %c0_92, %c0_93], %73 {strides = array<i32>} : memref<1x4x512x64xf32, #tpu.memory_space<vmem>>, vector<1x1x512x64xf32>,
    return
  }
  func.func @transform_0(%arg0: i32, %arg1: i32) -> (i32, i32, i32) {
    %c0_i32 = arith.constant 0 : i32
    %c0_i32_0 = arith.constant 0 : i32
    return %arg0, %arg1, %c0_i32 : i32, i32, i32
  }
  func.func @transform_1(%arg0: i32, %arg1: i32) -> (i32, i32, i32) {
    %c0_i32 = arith.constant 0 : i32
    %c0_i32_0 = arith.constant 0 : i32
    %c0_i32_1 = arith.constant 0 : i32
    %c0_i32_2 = arith.constant 0 : i32
    return %c0_i32, %c0_i32_0, %c0_i32_1 : i32, i32, i32
  }
  func.func @transform_2(%arg0: i32, %arg1: i32) -> (i32, i32, i32) {
    %c0_i32 = arith.constant 0 : i32
    %c0_i32_0 = arith.constant 0 : i32
    %c0_i32_1 = arith.constant 0 : i32
    %c0_i32_2 = arith.constant 0 : i32
    return %c0_i32, %c0_i32_0, %c0_i32_1 : i32, i32, i32
  }
  func.func @transform_3(%arg0: i32, %arg1: i32) -> (i32, i32, i32) {
    %c0_i32 = arith.constant 0 : i32
    %c0_i32_0 = arith.constant 0 : i32
    %c0_i32_1 = arith.constant 0 : i32
    %c0_i32_2 = arith.constant 0 : i32
    return %c0_i32, %c0_i32_0, %c0_i32_1 : i32, i32, i32
  }
  func.func @transform_4(%arg0: i32, %arg1: i32) -> (i32, i32, i32, i32) {
    %c0_i32 = arith.constant 0 : i32
    %c0_i32_0 = arith.constant 0 : i32
    %c0_i32_1 = arith.constant 0 : i32
    return %arg0, %c0_i32, %arg1, %c0_i32_0 : i32, i32, i32, i32
  }
  func.func @transform_5(%arg0: i32, %arg1: i32) -> (i32, i32, i32, i32) {
    %c0_i32 = arith.constant 0 : i32
    %c0_i32_0 = arith.constant 0 : i32
    %c0_i32_1 = arith.constant 0 : i32
    return %arg0, %c0_i32, %arg1, %c0_i32_0 : i32, i32, i32, i32
  }
  func.func @transform_6(%arg0: i32, %arg1: i32) -> (i32, i32, i32, i32) {
    %c0_i32 = arith.constant 0 : i32
    %c0_i32_0 = arith.constant 0 : i32
    %c0_i32_1 = arith.constant 0 : i32
    return %arg0, %c0_i32, %arg1, %c0_i32_0 : i32, i32, i32, i32
  }
}

</mosaic_0001>

<bundles_post_ra>
// kernel: tpu_custom_call.1
= control target key start
LH: loop header
LB: loop body
LE: loop exit
PB: predicated region body
PF: predicated region fallthrough
CT: control target
= control target key end

     0   :  { %s18077_s0 = inlined_call_operand.hbm [shape: f32[2,1024,128], index: 0, kind: input, shape index: {}]   ;;  %s18078_s1 = inlined_call_operand.vmem [shape: f32[4,128,64], index: 1, kind: input, shape index: {}]   ;;  %s18079_s2 = inlined_call_operand.vmem [shape: f32[4,128,64], index: 2, kind: input, shape index: {}]   ;;  %s18080_s3 = inlined_call_operand.vmem [shape: f32[4,128,64], index: 3, kind: input, shape index: {}]   ;;  %s18081_s4 = inlined_call_operand.vmem [shape: f32[2,4,1024,64], index: 4, kind: output, shape index: {0}]   ;;  %s18082_s5 = inlined_call_operand.vmem [shape: f32[2,4,1024,64], index: 5, kind: output, shape index: {1}]   ;;  %s18083_s6 = inlined_call_operand.vmem [shape: f32[2,4,1024,64], index: 6, kind: output, shape index: {2}]  }
   0x1   :  { %18122 = sst [smem:[#allocation18_spill]] %s18083_s6 }
   0x2   :  { %12 = vsyncpa [#allocation3], 0 }
   0x3   :  { %14 = vsyncpa [#allocation3 + $0x1], 0  ;;  %s12882_s21 = smov 0   ;;  %s12884_s22 = smov 0  }
   0x4   :  { %s12886_s23 = smov 0   ;;  %s12888_s24 = smov 0  }
   0x5   :  { %s12890_s25 = smov 0   ;;  %s12892_s26 = smov 0  }
   0x6   :  { %s12894_s27 = smov 0   ;;  %s12896_s28 = smov 0  }
   0x7 LB: > { %s9304_s29 = sadd.s32 4294967295, %s12842_s28   ;;  %s29_s30 = sadd.s32 1, %s12834_s26  ;;  %s12842_s28 = sphi %s12896_s28, %s20_s28   ;;  %s12838_s27 = sphi %s12894_s27, %s18174_s27   ;;  %s12834_s26 = sphi %s12892_s26, %s18173_s26   ;;  %s12830_s25 = sphi %s12890_s25, %s18172_s25   ;;  %s12826_s24 = sphi %s12888_s24, %s18171_s24   ;;  %s12822_s23 = sphi %s12886_s23, %s18170_s23   ;;  %s12818_s22 = sphi %s12884_s22, %s18169_s22   ;;  %s12814_s21 = sphi %s12882_s21, %s18168_s21  }
   0x8   : > { %p30_p0 = scmp.ge.s32.totalorder %s29_s30, 2  ;;  %s32_s7 = sadd.s32 1, %s12838_s27 }
   0x9   : > { %s41_s8 = sadd.s32 1, %s12822_s23  ;;  %p48_p1 = scmp.ne.s32.totalorder %s12822_s23, %s12818_s22 }
   0xa   : > { %s18176_s30 = smov (%p30_p0, %s29_s30), 0  ;;  %s18178_s7 = smov (!%p30_p0, %s32_s7), %s12838_s27 }
   0xb   : > { %18123 = sst [smem:[#allocation8_spill]] %s18176_s30  ;;  %s37_s9 = ssub.s32 %s12834_s26, %s18176_s30 }
   0xc   : > { %p49_p2 = scmp.eq.s32.totalorder %s12842_s28, 0  ;;  %p34_p3 = scmp.ge.s32.totalorder %s18178_s7, 2 }
   0xd   : > { %p54_p4 = scmp.ne.s32.totalorder %s12818_s22, %s12814_s21  ;;  %p55_p6 = scmp.eq.s32.totalorder %s9304_s29, 0 }
   0xe   : > { %p12936_p5 = por %p49_p2, %p48_p1  ;;  %s18180_s7 = smov (%p34_p3, %s18178_s7), 0 }
   0xf   : > { %18125 = sst [smem:[#allocation9_spill]] %s18180_s7  ;;  %p12942_p7 = por %p55_p6, %p54_p4 }
  0x10   : > { %p143_p8 = scmp.eq.s32.totalorder %s9304_s29, 3  ;;  %s36_s12 = ssub.s32 %s12838_s27, %s18180_s7 }
  0x11   : > { %s38_s13 = sor.u32 %s37_s9, %s36_s12  ;;  %p12553_p11 = scmp.lt.s32.totalorder %s12842_s28, 4 }
  0x12   : > { %p12951_p9 = por %p143_p8, %p48_p1  ;;  %p39_p10 = scmp.eq.s32.totalorder %s38_s13, 0 }
  0x13   : > { %s234_s15 = sand.u32 1, %s12822_s23   ;;  %s9309_s16 = sshll.u32 %s12834_s26, 6 }
  0x14   : > { %s12959_s17 = scalar_select %p39_p10, %s12822_s23, %s41_s8  }
  0x15   : > { %s9308_s18 = sshll.u32 %s234_s15, 9  ;;  %s9310_s19 = sshll.u32 %s12838_s27, 7 }
  0x16   : > { %s244_s20 = sadd.s32 %s9310_s19, %s9309_s16  ;;  %s238_s21 = scalar_lea.vmem [#allocation2], %s9308_s18 }
  0x17   : > { %s247_s29 = sshll.u32 %s238_s21, 4  ;;  %s9311_s7 = sshll.u32 %s244_s20, 7  ;;  %s248_s29 = int_to_ptr.vmem [resolvable:$true] %s247_s29 }
  0x18   : > { %s246_s30 = scalar_lea.hbm %s18077_s0, %s9311_s7  ;;  %p12967_p12 = pnand %p12553_p11, %p12936_p5 }
  0x19   : > { %p9312_p13 = scmp.ge.s32.totalorder %s12842_s28, 1  ;;  %s235_s8 = scalar_lea.sflag [#allocation3], %s234_s15 }
  0x1a   : > { %p12750_p0 = pneg %p12967_p12  ;;  %s12761_s13 = scalar_lea.vmem %s248_s29, 8192 }
  0x1b   : > { %p12762_p1 = scmp.ne.s32.totalorder %s248_s29, %s12761_s13  ;;  %s12844_s16 = smov [#allocation2]  }
  0x1c   : > { %s12766_s18 = sshll.u32 %s12844_s16, 4  ;;  %s12767_s18 = int_to_ptr.vmem [resolvable:$false] %s12766_s18 }
  0x1d   : > { %p12764_p2 = pnand %p12762_p1, %p12750_p0  ;;  %s12768_s19 = scalar_lea.vmem %s12767_s18, 16384 }
  0x1e   : > { %p12769_p4 = scmp.lt.s32.totalorder %s248_s29, %s12767_s18  ;;  %p12770_p6 = scmp.lt.s32.totalorder %s12768_s19, %s12761_s13 }
  0x1f   : > { %p12765_p3 = pneg %p12764_p2 }
  0x20   : > { %p12771_p8 = por %p12770_p6, %p12769_p4 }
  0x22   : > { %p12772_p5 = pnand %p12771_p8, %p12765_p3 }
  0x24   : > { %12775 = shalt.err (!%p12772_p5)
}
  0x25   : > { %s12845_s7 = smov 128   ;;  %s12846_s10 = smov 8  }
  0x26   : > { %12552 = dma.hbm_to_vmem [thread:$0]  (!%p12967_p12), %s246_s30, 8192, %s248_s29, %s235_s8, %s12845_s7, %s12845_s7, %s12846_s10  }
  0x27   : > { %p255_p10 = scmp.lt.s32.totalorder %s12842_s28, 5 }
  0x29   : > { %p256_p11 = pnand %p9312_p13, %p255_p10 }
  0x2b   : > { %259 = sbr.rel (%p256_p11) target bundleno = 1413 (0x585), region = 36 }
  0x30   : > { %s12980_s15 = sand.u32 1, %s12818_s22  }
  0x31   : > { %s9313_s20 = sshll.u32 %s12980_s15, 9  ;;  %s262_s21 = scalar_lea.sflag [#allocation3], %s12980_s15 }
  0x32   : > { %s12984_s9 = scalar_lea.vmem [#allocation2], %s9313_s20 }
  0x33   : > { %12809 = dma.done.wait (%p12942_p7), %s262_s21, 8192  }
  0x34   : > { %12811 = vsyncadd (%p12942_p7), %s262_s21, 4294959104  ;;  %v384_v0 = vld [vmem:[%s18078_s1 + $0x78] sm:$0xff]  ;;  %v383_v2 = vld [vmem:[%s18078_s1 + $0x70] sm:$0xff]  ;;  %s13669_s7 = sshll.u32 %s12980_s15, 11  ;;  %vm770_vm0 = vcmask 523264   ;;  %s10041_s10 = sshll.u32 (%p12951_p9), %s12830_s25, 9 }
  0x35   : > { %v850_v1 = vld [vmem:[%s18079_s2 + $0x78] sm:$0xff]  ;;  %11011 = vmatprep.subr.mxu0 %v384_v0  ;;  %v849_v3 = vld [vmem:[%s18079_s2 + $0x70] sm:$0xff]  ;;  %v382_v4 = vld [vmem:[%s18078_s1 + $0x68] sm:$0xff]  ;;  %s13690_s15 = scalar_lea.vmem [#allocation4], %s13669_s7  ;;  %s13695_s30 = scalar_lea.vmem [#allocation5], %s13669_s7 }
  0x36   : > { %11139 = vmatprep.subr.mxu1 %v850_v1  ;;  %11012 = vmatpush3.msra.mxu0 %v384_v0  ;;  %v848_v5 = vld [vmem:[%s18079_s2 + $0x68] sm:$0xff]  ;;  %v381_v6 = vld [vmem:[%s18078_s1 + $0x60] sm:$0xff]  ;;  %v380_v8 = vld [vmem:[%s18078_s1 + $0x58] sm:$0xff]  ;;  %s14286_s16 = scalar_lea.vmem [#allocation6], %s13669_s7 }
  0x37   : > { %11140 = vmatpush3.msra.mxu1 %v850_v1  ;;  %11013 = vmatprep.subr.mxu0 %v383_v2  ;;  %v847_v7 = vld [vmem:[%s18079_s2 + $0x60] sm:$0xff]  ;;  %v846_v9 = vld [vmem:[%s18079_s2 + $0x58] sm:$0xff]  ;;  %v379_v10 = vld [vmem:[%s18078_s1 + $0x50] sm:$0xff] }
  0x38   : > { %11141 = vmatprep.subr.mxu1 %v849_v3  ;;  %11014 = vmatpush3.msra.mxu0 %v383_v2  ;;  %v845_v11 = vld [vmem:[%s18079_s2 + $0x50] sm:$0xff]  ;;  %v378_v12 = vld [vmem:[%s18078_s1 + $0x48] sm:$0xff]  ;;  %v377_v14 = vld [vmem:[%s18078_s1 + $0x40] sm:$0xff] }
  0x39   : > { %11142 = vmatpush3.msra.mxu1 %v849_v3  ;;  %11015 = vmatprep.subr.mxu0 %v382_v4  ;;  %v844_v13 = vld [vmem:[%s18079_s2 + $0x48] sm:$0xff]  ;;  %v843_v15 = vld [vmem:[%s18079_s2 + $0x40] sm:$0xff]  ;;  %v376_v16 = vld [vmem:[%s18078_s1 + $0x38] sm:$0xff] }
  0x3a   : > { %11143 = vmatprep.subr.mxu1 %v848_v5  ;;  %11016 = vmatpush3.msra.mxu0 %v382_v4  ;;  %v842_v17 = vld [vmem:[%s18079_s2 + $0x38] sm:$0xff]  ;;  %v375_v18 = vld [vmem:[%s18078_s1 + $0x30] sm:$0xff]  ;;  %v374_v20 = vld [vmem:[%s18078_s1 + $0x28] sm:$0xff] }
  0x3b   : > { %11144 = vmatpush3.msra.mxu1 %v848_v5  ;;  %11017 = vmatprep.subr.mxu0 %v381_v6  ;;  %v841_v19 = vld [vmem:[%s18079_s2 + $0x30] sm:$0xff]  ;;  %v840_v21 = vld [vmem:[%s18079_s2 + $0x28] sm:$0xff]  ;;  %v373_v22 = vld [vmem:[%s18078_s1 + $0x20] sm:$0xff] }
  0x3c   : > { %11145 = vmatprep.subr.mxu1 %v847_v7  ;;  %11018 = vmatpush3.msra.mxu0 %v381_v6  ;;  %v839_v23 = vld [vmem:[%s18079_s2 + $0x20] sm:$0xff]  ;;  %v372_v24 = vld [vmem:[%s18078_s1 + $0x18] sm:$0xff]  ;;  %v371_v26 = vld [vmem:[%s18078_s1 + $0x10] sm:$0xff] }
  0x3d   : > { %11146 = vmatpush3.msra.mxu1 %v847_v7  ;;  %11019 = vmatprep.subr.mxu0 %v380_v8  ;;  %v838_v25 = vld [vmem:[%s18079_s2 + $0x18] sm:$0xff]  ;;  %v837_v27 = vld [vmem:[%s18079_s2 + $0x10] sm:$0xff]  ;;  %v370_v28 = vld [vmem:[%s18078_s1 + $0x8] sm:$0xff] }
  0x3e   : > { %11147 = vmatprep.subr.mxu1 %v846_v9  ;;  %11020 = vmatpush3.msra.mxu0 %v380_v8  ;;  %v836_v29 = vld [vmem:[%s18079_s2 + $0x8] sm:$0xff]  ;;  %v369_v30 = vld [vmem:[%s18078_s1] sm:$0xff]  ;;  %v1315_v34 = vld [vmem:[%s18080_s3 + $0x78] sm:$0xff] }
  0x3f   : > { %11148 = vmatpush3.msra.mxu1 %v846_v9  ;;  %11021 = vmatprep.subr.mxu0 %v379_v10  ;;  %v835_v31 = vld [vmem:[%s18079_s2] sm:$0xff]  ;;  %v13090_v33 = vld [vmem:[%s12984_s9 + $0x8] sm:$0xff]  ;;  %v9332_v35 = vld [vmem:[%s18078_s1 + $0xf8] sm:$0xff] }
  0x40   : > { %11149 = vmatprep.subr.mxu1 %v845_v11  ;;  %11022 = vmatpush3.msra.mxu0 %v379_v10  ;;  %v13087_v32 = vld [vmem:[%s12984_s9] sm:$0xff]  ;;  %v13103_v36 = vld [vmem:[%s12984_s9 + $0x10] sm:$0xff]  ;;  %v13106_v37 = vld [vmem:[%s12984_s9 + $0x18] sm:$0xff] }
  0x41   : > { %11150 = vmatpush3.msra.mxu1 %v845_v11  ;;  %11023 = vmatprep.subr.mxu0 %v378_v12  ;;  %v13109_v38 = vld [vmem:[%s12984_s9 + $0x20] sm:$0xff]  ;;  %v1314_v39 = vld [vmem:[%s18080_s3 + $0x70] sm:$0xff]  ;;  %v13124_v41 = vld [vmem:[%s12984_s9 + $0x28] sm:$0xff] }
  0x42   : > { %11151 = vmatprep.subr.mxu1 %v844_v13  ;;  %11024 = vmatpush3.msra.mxu0 %v378_v12  ;;  %v9331_v40 = vld [vmem:[%s18078_s1 + $0xf0] sm:$0xff]  ;;  %v1313_v43 = vld [vmem:[%s18080_s3 + $0x68] sm:$0xff]  ;;  %v13140_v45 = vld [vmem:[%s12984_s9 + $0x38] sm:$0xff] }
  0x43   : > { %11152 = vmatpush3.msra.mxu1 %v844_v13  ;;  %11025 = vmatprep.subr.mxu0 %v377_v14  ;;  %v13127_v42 = vld [vmem:[%s12984_s9 + $0x30] sm:$0xff]  ;;  %v9330_v44 = vld [vmem:[%s18078_s1 + $0xe8] sm:$0xff]  ;;  %v13143_v46 = vld [vmem:[%s12984_s9 + $0x40] sm:$0xff] }
  0x44   : > { %11153 = vmatprep.subr.mxu1 %v843_v15  ;;  %11026 = vmatpush3.msra.mxu0 %v377_v14  ;;  %v1312_v47 = vld [vmem:[%s18080_s3 + $0x60] sm:$0xff]  ;;  %v13156_v49 = vld [vmem:[%s12984_s9 + $0x48] sm:$0xff]  ;;  %v13159_v50 = vld [vmem:[%s12984_s9 + $0x50] sm:$0xff] }
  0x45   : > { %11154 = vmatpush3.msra.mxu1 %v843_v15  ;;  %11027 = vmatprep.subr.mxu0 %v376_v16  ;;  %v9329_v48 = vld [vmem:[%s18078_s1 + $0xe0] sm:$0xff]  ;;  %v1311_v51 = vld [vmem:[%s18080_s3 + $0x58] sm:$0xff]  ;;  %v1310_v55 = vld [vmem:[%s18080_s3 + $0x50] sm:$0xff] }
  0x46   : > { %11155 = vmatprep.subr.mxu1 %v842_v17  ;;  %11028 = vmatpush3.msra.mxu0 %v376_v16  ;;  %v9328_v52 = vld [vmem:[%s18078_s1 + $0xd8] sm:$0xff]  ;;  %v13175_v54 = vld [vmem:[%s12984_s9 + $0x60] sm:$0xff]  ;;  %v9327_v56 = vld [vmem:[%s18078_s1 + $0xd0] sm:$0xff] }
  0x47   : > { %11156 = vmatpush3.msra.mxu1 %v842_v17  ;;  %11029 = vmatprep.subr.mxu0 %v375_v18  ;;  %v13172_v53 = vld [vmem:[%s12984_s9 + $0x58] sm:$0xff]  ;;  %v13188_v57 = vld [vmem:[%s12984_s9 + $0x68] sm:$0xff]  ;;  %v13191_v58 = vld [vmem:[%s12984_s9 + $0x70] sm:$0xff] }
  0x48   : > { %11157 = vmatprep.subr.mxu1 %v841_v19  ;;  %11030 = vmatpush3.msra.mxu0 %v375_v18  ;;  %v1309_v59 = vld [vmem:[%s18080_s3 + $0x48] sm:$0xff]  ;;  %v13204_v61 = vld [vmem:[%s12984_s9 + $0x78] sm:$0xff]  ;;  %v13207_v62 = vld [vmem:[%s12984_s9 + $0x80] sm:$0xff] }
  0x49   : > { %11158 = vmatpush3.msra.mxu1 %v841_v19  ;;  %11031 = vmatprep.subr.mxu0 %v374_v20  ;;  %v9326_v60 = vld [vmem:[%s18078_s1 + $0xc8] sm:$0xff]  ;;  %v1308_v63 = vld [vmem:[%s18080_s3 + $0x40] sm:$0xff]  ;;  %v13223_v2 = vld [vmem:[%s12984_s9 + $0x90] sm:$0xff] }
  0x4a   : > { %11159 = vmatprep.subr.mxu1 %v840_v21  ;;  %11032 = vmatpush3.msra.mxu0 %v374_v20  ;;  %v9325_v0 = vld [vmem:[%s18078_s1 + $0xc0] sm:$0xff]  ;;  %v13220_v1 = vld [vmem:[%s12984_s9 + $0x88] sm:$0xff]  ;;  %v1307_v3 = vld [vmem:[%s18080_s3 + $0x38] sm:$0xff] }
  0x4b   : > { %11160 = vmatpush3.msra.mxu1 %v840_v21  ;;  %11033 = vmatprep.subr.mxu0 %v373_v22  ;;  %v9324_v4 = vld [vmem:[%s18078_s1 + $0xb8] sm:$0xff]  ;;  %v13239_v6 = vld [vmem:[%s12984_s9 + $0xa0] sm:$0xff]  ;;  %v1306_v7 = vld [vmem:[%s18080_s3 + $0x30] sm:$0xff] }
  0x4c   : > { %11161 = vmatprep.subr.mxu1 %v839_v23  ;;  %11034 = vmatpush3.msra.mxu0 %v373_v22  ;;  %v13236_v5 = vld [vmem:[%s12984_s9 + $0x98] sm:$0xff]  ;;  %v9323_v8 = vld [vmem:[%s18078_s1 + $0xb0] sm:$0xff]  ;;  %v13252_v9 = vld [vmem:[%s12984_s9 + $0xa8] sm:$0xff] }
  0x4d   : > { %11162 = vmatpush3.msra.mxu1 %v839_v23  ;;  %11035 = vmatprep.subr.mxu0 %v372_v24  ;;  %v13255_v10 = vld [vmem:[%s12984_s9 + $0xb0] sm:$0xff]  ;;  %v1305_v11 = vld [vmem:[%s18080_s3 + $0x28] sm:$0xff]  ;;  %v13268_v13 = vld [vmem:[%s12984_s9 + $0xb8] sm:$0xff] }
  0x4e   : > { %11163 = vmatprep.subr.mxu1 %v838_v25  ;;  %11036 = vmatpush3.msra.mxu0 %v372_v24  ;;  %v9322_v12 = vld [vmem:[%s18078_s1 + $0xa8] sm:$0xff]  ;;  %v13271_v14 = vld [vmem:[%s12984_s9 + $0xc0] sm:$0xff]  ;;  %v13287_v18 = vld [vmem:[%s12984_s9 + $0xd0] sm:$0xff] }
  0x4f   : > { %11164 = vmatpush3.msra.mxu1 %v838_v25  ;;  %11037 = vmatprep.subr.mxu0 %v371_v26  ;;  %v1304_v15 = vld [vmem:[%s18080_s3 + $0x20] sm:$0xff]  ;;  %v13284_v17 = vld [vmem:[%s12984_s9 + $0xc8] sm:$0xff]  ;;  %v1303_v19 = vld [vmem:[%s18080_s3 + $0x18] sm:$0xff] }
  0x50   : > { %11165 = vmatprep.subr.mxu1 %v837_v27  ;;  %11038 = vmatpush3.msra.mxu0 %v371_v26  ;;  %v9321_v16 = vld [vmem:[%s18078_s1 + $0xa0] sm:$0xff]  ;;  %v9320_v20 = vld [vmem:[%s18078_s1 + $0x98] sm:$0xff]  ;;  %v1302_v23 = vld [vmem:[%s18080_s3 + $0x10] sm:$0xff] }
  0x51   : > { %11166 = vmatpush3.msra.mxu1 %v837_v27  ;;  %11039 = vmatprep.subr.mxu0 %v370_v28  ;;  %v13300_v21 = vld [vmem:[%s12984_s9 + $0xd8] sm:$0xff]  ;;  %v13303_v22 = vld [vmem:[%s12984_s9 + $0xe0] sm:$0xff]  ;;  %v9319_v24 = vld [vmem:[%s18078_s1 + $0x90] sm:$0xff] }
  0x52   : > { %11167 = vmatprep.subr.mxu1 %v836_v29  ;;  %11040 = vmatpush3.msra.mxu0 %v370_v28  ;;  %v13316_v25 = vld [vmem:[%s12984_s9 + $0xe8] sm:$0xff]  ;;  %v13319_v26 = vld [vmem:[%s12984_s9 + $0xf0] sm:$0xff] }
  0x53   : > { %11168 = vmatpush3.msra.mxu1 %v836_v29  ;;  %11041 = vmatprep.subr.mxu0 %v369_v30  ;;  %v1301_v27 = vld [vmem:[%s18080_s3 + $0x8] sm:$0xff]  ;;  %v13332_v29 = vld [vmem:[%s12984_s9 + $0xf8] sm:$0xff] }
  0x54   : > { %11169 = vmatprep.subr.mxu1 %v835_v31  ;;  %11042 = vmatpush3.msra.mxu0 %v369_v30  ;;  %v9318_v28 = vld [vmem:[%s18078_s1 + $0x88] sm:$0xff]  ;;  %v13335_v30 = vld [vmem:[%s12984_s9 + $0x100] sm:$0xff] }
  0x55   : > { %11043 = vmatprep.mubr.f32.mxu0 %v13087_v32  ;;  %11170 = vmatpush3.msra.mxu1 %v835_v31  ;;  %v1300_v31 = vld [vmem:[%s18080_s3] sm:$0xff] }
  0x56   : > { %11171 = vmatprep.mubr.f32.mxu1 %v13087_v32  ;;  %11044 = vmatmul.mubr.f32.vlgmr.msra.gmra.mxu0 %v13090_v33 }
  0x57   : > { %11172 = vmatmul.mubr.f32.vlgmr.msra.gmra.mxu1 %v13090_v33  ;;  %11267 = vmatprep.subr.mxu0 %v1315_v34 }
  0x58   : > { %11395 = vmatprep.subr.mxu1 %v9332_v35  ;;  %11268 = vmatpush3.msra.mxu0 %v1315_v34  ;;  %v9317_v34 = vld [vmem:[%s18078_s1 + $0x80] sm:$0xff] }
  0x59   : > { %11396 = vmatpush3.msra.mxu1 %v9332_v35  ;;  %11046 = vmatprep.mubr.f32.mxu0 %v13103_v36  ;;  %v13348_v35 = vld [vmem:[%s12984_s9 + $0x108] sm:$0xff] }
  0x5a   : > { %11174 = vmatprep.mubr.f32.mxu1 %v13103_v36  ;;  %11047 = vmatmul.mubr.f32.gmra.mxu0 %v13106_v37 }
  0x5b   : > { %11175 = vmatmul.mubr.f32.gmra.mxu1 %v13106_v37  ;;  %11049 = vmatprep.mubr.f32.mxu0 %v13109_v38 }
  0x5c   : > { %11177 = vmatprep.mubr.f32.mxu1 %v13109_v38  ;;  %11269 = vmatprep.subr.mxu0 %v1314_v39 }
  0x5d   : > { %11397 = vmatprep.subr.mxu1 %v9331_v40  ;;  %11270 = vmatpush3.msra.mxu0 %v1314_v39  ;;  %v13351_v39 = vld [vmem:[%s12984_s9 + $0x110] sm:$0xff] }
  0x5e   : > { %11398 = vmatpush3.msra.mxu1 %v9331_v40  ;;  %11050 = vmatmul.mubr.f32.gmra.mxu0 %v13124_v41  ;;  %v13356_v40 = vld [vmem:[%s18079_s2 + $0xf8] sm:$0xff] }
  0x5f   : > { %11178 = vmatmul.mubr.f32.gmra.mxu1 %v13124_v41  ;;  %11052 = vmatprep.mubr.f32.mxu0 %v13127_v42 }
  0x60   : > { %11180 = vmatprep.mubr.f32.mxu1 %v13127_v42  ;;  %11271 = vmatprep.subr.mxu0 %v1313_v43 }
  0x61   : > { %11399 = vmatprep.subr.mxu1 %v9330_v44  ;;  %11272 = vmatpush3.msra.mxu0 %v1313_v43  ;;  %v13361_v43 = vld [vmem:[%s18080_s3 + $0xf8] sm:$0xff] }
  0x62   : > { %11400 = vmatpush3.msra.mxu1 %v9330_v44  ;;  %11053 = vmatmul.mubr.f32.gmra.mxu0 %v13140_v45  ;;  %v13368_v44 = vld [vmem:[%s12984_s9 + $0x118] sm:$0xff] }
  0x63   : > { %11181 = vmatmul.mubr.f32.gmra.mxu1 %v13140_v45  ;;  %11055 = vmatprep.mubr.f32.mxu0 %v13143_v46 }
  0x64   : > { %11183 = vmatprep.mubr.f32.mxu1 %v13143_v46  ;;  %11273 = vmatprep.subr.mxu0 %v1312_v47 }
  0x65   : > { %11401 = vmatprep.subr.mxu1 %v9329_v48  ;;  %11274 = vmatpush3.msra.mxu0 %v1312_v47  ;;  %v13371_v47 = vld [vmem:[%s12984_s9 + $0x120] sm:$0xff] }
  0x66   : > { %11402 = vmatpush3.msra.mxu1 %v9329_v48  ;;  %11056 = vmatmul.mubr.f32.gmra.mxu0 %v13156_v49  ;;  %v13380_v48 = vld [vmem:[%s12984_s9 + $0x128] sm:$0xff] }
  0x67   : > { %11184 = vmatmul.mubr.f32.gmra.mxu1 %v13156_v49  ;;  %11058 = vmatprep.mubr.f32.mxu0 %v13159_v50 }
  0x68   : > { %11186 = vmatprep.mubr.f32.mxu1 %v13159_v50  ;;  %11275 = vmatprep.subr.mxu0 %v1311_v51 }
  0x69   : > { %11403 = vmatprep.subr.mxu1 %v9328_v52  ;;  %11276 = vmatpush3.msra.mxu0 %v1311_v51  ;;  %v13383_v51 = vld [vmem:[%s12984_s9 + $0x130] sm:$0xff] }
  0x6a   : > { %11404 = vmatpush3.msra.mxu1 %v9328_v52  ;;  %11059 = vmatmul.mubr.f32.gmra.mxu0 %v13172_v53  ;;  %v13390_v52 = vld [vmem:[%s12984_s9 + $0x138] sm:$0xff] }
  0x6b   : > { %11187 = vmatmul.mubr.f32.gmra.mxu1 %v13172_v53  ;;  %11061 = vmatprep.mubr.f32.mxu0 %v13175_v54 }
  0x6c   : > { %11189 = vmatprep.mubr.f32.mxu1 %v13175_v54  ;;  %11277 = vmatprep.subr.mxu0 %v1310_v55 }
  0x6d   : > { %11405 = vmatprep.subr.mxu1 %v9327_v56  ;;  %11278 = vmatpush3.msra.mxu0 %v1310_v55  ;;  %v13393_v55 = vld [vmem:[%s12984_s9 + $0x140] sm:$0xff] }
  0x6e   : > { %11406 = vmatpush3.msra.mxu1 %v9327_v56  ;;  %11062 = vmatmul.mubr.f32.gmra.mxu0 %v13188_v57  ;;  %v13400_v56 = vld [vmem:[%s12984_s9 + $0x148] sm:$0xff] }
  0x6f   : > { %11190 = vmatmul.mubr.f32.gmra.mxu1 %v13188_v57  ;;  %11064 = vmatprep.mubr.f32.mxu0 %v13191_v58 }
  0x70   : > { %11192 = vmatprep.mubr.f32.mxu1 %v13191_v58  ;;  %11279 = vmatprep.subr.mxu0 %v1309_v59 }
  0x71   : > { %11407 = vmatprep.subr.mxu1 %v9326_v60  ;;  %11280 = vmatpush3.msra.mxu0 %v1309_v59  ;;  %v13403_v59 = vld [vmem:[%s12984_s9 + $0x150] sm:$0xff] }
  0x72   : > { %11408 = vmatpush3.msra.mxu1 %v9326_v60  ;;  %11065 = vmatmul.mubr.f32.gmra.mxu0 %v13204_v61  ;;  %v13410_v60 = vld [vmem:[%s12984_s9 + $0x158] sm:$0xff] }
  0x73   : > { %11193 = vmatmul.mubr.f32.gmra.mxu1 %v13204_v61  ;;  %11067 = vmatprep.mubr.f32.mxu0 %v13207_v62 }
  0x74   : > { %11195 = vmatprep.mubr.f32.mxu1 %v13207_v62  ;;  %11281 = vmatprep.subr.mxu0 %v1308_v63 }
  0x75   : > { %11409 = vmatprep.subr.mxu1 %v9325_v0  ;;  %11282 = vmatpush3.msra.mxu0 %v1308_v63  ;;  %v13413_v63 = vld [vmem:[%s12984_s9 + $0x160] sm:$0xff] }
  0x76   : > { %11410 = vmatpush3.msra.mxu1 %v9325_v0  ;;  %11068 = vmatmul.mubr.f32.gmra.mxu0 %v13220_v1  ;;  %v13420_v0 = vld [vmem:[%s12984_s9 + $0x168] sm:$0xff] }
  0x77   : > { %11196 = vmatmul.mubr.f32.gmra.mxu1 %v13220_v1  ;;  %11070 = vmatprep.mubr.f32.mxu0 %v13223_v2 }
  0x78   : > { %11198 = vmatprep.mubr.f32.mxu1 %v13223_v2  ;;  %11283 = vmatprep.subr.mxu0 %v1307_v3 }
  0x79   : > { %11411 = vmatprep.subr.mxu1 %v9324_v4  ;;  %11284 = vmatpush3.msra.mxu0 %v1307_v3  ;;  %v13423_v3 = vld [vmem:[%s12984_s9 + $0x170] sm:$0xff] }
  0x7a   : > { %11412 = vmatpush3.msra.mxu1 %v9324_v4  ;;  %11071 = vmatmul.mubr.f32.gmra.mxu0 %v13236_v5  ;;  %v13430_v4 = vld [vmem:[%s12984_s9 + $0x178] sm:$0xff] }
  0x7b   : > { %11199 = vmatmul.mubr.f32.gmra.mxu1 %v13236_v5  ;;  %11073 = vmatprep.mubr.f32.mxu0 %v13239_v6 }
  0x7c   : > { %11201 = vmatprep.mubr.f32.mxu1 %v13239_v6  ;;  %11285 = vmatprep.subr.mxu0 %v1306_v7 }
  0x7d   : > { %11413 = vmatprep.subr.mxu1 %v9323_v8  ;;  %11286 = vmatpush3.msra.mxu0 %v1306_v7  ;;  %v13433_v7 = vld [vmem:[%s12984_s9 + $0x180] sm:$0xff] }
  0x7e   : > { %11414 = vmatpush3.msra.mxu1 %v9323_v8  ;;  %11074 = vmatmul.mubr.f32.gmra.mxu0 %v13252_v9  ;;  %v13440_v8 = vld [vmem:[%s12984_s9 + $0x188] sm:$0xff] }
  0x7f   : > { %11202 = vmatmul.mubr.f32.gmra.mxu1 %v13252_v9  ;;  %11076 = vmatprep.mubr.f32.mxu0 %v13255_v10 }
  0x80   : > { %11204 = vmatprep.mubr.f32.mxu1 %v13255_v10  ;;  %11287 = vmatprep.subr.mxu0 %v1305_v11 }
  0x81   : > { %11415 = vmatprep.subr.mxu1 %v9322_v12  ;;  %11288 = vmatpush3.msra.mxu0 %v1305_v11  ;;  %v13443_v11 = vld [vmem:[%s12984_s9 + $0x190] sm:$0xff] }
  0x82   : > { %11416 = vmatpush3.msra.mxu1 %v9322_v12  ;;  %11077 = vmatmul.mubr.f32.gmra.mxu0 %v13268_v13  ;;  %v13450_v12 = vld [vmem:[%s12984_s9 + $0x198] sm:$0xff] }
  0x83   : > { %11205 = vmatmul.mubr.f32.gmra.mxu1 %v13268_v13  ;;  %11079 = vmatprep.mubr.f32.mxu0 %v13271_v14 }
  0x84   : > { %11207 = vmatprep.mubr.f32.mxu1 %v13271_v14  ;;  %11289 = vmatprep.subr.mxu0 %v1304_v15 }
  0x85   : > { %11417 = vmatprep.subr.mxu1 %v9321_v16  ;;  %11290 = vmatpush3.msra.mxu0 %v1304_v15  ;;  %v13453_v15 = vld [vmem:[%s12984_s9 + $0x1a0] sm:$0xff] }
  0x86   : > { %11418 = vmatpush3.msra.mxu1 %v9321_v16  ;;  %11080 = vmatmul.mubr.f32.gmra.mxu0 %v13284_v17  ;;  %v13460_v16 = vld [vmem:[%s12984_s9 + $0x1a8] sm:$0xff] }
  0x87   : > { %11208 = vmatmul.mubr.f32.gmra.mxu1 %v13284_v17  ;;  %11082 = vmatprep.mubr.f32.mxu0 %v13287_v18 }
  0x88   : > { %11210 = vmatprep.mubr.f32.mxu1 %v13287_v18  ;;  %11291 = vmatprep.subr.mxu0 %v1303_v19 }
  0x89   : > { %11419 = vmatprep.subr.mxu1 %v9320_v20  ;;  %11292 = vmatpush3.msra.mxu0 %v1303_v19  ;;  %v13463_v19 = vld [vmem:[%s12984_s9 + $0x1b0] sm:$0xff] }
  0x8a   : > { %11420 = vmatpush3.msra.mxu1 %v9320_v20  ;;  %11083 = vmatmul.mubr.f32.gmra.mxu0 %v13300_v21  ;;  %v13470_v20 = vld [vmem:[%s12984_s9 + $0x1b8] sm:$0xff] }
  0x8b   : > { %11211 = vmatmul.mubr.f32.gmra.mxu1 %v13300_v21  ;;  %11085 = vmatprep.mubr.f32.mxu0 %v13303_v22 }
  0x8c   : > { %11213 = vmatprep.mubr.f32.mxu1 %v13303_v22  ;;  %11293 = vmatprep.subr.mxu0 %v1302_v23 }
  0x8d   : > { %11421 = vmatprep.subr.mxu1 %v9319_v24  ;;  %11294 = vmatpush3.msra.mxu0 %v1302_v23  ;;  %v13473_v23 = vld [vmem:[%s12984_s9 + $0x1c0] sm:$0xff] }
  0x8e   : > { %11422 = vmatpush3.msra.mxu1 %v9319_v24  ;;  %11086 = vmatmul.mubr.f32.gmra.mxu0 %v13316_v25  ;;  %18129 = vst [vmem:[#allocation10_spill] sm:$0xff] %v13473_v23  ;;  %v13480_v24 = vld [vmem:[%s12984_s9 + $0x1c8] sm:$0xff] }
  0x8f   : > { %11214 = vmatmul.mubr.f32.gmra.mxu1 %v13316_v25  ;;  %11088 = vmatprep.mubr.f32.mxu0 %v13319_v26 }
  0x90   : > { %11216 = vmatprep.mubr.f32.mxu1 %v13319_v26  ;;  %11295 = vmatprep.subr.mxu0 %v1301_v27 }
  0x91   : > { %11423 = vmatprep.subr.mxu1 %v9318_v28  ;;  %11296 = vmatpush3.msra.mxu0 %v1301_v27  ;;  %v13483_v27 = vld [vmem:[%s12984_s9 + $0x1d0] sm:$0xff] }
  0x92   : > { %11424 = vmatpush3.msra.mxu1 %v9318_v28  ;;  %11089 = vmatmul.mubr.f32.gmra.mxu0 %v13332_v29  ;;  %18130 = vst [vmem:[#allocation11_spill] sm:$0xff] %v13483_v27  ;;  %v13490_v28 = vld [vmem:[%s12984_s9 + $0x1d8] sm:$0xff] }
  0x93   : > { %11217 = vmatmul.mubr.f32.gmra.mxu1 %v13332_v29  ;;  %11091 = vmatprep.mubr.f32.mxu0 %v13335_v30 }
  0x94   : > { %11219 = vmatprep.mubr.f32.mxu1 %v13335_v30  ;;  %11297 = vmatprep.subr.mxu0 %v1300_v31 }
  0x95   : > { %11425 = vmatprep.subr.mxu1 %v9317_v34  ;;  %11298 = vmatpush3.msra.mxu0 %v1300_v31  ;;  %v13493_v31 = vld [vmem:[%s12984_s9 + $0x1e0] sm:$0xff] }
  0x96   : > { %11426 = vmatpush3.msra.mxu1 %v9317_v34  ;;  %11092 = vmatmul.mubr.f32.gmra.mxu0 %v13348_v35  ;;  %v13500_v34 = vld [vmem:[%s12984_s9 + $0x1e8] sm:$0xff] }
  0x97   : > { %11220 = vmatmul.mubr.f32.gmra.mxu1 %v13348_v35  ;;  %11094 = vmatprep.mubr.f32.mxu0 %v13351_v39  ;;  %18131 = vst [vmem:[#allocation12_spill] sm:$0xff] %v13500_v34 }
  0x98   : > { %11222 = vmatprep.mubr.f32.mxu1 %v13351_v39  ;;  %11523 = vmatprep.subr.mxu0 %v13356_v40 }
  0x99   : > { %11651 = vmatprep.subr.mxu1 %v13361_v43 }
  0x9a   : > { %11095 = vmatmul.mubr.f32.gmra.mxu0 %v13368_v44 }
  0x9b   : > { %11223 = vmatmul.mubr.f32.gmra.mxu1 %v13368_v44  ;;  %11097 = vmatprep.mubr.f32.mxu0 %v13371_v47 }
  0x9c   : > { %11225 = vmatprep.mubr.f32.mxu1 %v13371_v47 }
  0x9e   : > { %11098 = vmatmul.mubr.f32.gmra.mxu0 %v13380_v48 }
  0x9f   : > { %11226 = vmatmul.mubr.f32.gmra.mxu1 %v13380_v48  ;;  %11100 = vmatprep.mubr.f32.mxu0 %v13383_v51 }
  0xa0   : > { %11228 = vmatprep.mubr.f32.mxu1 %v13383_v51 }
  0xa2   : > { %11101 = vmatmul.mubr.f32.gmra.mxu0 %v13390_v52 }
  0xa3   : > { %11229 = vmatmul.mubr.f32.gmra.mxu1 %v13390_v52  ;;  %11103 = vmatprep.mubr.f32.mxu0 %v13393_v55 }
  0xa4   : > { %11231 = vmatprep.mubr.f32.mxu1 %v13393_v55 }
  0xa6   : > { %11104 = vmatmul.mubr.f32.gmra.mxu0 %v13400_v56 }
  0xa7   : > { %11232 = vmatmul.mubr.f32.gmra.mxu1 %v13400_v56  ;;  %11106 = vmatprep.mubr.f32.mxu0 %v13403_v59 }
  0xa8   : > { %11234 = vmatprep.mubr.f32.mxu1 %v13403_v59 }
  0xaa   : > { %11107 = vmatmul.mubr.f32.gmra.mxu0 %v13410_v60 }
  0xab   : > { %11235 = vmatmul.mubr.f32.gmra.mxu1 %v13410_v60  ;;  %11109 = vmatprep.mubr.f32.mxu0 %v13413_v63 }
  0xac   : > { %11237 = vmatprep.mubr.f32.mxu1 %v13413_v63 }
  0xae   : > { %11110 = vmatmul.mubr.f32.gmra.mxu0 %v13420_v0 }
  0xaf   : > { %11238 = vmatmul.mubr.f32.gmra.mxu1 %v13420_v0  ;;  %11112 = vmatprep.mubr.f32.mxu0 %v13423_v3 }
  0xb0   : > { %11240 = vmatprep.mubr.f32.mxu1 %v13423_v3 }
  0xb2   : > { %11113 = vmatmul.mubr.f32.gmra.mxu0 %v13430_v4 }
  0xb3   : > { %11241 = vmatmul.mubr.f32.gmra.mxu1 %v13430_v4  ;;  %11115 = vmatprep.mubr.f32.mxu0 %v13433_v7 }
  0xb4   : > { %11243 = vmatprep.mubr.f32.mxu1 %v13433_v7 }
  0xb6   : > { %11116 = vmatmul.mubr.f32.gmra.mxu0 %v13440_v8 }
  0xb7   : > { %11244 = vmatmul.mubr.f32.gmra.mxu1 %v13440_v8  ;;  %11118 = vmatprep.mubr.f32.mxu0 %v13443_v11 }
  0xb8   : > { %11246 = vmatprep.mubr.f32.mxu1 %v13443_v11 }
  0xba   : > { %11119 = vmatmul.mubr.f32.gmra.mxu0 %v13450_v12 }
  0xbb   : > { %11247 = vmatmul.mubr.f32.gmra.mxu1 %v13450_v12  ;;  %11121 = vmatprep.mubr.f32.mxu0 %v13453_v15 }
  0xbc   : > { %11249 = vmatprep.mubr.f32.mxu1 %v13453_v15 }
  0xbe   : > { %11122 = vmatmul.mubr.f32.gmra.mxu0 %v13460_v16 }
  0xbf   : > { %11250 = vmatmul.mubr.f32.gmra.mxu1 %v13460_v16  ;;  %11124 = vmatprep.mubr.f32.mxu0 %v13463_v19 }
  0xc0   : > { %11252 = vmatprep.mubr.f32.mxu1 %v13463_v19 }
  0xc2   : > { %11125 = vmatmul.mubr.f32.gmra.mxu0 %v13470_v20 }
  0xc3   : > { %11253 = vmatmul.mubr.f32.gmra.mxu1 %v13470_v20  ;;  %11127 = vmatprep.mubr.f32.mxu0 %v13473_v23 }
  0xc4   : > { %11255 = vmatprep.mubr.f32.mxu1 %v13473_v23  ;;  %v13503_v23 = vld [vmem:[%s12984_s9 + $0x1f0] sm:$0xff] }
  0xc5   : > { %18132 = vst [vmem:[#allocation13_spill] sm:$0xff] %v13503_v23 }
  0xc6   : > { %11128 = vmatmul.mubr.f32.gmra.mxu0 %v13480_v24 }
  0xc7   : > { %11256 = vmatmul.mubr.f32.gmra.mxu1 %v13480_v24  ;;  %11130 = vmatprep.mubr.f32.mxu0 %v13483_v27 }
  0xc8   : > { %11258 = vmatprep.mubr.f32.mxu1 %v13483_v27  ;;  %v13510_v27 = vld [vmem:[%s12984_s9 + $0x1f8] sm:$0xff] }
  0xca   : > { %11131 = vmatmul.mubr.f32.gmra.mxu0 %v13490_v28 }
  0xcb   : > { %11259 = vmatmul.mubr.f32.gmra.mxu1 %v13490_v28  ;;  %11133 = vmatprep.mubr.f32.mxu0 %v13493_v31 }
  0xcc   : > { %11261 = vmatprep.mubr.f32.mxu1 %v13493_v31 }
  0xce   : > { %11134 = vmatmul.mubr.f32.gmra.mxu0 %v13500_v34 }
  0xcf   : > { %11262 = vmatmul.mubr.f32.gmra.mxu1 %v13500_v34  ;;  %11136 = vmatprep.mubr.f32.mxu0 %v13503_v23  ;;  %v9411_v34 = vld [vmem:[%s18079_s2 + $0xf0] sm:$0xff] }
  0xd0   : > { %11264 = vmatprep.mubr.f32.mxu1 %v13503_v23  ;;  %v9491_v23 = vld [vmem:[%s18080_s3 + $0xf0] sm:$0xff] }
  0xd2   : > { %11137 = vmatmul.mubr.f32.gmra.mxu0 %v13510_v27 }
  0xd3   : > { %11265 = vmatmul.mubr.f32.gmra.mxu1 %v13510_v27  ;;  %11299 = vmatprep.mubr.f32.mxu0 %v13087_v32 }
  0xd4   : > { %11427 = vmatprep.mubr.f32.mxu1 %v13087_v32  ;;  %v9410_v32 = vld [vmem:[%s18079_s2 + $0xe8] sm:$0xff] }
  0xd6   : > { %11300 = vmatmul.mubr.f32.vlgmr.msra.gmra.mxu0 %v13090_v33 }
  0xd7   : > { %11428 = vmatmul.mubr.f32.vlgmr.msra.gmra.mxu1 %v13090_v33  ;;  %11524 = vmatpush3.msra.mxu0 %v13356_v40  ;;  %v9490_v33 = vld [vmem:[%s18080_s3 + $0xe8] sm:$0xff] }
  0xd8   : > { %11652 = vmatpush3.msra.mxu1 %v13361_v43  ;;  %11302 = vmatprep.mubr.f32.mxu0 %v13103_v36 }
  0xd9   : > { %11430 = vmatprep.mubr.f32.mxu1 %v13103_v36  ;;  %11525 = vmatprep.subr.mxu0 %v9411_v34  ;;  %v9409_v36 = vld [vmem:[%s18079_s2 + $0xe0] sm:$0xff] }
  0xda   : > { %11653 = vmatprep.subr.mxu1 %v9491_v23  ;;  %11303 = vmatmul.mubr.f32.gmra.mxu0 %v13106_v37 }
  0xdb   : > { %11431 = vmatmul.mubr.f32.gmra.mxu1 %v13106_v37  ;;  %11305 = vmatprep.mubr.f32.mxu0 %v13109_v38  ;;  %v9489_v37 = vld [vmem:[%s18080_s3 + $0xe0] sm:$0xff] }
  0xdc   : > { %11433 = vmatprep.mubr.f32.mxu1 %v13109_v38  ;;  %11526 = vmatpush3.msra.mxu0 %v9411_v34  ;;  %v9408_v38 = vld [vmem:[%s18079_s2 + $0xd8] sm:$0xff] }
  0xdd   : > { %11654 = vmatpush3.msra.mxu1 %v9491_v23  ;;  %11527 = vmatprep.subr.mxu0 %v9410_v32 }
  0xde   : > { %11655 = vmatprep.subr.mxu1 %v9490_v33  ;;  %11306 = vmatmul.mubr.f32.gmra.mxu0 %v13124_v41 }
  0xdf   : > { %11434 = vmatmul.mubr.f32.gmra.mxu1 %v13124_v41  ;;  %11308 = vmatprep.mubr.f32.mxu0 %v13127_v42  ;;  %v9488_v41 = vld [vmem:[%s18080_s3 + $0xd8] sm:$0xff] }
  0xe0   : > { %11436 = vmatprep.mubr.f32.mxu1 %v13127_v42  ;;  %11528 = vmatpush3.msra.mxu0 %v9410_v32  ;;  %v9407_v42 = vld [vmem:[%s18079_s2 + $0xd0] sm:$0xff] }
  0xe1   : > { %11656 = vmatpush3.msra.mxu1 %v9490_v33  ;;  %11529 = vmatprep.subr.mxu0 %v9409_v36 }
  0xe2   : > { %11657 = vmatprep.subr.mxu1 %v9489_v37  ;;  %11309 = vmatmul.mubr.f32.gmra.mxu0 %v13140_v45 }
  0xe3   : > { %11437 = vmatmul.mubr.f32.gmra.mxu1 %v13140_v45  ;;  %11311 = vmatprep.mubr.f32.mxu0 %v13143_v46  ;;  %v9487_v45 = vld [vmem:[%s18080_s3 + $0xd0] sm:$0xff] }
  0xe4   : > { %11439 = vmatprep.mubr.f32.mxu1 %v13143_v46  ;;  %11530 = vmatpush3.msra.mxu0 %v9409_v36  ;;  %v9406_v46 = vld [vmem:[%s18079_s2 + $0xc8] sm:$0xff] }
  0xe5   : > { %11658 = vmatpush3.msra.mxu1 %v9489_v37  ;;  %11531 = vmatprep.subr.mxu0 %v9408_v38 }
  0xe6   : > { %11659 = vmatprep.subr.mxu1 %v9488_v41  ;;  %11312 = vmatmul.mubr.f32.gmra.mxu0 %v13156_v49 }
  0xe7   : > { %11440 = vmatmul.mubr.f32.gmra.mxu1 %v13156_v49  ;;  %11314 = vmatprep.mubr.f32.mxu0 %v13159_v50  ;;  %v9486_v49 = vld [vmem:[%s18080_s3 + $0xc8] sm:$0xff] }
  0xe8   : > { %11442 = vmatprep.mubr.f32.mxu1 %v13159_v50  ;;  %11532 = vmatpush3.msra.mxu0 %v9408_v38  ;;  %v9405_v50 = vld [vmem:[%s18079_s2 + $0xc0] sm:$0xff] }
  0xe9   : > { %11660 = vmatpush3.msra.mxu1 %v9488_v41  ;;  %11533 = vmatprep.subr.mxu0 %v9407_v42 }
  0xea   : > { %11661 = vmatprep.subr.mxu1 %v9487_v45  ;;  %11315 = vmatmul.mubr.f32.gmra.mxu0 %v13172_v53 }
  0xeb   : > { %11443 = vmatmul.mubr.f32.gmra.mxu1 %v13172_v53  ;;  %11317 = vmatprep.mubr.f32.mxu0 %v13175_v54  ;;  %v9485_v53 = vld [vmem:[%s18080_s3 + $0xc0] sm:$0xff] }
  0xec   : > { %11445 = vmatprep.mubr.f32.mxu1 %v13175_v54  ;;  %11534 = vmatpush3.msra.mxu0 %v9407_v42  ;;  %v9404_v54 = vld [vmem:[%s18079_s2 + $0xb8] sm:$0xff] }
  0xed   : > { %11662 = vmatpush3.msra.mxu1 %v9487_v45  ;;  %11535 = vmatprep.subr.mxu0 %v9406_v46 }
  0xee   : > { %11663 = vmatprep.subr.mxu1 %v9486_v49  ;;  %11318 = vmatmul.mubr.f32.gmra.mxu0 %v13188_v57 }
  0xef   : > { %11446 = vmatmul.mubr.f32.gmra.mxu1 %v13188_v57  ;;  %11320 = vmatprep.mubr.f32.mxu0 %v13191_v58  ;;  %v9484_v57 = vld [vmem:[%s18080_s3 + $0xb8] sm:$0xff] }
  0xf0   : > { %11448 = vmatprep.mubr.f32.mxu1 %v13191_v58  ;;  %11536 = vmatpush3.msra.mxu0 %v9406_v46  ;;  %v9403_v58 = vld [vmem:[%s18079_s2 + $0xb0] sm:$0xff] }
  0xf1   : > { %11664 = vmatpush3.msra.mxu1 %v9486_v49  ;;  %11537 = vmatprep.subr.mxu0 %v9405_v50 }
  0xf2   : > { %11665 = vmatprep.subr.mxu1 %v9485_v53  ;;  %11321 = vmatmul.mubr.f32.gmra.mxu0 %v13204_v61 }
  0xf3   : > { %11449 = vmatmul.mubr.f32.gmra.mxu1 %v13204_v61  ;;  %11323 = vmatprep.mubr.f32.mxu0 %v13207_v62  ;;  %v9483_v61 = vld [vmem:[%s18080_s3 + $0xb0] sm:$0xff] }
  0xf4   : > { %11451 = vmatprep.mubr.f32.mxu1 %v13207_v62  ;;  %11538 = vmatpush3.msra.mxu0 %v9405_v50  ;;  %v9402_v62 = vld [vmem:[%s18079_s2 + $0xa8] sm:$0xff] }
  0xf5   : > { %11666 = vmatpush3.msra.mxu1 %v9485_v53  ;;  %11539 = vmatprep.subr.mxu0 %v9404_v54 }
  0xf6   : > { %11667 = vmatprep.subr.mxu1 %v9484_v57  ;;  %11324 = vmatmul.mubr.f32.gmra.mxu0 %v13220_v1 }
  0xf7   : > { %11452 = vmatmul.mubr.f32.gmra.mxu1 %v13220_v1  ;;  %11326 = vmatprep.mubr.f32.mxu0 %v13223_v2  ;;  %v9482_v1 = vld [vmem:[%s18080_s3 + $0xa8] sm:$0xff] }
  0xf8   : > { %11454 = vmatprep.mubr.f32.mxu1 %v13223_v2  ;;  %11540 = vmatpush3.msra.mxu0 %v9404_v54  ;;  %v9401_v2 = vld [vmem:[%s18079_s2 + $0xa0] sm:$0xff] }
  0xf9   : > { %11668 = vmatpush3.msra.mxu1 %v9484_v57  ;;  %11541 = vmatprep.subr.mxu0 %v9403_v58 }
  0xfa   : > { %11669 = vmatprep.subr.mxu1 %v9483_v61  ;;  %11327 = vmatmul.mubr.f32.gmra.mxu0 %v13236_v5 }
  0xfb   : > { %11455 = vmatmul.mubr.f32.gmra.mxu1 %v13236_v5  ;;  %11329 = vmatprep.mubr.f32.mxu0 %v13239_v6  ;;  %v9481_v5 = vld [vmem:[%s18080_s3 + $0xa0] sm:$0xff] }
  0xfc   : > { %11457 = vmatprep.mubr.f32.mxu1 %v13239_v6  ;;  %11542 = vmatpush3.msra.mxu0 %v9403_v58  ;;  %v9400_v6 = vld [vmem:[%s18079_s2 + $0x98] sm:$0xff] }
  0xfd   : > { %11670 = vmatpush3.msra.mxu1 %v9483_v61  ;;  %11543 = vmatprep.subr.mxu0 %v9402_v62 }
  0xfe   : > { %11671 = vmatprep.subr.mxu1 %v9482_v1  ;;  %11330 = vmatmul.mubr.f32.gmra.mxu0 %v13252_v9 }
  0xff   : > { %11458 = vmatmul.mubr.f32.gmra.mxu1 %v13252_v9  ;;  %11332 = vmatprep.mubr.f32.mxu0 %v13255_v10  ;;  %v9480_v9 = vld [vmem:[%s18080_s3 + $0x98] sm:$0xff] }
 0x100   : > { %11460 = vmatprep.mubr.f32.mxu1 %v13255_v10  ;;  %11544 = vmatpush3.msra.mxu0 %v9402_v62  ;;  %v9399_v10 = vld [vmem:[%s18079_s2 + $0x90] sm:$0xff] }
 0x101   : > { %11672 = vmatpush3.msra.mxu1 %v9482_v1  ;;  %11545 = vmatprep.subr.mxu0 %v9401_v2 }
 0x102   : > { %11673 = vmatprep.subr.mxu1 %v9481_v5  ;;  %11333 = vmatmul.mubr.f32.gmra.mxu0 %v13268_v13 }
 0x103   : > { %11461 = vmatmul.mubr.f32.gmra.mxu1 %v13268_v13  ;;  %11335 = vmatprep.mubr.f32.mxu0 %v13271_v14  ;;  %v9479_v13 = vld [vmem:[%s18080_s3 + $0x90] sm:$0xff] }
 0x104   : > { %11463 = vmatprep.mubr.f32.mxu1 %v13271_v14  ;;  %11546 = vmatpush3.msra.mxu0 %v9401_v2  ;;  %v9398_v14 = vld [vmem:[%s18079_s2 + $0x88] sm:$0xff] }
 0x105   : > { %11674 = vmatpush3.msra.mxu1 %v9481_v5  ;;  %11547 = vmatprep.subr.mxu0 %v9400_v6 }
 0x106   : > { %11675 = vmatprep.subr.mxu1 %v9480_v9  ;;  %11336 = vmatmul.mubr.f32.gmra.mxu0 %v13284_v17 }
 0x107   : > { %11464 = vmatmul.mubr.f32.gmra.mxu1 %v13284_v17  ;;  %11338 = vmatprep.mubr.f32.mxu0 %v13287_v18  ;;  %v9478_v17 = vld [vmem:[%s18080_s3 + $0x88] sm:$0xff] }
 0x108   : > { %11466 = vmatprep.mubr.f32.mxu1 %v13287_v18  ;;  %11548 = vmatpush3.msra.mxu0 %v9400_v6  ;;  %v9397_v18 = vld [vmem:[%s18079_s2 + $0x80] sm:$0xff] }
 0x109   : > { %11676 = vmatpush3.msra.mxu1 %v9480_v9  ;;  %11549 = vmatprep.subr.mxu0 %v9399_v10 }
 0x10a   : > { %11677 = vmatprep.subr.mxu1 %v9479_v13  ;;  %11339 = vmatmul.mubr.f32.gmra.mxu0 %v13300_v21 }
 0x10b   : > { %11467 = vmatmul.mubr.f32.gmra.mxu1 %v13300_v21  ;;  %11341 = vmatprep.mubr.f32.mxu0 %v13303_v22  ;;  %v9477_v21 = vld [vmem:[%s18080_s3 + $0x80] sm:$0xff] }
 0x10c   : > { %11469 = vmatprep.mubr.f32.mxu1 %v13303_v22  ;;  %11550 = vmatpush3.msra.mxu0 %v9399_v10  ;;  %v13676_v22 = vld [vmem:[%s18078_s1 + $0x178] sm:$0xff] }
 0x10d   : > { %11678 = vmatpush3.msra.mxu1 %v9479_v13  ;;  %11551 = vmatprep.subr.mxu0 %v9398_v14 }
 0x10e   : > { %11679 = vmatprep.subr.mxu1 %v9478_v17  ;;  %11342 = vmatmul.mubr.f32.gmra.mxu0 %v13316_v25 }
 0x10f   : > { %11470 = vmatmul.mubr.f32.gmra.mxu1 %v13316_v25  ;;  %11344 = vmatprep.mubr.f32.mxu0 %v13319_v26  ;;  %v13681_v25 = vld [vmem:[%s18079_s2 + $0x178] sm:$0xff] }
 0x110   : > { %11472 = vmatprep.mubr.f32.mxu1 %v13319_v26  ;;  %11552 = vmatpush3.msra.mxu0 %v9398_v14 }
 0x111   : > { %11680 = vmatpush3.msra.mxu1 %v9478_v17  ;;  %11553 = vmatprep.subr.mxu0 %v9397_v18 }
 0x112   : > { %11681 = vmatprep.subr.mxu1 %v9477_v21  ;;  %11345 = vmatmul.mubr.f32.gmra.mxu0 %v13332_v29 }
 0x113   : > { %11473 = vmatmul.mubr.f32.gmra.mxu1 %v13332_v29  ;;  %11347 = vmatprep.mubr.f32.mxu0 %v13335_v30 }
 0x114   : > { %11475 = vmatprep.mubr.f32.mxu1 %v13335_v30  ;;  %11554 = vmatpush3.msra.mxu0 %v9397_v18 }
 0x115   : > { %11682 = vmatpush3.msra.mxu1 %v9477_v21  ;;  %11779 = vmatprep.subr.mxu0 %v13676_v22 }
 0x116   : > { %11907 = vmatprep.subr.mxu1 %v13681_v25  ;;  %v11045_v26 = vpop.f32.mrf.mxu0  ;;  %11348 = vmatmul.mubr.f32.gmra.mxu0 %v13348_v35 }
 0x117   : > { %v11173_v29 = vpop.f32.mrf.mxu1  ;;  %11476 = vmatmul.mubr.f32.gmra.mxu1 %v13348_v35  ;;  %772 = vst.msk [vmem:[%s13690_s15 + $0x8] sm:$0xff] %vm770_vm0, %v11045_v26  ;;  %11350 = vmatprep.mubr.f32.mxu0 %v13351_v39 }
 0x118   : > { %1237 = vst.msk [vmem:[%s13695_s30 + $0x8] sm:$0xff] %vm770_vm0, %v11173_v29  ;;  %11478 = vmatprep.mubr.f32.mxu1 %v13351_v39  ;;  %v451_v30 = vpop.f32.mrf.mxu0 }
 0x119   : > { %v917_v35 = vpop.f32.mrf.mxu1  ;;  %771 = vst.msk [vmem:[%s13690_s15] sm:$0xff] %vm770_vm0, %v451_v30 }
 0x11a   : > { %1236 = vst.msk [vmem:[%s13695_s30] sm:$0xff] %vm770_vm0, %v917_v35  ;;  %v11048_v40 = vpop.f32.mrf.mxu0  ;;  %11351 = vmatmul.mubr.f32.gmra.mxu0 %v13368_v44 }
 0x11b   : > { %v11176_v43 = vpop.f32.mrf.mxu1  ;;  %11479 = vmatmul.mubr.f32.gmra.mxu1 %v13368_v44  ;;  %774 = vst.msk [vmem:[%s13690_s15 + $0x18] sm:$0xff] %vm770_vm0, %v11048_v40  ;;  %11353 = vmatprep.mubr.f32.mxu0 %v13371_v47 }
 0x11c   : > { %1239 = vst.msk [vmem:[%s13695_s30 + $0x18] sm:$0xff] %vm770_vm0, %v11176_v43  ;;  %11481 = vmatprep.mubr.f32.mxu1 %v13371_v47  ;;  %v461_v39 = vpop.f32.mrf.mxu0  ;;  %v13880_v43 = vld [vmem:[%s12984_s9] sm:$0xff] }
 0x11d   : > { %v927_v23 = vpop.f32.mrf.mxu1  ;;  %773 = vst.msk [vmem:[%s13690_s15 + $0x10] sm:$0xff] %vm770_vm0, %v461_v39 }
 0x11e   : > { %1238 = vst.msk [vmem:[%s13695_s30 + $0x10] sm:$0xff] %vm770_vm0, %v927_v23  ;;  %v11051_v34 = vpop.f32.mrf.mxu0  ;;  %11354 = vmatmul.mubr.f32.gmra.mxu0 %v13380_v48 }
 0x11f   : > { %v11179_v32 = vpop.f32.mrf.mxu1  ;;  %11482 = vmatmul.mubr.f32.gmra.mxu1 %v13380_v48  ;;  %776 = vst.msk [vmem:[%s13690_s15 + $0x28] sm:$0xff] %vm770_vm0, %v11051_v34  ;;  %11356 = vmatprep.mubr.f32.mxu0 %v13383_v51 }
 0x120   : > { %1241 = vst.msk [vmem:[%s13695_s30 + $0x28] sm:$0xff] %vm770_vm0, %v11179_v32  ;;  %11484 = vmatprep.mubr.f32.mxu1 %v13383_v51  ;;  %v471_v44 = vpop.f32.mrf.mxu0  ;;  %v13889_v32 = vld [vmem:[%s12984_s9 + $0x8] sm:$0xff] }
 0x121   : > { %v937_v47 = vpop.f32.mrf.mxu1  ;;  %775 = vst.msk [vmem:[%s13690_s15 + $0x20] sm:$0xff] %vm770_vm0, %v471_v44  ;;  %v9571_v44 = vld [vmem:[%s18078_s1 + $0x170] sm:$0xff] }
 0x122   : > { %1240 = vst.msk [vmem:[%s13695_s30 + $0x20] sm:$0xff] %vm770_vm0, %v937_v47  ;;  %v11054_v33 = vpop.f32.mrf.mxu0  ;;  %11357 = vmatmul.mubr.f32.gmra.mxu0 %v13390_v52  ;;  %v9651_v47 = vld [vmem:[%s18079_s2 + $0x170] sm:$0xff] }
 0x123   : > { %v11182_v36 = vpop.f32.mrf.mxu1  ;;  %11485 = vmatmul.mubr.f32.gmra.mxu1 %v13390_v52  ;;  %778 = vst.msk [vmem:[%s13690_s15 + $0x38] sm:$0xff] %vm770_vm0, %v11054_v33  ;;  %11359 = vmatprep.mubr.f32.mxu0 %v13393_v55 }
 0x124   : > { %1243 = vst.msk [vmem:[%s13695_s30 + $0x38] sm:$0xff] %vm770_vm0, %v11182_v36  ;;  %11487 = vmatprep.mubr.f32.mxu1 %v13393_v55  ;;  %v481_v48 = vpop.f32.mrf.mxu0 }
 0x125   : > { %v947_v51 = vpop.f32.mrf.mxu1  ;;  %777 = vst.msk [vmem:[%s13690_s15 + $0x30] sm:$0xff] %vm770_vm0, %v481_v48  ;;  %v13906_v48 = vld [vmem:[%s12984_s9 + $0x10] sm:$0xff] }
 0x126   : > { %1242 = vst.msk [vmem:[%s13695_s30 + $0x30] sm:$0xff] %vm770_vm0, %v947_v51  ;;  %v11057_v37 = vpop.f32.mrf.mxu0  ;;  %11360 = vmatmul.mubr.f32.gmra.mxu0 %v13400_v56  ;;  %v13915_v51 = vld [vmem:[%s12984_s9 + $0x18] sm:$0xff] }
 0x127   : > { %v11185_v38 = vpop.f32.mrf.mxu1  ;;  %11488 = vmatmul.mubr.f32.gmra.mxu1 %v13400_v56  ;;  %780 = vst.msk [vmem:[%s13690_s15 + $0x48] sm:$0xff] %vm770_vm0, %v11057_v37  ;;  %11362 = vmatprep.mubr.f32.mxu0 %v13403_v59  ;;  %v9570_v37 = vld [vmem:[%s18078_s1 + $0x168] sm:$0xff] }
 0x128   : > { %1245 = vst.msk [vmem:[%s13695_s30 + $0x48] sm:$0xff] %vm770_vm0, %v11185_v38  ;;  %11490 = vmatprep.mubr.f32.mxu1 %v13403_v59  ;;  %v491_v52 = vpop.f32.mrf.mxu0  ;;  %v9650_v38 = vld [vmem:[%s18079_s2 + $0x168] sm:$0xff] }
 0x129   : > { %v957_v55 = vpop.f32.mrf.mxu1  ;;  %779 = vst.msk [vmem:[%s13690_s15 + $0x40] sm:$0xff] %vm770_vm0, %v491_v52  ;;  %v13930_v52 = vld [vmem:[%s12984_s9 + $0x20] sm:$0xff] }
 0x12a   : > { %1244 = vst.msk [vmem:[%s13695_s30 + $0x40] sm:$0xff] %vm770_vm0, %v957_v55  ;;  %v11060_v41 = vpop.f32.mrf.mxu0  ;;  %11363 = vmatmul.mubr.f32.gmra.mxu0 %v13410_v60 }
 0x12b   : > { %v11188_v42 = vpop.f32.mrf.mxu1  ;;  %11491 = vmatmul.mubr.f32.gmra.mxu1 %v13410_v60  ;;  %782 = vst.msk [vmem:[%s13690_s15 + $0x58] sm:$0xff] %vm770_vm0, %v11060_v41  ;;  %11365 = vmatprep.mubr.f32.mxu0 %v13413_v63 }
 0x12c   : > { %1247 = vst.msk [vmem:[%s13695_s30 + $0x58] sm:$0xff] %vm770_vm0, %v11188_v42  ;;  %11493 = vmatprep.mubr.f32.mxu1 %v13413_v63  ;;  %v501_v56 = vpop.f32.mrf.mxu0 }
 0x12d   : > { %v967_v59 = vpop.f32.mrf.mxu1  ;;  %781 = vst.msk [vmem:[%s13690_s15 + $0x50] sm:$0xff] %vm770_vm0, %v501_v56 }
 0x12e   : > { %1246 = vst.msk [vmem:[%s13695_s30 + $0x50] sm:$0xff] %vm770_vm0, %v967_v59  ;;  %v11063_v45 = vpop.f32.mrf.mxu0  ;;  %11366 = vmatmul.mubr.f32.gmra.mxu0 %v13420_v0  ;;  %v13939_v59 = vld [vmem:[%s12984_s9 + $0x28] sm:$0xff] }
 0x12f   : > { %v11191_v46 = vpop.f32.mrf.mxu1  ;;  %11494 = vmatmul.mubr.f32.gmra.mxu1 %v13420_v0  ;;  %784 = vst.msk [vmem:[%s13690_s15 + $0x68] sm:$0xff] %vm770_vm0, %v11063_v45  ;;  %11368 = vmatprep.mubr.f32.mxu0 %v13423_v3  ;;  %v9569_v45 = vld [vmem:[%s18078_s1 + $0x160] sm:$0xff] }
 0x130   : > { %1249 = vst.msk [vmem:[%s13695_s30 + $0x68] sm:$0xff] %vm770_vm0, %v11191_v46  ;;  %11496 = vmatprep.mubr.f32.mxu1 %v13423_v3  ;;  %v511_v60 = vpop.f32.mrf.mxu0  ;;  %v9649_v46 = vld [vmem:[%s18079_s2 + $0x160] sm:$0xff] }
 0x131   : > { %v977_v63 = vpop.f32.mrf.mxu1  ;;  %783 = vst.msk [vmem:[%s13690_s15 + $0x60] sm:$0xff] %vm770_vm0, %v511_v60  ;;  %v13954_v60 = vld [vmem:[%s12984_s9 + $0x30] sm:$0xff] }
 0x132   : > { %1248 = vst.msk [vmem:[%s13695_s30 + $0x60] sm:$0xff] %vm770_vm0, %v977_v63  ;;  %v11066_v49 = vpop.f32.mrf.mxu0  ;;  %11369 = vmatmul.mubr.f32.gmra.mxu0 %v13430_v4 }
 0x133   : > { %v11194_v50 = vpop.f32.mrf.mxu1  ;;  %11497 = vmatmul.mubr.f32.gmra.mxu1 %v13430_v4  ;;  %786 = vst.msk [vmem:[%s13690_s15 + $0x78] sm:$0xff] %vm770_vm0, %v11066_v49  ;;  %11371 = vmatprep.mubr.f32.mxu0 %v13433_v7 }
 0x134   : > { %1251 = vst.msk [vmem:[%s13695_s30 + $0x78] sm:$0xff] %vm770_vm0, %v11194_v50  ;;  %11499 = vmatprep.mubr.f32.mxu1 %v13433_v7  ;;  %v521_v0 = vpop.f32.mrf.mxu0 }
 0x135   : > { %v987_v3 = vpop.f32.mrf.mxu1  ;;  %785 = vst.msk [vmem:[%s13690_s15 + $0x70] sm:$0xff] %vm770_vm0, %v521_v0 }
 0x136   : > { %1250 = vst.msk [vmem:[%s13695_s30 + $0x70] sm:$0xff] %vm770_vm0, %v987_v3  ;;  %v11069_v53 = vpop.f32.mrf.mxu0  ;;  %11372 = vmatmul.mubr.f32.gmra.mxu0 %v13440_v8  ;;  %v13963_v3 = vld [vmem:[%s12984_s9 + $0x38] sm:$0xff] }
 0x137   : > { %v11197_v54 = vpop.f32.mrf.mxu1  ;;  %11500 = vmatmul.mubr.f32.gmra.mxu1 %v13440_v8  ;;  %788 = vst.msk [vmem:[%s13690_s15 + $0x88] sm:$0xff] %vm770_vm0, %v11069_v53  ;;  %11374 = vmatprep.mubr.f32.mxu0 %v13443_v11  ;;  %v9568_v53 = vld [vmem:[%s18078_s1 + $0x158] sm:$0xff] }
 0x138   : > { %1253 = vst.msk [vmem:[%s13695_s30 + $0x88] sm:$0xff] %vm770_vm0, %v11197_v54  ;;  %11502 = vmatprep.mubr.f32.mxu1 %v13443_v11  ;;  %v531_v4 = vpop.f32.mrf.mxu0  ;;  %v9648_v54 = vld [vmem:[%s18079_s2 + $0x158] sm:$0xff] }
 0x139   : > { %v997_v7 = vpop.f32.mrf.mxu1  ;;  %787 = vst.msk [vmem:[%s13690_s15 + $0x80] sm:$0xff] %vm770_vm0, %v531_v4  ;;  %v13978_v4 = vld [vmem:[%s12984_s9 + $0x40] sm:$0xff] }
 0x13a   : > { %1252 = vst.msk [vmem:[%s13695_s30 + $0x80] sm:$0xff] %vm770_vm0, %v997_v7  ;;  %v11072_v57 = vpop.f32.mrf.mxu0  ;;  %11375 = vmatmul.mubr.f32.gmra.mxu0 %v13450_v12 }
 0x13b   : > { %v11200_v58 = vpop.f32.mrf.mxu1  ;;  %11503 = vmatmul.mubr.f32.gmra.mxu1 %v13450_v12  ;;  %790 = vst.msk [vmem:[%s13690_s15 + $0x98] sm:$0xff] %vm770_vm0, %v11072_v57  ;;  %11377 = vmatprep.mubr.f32.mxu0 %v13453_v15 }
 0x13c   : > { %1255 = vst.msk [vmem:[%s13695_s30 + $0x98] sm:$0xff] %vm770_vm0, %v11200_v58  ;;  %11505 = vmatprep.mubr.f32.mxu1 %v13453_v15  ;;  %v541_v8 = vpop.f32.mrf.mxu0 }
 0x13d   : > { %v1007_v11 = vpop.f32.mrf.mxu1  ;;  %789 = vst.msk [vmem:[%s13690_s15 + $0x90] sm:$0xff] %vm770_vm0, %v541_v8 }
 0x13e   : > { %1254 = vst.msk [vmem:[%s13695_s30 + $0x90] sm:$0xff] %vm770_vm0, %v1007_v11  ;;  %v11075_v61 = vpop.f32.mrf.mxu0  ;;  %11378 = vmatmul.mubr.f32.gmra.mxu0 %v13460_v16  ;;  %v13987_v11 = vld [vmem:[%s12984_s9 + $0x48] sm:$0xff] }
 0x13f   : > { %v11203_v62 = vpop.f32.mrf.mxu1  ;;  %11506 = vmatmul.mubr.f32.gmra.mxu1 %v13460_v16  ;;  %792 = vst.msk [vmem:[%s13690_s15 + $0xa8] sm:$0xff] %vm770_vm0, %v11075_v61  ;;  %11380 = vmatprep.mubr.f32.mxu0 %v13463_v19  ;;  %v18133_v16 = vld [vmem:[#allocation10_spill] sm:$0xff]  ;;  %v9567_v61 = vld [vmem:[%s18078_s1 + $0x150] sm:$0xff] }
 0x140   : > { %1257 = vst.msk [vmem:[%s13695_s30 + $0xa8] sm:$0xff] %vm770_vm0, %v11203_v62  ;;  %11508 = vmatprep.mubr.f32.mxu1 %v13463_v19  ;;  %v551_v12 = vpop.f32.mrf.mxu0  ;;  %v9647_v62 = vld [vmem:[%s18079_s2 + $0x150] sm:$0xff] }
 0x141   : > { %v1017_v15 = vpop.f32.mrf.mxu1  ;;  %791 = vst.msk [vmem:[%s13690_s15 + $0xa0] sm:$0xff] %vm770_vm0, %v551_v12  ;;  %v14002_v12 = vld [vmem:[%s12984_s9 + $0x50] sm:$0xff] }
 0x142   : > { %1256 = vst.msk [vmem:[%s13695_s30 + $0xa0] sm:$0xff] %vm770_vm0, %v1017_v15  ;;  %v11078_v1 = vpop.f32.mrf.mxu0  ;;  %11381 = vmatmul.mubr.f32.gmra.mxu0 %v13470_v20 }
 0x143   : > { %v11206_v2 = vpop.f32.mrf.mxu1  ;;  %11509 = vmatmul.mubr.f32.gmra.mxu1 %v13470_v20  ;;  %794 = vst.msk [vmem:[%s13690_s15 + $0xb8] sm:$0xff] %vm770_vm0, %v11078_v1  ;;  %11383 = vmatprep.mubr.f32.mxu0 %v18133_v16  ;;  %v18134_v20 = vld [vmem:[#allocation11_spill] sm:$0xff] }
 0x144   : > { %1259 = vst.msk [vmem:[%s13695_s30 + $0xb8] sm:$0xff] %vm770_vm0, %v11206_v2  ;;  %11511 = vmatprep.mubr.f32.mxu1 %v18133_v16  ;;  %v561_v19 = vpop.f32.mrf.mxu0 }
 0x145   : > { %v1027_v5 = vpop.f32.mrf.mxu1  ;;  %793 = vst.msk [vmem:[%s13690_s15 + $0xb0] sm:$0xff] %vm770_vm0, %v561_v19  ;;  %v14011_v19 = vld [vmem:[%s12984_s9 + $0x58] sm:$0xff] }
 0x146   : > { %1258 = vst.msk [vmem:[%s13695_s30 + $0xb0] sm:$0xff] %vm770_vm0, %v1027_v5  ;;  %v11081_v6 = vpop.f32.mrf.mxu0  ;;  %11384 = vmatmul.mubr.f32.gmra.mxu0 %v13480_v24  ;;  %v9566_v5 = vld [vmem:[%s18078_s1 + $0x148] sm:$0xff] }
 0x147   : > { %v11209_v9 = vpop.f32.mrf.mxu1  ;;  %11512 = vmatmul.mubr.f32.gmra.mxu1 %v13480_v24  ;;  %796 = vst.msk [vmem:[%s13690_s15 + $0xc8] sm:$0xff] %vm770_vm0, %v11081_v6  ;;  %11386 = vmatprep.mubr.f32.mxu0 %v18134_v20  ;;  %v9646_v6 = vld [vmem:[%s18079_s2 + $0x148] sm:$0xff] }
 0x148   : > { %1261 = vst.msk [vmem:[%s13695_s30 + $0xc8] sm:$0xff] %vm770_vm0, %v11209_v9  ;;  %11514 = vmatprep.mubr.f32.mxu1 %v18134_v20  ;;  %v571_v10 = vpop.f32.mrf.mxu0  ;;  %v14026_v9 = vld [vmem:[%s12984_s9 + $0x60] sm:$0xff] }
 0x149   : > { %v1037_v13 = vpop.f32.mrf.mxu1  ;;  %795 = vst.msk [vmem:[%s13690_s15 + $0xc0] sm:$0xff] %vm770_vm0, %v571_v10 }
 0x14a   : > { %1260 = vst.msk [vmem:[%s13695_s30 + $0xc0] sm:$0xff] %vm770_vm0, %v1037_v13  ;;  %v11084_v14 = vpop.f32.mrf.mxu0  ;;  %11387 = vmatmul.mubr.f32.gmra.mxu0 %v13490_v28 }
 0x14b   : > { %v11212_v17 = vpop.f32.mrf.mxu1  ;;  %11515 = vmatmul.mubr.f32.gmra.mxu1 %v13490_v28  ;;  %798 = vst.msk [vmem:[%s13690_s15 + $0xd8] sm:$0xff] %vm770_vm0, %v11084_v14  ;;  %11389 = vmatprep.mubr.f32.mxu0 %v13493_v31  ;;  %v18135_v28 = vld [vmem:[#allocation12_spill] sm:$0xff] }
 0x14c   : > { %1263 = vst.msk [vmem:[%s13695_s30 + $0xd8] sm:$0xff] %vm770_vm0, %v11212_v17  ;;  %11517 = vmatprep.mubr.f32.mxu1 %v13493_v31  ;;  %v581_v24 = vpop.f32.mrf.mxu0  ;;  %v18136_v31 = vld [vmem:[#allocation13_spill] sm:$0xff]  ;;  %v14035_v17 = vld [vmem:[%s12984_s9 + $0x68] sm:$0xff] }
 0x14d   : > { %v1047_v18 = vpop.f32.mrf.mxu1  ;;  %797 = vst.msk [vmem:[%s13690_s15 + $0xd0] sm:$0xff] %vm770_vm0, %v581_v24  ;;  %v9565_v24 = vld [vmem:[%s18078_s1 + $0x140] sm:$0xff] }
 0x14e   : > { %1262 = vst.msk [vmem:[%s13695_s30 + $0xd0] sm:$0xff] %vm770_vm0, %v1047_v18  ;;  %v11087_v21 = vpop.f32.mrf.mxu0  ;;  %11390 = vmatmul.mubr.f32.gmra.mxu0 %v18135_v28  ;;  %v9645_v18 = vld [vmem:[%s18079_s2 + $0x140] sm:$0xff] }
 0x14f   : > { %v11215_v26 = vpop.f32.mrf.mxu1  ;;  %11518 = vmatmul.mubr.f32.gmra.mxu1 %v18135_v28  ;;  %800 = vst.msk [vmem:[%s13690_s15 + $0xe8] sm:$0xff] %vm770_vm0, %v11087_v21  ;;  %11392 = vmatprep.mubr.f32.mxu0 %v18136_v31  ;;  %v14050_v21 = vld [vmem:[%s12984_s9 + $0x70] sm:$0xff] }
 0x150   : > { %1265 = vst.msk [vmem:[%s13695_s30 + $0xe8] sm:$0xff] %vm770_vm0, %v11215_v26  ;;  %11520 = vmatprep.mubr.f32.mxu1 %v18136_v31  ;;  %v591_v29 = vpop.f32.mrf.mxu0 }
 0x151   : > { %v1057_v30 = vpop.f32.mrf.mxu1  ;;  %799 = vst.msk [vmem:[%s13690_s15 + $0xe0] sm:$0xff] %vm770_vm0, %v591_v29 }
 0x152   : > { %1264 = vst.msk [vmem:[%s13695_s30 + $0xe0] sm:$0xff] %vm770_vm0, %v1057_v30  ;;  %v11090_v35 = vpop.f32.mrf.mxu0  ;;  %11393 = vmatmul.mubr.f32.gmra.mxu0 %v13510_v27  ;;  %v14059_v30 = vld [vmem:[%s12984_s9 + $0x78] sm:$0xff] }
 0x153   : > { %v11218_v40 = vpop.f32.mrf.mxu1  ;;  %11521 = vmatmul.mubr.f32.gmra.mxu1 %v13510_v27  ;;  %802 = vst.msk [vmem:[%s13690_s15 + $0xf8] sm:$0xff] %vm770_vm0, %v11090_v35  ;;  %11555 = vmatprep.mubr.f32.mxu0 %v13880_v43  ;;  %v9564_v35 = vld [vmem:[%s18078_s1 + $0x138] sm:$0xff] }
 0x154   : > { %1267 = vst.msk [vmem:[%s13695_s30 + $0xf8] sm:$0xff] %vm770_vm0, %v11218_v40  ;;  %11683 = vmatprep.mubr.f32.mxu1 %v13880_v43  ;;  %v601_v39 = vpop.f32.mrf.mxu0  ;;  %v9644_v40 = vld [vmem:[%s18079_s2 + $0x138] sm:$0xff] }
 0x155   : > { %v1067_v23 = vpop.f32.mrf.mxu1  ;;  %801 = vst.msk [vmem:[%s13690_s15 + $0xf0] sm:$0xff] %vm770_vm0, %v601_v39  ;;  %v14074_v39 = vld [vmem:[%s12984_s9 + $0x80] sm:$0xff] }
 0x156   : > { %1266 = vst.msk [vmem:[%s13695_s30 + $0xf0] sm:$0xff] %vm770_vm0, %v1067_v23  ;;  %v11093_v27 = vpop.f32.mrf.mxu0  ;;  %11556 = vmatmul.mubr.f32.vlgmr.msra.gmra.mxu0 %v13889_v32 }
 0x157   : > { %v11221_v34 = vpop.f32.mrf.mxu1  ;;  %11684 = vmatmul.mubr.f32.vlgmr.msra.gmra.mxu1 %v13889_v32  ;;  %804 = vst.msk [vmem:[%s13690_s15 + $0x108] sm:$0xff] %vm770_vm0, %v11093_v27  ;;  %11780 = vmatpush3.msra.mxu0 %v13676_v22 }
 0x158   : > { %1269 = vst.msk [vmem:[%s13695_s30 + $0x108] sm:$0xff] %vm770_vm0, %v11221_v34  ;;  %11908 = vmatpush3.msra.mxu1 %v13681_v25  ;;  %v611_v33 = vpop.f32.mrf.mxu0  ;;  %11558 = vmatprep.mubr.f32.mxu0 %v13906_v48 }
 0x159   : > { %v1077_v36 = vpop.f32.mrf.mxu1  ;;  %11686 = vmatprep.mubr.f32.mxu1 %v13906_v48  ;;  %803 = vst.msk [vmem:[%s13690_s15 + $0x100] sm:$0xff] %vm770_vm0, %v611_v33  ;;  %11781 = vmatprep.subr.mxu0 %v9571_v44  ;;  %v9563_v33 = vld [vmem:[%s18078_s1 + $0x130] sm:$0xff] }
 0x15a   : > { %1268 = vst.msk [vmem:[%s13695_s30 + $0x100] sm:$0xff] %vm770_vm0, %v1077_v36  ;;  %11909 = vmatprep.subr.mxu1 %v9651_v47  ;;  %v11096_v22 = vpop.f32.mrf.mxu0  ;;  %11559 = vmatmul.mubr.f32.gmra.mxu0 %v13915_v51  ;;  %v9643_v36 = vld [vmem:[%s18079_s2 + $0x130] sm:$0xff] }
 0x15b   : > { %v11224_v25 = vpop.f32.mrf.mxu1  ;;  %11687 = vmatmul.mubr.f32.gmra.mxu1 %v13915_v51  ;;  %806 = vst.msk [vmem:[%s13690_s15 + $0x118] sm:$0xff] %vm770_vm0, %v11096_v22  ;;  %11561 = vmatprep.mubr.f32.mxu0 %v13930_v52  ;;  %v14098_v22 = vld [vmem:[%s12984_s9 + $0x90] sm:$0xff] }
 0x15c   : > { %1271 = vst.msk [vmem:[%s13695_s30 + $0x118] sm:$0xff] %vm770_vm0, %v11224_v25  ;;  %11689 = vmatprep.mubr.f32.mxu1 %v13930_v52  ;;  %v621_v55 = vpop.f32.mrf.mxu0  ;;  %11782 = vmatpush3.msra.mxu0 %v9571_v44 }
 0x15d   : > { %v1087_v41 = vpop.f32.mrf.mxu1  ;;  %11910 = vmatpush3.msra.mxu1 %v9651_v47  ;;  %805 = vst.msk [vmem:[%s13690_s15 + $0x110] sm:$0xff] %vm770_vm0, %v621_v55  ;;  %11783 = vmatprep.subr.mxu0 %v9570_v37  ;;  %v14083_v47 = vld [vmem:[%s12984_s9 + $0x88] sm:$0xff] }
 0x15e   : > { %1270 = vst.msk [vmem:[%s13695_s30 + $0x110] sm:$0xff] %vm770_vm0, %v1087_v41  ;;  %11911 = vmatprep.subr.mxu1 %v9650_v38  ;;  %v11099_v42 = vpop.f32.mrf.mxu0  ;;  %11562 = vmatmul.mubr.f32.gmra.mxu0 %v13939_v59  ;;  %v14107_v41 = vld [vmem:[%s12984_s9 + $0x98] sm:$0xff] }
 0x15f   : > { %v11227_v56 = vpop.f32.mrf.mxu1  ;;  %11690 = vmatmul.mubr.f32.gmra.mxu1 %v13939_v59  ;;  %808 = vst.msk [vmem:[%s13690_s15 + $0x128] sm:$0xff] %vm770_vm0, %v11099_v42  ;;  %11564 = vmatprep.mubr.f32.mxu0 %v13954_v60  ;;  %v9562_v42 = vld [vmem:[%s18078_s1 + $0x128] sm:$0xff] }
 0x160   : > { %1273 = vst.msk [vmem:[%s13695_s30 + $0x128] sm:$0xff] %vm770_vm0, %v11227_v56  ;;  %11692 = vmatprep.mubr.f32.mxu1 %v13954_v60  ;;  %v631_v63 = vpop.f32.mrf.mxu0  ;;  %11784 = vmatpush3.msra.mxu0 %v9570_v37  ;;  %v9642_v56 = vld [vmem:[%s18079_s2 + $0x128] sm:$0xff] }
 0x161   : > { %v1097_v49 = vpop.f32.mrf.mxu1  ;;  %11912 = vmatpush3.msra.mxu1 %v9650_v38  ;;  %807 = vst.msk [vmem:[%s13690_s15 + $0x120] sm:$0xff] %vm770_vm0, %v631_v63  ;;  %11785 = vmatprep.subr.mxu0 %v9569_v45 }
 0x162   : > { %1272 = vst.msk [vmem:[%s13695_s30 + $0x120] sm:$0xff] %vm770_vm0, %v1097_v49  ;;  %11913 = vmatprep.subr.mxu1 %v9649_v46  ;;  %v11102_v50 = vpop.f32.mrf.mxu0  ;;  %11565 = vmatmul.mubr.f32.gmra.mxu0 %v13963_v3 }
 0x163   : > { %v11230_v0 = vpop.f32.mrf.mxu1  ;;  %11693 = vmatmul.mubr.f32.gmra.mxu1 %v13963_v3  ;;  %810 = vst.msk [vmem:[%s13690_s15 + $0x138] sm:$0xff] %vm770_vm0, %v11102_v50  ;;  %11567 = vmatprep.mubr.f32.mxu0 %v13978_v4 }
 0x164   : > { %1275 = vst.msk [vmem:[%s13695_s30 + $0x138] sm:$0xff] %vm770_vm0, %v11230_v0  ;;  %11695 = vmatprep.mubr.f32.mxu1 %v13978_v4  ;;  %v641_v7 = vpop.f32.mrf.mxu0  ;;  %11786 = vmatpush3.msra.mxu0 %v9569_v45  ;;  %v14122_v45 = vld [vmem:[%s12984_s9 + $0xa0] sm:$0xff]  ;;  %v14131_v0 = vld [vmem:[%s12984_s9 + $0xa8] sm:$0xff] }
 0x165   : > { %v1107_v57 = vpop.f32.mrf.mxu1  ;;  %11914 = vmatpush3.msra.mxu1 %v9649_v46  ;;  %809 = vst.msk [vmem:[%s13690_s15 + $0x130] sm:$0xff] %vm770_vm0, %v641_v7  ;;  %11787 = vmatprep.subr.mxu0 %v9568_v53  ;;  %v14146_v7 = vld [vmem:[%s12984_s9 + $0xb0] sm:$0xff] }
 0x166   : > { %1274 = vst.msk [vmem:[%s13695_s30 + $0x130] sm:$0xff] %vm770_vm0, %v1107_v57  ;;  %11915 = vmatprep.subr.mxu1 %v9648_v54  ;;  %v11105_v58 = vpop.f32.mrf.mxu0  ;;  %11568 = vmatmul.mubr.f32.gmra.mxu0 %v13987_v11 }
 0x167   : > { %v11233_v8 = vpop.f32.mrf.mxu1  ;;  %11696 = vmatmul.mubr.f32.gmra.mxu1 %v13987_v11  ;;  %812 = vst.msk [vmem:[%s13690_s15 + $0x148] sm:$0xff] %vm770_vm0, %v11105_v58  ;;  %11570 = vmatprep.mubr.f32.mxu0 %v14002_v12 }
 0x168   : > { %1277 = vst.msk [vmem:[%s13695_s30 + $0x148] sm:$0xff] %vm770_vm0, %v11233_v8  ;;  %11698 = vmatprep.mubr.f32.mxu1 %v14002_v12  ;;  %v651_v15 = vpop.f32.mrf.mxu0  ;;  %11788 = vmatpush3.msra.mxu0 %v9568_v53  ;;  %v9561_v53 = vld [vmem:[%s18078_s1 + $0x120] sm:$0xff] }
 0x169   : > { %v1117_v1 = vpop.f32.mrf.mxu1  ;;  %11916 = vmatpush3.msra.mxu1 %v9648_v54  ;;  %811 = vst.msk [vmem:[%s13690_s15 + $0x140] sm:$0xff] %vm770_vm0, %v651_v15  ;;  %11789 = vmatprep.subr.mxu0 %v9567_v61  ;;  %v9641_v54 = vld [vmem:[%s18079_s2 + $0x120] sm:$0xff]  ;;  %v9560_v15 = vld [vmem:[%s18078_s1 + $0x118] sm:$0xff] }
 0x16a   : > { %1276 = vst.msk [vmem:[%s13695_s30 + $0x140] sm:$0xff] %vm770_vm0, %v1117_v1  ;;  %11917 = vmatprep.subr.mxu1 %v9647_v62  ;;  %v11108_v2 = vpop.f32.mrf.mxu0  ;;  %11571 = vmatmul.mubr.f32.gmra.mxu0 %v14011_v19  ;;  %v9640_v1 = vld [vmem:[%s18079_s2 + $0x118] sm:$0xff] }
 0x16b   : > { %v11236_v16 = vpop.f32.mrf.mxu1  ;;  %11699 = vmatmul.mubr.f32.gmra.mxu1 %v14011_v19  ;;  %814 = vst.msk [vmem:[%s13690_s15 + $0x158] sm:$0xff] %vm770_vm0, %v11108_v2  ;;  %11573 = vmatprep.mubr.f32.mxu0 %v14026_v9  ;;  %v14170_v2 = vld [vmem:[%s12984_s9 + $0xc0] sm:$0xff] }
 0x16c   : > { %1279 = vst.msk [vmem:[%s13695_s30 + $0x158] sm:$0xff] %vm770_vm0, %v11236_v16  ;;  %11701 = vmatprep.mubr.f32.mxu1 %v14026_v9  ;;  %v661_v20 = vpop.f32.mrf.mxu0  ;;  %11790 = vmatpush3.msra.mxu0 %v9567_v61 }
 0x16d   : > { %v1127_v10 = vpop.f32.mrf.mxu1  ;;  %11918 = vmatpush3.msra.mxu1 %v9647_v62  ;;  %813 = vst.msk [vmem:[%s13690_s15 + $0x150] sm:$0xff] %vm770_vm0, %v661_v20  ;;  %11791 = vmatprep.subr.mxu0 %v9566_v5  ;;  %v14155_v62 = vld [vmem:[%s12984_s9 + $0xb8] sm:$0xff] }
 0x16e   : > { %1278 = vst.msk [vmem:[%s13695_s30 + $0x150] sm:$0xff] %vm770_vm0, %v1127_v10  ;;  %11919 = vmatprep.subr.mxu1 %v9646_v6  ;;  %v11111_v13 = vpop.f32.mrf.mxu0  ;;  %11574 = vmatmul.mubr.f32.gmra.mxu0 %v14035_v17  ;;  %v14179_v10 = vld [vmem:[%s12984_s9 + $0xc8] sm:$0xff] }
 0x16f   : > { %v11239_v14 = vpop.f32.mrf.mxu1  ;;  %11702 = vmatmul.mubr.f32.gmra.mxu1 %v14035_v17  ;;  %816 = vst.msk [vmem:[%s13690_s15 + $0x168] sm:$0xff] %vm770_vm0, %v11111_v13  ;;  %11576 = vmatprep.mubr.f32.mxu0 %v14050_v21  ;;  %v9559_v13 = vld [vmem:[%s18078_s1 + $0x110] sm:$0xff] }
 0x170   : > { %1281 = vst.msk [vmem:[%s13695_s30 + $0x168] sm:$0xff] %vm770_vm0, %v11239_v14  ;;  %11704 = vmatprep.mubr.f32.mxu1 %v14050_v21  ;;  %v671_v26 = vpop.f32.mrf.mxu0  ;;  %11792 = vmatpush3.msra.mxu0 %v9566_v5  ;;  %v9639_v14 = vld [vmem:[%s18079_s2 + $0x110] sm:$0xff] }
 0x171   : > { %v1137_v28 = vpop.f32.mrf.mxu1  ;;  %11920 = vmatpush3.msra.mxu1 %v9646_v6  ;;  %815 = vst.msk [vmem:[%s13690_s15 + $0x160] sm:$0xff] %vm770_vm0, %v671_v26  ;;  %11793 = vmatprep.subr.mxu0 %v9565_v24 }
 0x172   : > { %1280 = vst.msk [vmem:[%s13695_s30 + $0x160] sm:$0xff] %vm770_vm0, %v1137_v28  ;;  %11921 = vmatprep.subr.mxu1 %v9645_v18  ;;  %v11114_v31 = vpop.f32.mrf.mxu0  ;;  %11577 = vmatmul.mubr.f32.gmra.mxu0 %v14059_v30 }
 0x173   : > { %v11242_v29 = vpop.f32.mrf.mxu1  ;;  %11705 = vmatmul.mubr.f32.gmra.mxu1 %v14059_v30  ;;  %818 = vst.msk [vmem:[%s13690_s15 + $0x178] sm:$0xff] %vm770_vm0, %v11114_v31  ;;  %11579 = vmatprep.mubr.f32.mxu0 %v14074_v39 }
 0x174   : > { %1283 = vst.msk [vmem:[%s13695_s30 + $0x178] sm:$0xff] %vm770_vm0, %v11242_v29  ;;  %11707 = vmatprep.mubr.f32.mxu1 %v14074_v39  ;;  %v681_v23 = vpop.f32.mrf.mxu0  ;;  %11794 = vmatpush3.msra.mxu0 %v9565_v24  ;;  %v14194_v24 = vld [vmem:[%s12984_s9 + $0xd0] sm:$0xff]  ;;  %v14203_v29 = vld [vmem:[%s12984_s9 + $0xd8] sm:$0xff] }
 0x175   : > { %v1147_v27 = vpop.f32.mrf.mxu1  ;;  %11922 = vmatpush3.msra.mxu1 %v9645_v18  ;;  %817 = vst.msk [vmem:[%s13690_s15 + $0x170] sm:$0xff] %vm770_vm0, %v681_v23  ;;  %11795 = vmatprep.subr.mxu0 %v9564_v35  ;;  %v14218_v23 = vld [vmem:[%s12984_s9 + $0xe0] sm:$0xff] }
 0x176   : > { %1282 = vst.msk [vmem:[%s13695_s30 + $0x170] sm:$0xff] %vm770_vm0, %v1147_v27  ;;  %11923 = vmatprep.subr.mxu1 %v9644_v40  ;;  %v11117_v34 = vpop.f32.mrf.mxu0  ;;  %11580 = vmatmul.mubr.f32.gmra.mxu0 %v14083_v47 }
 0x177   : > { %v11245_v44 = vpop.f32.mrf.mxu1  ;;  %11708 = vmatmul.mubr.f32.gmra.mxu1 %v14083_v47  ;;  %820 = vst.msk [vmem:[%s13690_s15 + $0x188] sm:$0xff] %vm770_vm0, %v11117_v34  ;;  %11582 = vmatprep.mubr.f32.mxu0 %v14098_v22 }
 0x178   : > { %1285 = vst.msk [vmem:[%s13695_s30 + $0x188] sm:$0xff] %vm770_vm0, %v11245_v44  ;;  %11710 = vmatprep.mubr.f32.mxu1 %v14098_v22  ;;  %v691_v25 = vpop.f32.mrf.mxu0  ;;  %11796 = vmatpush3.msra.mxu0 %v9564_v35  ;;  %v9558_v35 = vld [vmem:[%s18078_s1 + $0x108] sm:$0xff] }
 0x179   : > { %v1157_v37 = vpop.f32.mrf.mxu1  ;;  %11924 = vmatpush3.msra.mxu1 %v9644_v40  ;;  %819 = vst.msk [vmem:[%s13690_s15 + $0x180] sm:$0xff] %vm770_vm0, %v691_v25  ;;  %11797 = vmatprep.subr.mxu0 %v9563_v33  ;;  %v9638_v40 = vld [vmem:[%s18079_s2 + $0x108] sm:$0xff]  ;;  %v9557_v25 = vld [vmem:[%s18078_s1 + $0x100] sm:$0xff] }
 0x17a   : > { %1284 = vst.msk [vmem:[%s13695_s30 + $0x180] sm:$0xff] %vm770_vm0, %v1157_v37  ;;  %11925 = vmatprep.subr.mxu1 %v9643_v36  ;;  %v11120_v38 = vpop.f32.mrf.mxu0  ;;  %11583 = vmatmul.mubr.f32.gmra.mxu0 %v14107_v41  ;;  %v9637_v37 = vld [vmem:[%s18079_s2 + $0x100] sm:$0xff] }
 0x17b   : > { %v11248_v55 = vpop.f32.mrf.mxu1  ;;  %11711 = vmatmul.mubr.f32.gmra.mxu1 %v14107_v41  ;;  %822 = vst.msk [vmem:[%s13690_s15 + $0x198] sm:$0xff] %vm770_vm0, %v11120_v38  ;;  %11585 = vmatprep.mubr.f32.mxu0 %v14122_v45  ;;  %v14242_v38 = vld [vmem:[%s12984_s9 + $0xf0] sm:$0xff] }
 0x17c   : > { %1287 = vst.msk [vmem:[%s13695_s30 + $0x198] sm:$0xff] %vm770_vm0, %v11248_v55  ;;  %11713 = vmatprep.mubr.f32.mxu1 %v14122_v45  ;;  %v701_v46 = vpop.f32.mrf.mxu0  ;;  %11798 = vmatpush3.msra.mxu0 %v9563_v33 }
 0x17d   : > { %v1167_v63 = vpop.f32.mrf.mxu1  ;;  %11926 = vmatpush3.msra.mxu1 %v9643_v36  ;;  %821 = vst.msk [vmem:[%s13690_s15 + $0x190] sm:$0xff] %vm770_vm0, %v701_v46  ;;  %11799 = vmatprep.subr.mxu0 %v9562_v42  ;;  %v14227_v36 = vld [vmem:[%s12984_s9 + $0xe8] sm:$0xff] }
 0x17e   : > { %1286 = vst.msk [vmem:[%s13695_s30 + $0x190] sm:$0xff] %vm770_vm0, %v1167_v63  ;;  %11927 = vmatprep.subr.mxu1 %v9642_v56  ;;  %v11123_v49 = vpop.f32.mrf.mxu0  ;;  %11586 = vmatmul.mubr.f32.gmra.mxu0 %v14131_v0  ;;  %v14251_v63 = vld [vmem:[%s12984_s9 + $0xf8] sm:$0xff] }
 0x17f   : > { %v11251_v50 = vpop.f32.mrf.mxu1  ;;  %11714 = vmatmul.mubr.f32.gmra.mxu1 %v14131_v0  ;;  %824 = vst.msk [vmem:[%s13690_s15 + $0x1a8] sm:$0xff] %vm770_vm0, %v11123_v49  ;;  %11588 = vmatprep.mubr.f32.mxu0 %v14146_v7  ;;  %v14258_v49 = vld [vmem:[%s18080_s3 + $0x178] sm:$0xff] }
 0x180   : > { %1289 = vst.msk [vmem:[%s13695_s30 + $0x1a8] sm:$0xff] %vm770_vm0, %v11251_v50  ;;  %11716 = vmatprep.mubr.f32.mxu1 %v14146_v7  ;;  %v711_v57 = vpop.f32.mrf.mxu0  ;;  %11800 = vmatpush3.msra.mxu0 %v9562_v42  ;;  %v14263_v50 = vld [vmem:[%s18078_s1 + $0x1f8] sm:$0xff] }
 0x181   : > { %v1177_v58 = vpop.f32.mrf.mxu1  ;;  %11928 = vmatpush3.msra.mxu1 %v9642_v56  ;;  %823 = vst.msk [vmem:[%s13690_s15 + $0x1a0] sm:$0xff] %vm770_vm0, %v711_v57  ;;  %11801 = vmatprep.subr.mxu0 %v9561_v53 }
 0x182   : > { %1288 = vst.msk [vmem:[%s13695_s30 + $0x1a0] sm:$0xff] %vm770_vm0, %v1177_v58  ;;  %11929 = vmatprep.subr.mxu1 %v9641_v54  ;;  %v11126_v8 = vpop.f32.mrf.mxu0  ;;  %11589 = vmatmul.mubr.f32.gmra.mxu0 %v14155_v62 }
 0x183   : > { %v11254_v61 = vpop.f32.mrf.mxu1  ;;  %11717 = vmatmul.mubr.f32.gmra.mxu1 %v14155_v62  ;;  %826 = vst.msk [vmem:[%s13690_s15 + $0x1b8] sm:$0xff] %vm770_vm0, %v11126_v8  ;;  %11591 = vmatprep.mubr.f32.mxu0 %v14170_v2 }
 0x184   : > { %1291 = vst.msk [vmem:[%s13695_s30 + $0x1b8] sm:$0xff] %vm770_vm0, %v11254_v61  ;;  %11719 = vmatprep.mubr.f32.mxu1 %v14170_v2  ;;  %v721_v16 = vpop.f32.mrf.mxu0  ;;  %11802 = vmatpush3.msra.mxu0 %v9561_v53  ;;  %v14270_v53 = vld [vmem:[%s12984_s9 + $0x100] sm:$0xff]  ;;  %v14281_v61 = vld [vmem:[%s12984_s9 + $0x108] sm:$0xff] }
 0x185   : > { %v1187_v5 = vpop.f32.mrf.mxu1  ;;  %11930 = vmatpush3.msra.mxu1 %v9641_v54  ;;  %825 = vst.msk [vmem:[%s13690_s15 + $0x1b0] sm:$0xff] %vm770_vm0, %v721_v16  ;;  %11803 = vmatprep.subr.mxu0 %v9560_v15 }
 0x186   : > { %1290 = vst.msk [vmem:[%s13695_s30 + $0x1b0] sm:$0xff] %vm770_vm0, %v1187_v5  ;;  %11931 = vmatprep.subr.mxu1 %v9640_v1  ;;  %v11129_v6 = vpop.f32.mrf.mxu0  ;;  %11592 = vmatmul.mubr.f32.gmra.mxu0 %v14179_v10 }
 0x187   : > { %v11257_v20 = vpop.f32.mrf.mxu1  ;;  %11720 = vmatmul.mubr.f32.gmra.mxu1 %v14179_v10  ;;  %828 = vst.msk [vmem:[%s13690_s15 + $0x1c8] sm:$0xff] %vm770_vm0, %v11129_v6  ;;  %11594 = vmatprep.mubr.f32.mxu0 %v14194_v24 }
 0x188   : > { %1293 = vst.msk [vmem:[%s13695_s30 + $0x1c8] sm:$0xff] %vm770_vm0, %v11257_v20  ;;  %11722 = vmatprep.mubr.f32.mxu1 %v14194_v24  ;;  %v731_v18 = vpop.f32.mrf.mxu0  ;;  %11804 = vmatpush3.msra.mxu0 %v9560_v15  ;;  %v14293_v15 = vld [vmem:[%s12984_s9 + $0x110] sm:$0xff]  ;;  %v14302_v20 = vld [vmem:[%s12984_s9 + $0x118] sm:$0xff] }
 0x189   : > { %v1197_v26 = vpop.f32.mrf.mxu1  ;;  %11932 = vmatpush3.msra.mxu1 %v9640_v1  ;;  %827 = vst.msk [vmem:[%s13690_s15 + $0x1c0] sm:$0xff] %vm770_vm0, %v731_v18  ;;  %11805 = vmatprep.subr.mxu0 %v9559_v13 }
 0x18a   : > { %1292 = vst.msk [vmem:[%s13695_s30 + $0x1c0] sm:$0xff] %vm770_vm0, %v1197_v26  ;;  %11933 = vmatprep.subr.mxu1 %v9639_v14  ;;  %v11132_v28 = vpop.f32.mrf.mxu0  ;;  %11595 = vmatmul.mubr.f32.gmra.mxu0 %v14203_v29 }
 0x18b   : > { %v11260_v31 = vpop.f32.mrf.mxu1  ;;  %11723 = vmatmul.mubr.f32.gmra.mxu1 %v14203_v29  ;;  %830 = vst.msk [vmem:[%s13690_s15 + $0x1d8] sm:$0xff] %vm770_vm0, %v11132_v28  ;;  %11597 = vmatprep.mubr.f32.mxu0 %v14218_v23 }
 0x18c   : > { %1295 = vst.msk [vmem:[%s13695_s30 + $0x1d8] sm:$0xff] %vm770_vm0, %v11260_v31  ;;  %11725 = vmatprep.mubr.f32.mxu1 %v14218_v23  ;;  %v741_v27 = vpop.f32.mrf.mxu0  ;;  %11806 = vmatpush3.msra.mxu0 %v9559_v13  ;;  %v14311_v13 = vld [vmem:[%s12984_s9 + $0x120] sm:$0xff]  ;;  %v14320_v31 = vld [vmem:[%s12984_s9 + $0x128] sm:$0xff] }
 0x18d   : > { %v1207_v34 = vpop.f32.mrf.mxu1  ;;  %11934 = vmatpush3.msra.mxu1 %v9639_v14  ;;  %829 = vst.msk [vmem:[%s13690_s15 + $0x1d0] sm:$0xff] %vm770_vm0, %v741_v27  ;;  %11807 = vmatprep.subr.mxu0 %v9558_v35 }
 0x18e   : > { %1294 = vst.msk [vmem:[%s13695_s30 + $0x1d0] sm:$0xff] %vm770_vm0, %v1207_v34  ;;  %11935 = vmatprep.subr.mxu1 %v9638_v40  ;;  %v11135_v44 = vpop.f32.mrf.mxu0  ;;  %11598 = vmatmul.mubr.f32.gmra.mxu0 %v14227_v36 }
 0x18f   : > { %v11263_v33 = vpop.f32.mrf.mxu1  ;;  %11726 = vmatmul.mubr.f32.gmra.mxu1 %v14227_v36  ;;  %832 = vst.msk [vmem:[%s13690_s15 + $0x1e8] sm:$0xff] %vm770_vm0, %v11135_v44  ;;  %11600 = vmatprep.mubr.f32.mxu0 %v14242_v38 }
 0x190   : > { %1297 = vst.msk [vmem:[%s13695_s30 + $0x1e8] sm:$0xff] %vm770_vm0, %v11263_v33  ;;  %11728 = vmatprep.mubr.f32.mxu1 %v14242_v38  ;;  %v751_v55 = vpop.f32.mrf.mxu0  ;;  %11808 = vmatpush3.msra.mxu0 %v9558_v35  ;;  %v14329_v35 = vld [vmem:[%s12984_s9 + $0x130] sm:$0xff]  ;;  %v14338_v33 = vld [vmem:[%s12984_s9 + $0x138] sm:$0xff] }
 0x191   : > { %v1217_v42 = vpop.f32.mrf.mxu1  ;;  %11936 = vmatpush3.msra.mxu1 %v9638_v40  ;;  %831 = vst.msk [vmem:[%s13690_s15 + $0x1e0] sm:$0xff] %vm770_vm0, %v751_v55  ;;  %11809 = vmatprep.subr.mxu0 %v9557_v25 }
 0x192   : > { %1296 = vst.msk [vmem:[%s13695_s30 + $0x1e0] sm:$0xff] %vm770_vm0, %v1217_v42  ;;  %11937 = vmatprep.subr.mxu1 %v9637_v37  ;;  %v11138_v56 = vpop.f32.mrf.mxu0  ;;  %11601 = vmatmul.mubr.f32.gmra.mxu0 %v14251_v63 }
 0x193   : > { %v11266_v46 = vpop.f32.mrf.mxu1  ;;  %11729 = vmatmul.mubr.f32.gmra.mxu1 %v14251_v63  ;;  %834 = vst.msk [vmem:[%s13690_s15 + $0x1f8] sm:$0xff] %vm770_vm0, %v11138_v56  ;;  %11603 = vmatprep.mubr.f32.mxu0 %v14270_v53 }
 0x194   : > { %1299 = vst.msk [vmem:[%s13695_s30 + $0x1f8] sm:$0xff] %vm770_vm0, %v11266_v46  ;;  %11731 = vmatprep.mubr.f32.mxu1 %v14270_v53  ;;  %v761_v54 = vpop.f32.mrf.mxu0  ;;  %11810 = vmatpush3.msra.mxu0 %v9557_v25  ;;  %v14347_v25 = vld [vmem:[%s12984_s9 + $0x140] sm:$0xff]  ;;  %v14356_v46 = vld [vmem:[%s12984_s9 + $0x148] sm:$0xff] }
 0x195   : > { %v1227_v57 = vpop.f32.mrf.mxu1  ;;  %11938 = vmatpush3.msra.mxu1 %v9637_v37  ;;  %833 = vst.msk [vmem:[%s13690_s15 + $0x1f0] sm:$0xff] %vm770_vm0, %v761_v54  ;;  %12035 = vmatprep.subr.mxu0 %v14258_v49  ;;  %v14365_v54 = vld [vmem:[%s12984_s9 + $0x150] sm:$0xff] }
 0x196   : > { %1298 = vst.msk [vmem:[%s13695_s30 + $0x1f0] sm:$0xff] %vm770_vm0, %v1227_v57  ;;  %12163 = vmatprep.subr.mxu1 %v14263_v50  ;;  %v11301_v58 = vpop.f32.mrf.mxu0  ;;  %11604 = vmatmul.mubr.f32.gmra.mxu0 %v14281_v61 }
 0x197   : > { %v11429_v8 = vpop.f32.mrf.mxu1  ;;  %11732 = vmatmul.mubr.f32.gmra.mxu1 %v14281_v61  ;;  %1702 = vst.msk [vmem:[%s14286_s16 + $0x8] sm:$0xff] %vm770_vm0, %v11301_v58  ;;  %11606 = vmatprep.mubr.f32.mxu0 %v14293_v15 }
 0x198   : > { %9334 = vst.msk [vmem:[%s13690_s15 + $0x208] sm:$0xff] %vm770_vm0, %v11429_v8  ;;  %11734 = vmatprep.mubr.f32.mxu1 %v14293_v15  ;;  %v1382_v1 = vpop.f32.mrf.mxu0 }
 0x199   : > { %v1848_v16 = vpop.f32.mrf.mxu1  ;;  %1701 = vst.msk [vmem:[%s14286_s16] sm:$0xff] %vm770_vm0, %v1382_v1 }
 0x19a   : > { %9333 = vst.msk [vmem:[%s13690_s15 + $0x200] sm:$0xff] %vm770_vm0, %v1848_v16  ;;  %v11304_v5 = vpop.f32.mrf.mxu0  ;;  %11607 = vmatmul.mubr.f32.gmra.mxu0 %v14302_v20  ;;  %v14374_v16 = vld [vmem:[%s12984_s9 + $0x158] sm:$0xff] }
 0x19b   : > { %v11432_v6 = vpop.f32.mrf.mxu1  ;;  %11735 = vmatmul.mubr.f32.gmra.mxu1 %v14302_v20  ;;  %1704 = vst.msk [vmem:[%s14286_s16 + $0x18] sm:$0xff] %vm770_vm0, %v11304_v5  ;;  %11609 = vmatprep.mubr.f32.mxu0 %v14311_v13  ;;  %v14383_v5 = vld [vmem:[%s12984_s9 + $0x160] sm:$0xff] }
 0x19c   : > { %9336 = vst.msk [vmem:[%s13690_s15 + $0x218] sm:$0xff] %vm770_vm0, %v11432_v6  ;;  %11737 = vmatprep.mubr.f32.mxu1 %v14311_v13  ;;  %v1392_v14 = vpop.f32.mrf.mxu0 }
 0x19d   : > { %v1858_v18 = vpop.f32.mrf.mxu1  ;;  %1703 = vst.msk [vmem:[%s14286_s16 + $0x10] sm:$0xff] %vm770_vm0, %v1392_v14 }
 0x19e   : > { %9335 = vst.msk [vmem:[%s13690_s15 + $0x210] sm:$0xff] %vm770_vm0, %v1858_v18  ;;  %v11307_v26 = vpop.f32.mrf.mxu0  ;;  %11610 = vmatmul.mubr.f32.gmra.mxu0 %v14320_v31 }
 0x19f   : > { %v11435_v28 = vpop.f32.mrf.mxu1  ;;  %11738 = vmatmul.mubr.f32.gmra.mxu1 %v14320_v31  ;;  %1706 = vst.msk [vmem:[%s14286_s16 + $0x28] sm:$0xff] %vm770_vm0, %v11307_v26  ;;  %11612 = vmatprep.mubr.f32.mxu0 %v14329_v35 }
 0x1a0   : > { %9338 = vst.msk [vmem:[%s13690_s15 + $0x228] sm:$0xff] %vm770_vm0, %v11435_v28  ;;  %11740 = vmatprep.mubr.f32.mxu1 %v14329_v35  ;;  %v1402_v40 = vpop.f32.mrf.mxu0  ;;  %v14392_v28 = vld [vmem:[%s12984_s9 + $0x168] sm:$0xff] }
 0x1a1   : > { %v1868_v27 = vpop.f32.mrf.mxu1  ;;  %1705 = vst.msk [vmem:[%s14286_s16 + $0x20] sm:$0xff] %vm770_vm0, %v1402_v40  ;;  %v14401_v40 = vld [vmem:[%s12984_s9 + $0x170] sm:$0xff] }
 0x1a2   : > { %9337 = vst.msk [vmem:[%s13690_s15 + $0x220] sm:$0xff] %vm770_vm0, %v1868_v27  ;;  %v11310_v34 = vpop.f32.mrf.mxu0  ;;  %11613 = vmatmul.mubr.f32.gmra.mxu0 %v14338_v33 }
 0x1a3   : > { %v11438_v44 = vpop.f32.mrf.mxu1  ;;  %11741 = vmatmul.mubr.f32.gmra.mxu1 %v14338_v33  ;;  %1708 = vst.msk [vmem:[%s14286_s16 + $0x38] sm:$0xff] %vm770_vm0, %v11310_v34  ;;  %11615 = vmatprep.mubr.f32.mxu0 %v14347_v25 }
 0x1a4   : > { %9340 = vst.msk [vmem:[%s13690_s15 + $0x238] sm:$0xff] %vm770_vm0, %v11438_v44  ;;  %11743 = vmatprep.mubr.f32.mxu1 %v14347_v25  ;;  %v1412_v37 = vpop.f32.mrf.mxu0 }
 0x1a5   : > { %v1878_v55 = vpop.f32.mrf.mxu1  ;;  %1707 = vst.msk [vmem:[%s14286_s16 + $0x30] sm:$0xff] %vm770_vm0, %v1412_v37 }
 0x1a6   : > { %9339 = vst.msk [vmem:[%s13690_s15 + $0x230] sm:$0xff] %vm770_vm0, %v1878_v55  ;;  %v11313_v42 = vpop.f32.mrf.mxu0  ;;  %11616 = vmatmul.mubr.f32.gmra.mxu0 %v14356_v46  ;;  %v14410_v55 = vld [vmem:[%s12984_s9 + $0x178] sm:$0xff] }
 0x1a7   : > { %v11441_v56 = vpop.f32.mrf.mxu1  ;;  %11744 = vmatmul.mubr.f32.gmra.mxu1 %v14356_v46  ;;  %1710 = vst.msk [vmem:[%s14286_s16 + $0x48] sm:$0xff] %vm770_vm0, %v11313_v42  ;;  %11618 = vmatprep.mubr.f32.mxu0 %v14365_v54  ;;  %v14419_v42 = vld [vmem:[%s12984_s9 + $0x180] sm:$0xff] }
 0x1a8   : > { %9342 = vst.msk [vmem:[%s13690_s15 + $0x248] sm:$0xff] %vm770_vm0, %v11441_v56  ;;  %11746 = vmatprep.mubr.f32.mxu1 %v14365_v54  ;;  %v1422_v57 = vpop.f32.mrf.mxu0 }
 0x1a9   : > { %v1888_v58 = vpop.f32.mrf.mxu1  ;;  %1709 = vst.msk [vmem:[%s14286_s16 + $0x40] sm:$0xff] %vm770_vm0, %v1422_v57 }
 0x1aa   : > { %9341 = vst.msk [vmem:[%s13690_s15 + $0x240] sm:$0xff] %vm770_vm0, %v1888_v58  ;;  %v11316_v8 = vpop.f32.mrf.mxu0  ;;  %11619 = vmatmul.mubr.f32.gmra.mxu0 %v14374_v16 }
 0x1ab   : > { %v11444_v1 = vpop.f32.mrf.mxu1  ;;  %11747 = vmatmul.mubr.f32.gmra.mxu1 %v14374_v16  ;;  %1712 = vst.msk [vmem:[%s14286_s16 + $0x58] sm:$0xff] %vm770_vm0, %v11316_v8  ;;  %11621 = vmatprep.mubr.f32.mxu0 %v14383_v5 }
 0x1ac   : > { %9344 = vst.msk [vmem:[%s13690_s15 + $0x258] sm:$0xff] %vm770_vm0, %v11444_v1  ;;  %11749 = vmatprep.mubr.f32.mxu1 %v14383_v5  ;;  %v1432_v6 = vpop.f32.mrf.mxu0  ;;  %v14428_v1 = vld [vmem:[%s12984_s9 + $0x188] sm:$0xff] }
 0x1ad   : > { %v1898_v14 = vpop.f32.mrf.mxu1  ;;  %1711 = vst.msk [vmem:[%s14286_s16 + $0x50] sm:$0xff] %vm770_vm0, %v1432_v6  ;;  %v14437_v6 = vld [vmem:[%s12984_s9 + $0x190] sm:$0xff] }
 0x1ae   : > { %9343 = vst.msk [vmem:[%s13690_s15 + $0x250] sm:$0xff] %vm770_vm0, %v1898_v14  ;;  %v11319_v18 = vpop.f32.mrf.mxu0  ;;  %11622 = vmatmul.mubr.f32.gmra.mxu0 %v14392_v28 }
 0x1af   : > { %v11447_v26 = vpop.f32.mrf.mxu1  ;;  %11750 = vmatmul.mubr.f32.gmra.mxu1 %v14392_v28  ;;  %1714 = vst.msk [vmem:[%s14286_s16 + $0x68] sm:$0xff] %vm770_vm0, %v11319_v18  ;;  %11624 = vmatprep.mubr.f32.mxu0 %v14401_v40 }
 0x1b0   : > { %9346 = vst.msk [vmem:[%s13690_s15 + $0x268] sm:$0xff] %vm770_vm0, %v11447_v26  ;;  %11752 = vmatprep.mubr.f32.mxu1 %v14401_v40  ;;  %v1442_v27 = vpop.f32.mrf.mxu0 }
 0x1b1   : > { %v1908_v34 = vpop.f32.mrf.mxu1  ;;  %1713 = vst.msk [vmem:[%s14286_s16 + $0x60] sm:$0xff] %vm770_vm0, %v1442_v27 }
 0x1b2   : > { %9345 = vst.msk [vmem:[%s13690_s15 + $0x260] sm:$0xff] %vm770_vm0, %v1908_v34  ;;  %v11322_v44 = vpop.f32.mrf.mxu0  ;;  %11625 = vmatmul.mubr.f32.gmra.mxu0 %v14410_v55  ;;  %v14446_v34 = vld [vmem:[%s12984_s9 + $0x198] sm:$0xff] }
 0x1b3   : > { %v11450_v37 = vpop.f32.mrf.mxu1  ;;  %11753 = vmatmul.mubr.f32.gmra.mxu1 %v14410_v55  ;;  %1716 = vst.msk [vmem:[%s14286_s16 + $0x78] sm:$0xff] %vm770_vm0, %v11322_v44  ;;  %11627 = vmatprep.mubr.f32.mxu0 %v14419_v42  ;;  %v14455_v44 = vld [vmem:[%s12984_s9 + $0x1a0] sm:$0xff] }
 0x1b4   : > { %9348 = vst.msk [vmem:[%s13690_s15 + $0x278] sm:$0xff] %vm770_vm0, %v11450_v37  ;;  %11755 = vmatprep.mubr.f32.mxu1 %v14419_v42  ;;  %v1452_v56 = vpop.f32.mrf.mxu0 }
 0x1b5   : > { %v1918_v57 = vpop.f32.mrf.mxu1  ;;  %1715 = vst.msk [vmem:[%s14286_s16 + $0x70] sm:$0xff] %vm770_vm0, %v1452_v56 }
 0x1b6   : > { %9347 = vst.msk [vmem:[%s13690_s15 + $0x270] sm:$0xff] %vm770_vm0, %v1918_v57  ;;  %v11325_v58 = vpop.f32.mrf.mxu0  ;;  %11628 = vmatmul.mubr.f32.gmra.mxu0 %v14428_v1 }
 0x1b7   : > { %v11453_v8 = vpop.f32.mrf.mxu1  ;;  %11756 = vmatmul.mubr.f32.gmra.mxu1 %v14428_v1  ;;  %1718 = vst.msk [vmem:[%s14286_s16 + $0x88] sm:$0xff] %vm770_vm0, %v11325_v58  ;;  %11630 = vmatprep.mubr.f32.mxu0 %v14437_v6 }
 0x1b8   : > { %9350 = vst.msk [vmem:[%s13690_s15 + $0x288] sm:$0xff] %vm770_vm0, %v11453_v8  ;;  %11758 = vmatprep.mubr.f32.mxu1 %v14437_v6  ;;  %v1462_v14 = vpop.f32.mrf.mxu0  ;;  %v14464_v8 = vld [vmem:[%s12984_s9 + $0x1a8] sm:$0xff] }
 0x1b9   : > { %v1928_v18 = vpop.f32.mrf.mxu1  ;;  %1717 = vst.msk [vmem:[%s14286_s16 + $0x80] sm:$0xff] %vm770_vm0, %v1462_v14  ;;  %v14473_v14 = vld [vmem:[%s12984_s9 + $0x1b0] sm:$0xff] }
 0x1ba   : > { %9349 = vst.msk [vmem:[%s13690_s15 + $0x280] sm:$0xff] %vm770_vm0, %v1928_v18  ;;  %v11328_v26 = vpop.f32.mrf.mxu0  ;;  %11631 = vmatmul.mubr.f32.gmra.mxu0 %v14446_v34  ;;  %18137 = vst [vmem:[#allocation10_spill] sm:$0xff] %v14473_v14 }
 0x1bb   : > { %v11456_v27 = vpop.f32.mrf.mxu1  ;;  %11759 = vmatmul.mubr.f32.gmra.mxu1 %v14446_v34  ;;  %1720 = vst.msk [vmem:[%s14286_s16 + $0x98] sm:$0xff] %vm770_vm0, %v11328_v26  ;;  %11633 = vmatprep.mubr.f32.mxu0 %v14455_v44 }
 0x1bc   : > { %9352 = vst.msk [vmem:[%s13690_s15 + $0x298] sm:$0xff] %vm770_vm0, %v11456_v27  ;;  %11761 = vmatprep.mubr.f32.mxu1 %v14455_v44  ;;  %v1472_v37 = vpop.f32.mrf.mxu0 }
 0x1bd   : > { %v1938_v56 = vpop.f32.mrf.mxu1  ;;  %1719 = vst.msk [vmem:[%s14286_s16 + $0x90] sm:$0xff] %vm770_vm0, %v1472_v37 }
 0x1be   : > { %9351 = vst.msk [vmem:[%s13690_s15 + $0x290] sm:$0xff] %vm770_vm0, %v1938_v56  ;;  %v11331_v57 = vpop.f32.mrf.mxu0  ;;  %11634 = vmatmul.mubr.f32.gmra.mxu0 %v14464_v8  ;;  %v14482_v56 = vld [vmem:[%s12984_s9 + $0x1b8] sm:$0xff] }
 0x1bf   : > { %v11459_v58 = vpop.f32.mrf.mxu1  ;;  %11762 = vmatmul.mubr.f32.gmra.mxu1 %v14464_v8  ;;  %1722 = vst.msk [vmem:[%s14286_s16 + $0xa8] sm:$0xff] %vm770_vm0, %v11331_v57  ;;  %11636 = vmatprep.mubr.f32.mxu0 %v14473_v14  ;;  %18138 = vst [vmem:[#allocation11_spill] sm:$0xff] %v14482_v56  ;;  %v14491_v57 = vld [vmem:[%s12984_s9 + $0x1c0] sm:$0xff] }
 0x1c0   : > { %9354 = vst.msk [vmem:[%s13690_s15 + $0x2a8] sm:$0xff] %vm770_vm0, %v11459_v58  ;;  %11764 = vmatprep.mubr.f32.mxu1 %v14473_v14  ;;  %v1482_v18 = vpop.f32.mrf.mxu0  ;;  %18139 = vst [vmem:[#allocation12_spill] sm:$0xff] %v14491_v57  ;;  %v14554_v14 = vld [vmem:[%s12984_s9 + $0x1f8] sm:$0xff] }
 0x1c1   : > { %v1948_v26 = vpop.f32.mrf.mxu1  ;;  %1721 = vst.msk [vmem:[%s14286_s16 + $0xa0] sm:$0xff] %vm770_vm0, %v1482_v18 }
 0x1c2   : > { %9353 = vst.msk [vmem:[%s13690_s15 + $0x2a0] sm:$0xff] %vm770_vm0, %v1948_v26  ;;  %v11334_v27 = vpop.f32.mrf.mxu0  ;;  %11637 = vmatmul.mubr.f32.gmra.mxu0 %v14482_v56 }
 0x1c3   : > { %v11462_v37 = vpop.f32.mrf.mxu1  ;;  %11765 = vmatmul.mubr.f32.gmra.mxu1 %v14482_v56  ;;  %1724 = vst.msk [vmem:[%s14286_s16 + $0xb8] sm:$0xff] %vm770_vm0, %v11334_v27  ;;  %11639 = vmatprep.mubr.f32.mxu0 %v14491_v57  ;;  %v14500_v56 = vld [vmem:[%s12984_s9 + $0x1c8] sm:$0xff] }
 0x1c4   : > { %9356 = vst.msk [vmem:[%s13690_s15 + $0x2b8] sm:$0xff] %vm770_vm0, %v11462_v37  ;;  %11767 = vmatprep.mubr.f32.mxu1 %v14491_v57  ;;  %v1492_v58 = vpop.f32.mrf.mxu0  ;;  %18140 = vst [vmem:[#allocation13_spill] sm:$0xff] %v14500_v56  ;;  %v14509_v37 = vld [vmem:[%s12984_s9 + $0x1d0] sm:$0xff]  ;;  %v14518_v57 = vld [vmem:[%s12984_s9 + $0x1d8] sm:$0xff] }
 0x1c5   : > { %v1958_v18 = vpop.f32.mrf.mxu1  ;;  %1723 = vst.msk [vmem:[%s14286_s16 + $0xb0] sm:$0xff] %vm770_vm0, %v1492_v58  ;;  %18141 = vst [vmem:[#allocation14_spill] sm:$0xff] %v14509_v37 }
 0x1c6   : > { %9355 = vst.msk [vmem:[%s13690_s15 + $0x2b0] sm:$0xff] %vm770_vm0, %v1958_v18  ;;  %v11337_v26 = vpop.f32.mrf.mxu0  ;;  %11640 = vmatmul.mubr.f32.gmra.mxu0 %v14500_v56  ;;  %18142 = vst [vmem:[#allocation15_spill] sm:$0xff] %v14518_v57 }
 0x1c7   : > { %v11465_v27 = vpop.f32.mrf.mxu1  ;;  %11768 = vmatmul.mubr.f32.gmra.mxu1 %v14500_v56  ;;  %1726 = vst.msk [vmem:[%s14286_s16 + $0xc8] sm:$0xff] %vm770_vm0, %v11337_v26  ;;  %11642 = vmatprep.mubr.f32.mxu0 %v14509_v37 }
 0x1c8   : > { %9358 = vst.msk [vmem:[%s13690_s15 + $0x2c8] sm:$0xff] %vm770_vm0, %v11465_v27  ;;  %11770 = vmatprep.mubr.f32.mxu1 %v14509_v37  ;;  %v1502_v58 = vpop.f32.mrf.mxu0  ;;  %v14527_v27 = vld [vmem:[%s12984_s9 + $0x1e0] sm:$0xff]  ;;  %v14536_v37 = vld [vmem:[%s12984_s9 + $0x1e8] sm:$0xff] }
 0x1c9   : > { %v1968_v18 = vpop.f32.mrf.mxu1  ;;  %1725 = vst.msk [vmem:[%s14286_s16 + $0xc0] sm:$0xff] %vm770_vm0, %v1502_v58  ;;  %18143 = vst [vmem:[#allocation16_spill] sm:$0xff] %v14527_v27 }
 0x1ca   : > { %9357 = vst.msk [vmem:[%s13690_s15 + $0x2c0] sm:$0xff] %vm770_vm0, %v1968_v18  ;;  %v11340_v56 = vpop.f32.mrf.mxu0  ;;  %11643 = vmatmul.mubr.f32.gmra.mxu0 %v14518_v57  ;;  %18144 = vst [vmem:[#allocation17_spill] sm:$0xff] %v14536_v37 }
 0x1cb   : > { %v11468_v26 = vpop.f32.mrf.mxu1  ;;  %11771 = vmatmul.mubr.f32.gmra.mxu1 %v14518_v57  ;;  %1728 = vst.msk [vmem:[%s14286_s16 + $0xd8] sm:$0xff] %vm770_vm0, %v11340_v56  ;;  %11645 = vmatprep.mubr.f32.mxu0 %v14527_v27 }
 0x1cc   : > { %9360 = vst.msk [vmem:[%s13690_s15 + $0x2d8] sm:$0xff] %vm770_vm0, %v11468_v26  ;;  %11773 = vmatprep.mubr.f32.mxu1 %v14527_v27  ;;  %v1512_v58 = vpop.f32.mrf.mxu0  ;;  %v14545_v26 = vld [vmem:[%s12984_s9 + $0x1f0] sm:$0xff] }
 0x1cd   : > { %v1978_v18 = vpop.f32.mrf.mxu1  ;;  %1727 = vst.msk [vmem:[%s14286_s16 + $0xd0] sm:$0xff] %vm770_vm0, %v1512_v58 }
 0x1ce   : > { %9359 = vst.msk [vmem:[%s13690_s15 + $0x2d0] sm:$0xff] %vm770_vm0, %v1978_v18  ;;  %v11343_v57 = vpop.f32.mrf.mxu0  ;;  %11646 = vmatmul.mubr.f32.gmra.mxu0 %v14536_v37 }
 0x1cf   : > { %v11471_v56 = vpop.f32.mrf.mxu1  ;;  %11774 = vmatmul.mubr.f32.gmra.mxu1 %v14536_v37  ;;  %1730 = vst.msk [vmem:[%s14286_s16 + $0xe8] sm:$0xff] %vm770_vm0, %v11343_v57  ;;  %11648 = vmatprep.mubr.f32.mxu0 %v14545_v26 }
 0x1d0   : > { %9362 = vst.msk [vmem:[%s13690_s15 + $0x2e8] sm:$0xff] %vm770_vm0, %v11471_v56  ;;  %11776 = vmatprep.mubr.f32.mxu1 %v14545_v26  ;;  %v1522_v58 = vpop.f32.mrf.mxu0 }
 0x1d1   : > { %v1988_v18 = vpop.f32.mrf.mxu1  ;;  %1729 = vst.msk [vmem:[%s14286_s16 + $0xe0] sm:$0xff] %vm770_vm0, %v1522_v58 }
 0x1d2   : > { %9361 = vst.msk [vmem:[%s13690_s15 + $0x2e0] sm:$0xff] %vm770_vm0, %v1988_v18  ;;  %v11346_v37 = vpop.f32.mrf.mxu0  ;;  %11649 = vmatmul.mubr.f32.gmra.mxu0 %v14554_v14 }
 0x1d3   : > { %v11474_v27 = vpop.f32.mrf.mxu1  ;;  %11777 = vmatmul.mubr.f32.gmra.mxu1 %v14554_v14  ;;  %1732 = vst.msk [vmem:[%s14286_s16 + $0xf8] sm:$0xff] %vm770_vm0, %v11346_v37  ;;  %11811 = vmatprep.mubr.f32.mxu0 %v13880_v43  ;;  %v9731_v37 = vld [vmem:[%s18080_s3 + $0x170] sm:$0xff] }
 0x1d4   : > { %9364 = vst.msk [vmem:[%s13690_s15 + $0x2f8] sm:$0xff] %vm770_vm0, %v11474_v27  ;;  %11939 = vmatprep.mubr.f32.mxu1 %v13880_v43  ;;  %v1532_v57 = vpop.f32.mrf.mxu0  ;;  %v9811_v43 = vld [vmem:[%s18078_s1 + $0x1f0] sm:$0xff] }
 0x1d5   : > { %v1998_v56 = vpop.f32.mrf.mxu1  ;;  %1731 = vst.msk [vmem:[%s14286_s16 + $0xf0] sm:$0xff] %vm770_vm0, %v1532_v57 }
 0x1d6   : > { %9363 = vst.msk [vmem:[%s13690_s15 + $0x2f0] sm:$0xff] %vm770_vm0, %v1998_v56  ;;  %v11349_v58 = vpop.f32.mrf.mxu0  ;;  %11812 = vmatmul.mubr.f32.vlgmr.msra.gmra.mxu0 %v13889_v32 }
 0x1d7   : > { %v11477_v18 = vpop.f32.mrf.mxu1  ;;  %11940 = vmatmul.mubr.f32.vlgmr.msra.gmra.mxu1 %v13889_v32  ;;  %1734 = vst.msk [vmem:[%s14286_s16 + $0x108] sm:$0xff] %vm770_vm0, %v11349_v58  ;;  %12036 = vmatpush3.msra.mxu0 %v14258_v49 }
 0x1d8   : > { %9366 = vst.msk [vmem:[%s13690_s15 + $0x308] sm:$0xff] %vm770_vm0, %v11477_v18  ;;  %12164 = vmatpush3.msra.mxu1 %v14263_v50  ;;  %v1542_v27 = vpop.f32.mrf.mxu0  ;;  %11814 = vmatprep.mubr.f32.mxu0 %v13906_v48  ;;  %v9730_v50 = vld [vmem:[%s18080_s3 + $0x168] sm:$0xff] }
 0x1d9   : > { %v2008_v32 = vpop.f32.mrf.mxu1  ;;  %11942 = vmatprep.mubr.f32.mxu1 %v13906_v48  ;;  %1733 = vst.msk [vmem:[%s14286_s16 + $0x100] sm:$0xff] %vm770_vm0, %v1542_v27  ;;  %12037 = vmatprep.subr.mxu0 %v9731_v37  ;;  %v9810_v48 = vld [vmem:[%s18078_s1 + $0x1e8] sm:$0xff] }
 0x1da   : > { %9365 = vst.msk [vmem:[%s13690_s15 + $0x300] sm:$0xff] %vm770_vm0, %v2008_v32  ;;  %12165 = vmatprep.subr.mxu1 %v9811_v43  ;;  %v11352_v57 = vpop.f32.mrf.mxu0  ;;  %11815 = vmatmul.mubr.f32.gmra.mxu0 %v13915_v51 }
 0x1db   : > { %v11480_v49 = vpop.f32.mrf.mxu1  ;;  %11943 = vmatmul.mubr.f32.gmra.mxu1 %v13915_v51  ;;  %1736 = vst.msk [vmem:[%s14286_s16 + $0x118] sm:$0xff] %vm770_vm0, %v11352_v57  ;;  %11817 = vmatprep.mubr.f32.mxu0 %v13930_v52  ;;  %v9808_v57 = vld [vmem:[%s18078_s1 + $0x1d8] sm:$0xff] }
 0x1dc   : > { %9368 = vst.msk [vmem:[%s13690_s15 + $0x318] sm:$0xff] %vm770_vm0, %v11480_v49  ;;  %11945 = vmatprep.mubr.f32.mxu1 %v13930_v52  ;;  %v1552_v56 = vpop.f32.mrf.mxu0  ;;  %12038 = vmatpush3.msra.mxu0 %v9731_v37  ;;  %v9729_v52 = vld [vmem:[%s18080_s3 + $0x160] sm:$0xff] }
 0x1dd   : > { %v2018_v51 = vpop.f32.mrf.mxu1  ;;  %12166 = vmatpush3.msra.mxu1 %v9811_v43  ;;  %1735 = vst.msk [vmem:[%s14286_s16 + $0x110] sm:$0xff] %vm770_vm0, %v1552_v56  ;;  %12039 = vmatprep.subr.mxu0 %v9730_v50  ;;  %v9809_v37 = vld [vmem:[%s18078_s1 + $0x1e0] sm:$0xff]  ;;  %v9807_v56 = vld [vmem:[%s18078_s1 + $0x1d0] sm:$0xff] }
 0x1de   : > { %9367 = vst.msk [vmem:[%s13690_s15 + $0x310] sm:$0xff] %vm770_vm0, %v2018_v51  ;;  %12167 = vmatprep.subr.mxu1 %v9810_v48  ;;  %v11355_v58 = vpop.f32.mrf.mxu0  ;;  %11818 = vmatmul.mubr.f32.gmra.mxu0 %v13939_v59 }
 0x1df   : > { %v11483_v18 = vpop.f32.mrf.mxu1  ;;  %11946 = vmatmul.mubr.f32.gmra.mxu1 %v13939_v59  ;;  %1738 = vst.msk [vmem:[%s14286_s16 + $0x128] sm:$0xff] %vm770_vm0, %v11355_v58  ;;  %11820 = vmatprep.mubr.f32.mxu0 %v13954_v60 }
 0x1e0   : > { %9370 = vst.msk [vmem:[%s13690_s15 + $0x328] sm:$0xff] %vm770_vm0, %v11483_v18  ;;  %11948 = vmatprep.mubr.f32.mxu1 %v13954_v60  ;;  %v1562_v43 = vpop.f32.mrf.mxu0  ;;  %12040 = vmatpush3.msra.mxu0 %v9730_v50  ;;  %v9728_v60 = vld [vmem:[%s18080_s3 + $0x158] sm:$0xff] }
 0x1e1   : > { %v2028_v59 = vpop.f32.mrf.mxu1  ;;  %12168 = vmatpush3.msra.mxu1 %v9810_v48  ;;  %1737 = vst.msk [vmem:[%s14286_s16 + $0x120] sm:$0xff] %vm770_vm0, %v1562_v43  ;;  %12041 = vmatprep.subr.mxu0 %v9729_v52 }
 0x1e2   : > { %9369 = vst.msk [vmem:[%s13690_s15 + $0x320] sm:$0xff] %vm770_vm0, %v2028_v59  ;;  %12169 = vmatprep.subr.mxu1 %v9809_v37  ;;  %v11358_v27 = vpop.f32.mrf.mxu0  ;;  %11821 = vmatmul.mubr.f32.gmra.mxu0 %v13963_v3 }
 0x1e3   : > { %v11486_v32 = vpop.f32.mrf.mxu1  ;;  %11949 = vmatmul.mubr.f32.gmra.mxu1 %v13963_v3  ;;  %1740 = vst.msk [vmem:[%s14286_s16 + $0x138] sm:$0xff] %vm770_vm0, %v11358_v27  ;;  %11823 = vmatprep.mubr.f32.mxu0 %v13978_v4  ;;  %v9805_v27 = vld [vmem:[%s18078_s1 + $0x1c0] sm:$0xff] }
 0x1e4   : > { %9372 = vst.msk [vmem:[%s13690_s15 + $0x338] sm:$0xff] %vm770_vm0, %v11486_v32  ;;  %11951 = vmatprep.mubr.f32.mxu1 %v13978_v4  ;;  %v1572_v49 = vpop.f32.mrf.mxu0  ;;  %12042 = vmatpush3.msra.mxu0 %v9729_v52  ;;  %v9727_v4 = vld [vmem:[%s18080_s3 + $0x150] sm:$0xff]  ;;  %v9806_v52 = vld [vmem:[%s18078_s1 + $0x1c8] sm:$0xff] }
 0x1e5   : > { %v2038_v3 = vpop.f32.mrf.mxu1  ;;  %12170 = vmatpush3.msra.mxu1 %v9809_v37  ;;  %1739 = vst.msk [vmem:[%s14286_s16 + $0x130] sm:$0xff] %vm770_vm0, %v1572_v49  ;;  %12043 = vmatprep.subr.mxu0 %v9728_v60  ;;  %v9804_v49 = vld [vmem:[%s18078_s1 + $0x1b8] sm:$0xff] }
 0x1e6   : > { %9371 = vst.msk [vmem:[%s13690_s15 + $0x330] sm:$0xff] %vm770_vm0, %v2038_v3  ;;  %12171 = vmatprep.subr.mxu1 %v9808_v57  ;;  %v11361_v50 = vpop.f32.mrf.mxu0  ;;  %11824 = vmatmul.mubr.f32.gmra.mxu0 %v13987_v11 }
 0x1e7   : > { %v11489_v48 = vpop.f32.mrf.mxu1  ;;  %11952 = vmatmul.mubr.f32.gmra.mxu1 %v13987_v11  ;;  %1742 = vst.msk [vmem:[%s14286_s16 + $0x148] sm:$0xff] %vm770_vm0, %v11361_v50  ;;  %11826 = vmatprep.mubr.f32.mxu0 %v14002_v12 }
 0x1e8   : > { %9374 = vst.msk [vmem:[%s13690_s15 + $0x348] sm:$0xff] %vm770_vm0, %v11489_v48  ;;  %11954 = vmatprep.mubr.f32.mxu1 %v14002_v12  ;;  %v1582_v51 = vpop.f32.mrf.mxu0  ;;  %12044 = vmatpush3.msra.mxu0 %v9728_v60  ;;  %v9726_v12 = vld [vmem:[%s18080_s3 + $0x148] sm:$0xff] }
 0x1e9   : > { %v2048_v11 = vpop.f32.mrf.mxu1  ;;  %12172 = vmatpush3.msra.mxu1 %v9808_v57  ;;  %1741 = vst.msk [vmem:[%s14286_s16 + $0x140] sm:$0xff] %vm770_vm0, %v1582_v51  ;;  %12045 = vmatprep.subr.mxu0 %v9727_v4 }
 0x1ea   : > { %9373 = vst.msk [vmem:[%s13690_s15 + $0x340] sm:$0xff] %vm770_vm0, %v2048_v11  ;;  %12173 = vmatprep.subr.mxu1 %v9807_v56  ;;  %v11364_v58 = vpop.f32.mrf.mxu0  ;;  %11827 = vmatmul.mubr.f32.gmra.mxu0 %v14011_v19 }
 0x1eb   : > { %v11492_v18 = vpop.f32.mrf.mxu1  ;;  %11955 = vmatmul.mubr.f32.gmra.mxu1 %v14011_v19  ;;  %1744 = vst.msk [vmem:[%s14286_s16 + $0x158] sm:$0xff] %vm770_vm0, %v11364_v58  ;;  %11829 = vmatprep.mubr.f32.mxu0 %v14026_v9  ;;  %v9802_v58 = vld [vmem:[%s18078_s1 + $0x1a8] sm:$0xff] }
 0x1ec   : > { %9376 = vst.msk [vmem:[%s13690_s15 + $0x358] sm:$0xff] %vm770_vm0, %v11492_v18  ;;  %11957 = vmatprep.mubr.f32.mxu1 %v14026_v9  ;;  %v1592_v37 = vpop.f32.mrf.mxu0  ;;  %12046 = vmatpush3.msra.mxu0 %v9727_v4  ;;  %v9725_v9 = vld [vmem:[%s18080_s3 + $0x140] sm:$0xff]  ;;  %v9803_v4 = vld [vmem:[%s18078_s1 + $0x1b0] sm:$0xff] }
 0x1ed   : > { %v2058_v19 = vpop.f32.mrf.mxu1  ;;  %12174 = vmatpush3.msra.mxu1 %v9807_v56  ;;  %1743 = vst.msk [vmem:[%s14286_s16 + $0x150] sm:$0xff] %vm770_vm0, %v1592_v37  ;;  %12047 = vmatprep.subr.mxu0 %v9726_v12  ;;  %v9801_v37 = vld [vmem:[%s18078_s1 + $0x1a0] sm:$0xff] }
 0x1ee   : > { %9375 = vst.msk [vmem:[%s13690_s15 + $0x350] sm:$0xff] %vm770_vm0, %v2058_v19  ;;  %12175 = vmatprep.subr.mxu1 %v9806_v52  ;;  %v11367_v43 = vpop.f32.mrf.mxu0  ;;  %11830 = vmatmul.mubr.f32.gmra.mxu0 %v14035_v17 }
 0x1ef   : > { %v11495_v59 = vpop.f32.mrf.mxu1  ;;  %11958 = vmatmul.mubr.f32.gmra.mxu1 %v14035_v17  ;;  %1746 = vst.msk [vmem:[%s14286_s16 + $0x168] sm:$0xff] %vm770_vm0, %v11367_v43  ;;  %11832 = vmatprep.mubr.f32.mxu0 %v14050_v21 }
 0x1f0   : > { %9378 = vst.msk [vmem:[%s13690_s15 + $0x368] sm:$0xff] %vm770_vm0, %v11495_v59  ;;  %11960 = vmatprep.mubr.f32.mxu1 %v14050_v21  ;;  %v1602_v32 = vpop.f32.mrf.mxu0  ;;  %12048 = vmatpush3.msra.mxu0 %v9726_v12  ;;  %v9724_v21 = vld [vmem:[%s18080_s3 + $0x138] sm:$0xff] }
 0x1f1   : > { %v2068_v17 = vpop.f32.mrf.mxu1  ;;  %12176 = vmatpush3.msra.mxu1 %v9806_v52  ;;  %1745 = vst.msk [vmem:[%s14286_s16 + $0x160] sm:$0xff] %vm770_vm0, %v1602_v32  ;;  %12049 = vmatprep.subr.mxu0 %v9725_v9 }
 0x1f2   : > { %9377 = vst.msk [vmem:[%s13690_s15 + $0x360] sm:$0xff] %vm770_vm0, %v2068_v17  ;;  %12177 = vmatprep.subr.mxu1 %v9805_v27  ;;  %v11370_v60 = vpop.f32.mrf.mxu0  ;;  %11833 = vmatmul.mubr.f32.gmra.mxu0 %v14059_v30 }
 0x1f3   : > { %v11498_v57 = vpop.f32.mrf.mxu1  ;;  %11961 = vmatmul.mubr.f32.gmra.mxu1 %v14059_v30  ;;  %1748 = vst.msk [vmem:[%s14286_s16 + $0x178] sm:$0xff] %vm770_vm0, %v11370_v60  ;;  %11835 = vmatprep.mubr.f32.mxu0 %v14074_v39  ;;  %v9799_v60 = vld [vmem:[%s18078_s1 + $0x190] sm:$0xff] }
 0x1f4   : > { %9380 = vst.msk [vmem:[%s13690_s15 + $0x378] sm:$0xff] %vm770_vm0, %v11498_v57  ;;  %11963 = vmatprep.mubr.f32.mxu1 %v14074_v39  ;;  %v1612_v3 = vpop.f32.mrf.mxu0  ;;  %12050 = vmatpush3.msra.mxu0 %v9725_v9  ;;  %v9723_v39 = vld [vmem:[%s18080_s3 + $0x130] sm:$0xff]  ;;  %v9800_v9 = vld [vmem:[%s18078_s1 + $0x198] sm:$0xff] }
 0x1f5   : > { %v2078_v30 = vpop.f32.mrf.mxu1  ;;  %12178 = vmatpush3.msra.mxu1 %v9805_v27  ;;  %1747 = vst.msk [vmem:[%s14286_s16 + $0x170] sm:$0xff] %vm770_vm0, %v1612_v3  ;;  %12051 = vmatprep.subr.mxu0 %v9724_v21  ;;  %v9798_v3 = vld [vmem:[%s18078_s1 + $0x188] sm:$0xff] }
 0x1f6   : > { %9379 = vst.msk [vmem:[%s13690_s15 + $0x370] sm:$0xff] %vm770_vm0, %v2078_v30  ;;  %12179 = vmatprep.subr.mxu1 %v9804_v49  ;;  %v11373_v50 = vpop.f32.mrf.mxu0  ;;  %11836 = vmatmul.mubr.f32.gmra.mxu0 %v14083_v47 }
 0x1f7   : > { %v11501_v48 = vpop.f32.mrf.mxu1  ;;  %11964 = vmatmul.mubr.f32.gmra.mxu1 %v14083_v47  ;;  %1750 = vst.msk [vmem:[%s14286_s16 + $0x188] sm:$0xff] %vm770_vm0, %v11373_v50  ;;  %11838 = vmatprep.mubr.f32.mxu0 %v14098_v22 }
 0x1f8   : > { %9382 = vst.msk [vmem:[%s13690_s15 + $0x388] sm:$0xff] %vm770_vm0, %v11501_v48  ;;  %11966 = vmatprep.mubr.f32.mxu1 %v14098_v22  ;;  %v1622_v56 = vpop.f32.mrf.mxu0  ;;  %12052 = vmatpush3.msra.mxu0 %v9724_v21  ;;  %v9722_v22 = vld [vmem:[%s18080_s3 + $0x128] sm:$0xff] }
 0x1f9   : > { %v2088_v47 = vpop.f32.mrf.mxu1  ;;  %12180 = vmatpush3.msra.mxu1 %v9804_v49  ;;  %1749 = vst.msk [vmem:[%s14286_s16 + $0x180] sm:$0xff] %vm770_vm0, %v1622_v56  ;;  %12053 = vmatprep.subr.mxu0 %v9723_v39 }
 0x1fa   : > { %9381 = vst.msk [vmem:[%s13690_s15 + $0x380] sm:$0xff] %vm770_vm0, %v2088_v47  ;;  %12181 = vmatprep.subr.mxu1 %v9803_v4  ;;  %v11376_v51 = vpop.f32.mrf.mxu0  ;;  %11839 = vmatmul.mubr.f32.gmra.mxu0 %v14107_v41 }
 0x1fb   : > { %v11504_v11 = vpop.f32.mrf.mxu1  ;;  %11967 = vmatmul.mubr.f32.gmra.mxu1 %v14107_v41  ;;  %1752 = vst.msk [vmem:[%s14286_s16 + $0x198] sm:$0xff] %vm770_vm0, %v11376_v51  ;;  %11841 = vmatprep.mubr.f32.mxu0 %v14122_v45  ;;  %v14850_v51 = vld [vmem:[%s18080_s3 + $0x1f8] sm:$0xff] }
 0x1fc   : > { %9384 = vst.msk [vmem:[%s13690_s15 + $0x398] sm:$0xff] %vm770_vm0, %v11504_v11  ;;  %11969 = vmatprep.mubr.f32.mxu1 %v14122_v45  ;;  %v1632_v18 = vpop.f32.mrf.mxu0  ;;  %12054 = vmatpush3.msra.mxu0 %v9723_v39  ;;  %v9721_v45 = vld [vmem:[%s18080_s3 + $0x120] sm:$0xff] }
 0x1fd   : > { %v2098_v41 = vpop.f32.mrf.mxu1  ;;  %12182 = vmatpush3.msra.mxu1 %v9803_v4  ;;  %1751 = vst.msk [vmem:[%s14286_s16 + $0x190] sm:$0xff] %vm770_vm0, %v1632_v18  ;;  %12055 = vmatprep.subr.mxu0 %v9722_v22  ;;  %v9797_v39 = vld [vmem:[%s18078_s1 + $0x180] sm:$0xff] }
 0x1fe   : > { %9383 = vst.msk [vmem:[%s13690_s15 + $0x390] sm:$0xff] %vm770_vm0, %v2098_v41  ;;  %12183 = vmatprep.subr.mxu1 %v9802_v58  ;;  %v11379_v12 = vpop.f32.mrf.mxu0  ;;  %11842 = vmatmul.mubr.f32.gmra.mxu0 %v14131_v0 }
 0x1ff   : > { %v11507_v52 = vpop.f32.mrf.mxu1  ;;  %11970 = vmatmul.mubr.f32.gmra.mxu1 %v14131_v0  ;;  %1754 = vst.msk [vmem:[%s14286_s16 + $0x1a8] sm:$0xff] %vm770_vm0, %v11379_v12  ;;  %11844 = vmatprep.mubr.f32.mxu0 %v14146_v7 }
 0x200   : > { %9386 = vst.msk [vmem:[%s13690_s15 + $0x3a8] sm:$0xff] %vm770_vm0, %v11507_v52  ;;  %11972 = vmatprep.mubr.f32.mxu1 %v14146_v7  ;;  %v1642_v19 = vpop.f32.mrf.mxu0  ;;  %12056 = vmatpush3.msra.mxu0 %v9722_v22  ;;  %v9720_v7 = vld [vmem:[%s18080_s3 + $0x118] sm:$0xff] }
 0x201   : > { %v2108_v0 = vpop.f32.mrf.mxu1  ;;  %12184 = vmatpush3.msra.mxu1 %v9802_v58  ;;  %1753 = vst.msk [vmem:[%s14286_s16 + $0x1a0] sm:$0xff] %vm770_vm0, %v1642_v19  ;;  %12057 = vmatprep.subr.mxu0 %v9721_v45 }
 0x202   : > { %9385 = vst.msk [vmem:[%s13690_s15 + $0x3a0] sm:$0xff] %vm770_vm0, %v2108_v0  ;;  %12185 = vmatprep.subr.mxu1 %v9801_v37  ;;  %v11382_v43 = vpop.f32.mrf.mxu0  ;;  %11845 = vmatmul.mubr.f32.gmra.mxu0 %v14155_v62 }
 0x203   : > { %v11510_v59 = vpop.f32.mrf.mxu1  ;;  %11973 = vmatmul.mubr.f32.gmra.mxu1 %v14155_v62  ;;  %1756 = vst.msk [vmem:[%s14286_s16 + $0x1b8] sm:$0xff] %vm770_vm0, %v11382_v43  ;;  %11847 = vmatprep.mubr.f32.mxu0 %v14170_v2 }
 0x204   : > { %9388 = vst.msk [vmem:[%s13690_s15 + $0x3b8] sm:$0xff] %vm770_vm0, %v11510_v59  ;;  %11975 = vmatprep.mubr.f32.mxu1 %v14170_v2  ;;  %v1652_v27 = vpop.f32.mrf.mxu0  ;;  %12058 = vmatpush3.msra.mxu0 %v9721_v45  ;;  %v9719_v2 = vld [vmem:[%s18080_s3 + $0x110] sm:$0xff] }
 0x205   : > { %v2118_v62 = vpop.f32.mrf.mxu1  ;;  %12186 = vmatpush3.msra.mxu1 %v9801_v37  ;;  %1755 = vst.msk [vmem:[%s14286_s16 + $0x1b0] sm:$0xff] %vm770_vm0, %v1652_v27  ;;  %12059 = vmatprep.subr.mxu0 %v9720_v7 }
 0x206   : > { %9387 = vst.msk [vmem:[%s13690_s15 + $0x3b0] sm:$0xff] %vm770_vm0, %v2118_v62  ;;  %12187 = vmatprep.subr.mxu1 %v9800_v9  ;;  %v11385_v32 = vpop.f32.mrf.mxu0  ;;  %11848 = vmatmul.mubr.f32.gmra.mxu0 %v14179_v10 }
 0x207   : > { %v11513_v17 = vpop.f32.mrf.mxu1  ;;  %11976 = vmatmul.mubr.f32.gmra.mxu1 %v14179_v10  ;;  %1758 = vst.msk [vmem:[%s14286_s16 + $0x1c8] sm:$0xff] %vm770_vm0, %v11385_v32  ;;  %11850 = vmatprep.mubr.f32.mxu0 %v14194_v24 }
 0x208   : > { %9390 = vst.msk [vmem:[%s13690_s15 + $0x3c8] sm:$0xff] %vm770_vm0, %v11513_v17  ;;  %11978 = vmatprep.mubr.f32.mxu1 %v14194_v24  ;;  %v1662_v57 = vpop.f32.mrf.mxu0  ;;  %12060 = vmatpush3.msra.mxu0 %v9720_v7  ;;  %v9718_v24 = vld [vmem:[%s18080_s3 + $0x108] sm:$0xff] }
 0x209   : > { %v2128_v10 = vpop.f32.mrf.mxu1  ;;  %12188 = vmatpush3.msra.mxu1 %v9800_v9  ;;  %1757 = vst.msk [vmem:[%s14286_s16 + $0x1c0] sm:$0xff] %vm770_vm0, %v1662_v57  ;;  %12061 = vmatprep.subr.mxu0 %v9719_v2 }
 0x20a   : > { %9389 = vst.msk [vmem:[%s13690_s15 + $0x3c0] sm:$0xff] %vm770_vm0, %v2128_v10  ;;  %12189 = vmatprep.subr.mxu1 %v9799_v60  ;;  %v11388_v21 = vpop.f32.mrf.mxu0  ;;  %11851 = vmatmul.mubr.f32.gmra.mxu0 %v14203_v29 }
 0x20b   : > { %v11516_v49 = vpop.f32.mrf.mxu1  ;;  %11979 = vmatmul.mubr.f32.gmra.mxu1 %v14203_v29  ;;  %1760 = vst.msk [vmem:[%s14286_s16 + $0x1d8] sm:$0xff] %vm770_vm0, %v11388_v21  ;;  %11853 = vmatprep.mubr.f32.mxu0 %v14218_v23 }
 0x20c   : > { %9392 = vst.msk [vmem:[%s13690_s15 + $0x3d8] sm:$0xff] %vm770_vm0, %v11516_v49  ;;  %11981 = vmatprep.mubr.f32.mxu1 %v14218_v23  ;;  %v1672_v30 = vpop.f32.mrf.mxu0  ;;  %12062 = vmatpush3.msra.mxu0 %v9719_v2  ;;  %v9717_v23 = vld [vmem:[%s18080_s3 + $0x100] sm:$0xff] }
 0x20d   : > { %v2138_v29 = vpop.f32.mrf.mxu1  ;;  %12190 = vmatpush3.msra.mxu1 %v9799_v60  ;;  %1759 = vst.msk [vmem:[%s14286_s16 + $0x1d0] sm:$0xff] %vm770_vm0, %v1672_v30  ;;  %12063 = vmatprep.subr.mxu0 %v9718_v24  ;;  %v18147_v30 = vld [vmem:[#allocation12_spill] sm:$0xff] }
 0x20e   : > { %9391 = vst.msk [vmem:[%s13690_s15 + $0x3d0] sm:$0xff] %vm770_vm0, %v2138_v29  ;;  %12191 = vmatprep.subr.mxu1 %v9798_v3  ;;  %v11391_v50 = vpop.f32.mrf.mxu0  ;;  %11854 = vmatmul.mubr.f32.gmra.mxu0 %v14227_v36 }
 0x20f   : > { %v11519_v48 = vpop.f32.mrf.mxu1  ;;  %11982 = vmatmul.mubr.f32.gmra.mxu1 %v14227_v36  ;;  %1762 = vst.msk [vmem:[%s14286_s16 + $0x1e8] sm:$0xff] %vm770_vm0, %v11391_v50  ;;  %11856 = vmatprep.mubr.f32.mxu0 %v14242_v38 }
 0x210   : > { %9394 = vst.msk [vmem:[%s13690_s15 + $0x3e8] sm:$0xff] %vm770_vm0, %v11519_v48  ;;  %11984 = vmatprep.mubr.f32.mxu1 %v14242_v38  ;;  %v1682_v4 = vpop.f32.mrf.mxu0  ;;  %12064 = vmatpush3.msra.mxu0 %v9718_v24  ;;  %v14845_v38 = vld [vmem:[%s18079_s2 + $0x1f8] sm:$0xff] }
 0x211   : > { %v2148_v36 = vpop.f32.mrf.mxu1  ;;  %12192 = vmatpush3.msra.mxu1 %v9798_v3  ;;  %1761 = vst.msk [vmem:[%s14286_s16 + $0x1e0] sm:$0xff] %vm770_vm0, %v1682_v4  ;;  %12065 = vmatprep.subr.mxu0 %v9717_v23  ;;  %v18149_v4 = vld [vmem:[#allocation14_spill] sm:$0xff] }
 0x212   : > { %9393 = vst.msk [vmem:[%s13690_s15 + $0x3e0] sm:$0xff] %vm770_vm0, %v2148_v36  ;;  %12193 = vmatprep.subr.mxu1 %v9797_v39  ;;  %v11394_v56 = vpop.f32.mrf.mxu0  ;;  %11857 = vmatmul.mubr.f32.gmra.mxu0 %v14251_v63 }
 0x213   : > { %v11522_v47 = vpop.f32.mrf.mxu1  ;;  %11985 = vmatmul.mubr.f32.gmra.mxu1 %v14251_v63  ;;  %1764 = vst.msk [vmem:[%s14286_s16 + $0x1f8] sm:$0xff] %vm770_vm0, %v11394_v56  ;;  %11859 = vmatprep.mubr.f32.mxu0 %v14270_v53 }
 0x214   : > { %9396 = vst.msk [vmem:[%s13690_s15 + $0x3f8] sm:$0xff] %vm770_vm0, %v11522_v47  ;;  %11987 = vmatprep.mubr.f32.mxu1 %v14270_v53  ;;  %v1692_v63 = vpop.f32.mrf.mxu0  ;;  %12066 = vmatpush3.msra.mxu0 %v9717_v23 }
 0x215   : > { %v2158_v11 = vpop.f32.mrf.mxu1  ;;  %12194 = vmatpush3.msra.mxu1 %v9797_v39  ;;  %1763 = vst.msk [vmem:[%s14286_s16 + $0x1f0] sm:$0xff] %vm770_vm0, %v1692_v63  ;;  %12291 = vmatprep.subr.mxu0 %v14845_v38  ;;  %v18148_v39 = vld [vmem:[#allocation13_spill] sm:$0xff] }
 0x216   : > { %9395 = vst.msk [vmem:[%s13690_s15 + $0x3f0] sm:$0xff] %vm770_vm0, %v2158_v11  ;;  %12419 = vmatprep.subr.mxu1 %v14850_v51  ;;  %v11557_v22 = vpop.f32.mrf.mxu0  ;;  %11860 = vmatmul.mubr.f32.gmra.mxu0 %v14281_v61  ;;  %v18150_v11 = vld [vmem:[#allocation15_spill] sm:$0xff] }
 0x217   : > { %v11685_v58 = vpop.f32.mrf.mxu1  ;;  %11988 = vmatmul.mubr.f32.gmra.mxu1 %v14281_v61  ;;  %9414 = vst.msk [vmem:[%s13695_s30 + $0x208] sm:$0xff] %vm770_vm0, %v11557_v22  ;;  %11862 = vmatprep.mubr.f32.mxu0 %v14293_v15  ;;  %v18151_v22 = vld [vmem:[#allocation16_spill] sm:$0xff] }
 0x218   : > { %9494 = vst.msk [vmem:[%s14286_s16 + $0x208] sm:$0xff] %vm770_vm0, %v11685_v58  ;;  %11990 = vmatprep.mubr.f32.mxu1 %v14293_v15  ;;  %v2315_v53 = vpop.f32.mrf.mxu0 }
 0x219   : > { %v2782_v18 = vpop.f32.mrf.mxu1  ;;  %9413 = vst.msk [vmem:[%s13695_s30 + $0x200] sm:$0xff] %vm770_vm0, %v2315_v53 }
 0x21a   : > { %9493 = vst.msk [vmem:[%s14286_s16 + $0x200] sm:$0xff] %vm770_vm0, %v2782_v18  ;;  %v11560_v41 = vpop.f32.mrf.mxu0  ;;  %11863 = vmatmul.mubr.f32.gmra.mxu0 %v14302_v20 }
 0x21b   : > { %v11688_v12 = vpop.f32.mrf.mxu1  ;;  %11991 = vmatmul.mubr.f32.gmra.mxu1 %v14302_v20  ;;  %9416 = vst.msk [vmem:[%s13695_s30 + $0x218] sm:$0xff] %vm770_vm0, %v11560_v41  ;;  %11865 = vmatprep.mubr.f32.mxu0 %v14311_v13 }
 0x21c   : > { %9496 = vst.msk [vmem:[%s14286_s16 + $0x218] sm:$0xff] %vm770_vm0, %v11688_v12  ;;  %11993 = vmatprep.mubr.f32.mxu1 %v14311_v13  ;;  %v2325_v61 = vpop.f32.mrf.mxu0  ;;  %v18152_v12 = vld [vmem:[#allocation17_spill] sm:$0xff] }
 0x21d   : > { %v2792_v15 = vpop.f32.mrf.mxu1  ;;  %9415 = vst.msk [vmem:[%s13695_s30 + $0x210] sm:$0xff] %vm770_vm0, %v2325_v61 }
 0x21e   : > { %9495 = vst.msk [vmem:[%s14286_s16 + $0x210] sm:$0xff] %vm770_vm0, %v2792_v15  ;;  %v11563_v52 = vpop.f32.mrf.mxu0  ;;  %11866 = vmatmul.mubr.f32.gmra.mxu0 %v14320_v31 }
 0x21f   : > { %v11691_v45 = vpop.f32.mrf.mxu1  ;;  %11994 = vmatmul.mubr.f32.gmra.mxu1 %v14320_v31  ;;  %9418 = vst.msk [vmem:[%s13695_s30 + $0x228] sm:$0xff] %vm770_vm0, %v11563_v52  ;;  %11868 = vmatprep.mubr.f32.mxu0 %v14329_v35 }
 0x220   : > { %9498 = vst.msk [vmem:[%s14286_s16 + $0x228] sm:$0xff] %vm770_vm0, %v11691_v45  ;;  %11996 = vmatprep.mubr.f32.mxu1 %v14329_v35  ;;  %v2335_v20 = vpop.f32.mrf.mxu0 }
 0x221   : > { %v2802_v13 = vpop.f32.mrf.mxu1  ;;  %9417 = vst.msk [vmem:[%s13695_s30 + $0x220] sm:$0xff] %vm770_vm0, %v2335_v20 }
 0x222   : > { %9497 = vst.msk [vmem:[%s14286_s16 + $0x220] sm:$0xff] %vm770_vm0, %v2802_v13  ;;  %v11566_v37 = vpop.f32.mrf.mxu0  ;;  %11869 = vmatmul.mubr.f32.gmra.mxu0 %v14338_v33 }
 0x223   : > { %v11694_v19 = vpop.f32.mrf.mxu1  ;;  %11997 = vmatmul.mubr.f32.gmra.mxu1 %v14338_v33  ;;  %9420 = vst.msk [vmem:[%s13695_s30 + $0x238] sm:$0xff] %vm770_vm0, %v11566_v37  ;;  %11871 = vmatprep.mubr.f32.mxu0 %v14347_v25 }
 0x224   : > { %9500 = vst.msk [vmem:[%s14286_s16 + $0x238] sm:$0xff] %vm770_vm0, %v11694_v19  ;;  %11999 = vmatprep.mubr.f32.mxu1 %v14347_v25  ;;  %v2345_v31 = vpop.f32.mrf.mxu0  ;;  %v15060_v19 = vld [vmem:[%s12984_s9 + $0x8] sm:$0xff] }
 0x225   : > { %v2812_v35 = vpop.f32.mrf.mxu1  ;;  %9419 = vst.msk [vmem:[%s13695_s30 + $0x230] sm:$0xff] %vm770_vm0, %v2345_v31  ;;  %v9891_v31 = vld [vmem:[%s18079_s2 + $0x1f0] sm:$0xff] }
 0x226   : > { %9499 = vst.msk [vmem:[%s14286_s16 + $0x230] sm:$0xff] %vm770_vm0, %v2812_v35  ;;  %v11569_v0 = vpop.f32.mrf.mxu0  ;;  %11872 = vmatmul.mubr.f32.gmra.mxu0 %v14356_v46  ;;  %v9971_v35 = vld [vmem:[%s18080_s3 + $0x1f0] sm:$0xff] }
 0x227   : > { %v11697_v43 = vpop.f32.mrf.mxu1  ;;  %12000 = vmatmul.mubr.f32.gmra.mxu1 %v14356_v46  ;;  %9422 = vst.msk [vmem:[%s13695_s30 + $0x248] sm:$0xff] %vm770_vm0, %v11569_v0  ;;  %11874 = vmatprep.mubr.f32.mxu0 %v14365_v54 }
 0x228   : > { %9502 = vst.msk [vmem:[%s14286_s16 + $0x248] sm:$0xff] %vm770_vm0, %v11697_v43  ;;  %12002 = vmatprep.mubr.f32.mxu1 %v14365_v54  ;;  %v2355_v33 = vpop.f32.mrf.mxu0 }
 0x229   : > { %v2822_v25 = vpop.f32.mrf.mxu1  ;;  %9421 = vst.msk [vmem:[%s13695_s30 + $0x240] sm:$0xff] %vm770_vm0, %v2355_v33  ;;  %v15077_v33 = vld [vmem:[%s12984_s9 + $0x10] sm:$0xff] }
 0x22a   : > { %9501 = vst.msk [vmem:[%s14286_s16 + $0x240] sm:$0xff] %vm770_vm0, %v2822_v25  ;;  %v11572_v59 = vpop.f32.mrf.mxu0  ;;  %11875 = vmatmul.mubr.f32.gmra.mxu0 %v14374_v16  ;;  %v15086_v25 = vld [vmem:[%s12984_s9 + $0x18] sm:$0xff] }
 0x22b   : > { %v11700_v7 = vpop.f32.mrf.mxu1  ;;  %12003 = vmatmul.mubr.f32.gmra.mxu1 %v14374_v16  ;;  %9424 = vst.msk [vmem:[%s13695_s30 + $0x258] sm:$0xff] %vm770_vm0, %v11572_v59  ;;  %11877 = vmatprep.mubr.f32.mxu0 %v14383_v5  ;;  %v9890_v59 = vld [vmem:[%s18079_s2 + $0x1e8] sm:$0xff] }
 0x22c   : > { %9504 = vst.msk [vmem:[%s14286_s16 + $0x258] sm:$0xff] %vm770_vm0, %v11700_v7  ;;  %12005 = vmatprep.mubr.f32.mxu1 %v14383_v5  ;;  %v2365_v46 = vpop.f32.mrf.mxu0  ;;  %v9970_v7 = vld [vmem:[%s18080_s3 + $0x1e8] sm:$0xff] }
 0x22d   : > { %v2832_v54 = vpop.f32.mrf.mxu1  ;;  %9423 = vst.msk [vmem:[%s13695_s30 + $0x250] sm:$0xff] %vm770_vm0, %v2365_v46  ;;  %v15101_v46 = vld [vmem:[%s12984_s9 + $0x20] sm:$0xff] }
 0x22e   : > { %9503 = vst.msk [vmem:[%s14286_s16 + $0x250] sm:$0xff] %vm770_vm0, %v2832_v54  ;;  %v11575_v9 = vpop.f32.mrf.mxu0  ;;  %11878 = vmatmul.mubr.f32.gmra.mxu0 %v14392_v28 }
 0x22f   : > { %v11703_v27 = vpop.f32.mrf.mxu1  ;;  %12006 = vmatmul.mubr.f32.gmra.mxu1 %v14392_v28  ;;  %9426 = vst.msk [vmem:[%s13695_s30 + $0x268] sm:$0xff] %vm770_vm0, %v11575_v9  ;;  %11880 = vmatprep.mubr.f32.mxu0 %v14401_v40 }
 0x230   : > { %9506 = vst.msk [vmem:[%s14286_s16 + $0x268] sm:$0xff] %vm770_vm0, %v11703_v27  ;;  %12008 = vmatprep.mubr.f32.mxu1 %v14401_v40  ;;  %v2375_v16 = vpop.f32.mrf.mxu0 }
 0x231   : > { %v2842_v5 = vpop.f32.mrf.mxu1  ;;  %9425 = vst.msk [vmem:[%s13695_s30 + $0x260] sm:$0xff] %vm770_vm0, %v2375_v16 }
 0x232   : > { %9505 = vst.msk [vmem:[%s14286_s16 + $0x260] sm:$0xff] %vm770_vm0, %v2842_v5  ;;  %v11578_v62 = vpop.f32.mrf.mxu0  ;;  %11881 = vmatmul.mubr.f32.gmra.mxu0 %v14410_v55  ;;  %v15110_v5 = vld [vmem:[%s12984_s9 + $0x28] sm:$0xff] }
 0x233   : > { %v11706_v32 = vpop.f32.mrf.mxu1  ;;  %12009 = vmatmul.mubr.f32.gmra.mxu1 %v14410_v55  ;;  %9428 = vst.msk [vmem:[%s13695_s30 + $0x278] sm:$0xff] %vm770_vm0, %v11578_v62  ;;  %11883 = vmatprep.mubr.f32.mxu0 %v14419_v42  ;;  %v9889_v62 = vld [vmem:[%s18079_s2 + $0x1e0] sm:$0xff] }
 0x234   : > { %9508 = vst.msk [vmem:[%s14286_s16 + $0x278] sm:$0xff] %vm770_vm0, %v11706_v32  ;;  %12011 = vmatprep.mubr.f32.mxu1 %v14419_v42  ;;  %v2385_v28 = vpop.f32.mrf.mxu0  ;;  %v9969_v32 = vld [vmem:[%s18080_s3 + $0x1e0] sm:$0xff] }
 0x235   : > { %v2852_v40 = vpop.f32.mrf.mxu1  ;;  %9427 = vst.msk [vmem:[%s13695_s30 + $0x270] sm:$0xff] %vm770_vm0, %v2385_v28  ;;  %v15125_v28 = vld [vmem:[%s12984_s9 + $0x30] sm:$0xff] }
 0x236   : > { %9507 = vst.msk [vmem:[%s14286_s16 + $0x270] sm:$0xff] %vm770_vm0, %v2852_v40  ;;  %v11581_v17 = vpop.f32.mrf.mxu0  ;;  %11884 = vmatmul.mubr.f32.gmra.mxu0 %v14428_v1 }
 0x237   : > { %v11709_v2 = vpop.f32.mrf.mxu1  ;;  %12012 = vmatmul.mubr.f32.gmra.mxu1 %v14428_v1  ;;  %9430 = vst.msk [vmem:[%s13695_s30 + $0x288] sm:$0xff] %vm770_vm0, %v11581_v17  ;;  %11886 = vmatprep.mubr.f32.mxu0 %v14437_v6 }
 0x238   : > { %9510 = vst.msk [vmem:[%s14286_s16 + $0x288] sm:$0xff] %vm770_vm0, %v11709_v2  ;;  %12014 = vmatprep.mubr.f32.mxu1 %v14437_v6  ;;  %v2395_v55 = vpop.f32.mrf.mxu0 }
 0x239   : > { %v2862_v42 = vpop.f32.mrf.mxu1  ;;  %9429 = vst.msk [vmem:[%s13695_s30 + $0x280] sm:$0xff] %vm770_vm0, %v2395_v55 }
 0x23a   : > { %9509 = vst.msk [vmem:[%s14286_s16 + $0x280] sm:$0xff] %vm770_vm0, %v2862_v42  ;;  %v11584_v60 = vpop.f32.mrf.mxu0  ;;  %11887 = vmatmul.mubr.f32.gmra.mxu0 %v14446_v34  ;;  %v15134_v42 = vld [vmem:[%s12984_s9 + $0x38] sm:$0xff] }
 0x23b   : > { %v11712_v57 = vpop.f32.mrf.mxu1  ;;  %12015 = vmatmul.mubr.f32.gmra.mxu1 %v14446_v34  ;;  %9432 = vst.msk [vmem:[%s13695_s30 + $0x298] sm:$0xff] %vm770_vm0, %v11584_v60  ;;  %11889 = vmatprep.mubr.f32.mxu0 %v14455_v44  ;;  %v18145_v34 = vld [vmem:[#allocation10_spill] sm:$0xff]  ;;  %v9888_v60 = vld [vmem:[%s18079_s2 + $0x1d8] sm:$0xff] }
 0x23c   : > { %9512 = vst.msk [vmem:[%s14286_s16 + $0x298] sm:$0xff] %vm770_vm0, %v11712_v57  ;;  %12017 = vmatprep.mubr.f32.mxu1 %v14455_v44  ;;  %v2405_v1 = vpop.f32.mrf.mxu0  ;;  %v9968_v57 = vld [vmem:[%s18080_s3 + $0x1d8] sm:$0xff] }
 0x23d   : > { %v2872_v6 = vpop.f32.mrf.mxu1  ;;  %9431 = vst.msk [vmem:[%s13695_s30 + $0x290] sm:$0xff] %vm770_vm0, %v2405_v1  ;;  %v15149_v1 = vld [vmem:[%s12984_s9 + $0x40] sm:$0xff] }
 0x23e   : > { %9511 = vst.msk [vmem:[%s14286_s16 + $0x290] sm:$0xff] %vm770_vm0, %v2872_v6  ;;  %v11587_v10 = vpop.f32.mrf.mxu0  ;;  %11890 = vmatmul.mubr.f32.gmra.mxu0 %v14464_v8 }
 0x23f   : > { %v11715_v21 = vpop.f32.mrf.mxu1  ;;  %12018 = vmatmul.mubr.f32.gmra.mxu1 %v14464_v8  ;;  %9434 = vst.msk [vmem:[%s13695_s30 + $0x2a8] sm:$0xff] %vm770_vm0, %v11587_v10  ;;  %11892 = vmatprep.mubr.f32.mxu0 %v18145_v34  ;;  %v18146_v8 = vld [vmem:[#allocation11_spill] sm:$0xff] }
 0x240   : > { %9514 = vst.msk [vmem:[%s14286_s16 + $0x2a8] sm:$0xff] %vm770_vm0, %v11715_v21  ;;  %12020 = vmatprep.mubr.f32.mxu1 %v18145_v34  ;;  %v2415_v44 = vpop.f32.mrf.mxu0 }
 0x241   : > { %v2882_v49 = vpop.f32.mrf.mxu1  ;;  %9433 = vst.msk [vmem:[%s13695_s30 + $0x2a0] sm:$0xff] %vm770_vm0, %v2415_v44  ;;  %v15158_v44 = vld [vmem:[%s12984_s9 + $0x48] sm:$0xff] }
 0x242   : > { %9513 = vst.msk [vmem:[%s14286_s16 + $0x2a0] sm:$0xff] %vm770_vm0, %v2882_v49  ;;  %v11590_v24 = vpop.f32.mrf.mxu0  ;;  %11893 = vmatmul.mubr.f32.gmra.mxu0 %v18146_v8  ;;  %v9887_v49 = vld [vmem:[%s18079_s2 + $0x1d0] sm:$0xff] }
 0x243   : > { %v11718_v3 = vpop.f32.mrf.mxu1  ;;  %12021 = vmatmul.mubr.f32.gmra.mxu1 %v18146_v8  ;;  %9436 = vst.msk [vmem:[%s13695_s30 + $0x2b8] sm:$0xff] %vm770_vm0, %v11590_v24  ;;  %11895 = vmatprep.mubr.f32.mxu0 %v18147_v30  ;;  %v9967_v24 = vld [vmem:[%s18080_s3 + $0x1d0] sm:$0xff] }
 0x244   : > { %9516 = vst.msk [vmem:[%s14286_s16 + $0x2b8] sm:$0xff] %vm770_vm0, %v11718_v3  ;;  %12023 = vmatprep.mubr.f32.mxu1 %v18147_v30  ;;  %v2425_v29 = vpop.f32.mrf.mxu0  ;;  %v15173_v3 = vld [vmem:[%s12984_s9 + $0x50] sm:$0xff] }
 0x245   : > { %v2892_v50 = vpop.f32.mrf.mxu1  ;;  %9435 = vst.msk [vmem:[%s13695_s30 + $0x2b0] sm:$0xff] %vm770_vm0, %v2425_v29 }
 0x246   : > { %9515 = vst.msk [vmem:[%s14286_s16 + $0x2b0] sm:$0xff] %vm770_vm0, %v2892_v50  ;;  %v11593_v48 = vpop.f32.mrf.mxu0  ;;  %11896 = vmatmul.mubr.f32.gmra.mxu0 %v18148_v39 }
 0x247   : > { %v11721_v23 = vpop.f32.mrf.mxu1  ;;  %12024 = vmatmul.mubr.f32.gmra.mxu1 %v18148_v39  ;;  %9438 = vst.msk [vmem:[%s13695_s30 + $0x2c8] sm:$0xff] %vm770_vm0, %v11593_v48  ;;  %11898 = vmatprep.mubr.f32.mxu0 %v18149_v4  ;;  %v15182_v48 = vld [vmem:[%s12984_s9 + $0x58] sm:$0xff]  ;;  %v9966_v39 = vld [vmem:[%s18080_s3 + $0x1c8] sm:$0xff] }
 0x248   : > { %9518 = vst.msk [vmem:[%s14286_s16 + $0x2c8] sm:$0xff] %vm770_vm0, %v11721_v23  ;;  %12026 = vmatprep.mubr.f32.mxu1 %v18149_v4  ;;  %v2435_v36 = vpop.f32.mrf.mxu0  ;;  %v9886_v23 = vld [vmem:[%s18079_s2 + $0x1c8] sm:$0xff]  ;;  %v15197_v4 = vld [vmem:[%s12984_s9 + $0x60] sm:$0xff] }
 0x249   : > { %v2902_v56 = vpop.f32.mrf.mxu1  ;;  %9437 = vst.msk [vmem:[%s13695_s30 + $0x2c0] sm:$0xff] %vm770_vm0, %v2435_v36 }
 0x24a   : > { %9517 = vst.msk [vmem:[%s14286_s16 + $0x2c0] sm:$0xff] %vm770_vm0, %v2902_v56  ;;  %v11596_v47 = vpop.f32.mrf.mxu0  ;;  %11899 = vmatmul.mubr.f32.gmra.mxu0 %v18150_v11 }
 0x24b   : > { %v11724_v63 = vpop.f32.mrf.mxu1  ;;  %12027 = vmatmul.mubr.f32.gmra.mxu1 %v18150_v11  ;;  %9440 = vst.msk [vmem:[%s13695_s30 + $0x2d8] sm:$0xff] %vm770_vm0, %v11596_v47  ;;  %11901 = vmatprep.mubr.f32.mxu0 %v18151_v22  ;;  %v15206_v11 = vld [vmem:[%s12984_s9 + $0x68] sm:$0xff] }
 0x24c   : > { %9520 = vst.msk [vmem:[%s14286_s16 + $0x2d8] sm:$0xff] %vm770_vm0, %v11724_v63  ;;  %12029 = vmatprep.mubr.f32.mxu1 %v18151_v22  ;;  %v2445_v58 = vpop.f32.mrf.mxu0  ;;  %v9885_v22 = vld [vmem:[%s18079_s2 + $0x1c0] sm:$0xff] }
 0x24d   : > { %v2912_v53 = vpop.f32.mrf.mxu1  ;;  %9439 = vst.msk [vmem:[%s13695_s30 + $0x2d0] sm:$0xff] %vm770_vm0, %v2445_v58  ;;  %v9965_v58 = vld [vmem:[%s18080_s3 + $0x1c0] sm:$0xff] }
 0x24e   : > { %9519 = vst.msk [vmem:[%s14286_s16 + $0x2d0] sm:$0xff] %vm770_vm0, %v2912_v53  ;;  %v11599_v18 = vpop.f32.mrf.mxu0  ;;  %11902 = vmatmul.mubr.f32.gmra.mxu0 %v18152_v12  ;;  %v15221_v53 = vld [vmem:[%s12984_s9 + $0x70] sm:$0xff] }
 0x24f   : > { %v11727_v41 = vpop.f32.mrf.mxu1  ;;  %12030 = vmatmul.mubr.f32.gmra.mxu1 %v18152_v12  ;;  %9442 = vst.msk [vmem:[%s13695_s30 + $0x2e8] sm:$0xff] %vm770_vm0, %v11599_v18  ;;  %11904 = vmatprep.mubr.f32.mxu0 %v14545_v26 }
 0x250   : > { %9522 = vst.msk [vmem:[%s14286_s16 + $0x2e8] sm:$0xff] %vm770_vm0, %v11727_v41  ;;  %12032 = vmatprep.mubr.f32.mxu1 %v14545_v26  ;;  %v2455_v61 = vpop.f32.mrf.mxu0  ;;  %v15051_v26 = vld [vmem:[%s12984_s9] sm:$0xff] }
 0x251   : > { %v2922_v15 = vpop.f32.mrf.mxu1  ;;  %9441 = vst.msk [vmem:[%s13695_s30 + $0x2e0] sm:$0xff] %vm770_vm0, %v2455_v61 }
 0x252   : > { %9521 = vst.msk [vmem:[%s14286_s16 + $0x2e0] sm:$0xff] %vm770_vm0, %v2922_v15  ;;  %v11602_v52 = vpop.f32.mrf.mxu0  ;;  %11905 = vmatmul.mubr.f32.gmra.mxu0 %v14554_v14  ;;  %v15230_v15 = vld [vmem:[%s12984_s9 + $0x78] sm:$0xff] }
 0x253   : > { %v11730_v45 = vpop.f32.mrf.mxu1  ;;  %12033 = vmatmul.mubr.f32.gmra.mxu1 %v14554_v14  ;;  %9444 = vst.msk [vmem:[%s13695_s30 + $0x2f8] sm:$0xff] %vm770_vm0, %v11602_v52  ;;  %12067 = vmatprep.mubr.f32.mxu0 %v15051_v26  ;;  %v9884_v52 = vld [vmem:[%s18079_s2 + $0x1b8] sm:$0xff] }
 0x254   : > { %9524 = vst.msk [vmem:[%s14286_s16 + $0x2f8] sm:$0xff] %vm770_vm0, %v11730_v45  ;;  %12195 = vmatprep.mubr.f32.mxu1 %v15051_v26  ;;  %v2465_v20 = vpop.f32.mrf.mxu0  ;;  %v9964_v45 = vld [vmem:[%s18080_s3 + $0x1b8] sm:$0xff] }
 0x255   : > { %v2932_v13 = vpop.f32.mrf.mxu1  ;;  %9443 = vst.msk [vmem:[%s13695_s30 + $0x2f0] sm:$0xff] %vm770_vm0, %v2465_v20  ;;  %v15245_v20 = vld [vmem:[%s12984_s9 + $0x80] sm:$0xff] }
 0x256   : > { %9523 = vst.msk [vmem:[%s14286_s16 + $0x2f0] sm:$0xff] %vm770_vm0, %v2932_v13  ;;  %v11605_v14 = vpop.f32.mrf.mxu0  ;;  %12068 = vmatmul.mubr.f32.vlgmr.msra.gmra.mxu0 %v15060_v19 }
 0x257   : > { %v11733_v37 = vpop.f32.mrf.mxu1  ;;  %12196 = vmatmul.mubr.f32.vlgmr.msra.gmra.mxu1 %v15060_v19  ;;  %9446 = vst.msk [vmem:[%s13695_s30 + $0x308] sm:$0xff] %vm770_vm0, %v11605_v14  ;;  %12292 = vmatpush3.msra.mxu0 %v14845_v38 }
 0x258   : > { %9526 = vst.msk [vmem:[%s14286_s16 + $0x308] sm:$0xff] %vm770_vm0, %v11733_v37  ;;  %12420 = vmatpush3.msra.mxu1 %v14850_v51  ;;  %v2475_v0 = vpop.f32.mrf.mxu0  ;;  %12070 = vmatprep.mubr.f32.mxu0 %v15077_v33 }
 0x259   : > { %v2942_v43 = vpop.f32.mrf.mxu1  ;;  %12198 = vmatprep.mubr.f32.mxu1 %v15077_v33  ;;  %9445 = vst.msk [vmem:[%s13695_s30 + $0x300] sm:$0xff] %vm770_vm0, %v2475_v0  ;;  %12293 = vmatprep.subr.mxu0 %v9891_v31  ;;  %v9883_v0 = vld [vmem:[%s18079_s2 + $0x1b0] sm:$0xff] }
 0x25a   : > { %9525 = vst.msk [vmem:[%s14286_s16 + $0x300] sm:$0xff] %vm770_vm0, %v2942_v43  ;;  %12421 = vmatprep.subr.mxu1 %v9971_v35  ;;  %v11608_v38 = vpop.f32.mrf.mxu0  ;;  %12071 = vmatmul.mubr.f32.gmra.mxu0 %v15086_v25  ;;  %v9963_v43 = vld [vmem:[%s18080_s3 + $0x1b0] sm:$0xff] }
 0x25b   : > { %v11736_v51 = vpop.f32.mrf.mxu1  ;;  %12199 = vmatmul.mubr.f32.gmra.mxu1 %v15086_v25  ;;  %9448 = vst.msk [vmem:[%s13695_s30 + $0x318] sm:$0xff] %vm770_vm0, %v11608_v38  ;;  %12073 = vmatprep.mubr.f32.mxu0 %v15101_v46  ;;  %v15269_v38 = vld [vmem:[%s12984_s9 + $0x90] sm:$0xff] }
 0x25c   : > { %9528 = vst.msk [vmem:[%s14286_s16 + $0x318] sm:$0xff] %vm770_vm0, %v11736_v51  ;;  %12201 = vmatprep.mubr.f32.mxu1 %v15101_v46  ;;  %v2485_v54 = vpop.f32.mrf.mxu0  ;;  %12294 = vmatpush3.msra.mxu0 %v9891_v31 }
 0x25d   : > { %v2952_v9 = vpop.f32.mrf.mxu1  ;;  %12422 = vmatpush3.msra.mxu1 %v9971_v35  ;;  %9447 = vst.msk [vmem:[%s13695_s30 + $0x310] sm:$0xff] %vm770_vm0, %v2485_v54  ;;  %12295 = vmatprep.subr.mxu0 %v9890_v59  ;;  %v15254_v35 = vld [vmem:[%s12984_s9 + $0x88] sm:$0xff] }
 0x25e   : > { %9527 = vst.msk [vmem:[%s14286_s16 + $0x310] sm:$0xff] %vm770_vm0, %v2952_v9  ;;  %12423 = vmatprep.subr.mxu1 %v9970_v7  ;;  %v11611_v27 = vpop.f32.mrf.mxu0  ;;  %12074 = vmatmul.mubr.f32.gmra.mxu0 %v15110_v5  ;;  %v15278_v9 = vld [vmem:[%s12984_s9 + $0x98] sm:$0xff] }
 0x25f   : > { %v11739_v16 = vpop.f32.mrf.mxu1  ;;  %12202 = vmatmul.mubr.f32.gmra.mxu1 %v15110_v5  ;;  %9450 = vst.msk [vmem:[%s13695_s30 + $0x328] sm:$0xff] %vm770_vm0, %v11611_v27  ;;  %12076 = vmatprep.mubr.f32.mxu0 %v15125_v28  ;;  %v9882_v27 = vld [vmem:[%s18079_s2 + $0x1a8] sm:$0xff] }
 0x260   : > { %9530 = vst.msk [vmem:[%s14286_s16 + $0x328] sm:$0xff] %vm770_vm0, %v11739_v16  ;;  %12204 = vmatprep.mubr.f32.mxu1 %v15125_v28  ;;  %v2495_v40 = vpop.f32.mrf.mxu0  ;;  %12296 = vmatpush3.msra.mxu0 %v9890_v59  ;;  %v9962_v16 = vld [vmem:[%s18080_s3 + $0x1a8] sm:$0xff] }
 0x261   : > { %v2962_v17 = vpop.f32.mrf.mxu1  ;;  %12424 = vmatpush3.msra.mxu1 %v9970_v7  ;;  %9449 = vst.msk [vmem:[%s13695_s30 + $0x320] sm:$0xff] %vm770_vm0, %v2495_v40  ;;  %12297 = vmatprep.subr.mxu0 %v9889_v62 }
 0x262   : > { %9529 = vst.msk [vmem:[%s14286_s16 + $0x320] sm:$0xff] %vm770_vm0, %v2962_v17  ;;  %12425 = vmatprep.subr.mxu1 %v9969_v32  ;;  %v11614_v2 = vpop.f32.mrf.mxu0  ;;  %12077 = vmatmul.mubr.f32.gmra.mxu0 %v15134_v42 }
 0x263   : > { %v11742_v55 = vpop.f32.mrf.mxu1  ;;  %12205 = vmatmul.mubr.f32.gmra.mxu1 %v15134_v42  ;;  %9452 = vst.msk [vmem:[%s13695_s30 + $0x338] sm:$0xff] %vm770_vm0, %v11614_v2  ;;  %12079 = vmatprep.mubr.f32.mxu0 %v15149_v1 }
 0x264   : > { %9532 = vst.msk [vmem:[%s14286_s16 + $0x338] sm:$0xff] %vm770_vm0, %v11742_v55  ;;  %12207 = vmatprep.mubr.f32.mxu1 %v15149_v1  ;;  %v2505_v6 = vpop.f32.mrf.mxu0  ;;  %12298 = vmatpush3.msra.mxu0 %v9889_v62  ;;  %v15293_v62 = vld [vmem:[%s12984_s9 + $0xa0] sm:$0xff]  ;;  %v15302_v55 = vld [vmem:[%s12984_s9 + $0xa8] sm:$0xff] }
 0x265   : > { %v2972_v10 = vpop.f32.mrf.mxu1  ;;  %12426 = vmatpush3.msra.mxu1 %v9969_v32  ;;  %9451 = vst.msk [vmem:[%s13695_s30 + $0x330] sm:$0xff] %vm770_vm0, %v2505_v6  ;;  %12299 = vmatprep.subr.mxu0 %v9888_v60  ;;  %v15317_v6 = vld [vmem:[%s12984_s9 + $0xb0] sm:$0xff] }
 0x266   : > { %9531 = vst.msk [vmem:[%s14286_s16 + $0x330] sm:$0xff] %vm770_vm0, %v2972_v10  ;;  %12427 = vmatprep.subr.mxu1 %v9968_v57  ;;  %v11617_v21 = vpop.f32.mrf.mxu0  ;;  %12080 = vmatmul.mubr.f32.gmra.mxu0 %v15158_v44 }
 0x267   : > { %v11745_v34 = vpop.f32.mrf.mxu1  ;;  %12208 = vmatmul.mubr.f32.gmra.mxu1 %v15158_v44  ;;  %9454 = vst.msk [vmem:[%s13695_s30 + $0x348] sm:$0xff] %vm770_vm0, %v11617_v21  ;;  %12082 = vmatprep.mubr.f32.mxu0 %v15173_v3 }
 0x268   : > { %9534 = vst.msk [vmem:[%s14286_s16 + $0x348] sm:$0xff] %vm770_vm0, %v11745_v34  ;;  %12210 = vmatprep.mubr.f32.mxu1 %v15173_v3  ;;  %v2515_v8 = vpop.f32.mrf.mxu0  ;;  %12300 = vmatpush3.msra.mxu0 %v9888_v60  ;;  %v9881_v60 = vld [vmem:[%s18079_s2 + $0x1a0] sm:$0xff] }
 0x269   : > { %v2982_v30 = vpop.f32.mrf.mxu1  ;;  %12428 = vmatpush3.msra.mxu1 %v9968_v57  ;;  %9453 = vst.msk [vmem:[%s13695_s30 + $0x340] sm:$0xff] %vm770_vm0, %v2515_v8  ;;  %12301 = vmatprep.subr.mxu0 %v9887_v49  ;;  %v9961_v57 = vld [vmem:[%s18080_s3 + $0x1a0] sm:$0xff]  ;;  %v9880_v8 = vld [vmem:[%s18079_s2 + $0x198] sm:$0xff] }
 0x26a   : > { %9533 = vst.msk [vmem:[%s14286_s16 + $0x340] sm:$0xff] %vm770_vm0, %v2982_v30  ;;  %12429 = vmatprep.subr.mxu1 %v9967_v24  ;;  %v11620_v29 = vpop.f32.mrf.mxu0  ;;  %12083 = vmatmul.mubr.f32.gmra.mxu0 %v15182_v48  ;;  %v9960_v30 = vld [vmem:[%s18080_s3 + $0x198] sm:$0xff] }
 0x26b   : > { %v11748_v50 = vpop.f32.mrf.mxu1  ;;  %12211 = vmatmul.mubr.f32.gmra.mxu1 %v15182_v48  ;;  %9456 = vst.msk [vmem:[%s13695_s30 + $0x358] sm:$0xff] %vm770_vm0, %v11620_v29  ;;  %12085 = vmatprep.mubr.f32.mxu0 %v15197_v4  ;;  %v15341_v29 = vld [vmem:[%s12984_s9 + $0xc0] sm:$0xff] }
 0x26c   : > { %9536 = vst.msk [vmem:[%s14286_s16 + $0x358] sm:$0xff] %vm770_vm0, %v11748_v50  ;;  %12213 = vmatprep.mubr.f32.mxu1 %v15197_v4  ;;  %v2525_v36 = vpop.f32.mrf.mxu0  ;;  %12302 = vmatpush3.msra.mxu0 %v9887_v49 }
 0x26d   : > { %v2992_v56 = vpop.f32.mrf.mxu1  ;;  %12430 = vmatpush3.msra.mxu1 %v9967_v24  ;;  %9455 = vst.msk [vmem:[%s13695_s30 + $0x350] sm:$0xff] %vm770_vm0, %v2525_v36  ;;  %12303 = vmatprep.subr.mxu0 %v9886_v23  ;;  %v15326_v24 = vld [vmem:[%s12984_s9 + $0xb8] sm:$0xff] }
 0x26e   : > { %9535 = vst.msk [vmem:[%s14286_s16 + $0x350] sm:$0xff] %vm770_vm0, %v2992_v56  ;;  %12431 = vmatprep.subr.mxu1 %v9966_v39  ;;  %v11623_v47 = vpop.f32.mrf.mxu0  ;;  %12086 = vmatmul.mubr.f32.gmra.mxu0 %v15206_v11  ;;  %v15350_v56 = vld [vmem:[%s12984_s9 + $0xc8] sm:$0xff] }
 0x26f   : > { %v11751_v63 = vpop.f32.mrf.mxu1  ;;  %12214 = vmatmul.mubr.f32.gmra.mxu1 %v15206_v11  ;;  %9458 = vst.msk [vmem:[%s13695_s30 + $0x368] sm:$0xff] %vm770_vm0, %v11623_v47  ;;  %12088 = vmatprep.mubr.f32.mxu0 %v15221_v53  ;;  %v9879_v47 = vld [vmem:[%s18079_s2 + $0x190] sm:$0xff] }
 0x270   : > { %9538 = vst.msk [vmem:[%s14286_s16 + $0x368] sm:$0xff] %vm770_vm0, %v11751_v63  ;;  %12216 = vmatprep.mubr.f32.mxu1 %v15221_v53  ;;  %v2535_v18 = vpop.f32.mrf.mxu0  ;;  %12304 = vmatpush3.msra.mxu0 %v9886_v23  ;;  %v9959_v63 = vld [vmem:[%s18080_s3 + $0x190] sm:$0xff] }
 0x271   : > { %v3002_v41 = vpop.f32.mrf.mxu1  ;;  %12432 = vmatpush3.msra.mxu1 %v9966_v39  ;;  %9457 = vst.msk [vmem:[%s13695_s30 + $0x360] sm:$0xff] %vm770_vm0, %v2535_v18  ;;  %12305 = vmatprep.subr.mxu0 %v9885_v22 }
 0x272   : > { %9537 = vst.msk [vmem:[%s14286_s16 + $0x360] sm:$0xff] %vm770_vm0, %v3002_v41  ;;  %12433 = vmatprep.subr.mxu1 %v9965_v58  ;;  %v11626_v12 = vpop.f32.mrf.mxu0  ;;  %12089 = vmatmul.mubr.f32.gmra.mxu0 %v15230_v15 }
 0x273   : > { %v11754_v61 = vpop.f32.mrf.mxu1  ;;  %12217 = vmatmul.mubr.f32.gmra.mxu1 %v15230_v15  ;;  %9460 = vst.msk [vmem:[%s13695_s30 + $0x378] sm:$0xff] %vm770_vm0, %v11626_v12  ;;  %12091 = vmatprep.mubr.f32.mxu0 %v15245_v20 }
 0x274   : > { %9540 = vst.msk [vmem:[%s14286_s16 + $0x378] sm:$0xff] %vm770_vm0, %v11754_v61  ;;  %12219 = vmatprep.mubr.f32.mxu1 %v15245_v20  ;;  %v2545_v13 = vpop.f32.mrf.mxu0  ;;  %12306 = vmatpush3.msra.mxu0 %v9885_v22  ;;  %v15365_v22 = vld [vmem:[%s12984_s9 + $0xd0] sm:$0xff]  ;;  %v15374_v61 = vld [vmem:[%s12984_s9 + $0xd8] sm:$0xff] }
 0x275   : > { %v3012_v14 = vpop.f32.mrf.mxu1  ;;  %12434 = vmatpush3.msra.mxu1 %v9965_v58  ;;  %9459 = vst.msk [vmem:[%s13695_s30 + $0x370] sm:$0xff] %vm770_vm0, %v2545_v13  ;;  %12307 = vmatprep.subr.mxu0 %v9884_v52  ;;  %v15389_v13 = vld [vmem:[%s12984_s9 + $0xe0] sm:$0xff] }
 0x276   : > { %9539 = vst.msk [vmem:[%s14286_s16 + $0x370] sm:$0xff] %vm770_vm0, %v3012_v14  ;;  %12435 = vmatprep.subr.mxu1 %v9964_v45  ;;  %v11629_v37 = vpop.f32.mrf.mxu0  ;;  %12092 = vmatmul.mubr.f32.gmra.mxu0 %v15254_v35 }
 0x277   : > { %v11757_v31 = vpop.f32.mrf.mxu1  ;;  %12220 = vmatmul.mubr.f32.gmra.mxu1 %v15254_v35  ;;  %9462 = vst.msk [vmem:[%s13695_s30 + $0x388] sm:$0xff] %vm770_vm0, %v11629_v37  ;;  %12094 = vmatprep.mubr.f32.mxu0 %v15269_v38 }
 0x278   : > { %9542 = vst.msk [vmem:[%s14286_s16 + $0x388] sm:$0xff] %vm770_vm0, %v11757_v31  ;;  %12222 = vmatprep.mubr.f32.mxu1 %v15269_v38  ;;  %v2555_v51 = vpop.f32.mrf.mxu0  ;;  %12308 = vmatpush3.msra.mxu0 %v9884_v52  ;;  %v9878_v52 = vld [vmem:[%s18079_s2 + $0x188] sm:$0xff] }
 0x279   : > { %v3022_v59 = vpop.f32.mrf.mxu1  ;;  %12436 = vmatpush3.msra.mxu1 %v9964_v45  ;;  %9461 = vst.msk [vmem:[%s13695_s30 + $0x380] sm:$0xff] %vm770_vm0, %v2555_v51  ;;  %12309 = vmatprep.subr.mxu0 %v9883_v0  ;;  %v9958_v45 = vld [vmem:[%s18080_s3 + $0x188] sm:$0xff]  ;;  %v9877_v51 = vld [vmem:[%s18079_s2 + $0x180] sm:$0xff] }
 0x27a   : > { %9541 = vst.msk [vmem:[%s14286_s16 + $0x380] sm:$0xff] %vm770_vm0, %v3022_v59  ;;  %12437 = vmatprep.subr.mxu1 %v9963_v43  ;;  %v11632_v7 = vpop.f32.mrf.mxu0  ;;  %12095 = vmatmul.mubr.f32.gmra.mxu0 %v15278_v9  ;;  %v9957_v59 = vld [vmem:[%s18080_s3 + $0x180] sm:$0xff] }
 0x27b   : > { %v11760_v54 = vpop.f32.mrf.mxu1  ;;  %12223 = vmatmul.mubr.f32.gmra.mxu1 %v15278_v9  ;;  %9464 = vst.msk [vmem:[%s13695_s30 + $0x398] sm:$0xff] %vm770_vm0, %v11632_v7  ;;  %12097 = vmatprep.mubr.f32.mxu0 %v15293_v62  ;;  %v15413_v7 = vld [vmem:[%s12984_s9 + $0xf0] sm:$0xff] }
 0x27c   : > { %9544 = vst.msk [vmem:[%s14286_s16 + $0x398] sm:$0xff] %vm770_vm0, %v11760_v54  ;;  %12225 = vmatprep.mubr.f32.mxu1 %v15293_v62  ;;  %v2565_v32 = vpop.f32.mrf.mxu0  ;;  %12310 = vmatpush3.msra.mxu0 %v9883_v0 }
 0x27d   : > { %v3032_v40 = vpop.f32.mrf.mxu1  ;;  %12438 = vmatpush3.msra.mxu1 %v9963_v43  ;;  %9463 = vst.msk [vmem:[%s13695_s30 + $0x390] sm:$0xff] %vm770_vm0, %v2565_v32  ;;  %12311 = vmatprep.subr.mxu0 %v9882_v27  ;;  %v15398_v43 = vld [vmem:[%s12984_s9 + $0xe8] sm:$0xff] }
 0x27e   : > { %9543 = vst.msk [vmem:[%s14286_s16 + $0x390] sm:$0xff] %vm770_vm0, %v3032_v40  ;;  %12439 = vmatprep.subr.mxu1 %v9962_v16  ;;  %v11635_v17 = vpop.f32.mrf.mxu0  ;;  %12098 = vmatmul.mubr.f32.gmra.mxu0 %v15302_v55  ;;  %v15422_v40 = vld [vmem:[%s12984_s9 + $0xf8] sm:$0xff] }
 0x27f   : > { %v11763_v2 = vpop.f32.mrf.mxu1  ;;  %12226 = vmatmul.mubr.f32.gmra.mxu1 %v15302_v55  ;;  %9466 = vst.msk [vmem:[%s13695_s30 + $0x3a8] sm:$0xff] %vm770_vm0, %v11635_v17  ;;  %12100 = vmatprep.mubr.f32.mxu0 %v15317_v6  ;;  %v15431_v17 = vld [vmem:[%s12984_s9 + $0x100] sm:$0xff] }
 0x280   : > { %9546 = vst.msk [vmem:[%s14286_s16 + $0x3a8] sm:$0xff] %vm770_vm0, %v11763_v2  ;;  %12228 = vmatprep.mubr.f32.mxu1 %v15317_v6  ;;  %v2575_v10 = vpop.f32.mrf.mxu0  ;;  %12312 = vmatpush3.msra.mxu0 %v9882_v27 }
 0x281   : > { %v3042_v21 = vpop.f32.mrf.mxu1  ;;  %12440 = vmatpush3.msra.mxu1 %v9962_v16  ;;  %9465 = vst.msk [vmem:[%s13695_s30 + $0x3a0] sm:$0xff] %vm770_vm0, %v2575_v10  ;;  %12313 = vmatprep.subr.mxu0 %v9881_v60 }
 0x282   : > { %9545 = vst.msk [vmem:[%s14286_s16 + $0x3a0] sm:$0xff] %vm770_vm0, %v3042_v21  ;;  %12441 = vmatprep.subr.mxu1 %v9961_v57  ;;  %v11638_v34 = vpop.f32.mrf.mxu0  ;;  %12101 = vmatmul.mubr.f32.gmra.mxu0 %v15326_v24  ;;  %v15440_v21 = vld [vmem:[%s12984_s9 + $0x108] sm:$0xff] }
 0x283   : > { %v11766_v49 = vpop.f32.mrf.mxu1  ;;  %12229 = vmatmul.mubr.f32.gmra.mxu1 %v15326_v24  ;;  %9468 = vst.msk [vmem:[%s13695_s30 + $0x3b8] sm:$0xff] %vm770_vm0, %v11638_v34  ;;  %12103 = vmatprep.mubr.f32.mxu0 %v15341_v29  ;;  %v15449_v34 = vld [vmem:[%s12984_s9 + $0x110] sm:$0xff] }
 0x284   : > { %9548 = vst.msk [vmem:[%s14286_s16 + $0x3b8] sm:$0xff] %vm770_vm0, %v11766_v49  ;;  %12231 = vmatprep.mubr.f32.mxu1 %v15341_v29  ;;  %v2585_v50 = vpop.f32.mrf.mxu0  ;;  %12314 = vmatpush3.msra.mxu0 %v9881_v60 }
 0x285   : > { %v3052_v23 = vpop.f32.mrf.mxu1  ;;  %12442 = vmatpush3.msra.mxu1 %v9961_v57  ;;  %9467 = vst.msk [vmem:[%s13695_s30 + $0x3b0] sm:$0xff] %vm770_vm0, %v2585_v50  ;;  %12315 = vmatprep.subr.mxu0 %v9880_v8 }
 0x286   : > { %9547 = vst.msk [vmem:[%s14286_s16 + $0x3b0] sm:$0xff] %vm770_vm0, %v3052_v23  ;;  %12443 = vmatprep.subr.mxu1 %v9960_v30  ;;  %v11641_v39 = vpop.f32.mrf.mxu0  ;;  %12104 = vmatmul.mubr.f32.gmra.mxu0 %v15350_v56  ;;  %v15458_v23 = vld [vmem:[%s12984_s9 + $0x118] sm:$0xff] }
 0x287   : > { %v11769_v36 = vpop.f32.mrf.mxu1  ;;  %12232 = vmatmul.mubr.f32.gmra.mxu1 %v15350_v56  ;;  %9470 = vst.msk [vmem:[%s13695_s30 + $0x3c8] sm:$0xff] %vm770_vm0, %v11641_v39  ;;  %12106 = vmatprep.mubr.f32.mxu0 %v15365_v22  ;;  %v15467_v39 = vld [vmem:[%s12984_s9 + $0x120] sm:$0xff] }
 0x288   : > { %9550 = vst.msk [vmem:[%s14286_s16 + $0x3c8] sm:$0xff] %vm770_vm0, %v11769_v36  ;;  %12234 = vmatprep.mubr.f32.mxu1 %v15365_v22  ;;  %v2595_v58 = vpop.f32.mrf.mxu0  ;;  %12316 = vmatpush3.msra.mxu0 %v9880_v8 }
 0x289   : > { %v3062_v18 = vpop.f32.mrf.mxu1  ;;  %12444 = vmatpush3.msra.mxu1 %v9960_v30  ;;  %9469 = vst.msk [vmem:[%s13695_s30 + $0x3c0] sm:$0xff] %vm770_vm0, %v2595_v58  ;;  %12317 = vmatprep.subr.mxu0 %v9879_v47 }
 0x28a   : > { %9549 = vst.msk [vmem:[%s14286_s16 + $0x3c0] sm:$0xff] %vm770_vm0, %v3062_v18  ;;  %12445 = vmatprep.subr.mxu1 %v9959_v63  ;;  %v11644_v41 = vpop.f32.mrf.mxu0  ;;  %12107 = vmatmul.mubr.f32.gmra.mxu0 %v15374_v61  ;;  %v15476_v18 = vld [vmem:[%s12984_s9 + $0x128] sm:$0xff] }
 0x28b   : > { %v11772_v12 = vpop.f32.mrf.mxu1  ;;  %12235 = vmatmul.mubr.f32.gmra.mxu1 %v15374_v61  ;;  %9472 = vst.msk [vmem:[%s13695_s30 + $0x3d8] sm:$0xff] %vm770_vm0, %v11644_v41  ;;  %12109 = vmatprep.mubr.f32.mxu0 %v15389_v13  ;;  %v15485_v41 = vld [vmem:[%s12984_s9 + $0x130] sm:$0xff] }
 0x28c   : > { %9552 = vst.msk [vmem:[%s14286_s16 + $0x3d8] sm:$0xff] %vm770_vm0, %v11772_v12  ;;  %12237 = vmatprep.mubr.f32.mxu1 %v15389_v13  ;;  %v2605_v14 = vpop.f32.mrf.mxu0  ;;  %12318 = vmatpush3.msra.mxu0 %v9879_v47 }
 0x28d   : > { %v3072_v37 = vpop.f32.mrf.mxu1  ;;  %12446 = vmatpush3.msra.mxu1 %v9959_v63  ;;  %9471 = vst.msk [vmem:[%s13695_s30 + $0x3d0] sm:$0xff] %vm770_vm0, %v2605_v14  ;;  %12319 = vmatprep.subr.mxu0 %v9878_v52 }
 0x28e   : > { %9551 = vst.msk [vmem:[%s14286_s16 + $0x3d0] sm:$0xff] %vm770_vm0, %v3072_v37  ;;  %12447 = vmatprep.subr.mxu1 %v9958_v45  ;;  %v11647_v31 = vpop.f32.mrf.mxu0  ;;  %12110 = vmatmul.mubr.f32.gmra.mxu0 %v15398_v43  ;;  %v15494_v37 = vld [vmem:[%s12984_s9 + $0x138] sm:$0xff] }
 0x28f   : > { %v11775_v0 = vpop.f32.mrf.mxu1  ;;  %12238 = vmatmul.mubr.f32.gmra.mxu1 %v15398_v43  ;;  %9474 = vst.msk [vmem:[%s13695_s30 + $0x3e8] sm:$0xff] %vm770_vm0, %v11647_v31  ;;  %12112 = vmatprep.mubr.f32.mxu0 %v15413_v7  ;;  %v15503_v31 = vld [vmem:[%s12984_s9 + $0x140] sm:$0xff] }
 0x290   : > { %9554 = vst.msk [vmem:[%s14286_s16 + $0x3e8] sm:$0xff] %vm770_vm0, %v11775_v0  ;;  %12240 = vmatprep.mubr.f32.mxu1 %v15413_v7  ;;  %v2615_v54 = vpop.f32.mrf.mxu0  ;;  %12320 = vmatpush3.msra.mxu0 %v9878_v52 }
 0x291   : > { %v3082_v27 = vpop.f32.mrf.mxu1  ;;  %12448 = vmatpush3.msra.mxu1 %v9958_v45  ;;  %9473 = vst.msk [vmem:[%s13695_s30 + $0x3e0] sm:$0xff] %vm770_vm0, %v2615_v54  ;;  %12321 = vmatprep.subr.mxu0 %v9877_v51 }
 0x292   : > { %9553 = vst.msk [vmem:[%s14286_s16 + $0x3e0] sm:$0xff] %vm770_vm0, %v3082_v27  ;;  %12449 = vmatprep.subr.mxu1 %v9957_v59  ;;  %v11650_v16 = vpop.f32.mrf.mxu0  ;;  %12113 = vmatmul.mubr.f32.gmra.mxu0 %v15422_v40  ;;  %v15512_v27 = vld [vmem:[%s12984_s9 + $0x148] sm:$0xff] }
 0x293   : > { %v11778_v32 = vpop.f32.mrf.mxu1  ;;  %12241 = vmatmul.mubr.f32.gmra.mxu1 %v15422_v40  ;;  %9476 = vst.msk [vmem:[%s13695_s30 + $0x3f8] sm:$0xff] %vm770_vm0, %v11650_v16  ;;  %12115 = vmatprep.mubr.f32.mxu0 %v15431_v17  ;;  %v15521_v16 = vld [vmem:[%s12984_s9 + $0x150] sm:$0xff] }
 0x294   : > { %9556 = vst.msk [vmem:[%s14286_s16 + $0x3f8] sm:$0xff] %vm770_vm0, %v11778_v32  ;;  %12243 = vmatprep.mubr.f32.mxu1 %v15431_v17  ;;  %v2625_v2 = vpop.f32.mrf.mxu0  ;;  %12322 = vmatpush3.msra.mxu0 %v9877_v51 }
 0x295   : > { %v3092_v60 = vpop.f32.mrf.mxu1  ;;  %12450 = vmatpush3.msra.mxu1 %v9957_v59  ;;  %9475 = vst.msk [vmem:[%s13695_s30 + $0x3f0] sm:$0xff] %vm770_vm0, %v2625_v2 }
 0x296   : > { %9555 = vst.msk [vmem:[%s14286_s16 + $0x3f0] sm:$0xff] %vm770_vm0, %v3092_v60  ;;  %v11813_v57 = vpop.f32.mrf.mxu0  ;;  %12116 = vmatmul.mubr.f32.gmra.mxu0 %v15440_v21 }
 0x297   : > { %v11941_v10 = vpop.f32.mrf.mxu1  ;;  %12244 = vmatmul.mubr.f32.gmra.mxu1 %v15440_v21  ;;  %9574 = vst.msk [vmem:[%s13690_s15 + $0x408] sm:$0xff] %vm770_vm0, %v11813_v57  ;;  %12118 = vmatprep.mubr.f32.mxu0 %v15449_v34 }
 0x298   : > { %9654 = vst.msk [vmem:[%s13695_s30 + $0x408] sm:$0xff] %vm770_vm0, %v11941_v10  ;;  %12246 = vmatprep.mubr.f32.mxu1 %v15449_v34  ;;  %v3249_v49 = vpop.f32.mrf.mxu0  ;;  %v15530_v10 = vld [vmem:[%s12984_s9 + $0x158] sm:$0xff] }
 0x299   : > { %v3716_v8 = vpop.f32.mrf.mxu1  ;;  %9573 = vst.msk [vmem:[%s13690_s15 + $0x400] sm:$0xff] %vm770_vm0, %v3249_v49  ;;  %v15539_v49 = vld [vmem:[%s12984_s9 + $0x160] sm:$0xff] }
 0x29a   : > { %9653 = vst.msk [vmem:[%s13695_s30 + $0x400] sm:$0xff] %vm770_vm0, %v3716_v8  ;;  %v11816_v30 = vpop.f32.mrf.mxu0  ;;  %12119 = vmatmul.mubr.f32.gmra.mxu0 %v15458_v23 }
 0x29b   : > { %v11944_v50 = vpop.f32.mrf.mxu1  ;;  %12247 = vmatmul.mubr.f32.gmra.mxu1 %v15458_v23  ;;  %9576 = vst.msk [vmem:[%s13690_s15 + $0x418] sm:$0xff] %vm770_vm0, %v11816_v30  ;;  %12121 = vmatprep.mubr.f32.mxu0 %v15467_v39 }
 0x29c   : > { %9656 = vst.msk [vmem:[%s13695_s30 + $0x418] sm:$0xff] %vm770_vm0, %v11944_v50  ;;  %12249 = vmatprep.mubr.f32.mxu1 %v15467_v39  ;;  %v3259_v36 = vpop.f32.mrf.mxu0 }
 0x29d   : > { %v3726_v47 = vpop.f32.mrf.mxu1  ;;  %9575 = vst.msk [vmem:[%s13690_s15 + $0x410] sm:$0xff] %vm770_vm0, %v3259_v36 }
 0x29e   : > { %9655 = vst.msk [vmem:[%s13695_s30 + $0x410] sm:$0xff] %vm770_vm0, %v3726_v47  ;;  %v11819_v63 = vpop.f32.mrf.mxu0  ;;  %12122 = vmatmul.mubr.f32.gmra.mxu0 %v15476_v18  ;;  %v15548_v47 = vld [vmem:[%s12984_s9 + $0x168] sm:$0xff] }
 0x29f   : > { %v11947_v58 = vpop.f32.mrf.mxu1  ;;  %12250 = vmatmul.mubr.f32.gmra.mxu1 %v15476_v18  ;;  %9578 = vst.msk [vmem:[%s13690_s15 + $0x428] sm:$0xff] %vm770_vm0, %v11819_v63  ;;  %12124 = vmatprep.mubr.f32.mxu0 %v15485_v41  ;;  %v15557_v63 = vld [vmem:[%s12984_s9 + $0x170] sm:$0xff] }
 0x2a0   : > { %9658 = vst.msk [vmem:[%s13695_s30 + $0x428] sm:$0xff] %vm770_vm0, %v11947_v58  ;;  %12252 = vmatprep.mubr.f32.mxu1 %v15485_v41  ;;  %v3269_v12 = vpop.f32.mrf.mxu0 }
 0x2a1   : > { %v3736_v52 = vpop.f32.mrf.mxu1  ;;  %9577 = vst.msk [vmem:[%s13690_s15 + $0x420] sm:$0xff] %vm770_vm0, %v3269_v12 }
 0x2a2   : > { %9657 = vst.msk [vmem:[%s13695_s30 + $0x420] sm:$0xff] %vm770_vm0, %v3736_v52  ;;  %v11822_v45 = vpop.f32.mrf.mxu0  ;;  %12125 = vmatmul.mubr.f32.gmra.mxu0 %v15494_v37 }
 0x2a3   : > { %v11950_v14 = vpop.f32.mrf.mxu1  ;;  %12253 = vmatmul.mubr.f32.gmra.mxu1 %v15494_v37  ;;  %9580 = vst.msk [vmem:[%s13690_s15 + $0x438] sm:$0xff] %vm770_vm0, %v11822_v45  ;;  %12127 = vmatprep.mubr.f32.mxu0 %v15503_v31 }
 0x2a4   : > { %9660 = vst.msk [vmem:[%s13695_s30 + $0x438] sm:$0xff] %vm770_vm0, %v11950_v14  ;;  %12255 = vmatprep.mubr.f32.mxu1 %v15503_v31  ;;  %v3279_v0 = vpop.f32.mrf.mxu0  ;;  %v15566_v14 = vld [vmem:[%s12984_s9 + $0x178] sm:$0xff] }
 0x2a5   : > { %v3746_v51 = vpop.f32.mrf.mxu1  ;;  %9579 = vst.msk [vmem:[%s13690_s15 + $0x430] sm:$0xff] %vm770_vm0, %v3279_v0  ;;  %v15575_v0 = vld [vmem:[%s12984_s9 + $0x180] sm:$0xff] }
 0x2a6   : > { %9659 = vst.msk [vmem:[%s13695_s30 + $0x430] sm:$0xff] %vm770_vm0, %v3746_v51  ;;  %v11825_v59 = vpop.f32.mrf.mxu0  ;;  %12128 = vmatmul.mubr.f32.gmra.mxu0 %v15512_v27 }
 0x2a7   : > { %v11953_v54 = vpop.f32.mrf.mxu1  ;;  %12256 = vmatmul.mubr.f32.gmra.mxu1 %v15512_v27  ;;  %9582 = vst.msk [vmem:[%s13690_s15 + $0x448] sm:$0xff] %vm770_vm0, %v11825_v59  ;;  %12130 = vmatprep.mubr.f32.mxu0 %v15521_v16 }
 0x2a8   : > { %9662 = vst.msk [vmem:[%s13695_s30 + $0x448] sm:$0xff] %vm770_vm0, %v11953_v54  ;;  %12258 = vmatprep.mubr.f32.mxu1 %v15521_v16  ;;  %v3289_v32 = vpop.f32.mrf.mxu0 }
 0x2a9   : > { %v3756_v2 = vpop.f32.mrf.mxu1  ;;  %9581 = vst.msk [vmem:[%s13690_s15 + $0x440] sm:$0xff] %vm770_vm0, %v3289_v32 }
 0x2aa   : > { %9661 = vst.msk [vmem:[%s13695_s30 + $0x440] sm:$0xff] %vm770_vm0, %v3756_v2  ;;  %v11828_v60 = vpop.f32.mrf.mxu0  ;;  %12131 = vmatmul.mubr.f32.gmra.mxu0 %v15530_v10  ;;  %v15584_v2 = vld [vmem:[%s12984_s9 + $0x188] sm:$0xff] }
 0x2ab   : > { %v11956_v57 = vpop.f32.mrf.mxu1  ;;  %12259 = vmatmul.mubr.f32.gmra.mxu1 %v15530_v10  ;;  %9584 = vst.msk [vmem:[%s13690_s15 + $0x458] sm:$0xff] %vm770_vm0, %v11828_v60  ;;  %12133 = vmatprep.mubr.f32.mxu0 %v15539_v49  ;;  %v15593_v60 = vld [vmem:[%s12984_s9 + $0x190] sm:$0xff] }
 0x2ac   : > { %9664 = vst.msk [vmem:[%s13695_s30 + $0x458] sm:$0xff] %vm770_vm0, %v11956_v57  ;;  %12261 = vmatprep.mubr.f32.mxu1 %v15539_v49  ;;  %v3299_v8 = vpop.f32.mrf.mxu0 }
 0x2ad   : > { %v3766_v30 = vpop.f32.mrf.mxu1  ;;  %9583 = vst.msk [vmem:[%s13690_s15 + $0x450] sm:$0xff] %vm770_vm0, %v3299_v8 }
 0x2ae   : > { %9663 = vst.msk [vmem:[%s13695_s30 + $0x450] sm:$0xff] %vm770_vm0, %v3766_v30  ;;  %v11831_v50 = vpop.f32.mrf.mxu0  ;;  %12134 = vmatmul.mubr.f32.gmra.mxu0 %v15548_v47 }
 0x2af   : > { %v11959_v36 = vpop.f32.mrf.mxu1  ;;  %12262 = vmatmul.mubr.f32.gmra.mxu1 %v15548_v47  ;;  %9586 = vst.msk [vmem:[%s13690_s15 + $0x468] sm:$0xff] %vm770_vm0, %v11831_v50  ;;  %12136 = vmatprep.mubr.f32.mxu0 %v15557_v63 }
 0x2b0   : > { %9666 = vst.msk [vmem:[%s13695_s30 + $0x468] sm:$0xff] %vm770_vm0, %v11959_v36  ;;  %12264 = vmatprep.mubr.f32.mxu1 %v15557_v63  ;;  %v3309_v58 = vpop.f32.mrf.mxu0  ;;  %v15602_v36 = vld [vmem:[%s12984_s9 + $0x198] sm:$0xff] }
 0x2b1   : > { %v3776_v12 = vpop.f32.mrf.mxu1  ;;  %9585 = vst.msk [vmem:[%s13690_s15 + $0x460] sm:$0xff] %vm770_vm0, %v3309_v58  ;;  %v15611_v58 = vld [vmem:[%s12984_s9 + $0x1a0] sm:$0xff] }
 0x2b2   : > { %9665 = vst.msk [vmem:[%s13695_s30 + $0x460] sm:$0xff] %vm770_vm0, %v3776_v12  ;;  %v11834_v52 = vpop.f32.mrf.mxu0  ;;  %12137 = vmatmul.mubr.f32.gmra.mxu0 %v15566_v14 }
 0x2b3   : > { %v11962_v45 = vpop.f32.mrf.mxu1  ;;  %12265 = vmatmul.mubr.f32.gmra.mxu1 %v15566_v14  ;;  %9588 = vst.msk [vmem:[%s13690_s15 + $0x478] sm:$0xff] %vm770_vm0, %v11834_v52  ;;  %12139 = vmatprep.mubr.f32.mxu0 %v15575_v0 }
 0x2b4   : > { %9668 = vst.msk [vmem:[%s13695_s30 + $0x478] sm:$0xff] %vm770_vm0, %v11962_v45  ;;  %12267 = vmatprep.mubr.f32.mxu1 %v15575_v0  ;;  %v3319_v51 = vpop.f32.mrf.mxu0 }
 0x2b5   : > { %v3786_v59 = vpop.f32.mrf.mxu1  ;;  %9587 = vst.msk [vmem:[%s13690_s15 + $0x470] sm:$0xff] %vm770_vm0, %v3319_v51 }
 0x2b6   : > { %9667 = vst.msk [vmem:[%s13695_s30 + $0x470] sm:$0xff] %vm770_vm0, %v3786_v59  ;;  %v11837_v54 = vpop.f32.mrf.mxu0  ;;  %12140 = vmatmul.mubr.f32.gmra.mxu0 %v15584_v2  ;;  %v15620_v59 = vld [vmem:[%s12984_s9 + $0x1a8] sm:$0xff] }
 0x2b7   : > { %v11965_v32 = vpop.f32.mrf.mxu1  ;;  %12268 = vmatmul.mubr.f32.gmra.mxu1 %v15584_v2  ;;  %9590 = vst.msk [vmem:[%s13690_s15 + $0x488] sm:$0xff] %vm770_vm0, %v11837_v54  ;;  %12142 = vmatprep.mubr.f32.mxu0 %v15593_v60  ;;  %v15629_v54 = vld [vmem:[%s12984_s9 + $0x1b0] sm:$0xff] }
 0x2b8   : > { %9670 = vst.msk [vmem:[%s13695_s30 + $0x488] sm:$0xff] %vm770_vm0, %v11965_v32  ;;  %12270 = vmatprep.mubr.f32.mxu1 %v15593_v60  ;;  %v3329_v57 = vpop.f32.mrf.mxu0 }
 0x2b9   : > { %v3796_v8 = vpop.f32.mrf.mxu1  ;;  %9589 = vst.msk [vmem:[%s13690_s15 + $0x480] sm:$0xff] %vm770_vm0, %v3329_v57 }
 0x2ba   : > { %9669 = vst.msk [vmem:[%s13695_s30 + $0x480] sm:$0xff] %vm770_vm0, %v3796_v8  ;;  %v11840_v30 = vpop.f32.mrf.mxu0  ;;  %12143 = vmatmul.mubr.f32.gmra.mxu0 %v15602_v36 }
 0x2bb   : > { %v11968_v50 = vpop.f32.mrf.mxu1  ;;  %12271 = vmatmul.mubr.f32.gmra.mxu1 %v15602_v36  ;;  %9592 = vst.msk [vmem:[%s13690_s15 + $0x498] sm:$0xff] %vm770_vm0, %v11840_v30  ;;  %12145 = vmatprep.mubr.f32.mxu0 %v15611_v58 }
 0x2bc   : > { %9672 = vst.msk [vmem:[%s13695_s30 + $0x498] sm:$0xff] %vm770_vm0, %v11968_v50  ;;  %12273 = vmatprep.mubr.f32.mxu1 %v15611_v58  ;;  %v3339_v12 = vpop.f32.mrf.mxu0  ;;  %v15638_v50 = vld [vmem:[%s12984_s9 + $0x1b8] sm:$0xff] }
 0x2bd   : > { %v3806_v52 = vpop.f32.mrf.mxu1  ;;  %9591 = vst.msk [vmem:[%s13690_s15 + $0x490] sm:$0xff] %vm770_vm0, %v3339_v12  ;;  %v15647_v12 = vld [vmem:[%s12984_s9 + $0x1c0] sm:$0xff] }
 0x2be   : > { %9671 = vst.msk [vmem:[%s13695_s30 + $0x490] sm:$0xff] %vm770_vm0, %v3806_v52  ;;  %v11843_v45 = vpop.f32.mrf.mxu0  ;;  %12146 = vmatmul.mubr.f32.gmra.mxu0 %v15620_v59 }
 0x2bf   : > { %v11971_v51 = vpop.f32.mrf.mxu1  ;;  %12274 = vmatmul.mubr.f32.gmra.mxu1 %v15620_v59  ;;  %9594 = vst.msk [vmem:[%s13690_s15 + $0x4a8] sm:$0xff] %vm770_vm0, %v11843_v45  ;;  %12148 = vmatprep.mubr.f32.mxu0 %v15629_v54 }
 0x2c0   : > { %9674 = vst.msk [vmem:[%s13695_s30 + $0x4a8] sm:$0xff] %vm770_vm0, %v11971_v51  ;;  %12276 = vmatprep.mubr.f32.mxu1 %v15629_v54  ;;  %v3349_v32 = vpop.f32.mrf.mxu0 }
 0x2c1   : > { %v3816_v57 = vpop.f32.mrf.mxu1  ;;  %9593 = vst.msk [vmem:[%s13690_s15 + $0x4a0] sm:$0xff] %vm770_vm0, %v3349_v32 }
 0x2c2   : > { %9673 = vst.msk [vmem:[%s13695_s30 + $0x4a0] sm:$0xff] %vm770_vm0, %v3816_v57  ;;  %v11846_v8 = vpop.f32.mrf.mxu0  ;;  %12149 = vmatmul.mubr.f32.gmra.mxu0 %v15638_v50  ;;  %v15656_v57 = vld [vmem:[%s12984_s9 + $0x1c8] sm:$0xff] }
 0x2c3   : > { %v11974_v30 = vpop.f32.mrf.mxu1  ;;  %12277 = vmatmul.mubr.f32.gmra.mxu1 %v15638_v50  ;;  %9596 = vst.msk [vmem:[%s13690_s15 + $0x4b8] sm:$0xff] %vm770_vm0, %v11846_v8  ;;  %12151 = vmatprep.mubr.f32.mxu0 %v15647_v12  ;;  %18153 = vst [vmem:[#allocation10_spill] sm:$0xff] %v15656_v57  ;;  %v15665_v8 = vld [vmem:[%s12984_s9 + $0x1d0] sm:$0xff] }
 0x2c4   : > { %9676 = vst.msk [vmem:[%s13695_s30 + $0x4b8] sm:$0xff] %vm770_vm0, %v11974_v30  ;;  %12279 = vmatprep.mubr.f32.mxu1 %v15647_v12  ;;  %v3359_v52 = vpop.f32.mrf.mxu0  ;;  %18154 = vst [vmem:[#allocation11_spill] sm:$0xff] %v15665_v8 }
 0x2c5   : > { %v3826_v45 = vpop.f32.mrf.mxu1  ;;  %9595 = vst.msk [vmem:[%s13690_s15 + $0x4b0] sm:$0xff] %vm770_vm0, %v3359_v52 }
 0x2c6   : > { %9675 = vst.msk [vmem:[%s13695_s30 + $0x4b0] sm:$0xff] %vm770_vm0, %v3826_v45  ;;  %v11849_v51 = vpop.f32.mrf.mxu0  ;;  %12152 = vmatmul.mubr.f32.gmra.mxu0 %v15656_v57 }
 0x2c7   : > { %v11977_v32 = vpop.f32.mrf.mxu1  ;;  %12280 = vmatmul.mubr.f32.gmra.mxu1 %v15656_v57  ;;  %9598 = vst.msk [vmem:[%s13690_s15 + $0x4c8] sm:$0xff] %vm770_vm0, %v11849_v51  ;;  %12154 = vmatprep.mubr.f32.mxu0 %v15665_v8  ;;  %v15674_v57 = vld [vmem:[%s12984_s9 + $0x1d8] sm:$0xff] }
 0x2c8   : > { %9678 = vst.msk [vmem:[%s13695_s30 + $0x4c8] sm:$0xff] %vm770_vm0, %v11977_v32  ;;  %12282 = vmatprep.mubr.f32.mxu1 %v15665_v8  ;;  %v3369_v30 = vpop.f32.mrf.mxu0  ;;  %18155 = vst [vmem:[#allocation12_spill] sm:$0xff] %v15674_v57  ;;  %v15683_v32 = vld [vmem:[%s12984_s9 + $0x1e0] sm:$0xff]  ;;  %v15692_v8 = vld [vmem:[%s12984_s9 + $0x1e8] sm:$0xff] }
 0x2c9   : > { %v3836_v52 = vpop.f32.mrf.mxu1  ;;  %9597 = vst.msk [vmem:[%s13690_s15 + $0x4c0] sm:$0xff] %vm770_vm0, %v3369_v30  ;;  %18156 = vst [vmem:[#allocation13_spill] sm:$0xff] %v15683_v32 }
 0x2ca   : > { %9677 = vst.msk [vmem:[%s13695_s30 + $0x4c0] sm:$0xff] %vm770_vm0, %v3836_v52  ;;  %v11852_v45 = vpop.f32.mrf.mxu0  ;;  %12155 = vmatmul.mubr.f32.gmra.mxu0 %v15674_v57  ;;  %18157 = vst [vmem:[#allocation14_spill] sm:$0xff] %v15692_v8 }
 0x2cb   : > { %v11980_v51 = vpop.f32.mrf.mxu1  ;;  %12283 = vmatmul.mubr.f32.gmra.mxu1 %v15674_v57  ;;  %9600 = vst.msk [vmem:[%s13690_s15 + $0x4d8] sm:$0xff] %vm770_vm0, %v11852_v45  ;;  %12157 = vmatprep.mubr.f32.mxu0 %v15683_v32 }
 0x2cc   : > { %9680 = vst.msk [vmem:[%s13695_s30 + $0x4d8] sm:$0xff] %vm770_vm0, %v11980_v51  ;;  %12285 = vmatprep.mubr.f32.mxu1 %v15683_v32  ;;  %v3379_v30 = vpop.f32.mrf.mxu0  ;;  %v15701_v51 = vld [vmem:[%s12984_s9 + $0x1f0] sm:$0xff] }
 0x2cd   : > { %v3846_v52 = vpop.f32.mrf.mxu1  ;;  %9599 = vst.msk [vmem:[%s13690_s15 + $0x4d0] sm:$0xff] %vm770_vm0, %v3379_v30  ;;  %18158 = vst [vmem:[#allocation15_spill] sm:$0xff] %v15701_v51 }
 0x2ce   : > { %9679 = vst.msk [vmem:[%s13695_s30 + $0x4d0] sm:$0xff] %vm770_vm0, %v3846_v52  ;;  %v11855_v57 = vpop.f32.mrf.mxu0  ;;  %12158 = vmatmul.mubr.f32.gmra.mxu0 %v15692_v8 }
 0x2cf   : > { %v11983_v45 = vpop.f32.mrf.mxu1  ;;  %12286 = vmatmul.mubr.f32.gmra.mxu1 %v15692_v8  ;;  %9602 = vst.msk [vmem:[%s13690_s15 + $0x4e8] sm:$0xff] %vm770_vm0, %v11855_v57  ;;  %12160 = vmatprep.mubr.f32.mxu0 %v15701_v51  ;;  %v15710_v57 = vld [vmem:[%s12984_s9 + $0x1f8] sm:$0xff]  ;;  %s10040_s9 = sshll.u32 (%p12951_p9), %s12826_s24, 6 }
 0x2d0   : > { %9682 = vst.msk [vmem:[%s13695_s30 + $0x4e8] sm:$0xff] %vm770_vm0, %v11983_v45  ;;  %12288 = vmatprep.mubr.f32.mxu1 %v15701_v51  ;;  %v3389_v30 = vpop.f32.mrf.mxu0  ;;  %s5985_s20 = sadd.s32 (%p12951_p9), %s10041_s10, %s10040_s9 }
 0x2d1   : > { %v3856_v52 = vpop.f32.mrf.mxu1  ;;  %9601 = vst.msk [vmem:[%s13690_s15 + $0x4e0] sm:$0xff] %vm770_vm0, %v3389_v30  ;;  %s10042_s21 = sshll.u32 (%p12951_p9), %s5985_s20, 3 }
 0x2d2   : > { %9681 = vst.msk [vmem:[%s13695_s30 + $0x4e0] sm:$0xff] %vm770_vm0, %v3856_v52  ;;  %v11858_v8 = vpop.f32.mrf.mxu0  ;;  %12161 = vmatmul.mubr.f32.gmra.mxu0 %v15710_v57  ;;  %s16506_s12 = scalar_lea.vmem (%p12951_p9), %s18081_s4, %s10042_s21 }
 0x2d3   : > { %v11986_v32 = vpop.f32.mrf.mxu1  ;;  %12289 = vmatmul.mubr.f32.gmra.mxu1 %v15710_v57  ;;  %9604 = vst.msk [vmem:[%s13690_s15 + $0x4f8] sm:$0xff] %vm770_vm0, %v11858_v8  ;;  %12323 = vmatprep.mubr.f32.mxu0 %v15051_v26 }
 0x2d4   : > { %9684 = vst.msk [vmem:[%s13695_s30 + $0x4f8] sm:$0xff] %vm770_vm0, %v11986_v32  ;;  %12451 = vmatprep.mubr.f32.mxu1 %v15051_v26  ;;  %v3399_v45 = vpop.f32.mrf.mxu0 }
 0x2d5   : > { %v3866_v30 = vpop.f32.mrf.mxu1  ;;  %9603 = vst.msk [vmem:[%s13690_s15 + $0x4f0] sm:$0xff] %vm770_vm0, %v3399_v45 }
 0x2d6   : > { %9683 = vst.msk [vmem:[%s13695_s30 + $0x4f0] sm:$0xff] %vm770_vm0, %v3866_v30  ;;  %v11861_v52 = vpop.f32.mrf.mxu0  ;;  %12324 = vmatmul.mubr.f32.vlgmr.msra.gmra.mxu0 %v15060_v19 }
 0x2d7   : > { %v11989_v51 = vpop.f32.mrf.mxu1  ;;  %12452 = vmatmul.mubr.f32.vlgmr.msra.gmra.mxu1 %v15060_v19  ;;  %9606 = vst.msk [vmem:[%s13690_s15 + $0x508] sm:$0xff] %vm770_vm0, %v11861_v52  ;;  %12326 = vmatprep.mubr.f32.mxu0 %v15077_v33 }
 0x2d8   : > { %9686 = vst.msk [vmem:[%s13695_s30 + $0x508] sm:$0xff] %vm770_vm0, %v11989_v51  ;;  %12454 = vmatprep.mubr.f32.mxu1 %v15077_v33  ;;  %v3409_v26 = vpop.f32.mrf.mxu0 }
 0x2d9   : > { %v3876_v8 = vpop.f32.mrf.mxu1  ;;  %9605 = vst.msk [vmem:[%s13690_s15 + $0x500] sm:$0xff] %vm770_vm0, %v3409_v26 }
 0x2da   : > { %9685 = vst.msk [vmem:[%s13695_s30 + $0x500] sm:$0xff] %vm770_vm0, %v3876_v8  ;;  %v11864_v32 = vpop.f32.mrf.mxu0  ;;  %12327 = vmatmul.mubr.f32.gmra.mxu0 %v15086_v25 }
 0x2db   : > { %v11992_v45 = vpop.f32.mrf.mxu1  ;;  %12455 = vmatmul.mubr.f32.gmra.mxu1 %v15086_v25  ;;  %9608 = vst.msk [vmem:[%s13690_s15 + $0x518] sm:$0xff] %vm770_vm0, %v11864_v32  ;;  %12329 = vmatprep.mubr.f32.mxu0 %v15101_v46 }
 0x2dc   : > { %9688 = vst.msk [vmem:[%s13695_s30 + $0x518] sm:$0xff] %vm770_vm0, %v11992_v45  ;;  %12457 = vmatprep.mubr.f32.mxu1 %v15101_v46  ;;  %v3419_v19 = vpop.f32.mrf.mxu0 }
 0x2dd   : > { %v3886_v33 = vpop.f32.mrf.mxu1  ;;  %9607 = vst.msk [vmem:[%s13690_s15 + $0x510] sm:$0xff] %vm770_vm0, %v3419_v19 }
 0x2de   : > { %9687 = vst.msk [vmem:[%s13695_s30 + $0x510] sm:$0xff] %vm770_vm0, %v3886_v33  ;;  %v11867_v51 = vpop.f32.mrf.mxu0  ;;  %12330 = vmatmul.mubr.f32.gmra.mxu0 %v15110_v5 }
 0x2df   : > { %v11995_v30 = vpop.f32.mrf.mxu1  ;;  %12458 = vmatmul.mubr.f32.gmra.mxu1 %v15110_v5  ;;  %9610 = vst.msk [vmem:[%s13690_s15 + $0x528] sm:$0xff] %vm770_vm0, %v11867_v51  ;;  %12332 = vmatprep.mubr.f32.mxu0 %v15125_v28 }
 0x2e0   : > { %9690 = vst.msk [vmem:[%s13695_s30 + $0x528] sm:$0xff] %vm770_vm0, %v11995_v30  ;;  %12460 = vmatprep.mubr.f32.mxu1 %v15125_v28  ;;  %v3429_v25 = vpop.f32.mrf.mxu0 }
 0x2e1   : > { %v3896_v46 = vpop.f32.mrf.mxu1  ;;  %9609 = vst.msk [vmem:[%s13690_s15 + $0x520] sm:$0xff] %vm770_vm0, %v3429_v25 }
 0x2e2   : > { %9689 = vst.msk [vmem:[%s13695_s30 + $0x520] sm:$0xff] %vm770_vm0, %v3896_v46  ;;  %v11870_v52 = vpop.f32.mrf.mxu0  ;;  %12333 = vmatmul.mubr.f32.gmra.mxu0 %v15134_v42 }
 0x2e3   : > { %v11998_v26 = vpop.f32.mrf.mxu1  ;;  %12461 = vmatmul.mubr.f32.gmra.mxu1 %v15134_v42  ;;  %9612 = vst.msk [vmem:[%s13690_s15 + $0x538] sm:$0xff] %vm770_vm0, %v11870_v52  ;;  %12335 = vmatprep.mubr.f32.mxu0 %v15149_v1 }
 0x2e4   : > { %9692 = vst.msk [vmem:[%s13695_s30 + $0x538] sm:$0xff] %vm770_vm0, %v11998_v26  ;;  %12463 = vmatprep.mubr.f32.mxu1 %v15149_v1  ;;  %v3439_v5 = vpop.f32.mrf.mxu0 }
 0x2e5   : > { %v3906_v28 = vpop.f32.mrf.mxu1  ;;  %9611 = vst.msk [vmem:[%s13690_s15 + $0x530] sm:$0xff] %vm770_vm0, %v3439_v5 }
 0x2e6   : > { %9691 = vst.msk [vmem:[%s13695_s30 + $0x530] sm:$0xff] %vm770_vm0, %v3906_v28  ;;  %v11873_v8 = vpop.f32.mrf.mxu0  ;;  %12336 = vmatmul.mubr.f32.gmra.mxu0 %v15158_v44 }
 0x2e7   : > { %v12001_v32 = vpop.f32.mrf.mxu1  ;;  %12464 = vmatmul.mubr.f32.gmra.mxu1 %v15158_v44  ;;  %9614 = vst.msk [vmem:[%s13690_s15 + $0x548] sm:$0xff] %vm770_vm0, %v11873_v8  ;;  %12338 = vmatprep.mubr.f32.mxu0 %v15173_v3 }
 0x2e8   : > { %9694 = vst.msk [vmem:[%s13695_s30 + $0x548] sm:$0xff] %vm770_vm0, %v12001_v32  ;;  %12466 = vmatprep.mubr.f32.mxu1 %v15173_v3  ;;  %v3449_v42 = vpop.f32.mrf.mxu0 }
 0x2e9   : > { %v3916_v1 = vpop.f32.mrf.mxu1  ;;  %9613 = vst.msk [vmem:[%s13690_s15 + $0x540] sm:$0xff] %vm770_vm0, %v3449_v42 }
 0x2ea   : > { %9693 = vst.msk [vmem:[%s13695_s30 + $0x540] sm:$0xff] %vm770_vm0, %v3916_v1  ;;  %v11876_v45 = vpop.f32.mrf.mxu0  ;;  %12339 = vmatmul.mubr.f32.gmra.mxu0 %v15182_v48 }
 0x2eb   : > { %v12004_v19 = vpop.f32.mrf.mxu1  ;;  %12467 = vmatmul.mubr.f32.gmra.mxu1 %v15182_v48  ;;  %9616 = vst.msk [vmem:[%s13690_s15 + $0x558] sm:$0xff] %vm770_vm0, %v11876_v45  ;;  %12341 = vmatprep.mubr.f32.mxu0 %v15197_v4 }
 0x2ec   : > { %9696 = vst.msk [vmem:[%s13695_s30 + $0x558] sm:$0xff] %vm770_vm0, %v12004_v19  ;;  %12469 = vmatprep.mubr.f32.mxu1 %v15197_v4  ;;  %v3459_v44 = vpop.f32.mrf.mxu0 }
 0x2ed   : > { %v3926_v3 = vpop.f32.mrf.mxu1  ;;  %9615 = vst.msk [vmem:[%s13690_s15 + $0x550] sm:$0xff] %vm770_vm0, %v3459_v44 }
 0x2ee   : > { %9695 = vst.msk [vmem:[%s13695_s30 + $0x550] sm:$0xff] %vm770_vm0, %v3926_v3  ;;  %v11879_v33 = vpop.f32.mrf.mxu0  ;;  %12342 = vmatmul.mubr.f32.gmra.mxu0 %v15206_v11 }
 0x2ef   : > { %v12007_v51 = vpop.f32.mrf.mxu1  ;;  %12470 = vmatmul.mubr.f32.gmra.mxu1 %v15206_v11  ;;  %9618 = vst.msk [vmem:[%s13690_s15 + $0x568] sm:$0xff] %vm770_vm0, %v11879_v33  ;;  %12344 = vmatprep.mubr.f32.mxu0 %v15221_v53 }
 0x2f0   : > { %9698 = vst.msk [vmem:[%s13695_s30 + $0x568] sm:$0xff] %vm770_vm0, %v12007_v51  ;;  %12472 = vmatprep.mubr.f32.mxu1 %v15221_v53  ;;  %v3469_v48 = vpop.f32.mrf.mxu0 }
 0x2f1   : > { %v3936_v4 = vpop.f32.mrf.mxu1  ;;  %9617 = vst.msk [vmem:[%s13690_s15 + $0x560] sm:$0xff] %vm770_vm0, %v3469_v48 }
 0x2f2   : > { %9697 = vst.msk [vmem:[%s13695_s30 + $0x560] sm:$0xff] %vm770_vm0, %v3936_v4  ;;  %v11882_v30 = vpop.f32.mrf.mxu0  ;;  %12345 = vmatmul.mubr.f32.gmra.mxu0 %v15230_v15 }
 0x2f3   : > { %v12010_v25 = vpop.f32.mrf.mxu1  ;;  %12473 = vmatmul.mubr.f32.gmra.mxu1 %v15230_v15  ;;  %9620 = vst.msk [vmem:[%s13690_s15 + $0x578] sm:$0xff] %vm770_vm0, %v11882_v30  ;;  %12347 = vmatprep.mubr.f32.mxu0 %v15245_v20 }
 0x2f4   : > { %9700 = vst.msk [vmem:[%s13695_s30 + $0x578] sm:$0xff] %vm770_vm0, %v12010_v25  ;;  %12475 = vmatprep.mubr.f32.mxu1 %v15245_v20  ;;  %v3479_v11 = vpop.f32.mrf.mxu0 }
 0x2f5   : > { %v3946_v53 = vpop.f32.mrf.mxu1  ;;  %9619 = vst.msk [vmem:[%s13690_s15 + $0x570] sm:$0xff] %vm770_vm0, %v3479_v11 }
 0x2f6   : > { %9699 = vst.msk [vmem:[%s13695_s30 + $0x570] sm:$0xff] %vm770_vm0, %v3946_v53  ;;  %v11885_v46 = vpop.f32.mrf.mxu0  ;;  %12348 = vmatmul.mubr.f32.gmra.mxu0 %v15254_v35 }
 0x2f7   : > { %v12013_v52 = vpop.f32.mrf.mxu1  ;;  %12476 = vmatmul.mubr.f32.gmra.mxu1 %v15254_v35  ;;  %9622 = vst.msk [vmem:[%s13690_s15 + $0x588] sm:$0xff] %vm770_vm0, %v11885_v46  ;;  %12350 = vmatprep.mubr.f32.mxu0 %v15269_v38 }
 0x2f8   : > { %9702 = vst.msk [vmem:[%s13695_s30 + $0x588] sm:$0xff] %vm770_vm0, %v12013_v52  ;;  %12478 = vmatprep.mubr.f32.mxu1 %v15269_v38  ;;  %v3489_v15 = vpop.f32.mrf.mxu0 }
 0x2f9   : > { %v3956_v20 = vpop.f32.mrf.mxu1  ;;  %9621 = vst.msk [vmem:[%s13690_s15 + $0x580] sm:$0xff] %vm770_vm0, %v3489_v15 }
 0x2fa   : > { %9701 = vst.msk [vmem:[%s13695_s30 + $0x580] sm:$0xff] %vm770_vm0, %v3956_v20  ;;  %v11888_v26 = vpop.f32.mrf.mxu0  ;;  %12351 = vmatmul.mubr.f32.gmra.mxu0 %v15278_v9 }
 0x2fb   : > { %v12016_v5 = vpop.f32.mrf.mxu1  ;;  %12479 = vmatmul.mubr.f32.gmra.mxu1 %v15278_v9  ;;  %9624 = vst.msk [vmem:[%s13690_s15 + $0x598] sm:$0xff] %vm770_vm0, %v11888_v26  ;;  %12353 = vmatprep.mubr.f32.mxu0 %v15293_v62 }
 0x2fc   : > { %9704 = vst.msk [vmem:[%s13695_s30 + $0x598] sm:$0xff] %vm770_vm0, %v12016_v5  ;;  %12481 = vmatprep.mubr.f32.mxu1 %v15293_v62  ;;  %v3499_v35 = vpop.f32.mrf.mxu0 }
 0x2fd   : > { %v3966_v38 = vpop.f32.mrf.mxu1  ;;  %9623 = vst.msk [vmem:[%s13690_s15 + $0x590] sm:$0xff] %vm770_vm0, %v3499_v35 }
 0x2fe   : > { %9703 = vst.msk [vmem:[%s13695_s30 + $0x590] sm:$0xff] %vm770_vm0, %v3966_v38  ;;  %v11891_v28 = vpop.f32.mrf.mxu0  ;;  %12354 = vmatmul.mubr.f32.gmra.mxu0 %v15302_v55 }
 0x2ff   : > { %v12019_v8 = vpop.f32.mrf.mxu1  ;;  %12482 = vmatmul.mubr.f32.gmra.mxu1 %v15302_v55  ;;  %9626 = vst.msk [vmem:[%s13690_s15 + $0x5a8] sm:$0xff] %vm770_vm0, %v11891_v28  ;;  %12356 = vmatprep.mubr.f32.mxu0 %v15317_v6 }
 0x300   : > { %9706 = vst.msk [vmem:[%s13695_s30 + $0x5a8] sm:$0xff] %vm770_vm0, %v12019_v8  ;;  %12484 = vmatprep.mubr.f32.mxu1 %v15317_v6  ;;  %v3509_v9 = vpop.f32.mrf.mxu0 }
 0x301   : > { %v3976_v62 = vpop.f32.mrf.mxu1  ;;  %9625 = vst.msk [vmem:[%s13690_s15 + $0x5a0] sm:$0xff] %vm770_vm0, %v3509_v9 }
 0x302   : > { %9705 = vst.msk [vmem:[%s13695_s30 + $0x5a0] sm:$0xff] %vm770_vm0, %v3976_v62  ;;  %v11894_v32 = vpop.f32.mrf.mxu0  ;;  %12357 = vmatmul.mubr.f32.gmra.mxu0 %v15326_v24 }
 0x303   : > { %v12022_v42 = vpop.f32.mrf.mxu1  ;;  %12485 = vmatmul.mubr.f32.gmra.mxu1 %v15326_v24  ;;  %9628 = vst.msk [vmem:[%s13690_s15 + $0x5b8] sm:$0xff] %vm770_vm0, %v11894_v32  ;;  %12359 = vmatprep.mubr.f32.mxu0 %v15341_v29 }
 0x304   : > { %9708 = vst.msk [vmem:[%s13695_s30 + $0x5b8] sm:$0xff] %vm770_vm0, %v12022_v42  ;;  %12487 = vmatprep.mubr.f32.mxu1 %v15341_v29  ;;  %v3519_v55 = vpop.f32.mrf.mxu0 }
 0x305   : > { %v3986_v6 = vpop.f32.mrf.mxu1  ;;  %9627 = vst.msk [vmem:[%s13690_s15 + $0x5b0] sm:$0xff] %vm770_vm0, %v3519_v55 }
 0x306   : > { %9707 = vst.msk [vmem:[%s13695_s30 + $0x5b0] sm:$0xff] %vm770_vm0, %v3986_v6  ;;  %v11897_v1 = vpop.f32.mrf.mxu0  ;;  %12360 = vmatmul.mubr.f32.gmra.mxu0 %v15350_v56 }
 0x307   : > { %v12025_v45 = vpop.f32.mrf.mxu1  ;;  %12488 = vmatmul.mubr.f32.gmra.mxu1 %v15350_v56  ;;  %9630 = vst.msk [vmem:[%s13690_s15 + $0x5c8] sm:$0xff] %vm770_vm0, %v11897_v1  ;;  %12362 = vmatprep.mubr.f32.mxu0 %v15365_v22 }
 0x308   : > { %9710 = vst.msk [vmem:[%s13695_s30 + $0x5c8] sm:$0xff] %vm770_vm0, %v12025_v45  ;;  %12490 = vmatprep.mubr.f32.mxu1 %v15365_v22  ;;  %v3529_v24 = vpop.f32.mrf.mxu0 }
 0x309   : > { %v3996_v29 = vpop.f32.mrf.mxu1  ;;  %9629 = vst.msk [vmem:[%s13690_s15 + $0x5c0] sm:$0xff] %vm770_vm0, %v3529_v24 }
 0x30a   : > { %9709 = vst.msk [vmem:[%s13695_s30 + $0x5c0] sm:$0xff] %vm770_vm0, %v3996_v29  ;;  %v11900_v19 = vpop.f32.mrf.mxu0  ;;  %12363 = vmatmul.mubr.f32.gmra.mxu0 %v15374_v61 }
 0x30b   : > { %v12028_v44 = vpop.f32.mrf.mxu1  ;;  %12491 = vmatmul.mubr.f32.gmra.mxu1 %v15374_v61  ;;  %9632 = vst.msk [vmem:[%s13690_s15 + $0x5d8] sm:$0xff] %vm770_vm0, %v11900_v19  ;;  %12365 = vmatprep.mubr.f32.mxu0 %v15389_v13 }
 0x30c   : > { %9712 = vst.msk [vmem:[%s13695_s30 + $0x5d8] sm:$0xff] %vm770_vm0, %v12028_v44  ;;  %12493 = vmatprep.mubr.f32.mxu1 %v15389_v13  ;;  %v3539_v56 = vpop.f32.mrf.mxu0 }
 0x30d   : > { %v4006_v22 = vpop.f32.mrf.mxu1  ;;  %9631 = vst.msk [vmem:[%s13690_s15 + $0x5d0] sm:$0xff] %vm770_vm0, %v3539_v56 }
 0x30e   : > { %9711 = vst.msk [vmem:[%s13695_s30 + $0x5d0] sm:$0xff] %vm770_vm0, %v4006_v22  ;;  %v11903_v3 = vpop.f32.mrf.mxu0  ;;  %12366 = vmatmul.mubr.f32.gmra.mxu0 %v15398_v43 }
 0x30f   : > { %v12031_v33 = vpop.f32.mrf.mxu1  ;;  %12494 = vmatmul.mubr.f32.gmra.mxu1 %v15398_v43  ;;  %9634 = vst.msk [vmem:[%s13690_s15 + $0x5e8] sm:$0xff] %vm770_vm0, %v11903_v3  ;;  %12368 = vmatprep.mubr.f32.mxu0 %v15413_v7 }
 0x310   : > { %9714 = vst.msk [vmem:[%s13695_s30 + $0x5e8] sm:$0xff] %vm770_vm0, %v12031_v33  ;;  %12496 = vmatprep.mubr.f32.mxu1 %v15413_v7  ;;  %v3549_v61 = vpop.f32.mrf.mxu0  ;;  %v18161_v33 = vld [vmem:[#allocation12_spill] sm:$0xff] }
 0x311   : > { %v4016_v13 = vpop.f32.mrf.mxu1  ;;  %9633 = vst.msk [vmem:[%s13690_s15 + $0x5e0] sm:$0xff] %vm770_vm0, %v3549_v61  ;;  %v18162_v61 = vld [vmem:[#allocation13_spill] sm:$0xff] }
 0x312   : > { %9713 = vst.msk [vmem:[%s13695_s30 + $0x5e0] sm:$0xff] %vm770_vm0, %v4016_v13  ;;  %v11906_v51 = vpop.f32.mrf.mxu0  ;;  %12369 = vmatmul.mubr.f32.gmra.mxu0 %v15422_v40 }
 0x313   : > { %v12034_v48 = vpop.f32.mrf.mxu1  ;;  %12497 = vmatmul.mubr.f32.gmra.mxu1 %v15422_v40  ;;  %9636 = vst.msk [vmem:[%s13690_s15 + $0x5f8] sm:$0xff] %vm770_vm0, %v11906_v51  ;;  %12371 = vmatprep.mubr.f32.mxu0 %v15431_v17 }
 0x314   : > { %9716 = vst.msk [vmem:[%s13695_s30 + $0x5f8] sm:$0xff] %vm770_vm0, %v12034_v48  ;;  %12499 = vmatprep.mubr.f32.mxu1 %v15431_v17  ;;  %v3559_v43 = vpop.f32.mrf.mxu0 }
 0x315   : > { %v4026_v7 = vpop.f32.mrf.mxu1  ;;  %9635 = vst.msk [vmem:[%s13690_s15 + $0x5f0] sm:$0xff] %vm770_vm0, %v3559_v43 }
 0x316   : > { %9715 = vst.msk [vmem:[%s13695_s30 + $0x5f0] sm:$0xff] %vm770_vm0, %v4026_v7  ;;  %v12069_v4 = vpop.f32.mrf.mxu0  ;;  %12372 = vmatmul.mubr.f32.gmra.mxu0 %v15440_v21  ;;  %v18163_v7 = vld [vmem:[#allocation14_spill] sm:$0xff] }
 0x317   : > { %v12197_v30 = vpop.f32.mrf.mxu1  ;;  %12500 = vmatmul.mubr.f32.gmra.mxu1 %v15440_v21  ;;  %9734 = vst.msk [vmem:[%s14286_s16 + $0x408] sm:$0xff] %vm770_vm0, %v12069_v4  ;;  %12374 = vmatprep.mubr.f32.mxu0 %v15449_v34  ;;  %v18164_v4 = vld [vmem:[#allocation15_spill] sm:$0xff] }
 0x318   : > { %9814 = vst.msk [vmem:[%s13690_s15 + $0x608] sm:$0xff] %vm770_vm0, %v12197_v30  ;;  %12502 = vmatprep.mubr.f32.mxu1 %v15449_v34  ;;  %v4183_v40 = vpop.f32.mrf.mxu0 }
 0x319   : > { %v4650_v17 = vpop.f32.mrf.mxu1  ;;  %9733 = vst.msk [vmem:[%s14286_s16 + $0x400] sm:$0xff] %vm770_vm0, %v4183_v40 }
 0x31a   : > { %9813 = vst.msk [vmem:[%s13690_s15 + $0x600] sm:$0xff] %vm770_vm0, %v4650_v17  ;;  %v12072_v25 = vpop.f32.mrf.mxu0  ;;  %12375 = vmatmul.mubr.f32.gmra.mxu0 %v15458_v23 }
 0x31b   : > { %v12200_v11 = vpop.f32.mrf.mxu1  ;;  %12503 = vmatmul.mubr.f32.gmra.mxu1 %v15458_v23  ;;  %9736 = vst.msk [vmem:[%s14286_s16 + $0x418] sm:$0xff] %vm770_vm0, %v12072_v25  ;;  %12377 = vmatprep.mubr.f32.mxu0 %v15467_v39 }
 0x31c   : > { %9816 = vst.msk [vmem:[%s13690_s15 + $0x618] sm:$0xff] %vm770_vm0, %v12200_v11  ;;  %12505 = vmatprep.mubr.f32.mxu1 %v15467_v39  ;;  %v4193_v21 = vpop.f32.mrf.mxu0 }
 0x31d   : > { %v4660_v34 = vpop.f32.mrf.mxu1  ;;  %9735 = vst.msk [vmem:[%s14286_s16 + $0x410] sm:$0xff] %vm770_vm0, %v4193_v21 }
 0x31e   : > { %9815 = vst.msk [vmem:[%s13690_s15 + $0x610] sm:$0xff] %vm770_vm0, %v4660_v34  ;;  %v12075_v53 = vpop.f32.mrf.mxu0  ;;  %12378 = vmatmul.mubr.f32.gmra.mxu0 %v15476_v18 }
 0x31f   : > { %v12203_v46 = vpop.f32.mrf.mxu1  ;;  %12506 = vmatmul.mubr.f32.gmra.mxu1 %v15476_v18  ;;  %9738 = vst.msk [vmem:[%s14286_s16 + $0x428] sm:$0xff] %vm770_vm0, %v12075_v53  ;;  %12380 = vmatprep.mubr.f32.mxu0 %v15485_v41 }
 0x320   : > { %9818 = vst.msk [vmem:[%s13690_s15 + $0x628] sm:$0xff] %vm770_vm0, %v12203_v46  ;;  %12508 = vmatprep.mubr.f32.mxu1 %v15485_v41  ;;  %v4203_v23 = vpop.f32.mrf.mxu0 }
 0x321   : > { %v4670_v39 = vpop.f32.mrf.mxu1  ;;  %9737 = vst.msk [vmem:[%s14286_s16 + $0x420] sm:$0xff] %vm770_vm0, %v4203_v23 }
 0x322   : > { %9817 = vst.msk [vmem:[%s13690_s15 + $0x620] sm:$0xff] %vm770_vm0, %v4670_v39  ;;  %v12078_v52 = vpop.f32.mrf.mxu0  ;;  %12381 = vmatmul.mubr.f32.gmra.mxu0 %v15494_v37 }
 0x323   : > { %v12206_v15 = vpop.f32.mrf.mxu1  ;;  %12509 = vmatmul.mubr.f32.gmra.mxu1 %v15494_v37  ;;  %9740 = vst.msk [vmem:[%s14286_s16 + $0x438] sm:$0xff] %vm770_vm0, %v12078_v52  ;;  %12383 = vmatprep.mubr.f32.mxu0 %v15503_v31 }
 0x324   : > { %9820 = vst.msk [vmem:[%s13690_s15 + $0x638] sm:$0xff] %vm770_vm0, %v12206_v15  ;;  %12511 = vmatprep.mubr.f32.mxu1 %v15503_v31  ;;  %v4213_v18 = vpop.f32.mrf.mxu0 }
 0x325   : > { %v4680_v41 = vpop.f32.mrf.mxu1  ;;  %9739 = vst.msk [vmem:[%s14286_s16 + $0x430] sm:$0xff] %vm770_vm0, %v4213_v18 }
 0x326   : > { %9819 = vst.msk [vmem:[%s13690_s15 + $0x630] sm:$0xff] %vm770_vm0, %v4680_v41  ;;  %v12081_v20 = vpop.f32.mrf.mxu0  ;;  %12384 = vmatmul.mubr.f32.gmra.mxu0 %v15512_v27 }
 0x327   : > { %v12209_v26 = vpop.f32.mrf.mxu1  ;;  %12512 = vmatmul.mubr.f32.gmra.mxu1 %v15512_v27  ;;  %9742 = vst.msk [vmem:[%s14286_s16 + $0x448] sm:$0xff] %vm770_vm0, %v12081_v20  ;;  %12386 = vmatprep.mubr.f32.mxu0 %v15521_v16 }
 0x328   : > { %9822 = vst.msk [vmem:[%s13690_s15 + $0x648] sm:$0xff] %vm770_vm0, %v12209_v26  ;;  %12514 = vmatprep.mubr.f32.mxu1 %v15521_v16  ;;  %v4223_v37 = vpop.f32.mrf.mxu0 }
 0x329   : > { %v4690_v31 = vpop.f32.mrf.mxu1  ;;  %9741 = vst.msk [vmem:[%s14286_s16 + $0x440] sm:$0xff] %vm770_vm0, %v4223_v37 }
 0x32a   : > { %9821 = vst.msk [vmem:[%s13690_s15 + $0x640] sm:$0xff] %vm770_vm0, %v4690_v31  ;;  %v12084_v5 = vpop.f32.mrf.mxu0  ;;  %12387 = vmatmul.mubr.f32.gmra.mxu0 %v15530_v10 }
 0x32b   : > { %v12212_v35 = vpop.f32.mrf.mxu1  ;;  %12515 = vmatmul.mubr.f32.gmra.mxu1 %v15530_v10  ;;  %9744 = vst.msk [vmem:[%s14286_s16 + $0x458] sm:$0xff] %vm770_vm0, %v12084_v5  ;;  %12389 = vmatprep.mubr.f32.mxu0 %v15539_v49 }
 0x32c   : > { %9824 = vst.msk [vmem:[%s13690_s15 + $0x658] sm:$0xff] %vm770_vm0, %v12212_v35  ;;  %12517 = vmatprep.mubr.f32.mxu1 %v15539_v49  ;;  %v4233_v27 = vpop.f32.mrf.mxu0 }
 0x32d   : > { %v4700_v16 = vpop.f32.mrf.mxu1  ;;  %9743 = vst.msk [vmem:[%s14286_s16 + $0x450] sm:$0xff] %vm770_vm0, %v4233_v27 }
 0x32e   : > { %9823 = vst.msk [vmem:[%s13690_s15 + $0x650] sm:$0xff] %vm770_vm0, %v4700_v16  ;;  %v12087_v38 = vpop.f32.mrf.mxu0  ;;  %12390 = vmatmul.mubr.f32.gmra.mxu0 %v15548_v47 }
 0x32f   : > { %v12215_v28 = vpop.f32.mrf.mxu1  ;;  %12518 = vmatmul.mubr.f32.gmra.mxu1 %v15548_v47  ;;  %9746 = vst.msk [vmem:[%s14286_s16 + $0x468] sm:$0xff] %vm770_vm0, %v12087_v38  ;;  %12392 = vmatprep.mubr.f32.mxu0 %v15557_v63 }
 0x330   : > { %9826 = vst.msk [vmem:[%s13690_s15 + $0x668] sm:$0xff] %vm770_vm0, %v12215_v28  ;;  %12520 = vmatprep.mubr.f32.mxu1 %v15557_v63  ;;  %v4243_v10 = vpop.f32.mrf.mxu0 }
 0x331   : > { %v4710_v49 = vpop.f32.mrf.mxu1  ;;  %9745 = vst.msk [vmem:[%s14286_s16 + $0x460] sm:$0xff] %vm770_vm0, %v4243_v10 }
 0x332   : > { %9825 = vst.msk [vmem:[%s13690_s15 + $0x660] sm:$0xff] %vm770_vm0, %v4710_v49  ;;  %v12090_v8 = vpop.f32.mrf.mxu0  ;;  %12393 = vmatmul.mubr.f32.gmra.mxu0 %v15566_v14 }
 0x333   : > { %v12218_v9 = vpop.f32.mrf.mxu1  ;;  %12521 = vmatmul.mubr.f32.gmra.mxu1 %v15566_v14  ;;  %9748 = vst.msk [vmem:[%s14286_s16 + $0x478] sm:$0xff] %vm770_vm0, %v12090_v8  ;;  %12395 = vmatprep.mubr.f32.mxu0 %v15575_v0 }
 0x334   : > { %9828 = vst.msk [vmem:[%s13690_s15 + $0x678] sm:$0xff] %vm770_vm0, %v12218_v9  ;;  %12523 = vmatprep.mubr.f32.mxu1 %v15575_v0  ;;  %v4253_v47 = vpop.f32.mrf.mxu0 }
 0x335   : > { %v4720_v63 = vpop.f32.mrf.mxu1  ;;  %9747 = vst.msk [vmem:[%s14286_s16 + $0x470] sm:$0xff] %vm770_vm0, %v4253_v47 }
 0x336   : > { %9827 = vst.msk [vmem:[%s13690_s15 + $0x670] sm:$0xff] %vm770_vm0, %v4720_v63  ;;  %v12093_v62 = vpop.f32.mrf.mxu0  ;;  %12396 = vmatmul.mubr.f32.gmra.mxu0 %v15584_v2 }
 0x337   : > { %v12221_v32 = vpop.f32.mrf.mxu1  ;;  %12524 = vmatmul.mubr.f32.gmra.mxu1 %v15584_v2  ;;  %9750 = vst.msk [vmem:[%s14286_s16 + $0x488] sm:$0xff] %vm770_vm0, %v12093_v62  ;;  %12398 = vmatprep.mubr.f32.mxu0 %v15593_v60 }
 0x338   : > { %9830 = vst.msk [vmem:[%s13690_s15 + $0x688] sm:$0xff] %vm770_vm0, %v12221_v32  ;;  %12526 = vmatprep.mubr.f32.mxu1 %v15593_v60  ;;  %v4263_v14 = vpop.f32.mrf.mxu0 }
 0x339   : > { %v4730_v0 = vpop.f32.mrf.mxu1  ;;  %9749 = vst.msk [vmem:[%s14286_s16 + $0x480] sm:$0xff] %vm770_vm0, %v4263_v14 }
 0x33a   : > { %9829 = vst.msk [vmem:[%s13690_s15 + $0x680] sm:$0xff] %vm770_vm0, %v4730_v0  ;;  %v12096_v42 = vpop.f32.mrf.mxu0  ;;  %12399 = vmatmul.mubr.f32.gmra.mxu0 %v15602_v36 }
 0x33b   : > { %v12224_v55 = vpop.f32.mrf.mxu1  ;;  %12527 = vmatmul.mubr.f32.gmra.mxu1 %v15602_v36  ;;  %9752 = vst.msk [vmem:[%s14286_s16 + $0x498] sm:$0xff] %vm770_vm0, %v12096_v42  ;;  %12401 = vmatprep.mubr.f32.mxu0 %v15611_v58 }
 0x33c   : > { %9832 = vst.msk [vmem:[%s13690_s15 + $0x698] sm:$0xff] %vm770_vm0, %v12224_v55  ;;  %12529 = vmatprep.mubr.f32.mxu1 %v15611_v58  ;;  %v4273_v2 = vpop.f32.mrf.mxu0 }
 0x33d   : > { %v4740_v60 = vpop.f32.mrf.mxu1  ;;  %9751 = vst.msk [vmem:[%s14286_s16 + $0x490] sm:$0xff] %vm770_vm0, %v4273_v2 }
 0x33e   : > { %9831 = vst.msk [vmem:[%s13690_s15 + $0x690] sm:$0xff] %vm770_vm0, %v4740_v60  ;;  %v12099_v6 = vpop.f32.mrf.mxu0  ;;  %12402 = vmatmul.mubr.f32.gmra.mxu0 %v15620_v59 }
 0x33f   : > { %v12227_v1 = vpop.f32.mrf.mxu1  ;;  %12530 = vmatmul.mubr.f32.gmra.mxu1 %v15620_v59  ;;  %9754 = vst.msk [vmem:[%s14286_s16 + $0x4a8] sm:$0xff] %vm770_vm0, %v12099_v6  ;;  %12404 = vmatprep.mubr.f32.mxu0 %v15629_v54 }
 0x340   : > { %9834 = vst.msk [vmem:[%s13690_s15 + $0x6a8] sm:$0xff] %vm770_vm0, %v12227_v1  ;;  %12532 = vmatprep.mubr.f32.mxu1 %v15629_v54  ;;  %v4283_v36 = vpop.f32.mrf.mxu0 }
 0x341   : > { %v4750_v58 = vpop.f32.mrf.mxu1  ;;  %9753 = vst.msk [vmem:[%s14286_s16 + $0x4a0] sm:$0xff] %vm770_vm0, %v4283_v36 }
 0x342   : > { %9833 = vst.msk [vmem:[%s13690_s15 + $0x6a0] sm:$0xff] %vm770_vm0, %v4750_v58  ;;  %v12102_v45 = vpop.f32.mrf.mxu0  ;;  %12405 = vmatmul.mubr.f32.gmra.mxu0 %v15638_v50 }
 0x343   : > { %v12230_v24 = vpop.f32.mrf.mxu1  ;;  %12533 = vmatmul.mubr.f32.gmra.mxu1 %v15638_v50  ;;  %9756 = vst.msk [vmem:[%s14286_s16 + $0x4b8] sm:$0xff] %vm770_vm0, %v12102_v45  ;;  %12407 = vmatprep.mubr.f32.mxu0 %v15647_v12  ;;  %v18159_v50 = vld [vmem:[#allocation10_spill] sm:$0xff] }
 0x344   : > { %9836 = vst.msk [vmem:[%s13690_s15 + $0x6b8] sm:$0xff] %vm770_vm0, %v12230_v24  ;;  %12535 = vmatprep.mubr.f32.mxu1 %v15647_v12  ;;  %v4293_v59 = vpop.f32.mrf.mxu0  ;;  %v18160_v12 = vld [vmem:[#allocation11_spill] sm:$0xff] }
 0x345   : > { %v4760_v54 = vpop.f32.mrf.mxu1  ;;  %9755 = vst.msk [vmem:[%s14286_s16 + $0x4b0] sm:$0xff] %vm770_vm0, %v4293_v59 }
 0x346   : > { %9835 = vst.msk [vmem:[%s13690_s15 + $0x6b0] sm:$0xff] %vm770_vm0, %v4760_v54  ;;  %v12105_v29 = vpop.f32.mrf.mxu0  ;;  %12408 = vmatmul.mubr.f32.gmra.mxu0 %v18159_v50 }
 0x347   : > { %v12233_v19 = vpop.f32.mrf.mxu1  ;;  %12536 = vmatmul.mubr.f32.gmra.mxu1 %v18159_v50  ;;  %9758 = vst.msk [vmem:[%s14286_s16 + $0x4c8] sm:$0xff] %vm770_vm0, %v12105_v29  ;;  %12410 = vmatprep.mubr.f32.mxu0 %v18160_v12 }
 0x348   : > { %9838 = vst.msk [vmem:[%s13690_s15 + $0x6c8] sm:$0xff] %vm770_vm0, %v12233_v19  ;;  %12538 = vmatprep.mubr.f32.mxu1 %v18160_v12  ;;  %v4303_v44 = vpop.f32.mrf.mxu0 }
 0x349   : > { %v4770_v56 = vpop.f32.mrf.mxu1  ;;  %9757 = vst.msk [vmem:[%s14286_s16 + $0x4c0] sm:$0xff] %vm770_vm0, %v4303_v44 }
 0x34a   : > { %9837 = vst.msk [vmem:[%s13690_s15 + $0x6c0] sm:$0xff] %vm770_vm0, %v4770_v56  ;;  %v12108_v22 = vpop.f32.mrf.mxu0  ;;  %12411 = vmatmul.mubr.f32.gmra.mxu0 %v18161_v33 }
 0x34b   : > { %v12236_v3 = vpop.f32.mrf.mxu1  ;;  %12539 = vmatmul.mubr.f32.gmra.mxu1 %v18161_v33  ;;  %9760 = vst.msk [vmem:[%s14286_s16 + $0x4d8] sm:$0xff] %vm770_vm0, %v12108_v22  ;;  %12413 = vmatprep.mubr.f32.mxu0 %v18162_v61 }
 0x34c   : > { %9840 = vst.msk [vmem:[%s13690_s15 + $0x6d8] sm:$0xff] %vm770_vm0, %v12236_v3  ;;  %12541 = vmatprep.mubr.f32.mxu1 %v18162_v61  ;;  %v4313_v13 = vpop.f32.mrf.mxu0 }
 0x34d   : > { %v4780_v51 = vpop.f32.mrf.mxu1  ;;  %9759 = vst.msk [vmem:[%s14286_s16 + $0x4d0] sm:$0xff] %vm770_vm0, %v4313_v13 }
 0x34e   : > { %9839 = vst.msk [vmem:[%s13690_s15 + $0x6d0] sm:$0xff] %vm770_vm0, %v4780_v51  ;;  %v12111_v48 = vpop.f32.mrf.mxu0  ;;  %12414 = vmatmul.mubr.f32.gmra.mxu0 %v18163_v7 }
 0x34f   : > { %v12239_v43 = vpop.f32.mrf.mxu1  ;;  %12542 = vmatmul.mubr.f32.gmra.mxu1 %v18163_v7  ;;  %9762 = vst.msk [vmem:[%s14286_s16 + $0x4e8] sm:$0xff] %vm770_vm0, %v12111_v48  ;;  %12416 = vmatprep.mubr.f32.mxu0 %v18164_v4 }
 0x350   : > { %9842 = vst.msk [vmem:[%s13690_s15 + $0x6e8] sm:$0xff] %vm770_vm0, %v12239_v43  ;;  %12544 = vmatprep.mubr.f32.mxu1 %v18164_v4  ;;  %v4323_v30 = vpop.f32.mrf.mxu0 }
 0x351   : > { %v4790_v40 = vpop.f32.mrf.mxu1  ;;  %9761 = vst.msk [vmem:[%s14286_s16 + $0x4e0] sm:$0xff] %vm770_vm0, %v4323_v30 }
 0x352   : > { %9841 = vst.msk [vmem:[%s13690_s15 + $0x6e0] sm:$0xff] %vm770_vm0, %v4790_v40  ;;  %v12114_v17 = vpop.f32.mrf.mxu0  ;;  %12417 = vmatmul.mubr.f32.gmra.mxu0 %v15710_v57 }
 0x353   : > { %v12242_v25 = vpop.f32.mrf.mxu1  ;;  %12545 = vmatmul.mubr.f32.gmra.mxu1 %v15710_v57  ;;  %9764 = vst.msk [vmem:[%s14286_s16 + $0x4f8] sm:$0xff] %vm770_vm0, %v12114_v17 }
 0x354   : > { %9844 = vst.msk [vmem:[%s13690_s15 + $0x6f8] sm:$0xff] %vm770_vm0, %v12242_v25  ;;  %v4333_v11 = vpop.f32.mrf.mxu0 }
 0x355   : > { %v4800_v21 = vpop.f32.mrf.mxu1  ;;  %9763 = vst.msk [vmem:[%s14286_s16 + $0x4f0] sm:$0xff] %vm770_vm0, %v4333_v11 }
 0x356   : > { %9843 = vst.msk [vmem:[%s13690_s15 + $0x6f0] sm:$0xff] %vm770_vm0, %v4800_v21  ;;  %v12117_v34 = vpop.f32.mrf.mxu0 }
 0x357   : > { %v12245_v53 = vpop.f32.mrf.mxu1  ;;  %9766 = vst.msk [vmem:[%s14286_s16 + $0x508] sm:$0xff] %vm770_vm0, %v12117_v34 }
 0x358   : > { %9846 = vst.msk [vmem:[%s13690_s15 + $0x708] sm:$0xff] %vm770_vm0, %v12245_v53  ;;  %v4343_v57 = vpop.f32.mrf.mxu0 }
 0x359   : > { %v4810_v46 = vpop.f32.mrf.mxu1  ;;  %9765 = vst.msk [vmem:[%s14286_s16 + $0x500] sm:$0xff] %vm770_vm0, %v4343_v57 }
 0x35a   : > { %9845 = vst.msk [vmem:[%s13690_s15 + $0x700] sm:$0xff] %vm770_vm0, %v4810_v46  ;;  %v12120_v23 = vpop.f32.mrf.mxu0 }
 0x35b   : > { %v12248_v39 = vpop.f32.mrf.mxu1  ;;  %9768 = vst.msk [vmem:[%s14286_s16 + $0x518] sm:$0xff] %vm770_vm0, %v12120_v23 }
 0x35c   : > { %9848 = vst.msk [vmem:[%s13690_s15 + $0x718] sm:$0xff] %vm770_vm0, %v12248_v39  ;;  %v4353_v52 = vpop.f32.mrf.mxu0 }
 0x35d   : > { %v4820_v15 = vpop.f32.mrf.mxu1  ;;  %9767 = vst.msk [vmem:[%s14286_s16 + $0x510] sm:$0xff] %vm770_vm0, %v4353_v52 }
 0x35e   : > { %9847 = vst.msk [vmem:[%s13690_s15 + $0x710] sm:$0xff] %vm770_vm0, %v4820_v15  ;;  %v12123_v18 = vpop.f32.mrf.mxu0 }
 0x35f   : > { %v12251_v41 = vpop.f32.mrf.mxu1  ;;  %9770 = vst.msk [vmem:[%s14286_s16 + $0x528] sm:$0xff] %vm770_vm0, %v12123_v18 }
 0x360   : > { %9850 = vst.msk [vmem:[%s13690_s15 + $0x728] sm:$0xff] %vm770_vm0, %v12251_v41  ;;  %v4363_v20 = vpop.f32.mrf.mxu0 }
 0x361   : > { %v4830_v26 = vpop.f32.mrf.mxu1  ;;  %9769 = vst.msk [vmem:[%s14286_s16 + $0x520] sm:$0xff] %vm770_vm0, %v4363_v20 }
 0x362   : > { %9849 = vst.msk [vmem:[%s13690_s15 + $0x720] sm:$0xff] %vm770_vm0, %v4830_v26  ;;  %v12126_v37 = vpop.f32.mrf.mxu0 }
 0x363   : > { %v12254_v31 = vpop.f32.mrf.mxu1  ;;  %9772 = vst.msk [vmem:[%s14286_s16 + $0x538] sm:$0xff] %vm770_vm0, %v12126_v37 }
 0x364   : > { %9852 = vst.msk [vmem:[%s13690_s15 + $0x738] sm:$0xff] %vm770_vm0, %v12254_v31  ;;  %v4373_v5 = vpop.f32.mrf.mxu0 }
 0x365   : > { %v4840_v35 = vpop.f32.mrf.mxu1  ;;  %9771 = vst.msk [vmem:[%s14286_s16 + $0x530] sm:$0xff] %vm770_vm0, %v4373_v5 }
 0x366   : > { %9851 = vst.msk [vmem:[%s13690_s15 + $0x730] sm:$0xff] %vm770_vm0, %v4840_v35  ;;  %v12129_v27 = vpop.f32.mrf.mxu0 }
 0x367   : > { %v12257_v16 = vpop.f32.mrf.mxu1  ;;  %9774 = vst.msk [vmem:[%s14286_s16 + $0x548] sm:$0xff] %vm770_vm0, %v12129_v27 }
 0x368   : > { %9854 = vst.msk [vmem:[%s13690_s15 + $0x748] sm:$0xff] %vm770_vm0, %v12257_v16  ;;  %v4383_v38 = vpop.f32.mrf.mxu0 }
 0x369   : > { %v4850_v28 = vpop.f32.mrf.mxu1  ;;  %9773 = vst.msk [vmem:[%s14286_s16 + $0x540] sm:$0xff] %vm770_vm0, %v4383_v38 }
 0x36a   : > { %9853 = vst.msk [vmem:[%s13690_s15 + $0x740] sm:$0xff] %vm770_vm0, %v4850_v28  ;;  %v12132_v10 = vpop.f32.mrf.mxu0 }
 0x36b   : > { %v12260_v49 = vpop.f32.mrf.mxu1  ;;  %9776 = vst.msk [vmem:[%s14286_s16 + $0x558] sm:$0xff] %vm770_vm0, %v12132_v10 }
 0x36c   : > { %9856 = vst.msk [vmem:[%s13690_s15 + $0x758] sm:$0xff] %vm770_vm0, %v12260_v49  ;;  %v4393_v8 = vpop.f32.mrf.mxu0 }
 0x36d   : > { %v4860_v9 = vpop.f32.mrf.mxu1  ;;  %9775 = vst.msk [vmem:[%s14286_s16 + $0x550] sm:$0xff] %vm770_vm0, %v4393_v8 }
 0x36e   : > { %9855 = vst.msk [vmem:[%s13690_s15 + $0x750] sm:$0xff] %vm770_vm0, %v4860_v9  ;;  %v12135_v47 = vpop.f32.mrf.mxu0 }
 0x36f   : > { %v12263_v63 = vpop.f32.mrf.mxu1  ;;  %9778 = vst.msk [vmem:[%s14286_s16 + $0x568] sm:$0xff] %vm770_vm0, %v12135_v47 }
 0x370   : > { %9858 = vst.msk [vmem:[%s13690_s15 + $0x768] sm:$0xff] %vm770_vm0, %v12263_v63  ;;  %v4403_v62 = vpop.f32.mrf.mxu0 }
 0x371   : > { %v4870_v32 = vpop.f32.mrf.mxu1  ;;  %9777 = vst.msk [vmem:[%s14286_s16 + $0x560] sm:$0xff] %vm770_vm0, %v4403_v62 }
 0x372   : > { %9857 = vst.msk [vmem:[%s13690_s15 + $0x760] sm:$0xff] %vm770_vm0, %v4870_v32  ;;  %v12138_v14 = vpop.f32.mrf.mxu0 }
 0x373   : > { %v12266_v0 = vpop.f32.mrf.mxu1  ;;  %9780 = vst.msk [vmem:[%s14286_s16 + $0x578] sm:$0xff] %vm770_vm0, %v12138_v14 }
 0x374   : > { %9860 = vst.msk [vmem:[%s13690_s15 + $0x778] sm:$0xff] %vm770_vm0, %v12266_v0  ;;  %v4413_v42 = vpop.f32.mrf.mxu0 }
 0x375   : > { %v4880_v55 = vpop.f32.mrf.mxu1  ;;  %9779 = vst.msk [vmem:[%s14286_s16 + $0x570] sm:$0xff] %vm770_vm0, %v4413_v42 }
 0x376   : > { %9859 = vst.msk [vmem:[%s13690_s15 + $0x770] sm:$0xff] %vm770_vm0, %v4880_v55  ;;  %v12141_v2 = vpop.f32.mrf.mxu0 }
 0x377   : > { %v12269_v60 = vpop.f32.mrf.mxu1  ;;  %9782 = vst.msk [vmem:[%s14286_s16 + $0x588] sm:$0xff] %vm770_vm0, %v12141_v2 }
 0x378   : > { %9862 = vst.msk [vmem:[%s13690_s15 + $0x788] sm:$0xff] %vm770_vm0, %v12269_v60  ;;  %v4423_v6 = vpop.f32.mrf.mxu0 }
 0x379   : > { %v4890_v1 = vpop.f32.mrf.mxu1  ;;  %9781 = vst.msk [vmem:[%s14286_s16 + $0x580] sm:$0xff] %vm770_vm0, %v4423_v6 }
 0x37a   : > { %9861 = vst.msk [vmem:[%s13690_s15 + $0x780] sm:$0xff] %vm770_vm0, %v4890_v1  ;;  %v12144_v36 = vpop.f32.mrf.mxu0 }
 0x37b   : > { %v12272_v58 = vpop.f32.mrf.mxu1  ;;  %9784 = vst.msk [vmem:[%s14286_s16 + $0x598] sm:$0xff] %vm770_vm0, %v12144_v36 }
 0x37c   : > { %9864 = vst.msk [vmem:[%s13690_s15 + $0x798] sm:$0xff] %vm770_vm0, %v12272_v58  ;;  %v4433_v45 = vpop.f32.mrf.mxu0 }
 0x37d   : > { %v4900_v24 = vpop.f32.mrf.mxu1  ;;  %9783 = vst.msk [vmem:[%s14286_s16 + $0x590] sm:$0xff] %vm770_vm0, %v4433_v45 }
 0x37e   : > { %9863 = vst.msk [vmem:[%s13690_s15 + $0x790] sm:$0xff] %vm770_vm0, %v4900_v24  ;;  %v12147_v59 = vpop.f32.mrf.mxu0 }
 0x37f   : > { %v12275_v54 = vpop.f32.mrf.mxu1  ;;  %9786 = vst.msk [vmem:[%s14286_s16 + $0x5a8] sm:$0xff] %vm770_vm0, %v12147_v59 }
 0x380   : > { %9866 = vst.msk [vmem:[%s13690_s15 + $0x7a8] sm:$0xff] %vm770_vm0, %v12275_v54  ;;  %v4443_v29 = vpop.f32.mrf.mxu0 }
 0x381   : > { %v4910_v19 = vpop.f32.mrf.mxu1  ;;  %9785 = vst.msk [vmem:[%s14286_s16 + $0x5a0] sm:$0xff] %vm770_vm0, %v4443_v29 }
 0x382   : > { %9865 = vst.msk [vmem:[%s13690_s15 + $0x7a0] sm:$0xff] %vm770_vm0, %v4910_v19  ;;  %v12150_v50 = vpop.f32.mrf.mxu0 }
 0x383   : > { %v12278_v12 = vpop.f32.mrf.mxu1  ;;  %9788 = vst.msk [vmem:[%s14286_s16 + $0x5b8] sm:$0xff] %vm770_vm0, %v12150_v50 }
 0x384   : > { %9868 = vst.msk [vmem:[%s13690_s15 + $0x7b8] sm:$0xff] %vm770_vm0, %v12278_v12  ;;  %v4453_v44 = vpop.f32.mrf.mxu0 }
 0x385   : > { %v4920_v56 = vpop.f32.mrf.mxu1  ;;  %9787 = vst.msk [vmem:[%s14286_s16 + $0x5b0] sm:$0xff] %vm770_vm0, %v4453_v44 }
 0x386   : > { %9867 = vst.msk [vmem:[%s13690_s15 + $0x7b0] sm:$0xff] %vm770_vm0, %v4920_v56  ;;  %v12153_v22 = vpop.f32.mrf.mxu0 }
 0x387   : > { %v12281_v3 = vpop.f32.mrf.mxu1  ;;  %9790 = vst.msk [vmem:[%s14286_s16 + $0x5c8] sm:$0xff] %vm770_vm0, %v12153_v22 }
 0x388   : > { %9870 = vst.msk [vmem:[%s13690_s15 + $0x7c8] sm:$0xff] %vm770_vm0, %v12281_v3  ;;  %v4463_v33 = vpop.f32.mrf.mxu0 }
 0x389   : > { %v4930_v61 = vpop.f32.mrf.mxu1  ;;  %9789 = vst.msk [vmem:[%s14286_s16 + $0x5c0] sm:$0xff] %vm770_vm0, %v4463_v33 }
 0x38a   : > { %9869 = vst.msk [vmem:[%s13690_s15 + $0x7c0] sm:$0xff] %vm770_vm0, %v4930_v61  ;;  %v12156_v13 = vpop.f32.mrf.mxu0 }
 0x38b   : > { %v12284_v51 = vpop.f32.mrf.mxu1  ;;  %9792 = vst.msk [vmem:[%s14286_s16 + $0x5d8] sm:$0xff] %vm770_vm0, %v12156_v13 }
 0x38c   : > { %9872 = vst.msk [vmem:[%s13690_s15 + $0x7d8] sm:$0xff] %vm770_vm0, %v12284_v51  ;;  %v4473_v48 = vpop.f32.mrf.mxu0 }
 0x38d   : > { %v4940_v43 = vpop.f32.mrf.mxu1  ;;  %9791 = vst.msk [vmem:[%s14286_s16 + $0x5d0] sm:$0xff] %vm770_vm0, %v4473_v48 }
 0x38e   : > { %9871 = vst.msk [vmem:[%s13690_s15 + $0x7d0] sm:$0xff] %vm770_vm0, %v4940_v43  ;;  %v12159_v7 = vpop.f32.mrf.mxu0 }
 0x38f   : > { %v12287_v4 = vpop.f32.mrf.mxu1  ;;  %9794 = vst.msk [vmem:[%s14286_s16 + $0x5e8] sm:$0xff] %vm770_vm0, %v12159_v7 }
 0x390   : > { %9874 = vst.msk [vmem:[%s13690_s15 + $0x7e8] sm:$0xff] %vm770_vm0, %v12287_v4  ;;  %v4483_v30 = vpop.f32.mrf.mxu0 }
 0x391   : > { %v4950_v40 = vpop.f32.mrf.mxu1  ;;  %9793 = vst.msk [vmem:[%s14286_s16 + $0x5e0] sm:$0xff] %vm770_vm0, %v4483_v30 }
 0x392   : > { %9873 = vst.msk [vmem:[%s13690_s15 + $0x7e0] sm:$0xff] %vm770_vm0, %v4950_v40  ;;  %v12162_v17 = vpop.f32.mrf.mxu0 }
 0x393   : > { %v12290_v25 = vpop.f32.mrf.mxu1  ;;  %9796 = vst.msk [vmem:[%s14286_s16 + $0x5f8] sm:$0xff] %vm770_vm0, %v12162_v17 }
 0x394   : > { %9876 = vst.msk [vmem:[%s13690_s15 + $0x7f8] sm:$0xff] %vm770_vm0, %v12290_v25  ;;  %v4493_v11 = vpop.f32.mrf.mxu0 }
 0x395   : > { %v4960_v21 = vpop.f32.mrf.mxu1  ;;  %9795 = vst.msk [vmem:[%s14286_s16 + $0x5f0] sm:$0xff] %vm770_vm0, %v4493_v11 }
 0x396   : > { %9875 = vst.msk [vmem:[%s13690_s15 + $0x7f0] sm:$0xff] %vm770_vm0, %v4960_v21  ;;  %v12325_v34 = vpop.f32.mrf.mxu0 }
 0x397   : > { %v12453_v53 = vpop.f32.mrf.mxu1  ;;  %9894 = vst.msk [vmem:[%s13695_s30 + $0x608] sm:$0xff] %vm770_vm0, %v12325_v34 }
 0x398   : > { %9974 = vst.msk [vmem:[%s14286_s16 + $0x608] sm:$0xff] %vm770_vm0, %v12453_v53  ;;  %v5117_v57 = vpop.f32.mrf.mxu0 }
 0x399   : > { %v5584_v46 = vpop.f32.mrf.mxu1  ;;  %9893 = vst.msk [vmem:[%s13695_s30 + $0x600] sm:$0xff] %vm770_vm0, %v5117_v57 }
 0x39a   : > { %9973 = vst.msk [vmem:[%s14286_s16 + $0x600] sm:$0xff] %vm770_vm0, %v5584_v46  ;;  %v12328_v23 = vpop.f32.mrf.mxu0 }
 0x39b   : > { %v12456_v39 = vpop.f32.mrf.mxu1  ;;  %9896 = vst.msk [vmem:[%s13695_s30 + $0x618] sm:$0xff] %vm770_vm0, %v12328_v23 }
 0x39c   : > { %9976 = vst.msk [vmem:[%s14286_s16 + $0x618] sm:$0xff] %vm770_vm0, %v12456_v39  ;;  %v5127_v52 = vpop.f32.mrf.mxu0 }
 0x39d   : > { %v5594_v15 = vpop.f32.mrf.mxu1  ;;  %9895 = vst.msk [vmem:[%s13695_s30 + $0x610] sm:$0xff] %vm770_vm0, %v5127_v52 }
 0x39e   : > { %9975 = vst.msk [vmem:[%s14286_s16 + $0x610] sm:$0xff] %vm770_vm0, %v5594_v15  ;;  %v12331_v18 = vpop.f32.mrf.mxu0 }
 0x39f   : > { %v12459_v41 = vpop.f32.mrf.mxu1  ;;  %9898 = vst.msk [vmem:[%s13695_s30 + $0x628] sm:$0xff] %vm770_vm0, %v12331_v18 }
 0x3a0   : > { %9978 = vst.msk [vmem:[%s14286_s16 + $0x628] sm:$0xff] %vm770_vm0, %v12459_v41  ;;  %v5137_v20 = vpop.f32.mrf.mxu0 }
 0x3a1   : > { %v5604_v26 = vpop.f32.mrf.mxu1  ;;  %9897 = vst.msk [vmem:[%s13695_s30 + $0x620] sm:$0xff] %vm770_vm0, %v5137_v20 }
 0x3a2   : > { %9977 = vst.msk [vmem:[%s14286_s16 + $0x620] sm:$0xff] %vm770_vm0, %v5604_v26  ;;  %v12334_v37 = vpop.f32.mrf.mxu0 }
 0x3a3   : > { %v12462_v31 = vpop.f32.mrf.mxu1  ;;  %9900 = vst.msk [vmem:[%s13695_s30 + $0x638] sm:$0xff] %vm770_vm0, %v12334_v37 }
 0x3a4   : > { %9980 = vst.msk [vmem:[%s14286_s16 + $0x638] sm:$0xff] %vm770_vm0, %v12462_v31  ;;  %v5147_v5 = vpop.f32.mrf.mxu0 }
 0x3a5   : > { %v5614_v35 = vpop.f32.mrf.mxu1  ;;  %9899 = vst.msk [vmem:[%s13695_s30 + $0x630] sm:$0xff] %vm770_vm0, %v5147_v5 }
 0x3a6   : > { %9979 = vst.msk [vmem:[%s14286_s16 + $0x630] sm:$0xff] %vm770_vm0, %v5614_v35  ;;  %v12337_v27 = vpop.f32.mrf.mxu0 }
 0x3a7   : > { %v12465_v16 = vpop.f32.mrf.mxu1  ;;  %9902 = vst.msk [vmem:[%s13695_s30 + $0x648] sm:$0xff] %vm770_vm0, %v12337_v27 }
 0x3a8   : > { %9982 = vst.msk [vmem:[%s14286_s16 + $0x648] sm:$0xff] %vm770_vm0, %v12465_v16  ;;  %v5157_v38 = vpop.f32.mrf.mxu0 }
 0x3a9   : > { %v5624_v28 = vpop.f32.mrf.mxu1  ;;  %9901 = vst.msk [vmem:[%s13695_s30 + $0x640] sm:$0xff] %vm770_vm0, %v5157_v38 }
 0x3aa   : > { %9981 = vst.msk [vmem:[%s14286_s16 + $0x640] sm:$0xff] %vm770_vm0, %v5624_v28  ;;  %v12340_v10 = vpop.f32.mrf.mxu0 }
 0x3ab   : > { %v12468_v49 = vpop.f32.mrf.mxu1  ;;  %9904 = vst.msk [vmem:[%s13695_s30 + $0x658] sm:$0xff] %vm770_vm0, %v12340_v10 }
 0x3ac   : > { %9984 = vst.msk [vmem:[%s14286_s16 + $0x658] sm:$0xff] %vm770_vm0, %v12468_v49  ;;  %v5167_v8 = vpop.f32.mrf.mxu0 }
 0x3ad   : > { %v5634_v9 = vpop.f32.mrf.mxu1  ;;  %9903 = vst.msk [vmem:[%s13695_s30 + $0x650] sm:$0xff] %vm770_vm0, %v5167_v8 }
 0x3ae   : > { %9983 = vst.msk [vmem:[%s14286_s16 + $0x650] sm:$0xff] %vm770_vm0, %v5634_v9  ;;  %v12343_v47 = vpop.f32.mrf.mxu0 }
 0x3af   : > { %v12471_v63 = vpop.f32.mrf.mxu1  ;;  %9906 = vst.msk [vmem:[%s13695_s30 + $0x668] sm:$0xff] %vm770_vm0, %v12343_v47 }
 0x3b0   : > { %9986 = vst.msk [vmem:[%s14286_s16 + $0x668] sm:$0xff] %vm770_vm0, %v12471_v63  ;;  %v5177_v62 = vpop.f32.mrf.mxu0 }
 0x3b1   : > { %v5644_v32 = vpop.f32.mrf.mxu1  ;;  %9905 = vst.msk [vmem:[%s13695_s30 + $0x660] sm:$0xff] %vm770_vm0, %v5177_v62 }
 0x3b2   : > { %9985 = vst.msk [vmem:[%s14286_s16 + $0x660] sm:$0xff] %vm770_vm0, %v5644_v32  ;;  %v12346_v14 = vpop.f32.mrf.mxu0 }
 0x3b3   : > { %v12474_v0 = vpop.f32.mrf.mxu1  ;;  %9908 = vst.msk [vmem:[%s13695_s30 + $0x678] sm:$0xff] %vm770_vm0, %v12346_v14 }
 0x3b4   : > { %9988 = vst.msk [vmem:[%s14286_s16 + $0x678] sm:$0xff] %vm770_vm0, %v12474_v0  ;;  %v5187_v42 = vpop.f32.mrf.mxu0 }
 0x3b5   : > { %v5654_v55 = vpop.f32.mrf.mxu1  ;;  %9907 = vst.msk [vmem:[%s13695_s30 + $0x670] sm:$0xff] %vm770_vm0, %v5187_v42 }
 0x3b6   : > { %9987 = vst.msk [vmem:[%s14286_s16 + $0x670] sm:$0xff] %vm770_vm0, %v5654_v55  ;;  %v12349_v2 = vpop.f32.mrf.mxu0 }
 0x3b7   : > { %v12477_v60 = vpop.f32.mrf.mxu1  ;;  %9910 = vst.msk [vmem:[%s13695_s30 + $0x688] sm:$0xff] %vm770_vm0, %v12349_v2 }
 0x3b8   : > { %9990 = vst.msk [vmem:[%s14286_s16 + $0x688] sm:$0xff] %vm770_vm0, %v12477_v60  ;;  %v5197_v6 = vpop.f32.mrf.mxu0 }
 0x3b9   : > { %v5664_v1 = vpop.f32.mrf.mxu1  ;;  %9909 = vst.msk [vmem:[%s13695_s30 + $0x680] sm:$0xff] %vm770_vm0, %v5197_v6 }
 0x3ba   : > { %9989 = vst.msk [vmem:[%s14286_s16 + $0x680] sm:$0xff] %vm770_vm0, %v5664_v1  ;;  %v12352_v36 = vpop.f32.mrf.mxu0 }
 0x3bb   : > { %v12480_v58 = vpop.f32.mrf.mxu1  ;;  %9912 = vst.msk [vmem:[%s13695_s30 + $0x698] sm:$0xff] %vm770_vm0, %v12352_v36 }
 0x3bc   : > { %9992 = vst.msk [vmem:[%s14286_s16 + $0x698] sm:$0xff] %vm770_vm0, %v12480_v58  ;;  %v5207_v45 = vpop.f32.mrf.mxu0 }
 0x3bd   : > { %v5674_v24 = vpop.f32.mrf.mxu1  ;;  %9911 = vst.msk [vmem:[%s13695_s30 + $0x690] sm:$0xff] %vm770_vm0, %v5207_v45 }
 0x3be   : > { %9991 = vst.msk [vmem:[%s14286_s16 + $0x690] sm:$0xff] %vm770_vm0, %v5674_v24  ;;  %v12355_v59 = vpop.f32.mrf.mxu0 }
 0x3bf   : > { %v12483_v54 = vpop.f32.mrf.mxu1  ;;  %9914 = vst.msk [vmem:[%s13695_s30 + $0x6a8] sm:$0xff] %vm770_vm0, %v12355_v59 }
 0x3c0   : > { %9994 = vst.msk [vmem:[%s14286_s16 + $0x6a8] sm:$0xff] %vm770_vm0, %v12483_v54  ;;  %v5217_v29 = vpop.f32.mrf.mxu0 }
 0x3c1   : > { %v5684_v19 = vpop.f32.mrf.mxu1  ;;  %9913 = vst.msk [vmem:[%s13695_s30 + $0x6a0] sm:$0xff] %vm770_vm0, %v5217_v29 }
 0x3c2   : > { %9993 = vst.msk [vmem:[%s14286_s16 + $0x6a0] sm:$0xff] %vm770_vm0, %v5684_v19  ;;  %v12358_v50 = vpop.f32.mrf.mxu0 }
 0x3c3   : > { %v12486_v12 = vpop.f32.mrf.mxu1  ;;  %9916 = vst.msk [vmem:[%s13695_s30 + $0x6b8] sm:$0xff] %vm770_vm0, %v12358_v50 }
 0x3c4   : > { %9996 = vst.msk [vmem:[%s14286_s16 + $0x6b8] sm:$0xff] %vm770_vm0, %v12486_v12  ;;  %v5227_v44 = vpop.f32.mrf.mxu0 }
 0x3c5   : > { %v5694_v56 = vpop.f32.mrf.mxu1  ;;  %9915 = vst.msk [vmem:[%s13695_s30 + $0x6b0] sm:$0xff] %vm770_vm0, %v5227_v44 }
 0x3c6   : > { %9995 = vst.msk [vmem:[%s14286_s16 + $0x6b0] sm:$0xff] %vm770_vm0, %v5694_v56  ;;  %v12361_v22 = vpop.f32.mrf.mxu0 }
 0x3c7   : > { %v12489_v3 = vpop.f32.mrf.mxu1  ;;  %9918 = vst.msk [vmem:[%s13695_s30 + $0x6c8] sm:$0xff] %vm770_vm0, %v12361_v22 }
 0x3c8   : > { %9998 = vst.msk [vmem:[%s14286_s16 + $0x6c8] sm:$0xff] %vm770_vm0, %v12489_v3  ;;  %v5237_v33 = vpop.f32.mrf.mxu0 }
 0x3c9   : > { %v5704_v61 = vpop.f32.mrf.mxu1  ;;  %9917 = vst.msk [vmem:[%s13695_s30 + $0x6c0] sm:$0xff] %vm770_vm0, %v5237_v33 }
 0x3ca   : > { %9997 = vst.msk [vmem:[%s14286_s16 + $0x6c0] sm:$0xff] %vm770_vm0, %v5704_v61  ;;  %v12364_v13 = vpop.f32.mrf.mxu0 }
 0x3cb   : > { %v12492_v51 = vpop.f32.mrf.mxu1  ;;  %9920 = vst.msk [vmem:[%s13695_s30 + $0x6d8] sm:$0xff] %vm770_vm0, %v12364_v13 }
 0x3cc   : > { %10000 = vst.msk [vmem:[%s14286_s16 + $0x6d8] sm:$0xff] %vm770_vm0, %v12492_v51  ;;  %v5247_v48 = vpop.f32.mrf.mxu0 }
 0x3cd   : > { %v5714_v43 = vpop.f32.mrf.mxu1  ;;  %9919 = vst.msk [vmem:[%s13695_s30 + $0x6d0] sm:$0xff] %vm770_vm0, %v5247_v48 }
 0x3ce   : > { %9999 = vst.msk [vmem:[%s14286_s16 + $0x6d0] sm:$0xff] %vm770_vm0, %v5714_v43  ;;  %v12367_v7 = vpop.f32.mrf.mxu0 }
 0x3cf   : > { %v12495_v4 = vpop.f32.mrf.mxu1  ;;  %9922 = vst.msk [vmem:[%s13695_s30 + $0x6e8] sm:$0xff] %vm770_vm0, %v12367_v7 }
 0x3d0   : > { %10002 = vst.msk [vmem:[%s14286_s16 + $0x6e8] sm:$0xff] %vm770_vm0, %v12495_v4  ;;  %v5257_v30 = vpop.f32.mrf.mxu0 }
 0x3d1   : > { %v5724_v40 = vpop.f32.mrf.mxu1  ;;  %9921 = vst.msk [vmem:[%s13695_s30 + $0x6e0] sm:$0xff] %vm770_vm0, %v5257_v30 }
 0x3d2   : > { %10001 = vst.msk [vmem:[%s14286_s16 + $0x6e0] sm:$0xff] %vm770_vm0, %v5724_v40  ;;  %v12370_v17 = vpop.f32.mrf.mxu0 }
 0x3d3   : > { %v12498_v25 = vpop.f32.mrf.mxu1  ;;  %9924 = vst.msk [vmem:[%s13695_s30 + $0x6f8] sm:$0xff] %vm770_vm0, %v12370_v17 }
 0x3d4   : > { %10004 = vst.msk [vmem:[%s14286_s16 + $0x6f8] sm:$0xff] %vm770_vm0, %v12498_v25  ;;  %v5267_v11 = vpop.f32.mrf.mxu0 }
 0x3d5   : > { %v5734_v21 = vpop.f32.mrf.mxu1  ;;  %9923 = vst.msk [vmem:[%s13695_s30 + $0x6f0] sm:$0xff] %vm770_vm0, %v5267_v11 }
 0x3d6   : > { %10003 = vst.msk [vmem:[%s14286_s16 + $0x6f0] sm:$0xff] %vm770_vm0, %v5734_v21  ;;  %v12373_v34 = vpop.f32.mrf.mxu0 }
 0x3d7   : > { %v12501_v53 = vpop.f32.mrf.mxu1  ;;  %9926 = vst.msk [vmem:[%s13695_s30 + $0x708] sm:$0xff] %vm770_vm0, %v12373_v34  ;;  %v6526_v34 = vld [vmem:[%s13690_s15] sm:$0xff] (%p12951_p9) }
 0x3d8   : > { %10006 = vst.msk [vmem:[%s14286_s16 + $0x708] sm:$0xff] %vm770_vm0, %v12501_v53  ;;  %v5277_v57 = vpop.f32.mrf.mxu0  ;;  %v6528_v53 = vld [vmem:[%s13690_s15 + $0x8] sm:$0xff] (%p12951_p9)  ;;  %6527 = vst [vmem:[%s16506_s12] sm:$0xff] (%p12951_p9), %v6526_v34  ;;  %v6654_v34 = vld [vmem:[%s13690_s15 + $0x200] sm:$0xff] (%p12951_p9) }
 0x3d9   : > { %v5744_v46 = vpop.f32.mrf.mxu1  ;;  %9925 = vst.msk [vmem:[%s13695_s30 + $0x700] sm:$0xff] %vm770_vm0, %v5277_v57  ;;  %v6530_v57 = vld [vmem:[%s13690_s15 + $0x10] sm:$0xff] (%p12951_p9)  ;;  %6529 = vst [vmem:[%s16506_s12 + $0x8] sm:$0xff] (%p12951_p9), %v6528_v53  ;;  %v6656_v53 = vld [vmem:[%s13690_s15 + $0x208] sm:$0xff] (%p12951_p9) }
 0x3da   : > { %10005 = vst.msk [vmem:[%s14286_s16 + $0x700] sm:$0xff] %vm770_vm0, %v5744_v46  ;;  %v12376_v23 = vpop.f32.mrf.mxu0  ;;  %v6532_v46 = vld [vmem:[%s13690_s15 + $0x18] sm:$0xff] (%p12951_p9)  ;;  %6531 = vst [vmem:[%s16506_s12 + $0x10] sm:$0xff] (%p12951_p9), %v6530_v57  ;;  %v6658_v57 = vld [vmem:[%s13690_s15 + $0x210] sm:$0xff] (%p12951_p9) }
 0x3db   : > { %v12504_v39 = vpop.f32.mrf.mxu1  ;;  %9928 = vst.msk [vmem:[%s13695_s30 + $0x718] sm:$0xff] %vm770_vm0, %v12376_v23  ;;  %v6534_v23 = vld [vmem:[%s13690_s15 + $0x20] sm:$0xff] (%p12951_p9)  ;;  %6533 = vst [vmem:[%s16506_s12 + $0x18] sm:$0xff] (%p12951_p9), %v6532_v46  ;;  %v6660_v46 = vld [vmem:[%s13690_s15 + $0x218] sm:$0xff] (%p12951_p9) }
 0x3dc   : > { %10008 = vst.msk [vmem:[%s14286_s16 + $0x718] sm:$0xff] %vm770_vm0, %v12504_v39  ;;  %v5287_v52 = vpop.f32.mrf.mxu0  ;;  %v6536_v39 = vld [vmem:[%s13690_s15 + $0x28] sm:$0xff] (%p12951_p9)  ;;  %6535 = vst [vmem:[%s16506_s12 + $0x20] sm:$0xff] (%p12951_p9), %v6534_v23  ;;  %v6662_v23 = vld [vmem:[%s13690_s15 + $0x220] sm:$0xff] (%p12951_p9) }
 0x3dd   : > { %v5754_v15 = vpop.f32.mrf.mxu1  ;;  %9927 = vst.msk [vmem:[%s13695_s30 + $0x710] sm:$0xff] %vm770_vm0, %v5287_v52  ;;  %v6538_v52 = vld [vmem:[%s13690_s15 + $0x30] sm:$0xff] (%p12951_p9)  ;;  %6537 = vst [vmem:[%s16506_s12 + $0x28] sm:$0xff] (%p12951_p9), %v6536_v39  ;;  %v6664_v39 = vld [vmem:[%s13690_s15 + $0x228] sm:$0xff] (%p12951_p9) }
 0x3de   : > { %10007 = vst.msk [vmem:[%s14286_s16 + $0x710] sm:$0xff] %vm770_vm0, %v5754_v15  ;;  %v12379_v18 = vpop.f32.mrf.mxu0  ;;  %v6540_v15 = vld [vmem:[%s13690_s15 + $0x38] sm:$0xff] (%p12951_p9)  ;;  %6539 = vst [vmem:[%s16506_s12 + $0x30] sm:$0xff] (%p12951_p9), %v6538_v52  ;;  %v6666_v52 = vld [vmem:[%s13690_s15 + $0x230] sm:$0xff] (%p12951_p9) }
 0x3df   : > { %v12507_v41 = vpop.f32.mrf.mxu1  ;;  %9930 = vst.msk [vmem:[%s13695_s30 + $0x728] sm:$0xff] %vm770_vm0, %v12379_v18  ;;  %v6542_v18 = vld [vmem:[%s13690_s15 + $0x40] sm:$0xff] (%p12951_p9)  ;;  %6541 = vst [vmem:[%s16506_s12 + $0x38] sm:$0xff] (%p12951_p9), %v6540_v15  ;;  %v6668_v15 = vld [vmem:[%s13690_s15 + $0x238] sm:$0xff] (%p12951_p9) }
 0x3e0   : > { %10010 = vst.msk [vmem:[%s14286_s16 + $0x728] sm:$0xff] %vm770_vm0, %v12507_v41  ;;  %v5297_v20 = vpop.f32.mrf.mxu0  ;;  %v6544_v41 = vld [vmem:[%s13690_s15 + $0x48] sm:$0xff] (%p12951_p9)  ;;  %6543 = vst [vmem:[%s16506_s12 + $0x40] sm:$0xff] (%p12951_p9), %v6542_v18  ;;  %v6670_v18 = vld [vmem:[%s13690_s15 + $0x240] sm:$0xff] (%p12951_p9) }
 0x3e1   : > { %v5764_v26 = vpop.f32.mrf.mxu1  ;;  %9929 = vst.msk [vmem:[%s13695_s30 + $0x720] sm:$0xff] %vm770_vm0, %v5297_v20  ;;  %v6546_v20 = vld [vmem:[%s13690_s15 + $0x50] sm:$0xff] (%p12951_p9)  ;;  %6545 = vst [vmem:[%s16506_s12 + $0x48] sm:$0xff] (%p12951_p9), %v6544_v41  ;;  %v6672_v41 = vld [vmem:[%s13690_s15 + $0x248] sm:$0xff] (%p12951_p9) }
 0x3e2   : > { %10009 = vst.msk [vmem:[%s14286_s16 + $0x720] sm:$0xff] %vm770_vm0, %v5764_v26  ;;  %v12382_v37 = vpop.f32.mrf.mxu0  ;;  %v6548_v26 = vld [vmem:[%s13690_s15 + $0x58] sm:$0xff] (%p12951_p9)  ;;  %6547 = vst [vmem:[%s16506_s12 + $0x50] sm:$0xff] (%p12951_p9), %v6546_v20  ;;  %v6674_v20 = vld [vmem:[%s13690_s15 + $0x250] sm:$0xff] (%p12951_p9) }
 0x3e3   : > { %v12510_v31 = vpop.f32.mrf.mxu1  ;;  %9932 = vst.msk [vmem:[%s13695_s30 + $0x738] sm:$0xff] %vm770_vm0, %v12382_v37  ;;  %6549 = vst [vmem:[%s16506_s12 + $0x58] sm:$0xff] (%p12951_p9), %v6548_v26  ;;  %v6550_v37 = vld [vmem:[%s13690_s15 + $0x60] sm:$0xff] (%p12951_p9)  ;;  %v6676_v26 = vld [vmem:[%s13690_s15 + $0x258] sm:$0xff] (%p12951_p9) }
 0x3e4   : > { %10012 = vst.msk [vmem:[%s14286_s16 + $0x738] sm:$0xff] %vm770_vm0, %v12510_v31  ;;  %v5307_v5 = vpop.f32.mrf.mxu0  ;;  %v6552_v31 = vld [vmem:[%s13690_s15 + $0x68] sm:$0xff] (%p12951_p9)  ;;  %6551 = vst [vmem:[%s16506_s12 + $0x60] sm:$0xff] (%p12951_p9), %v6550_v37  ;;  %v6678_v37 = vld [vmem:[%s13690_s15 + $0x260] sm:$0xff] (%p12951_p9) }
 0x3e5   : > { %v5774_v35 = vpop.f32.mrf.mxu1  ;;  %9931 = vst.msk [vmem:[%s13695_s30 + $0x730] sm:$0xff] %vm770_vm0, %v5307_v5  ;;  %v6554_v5 = vld [vmem:[%s13690_s15 + $0x70] sm:$0xff] (%p12951_p9)  ;;  %6553 = vst [vmem:[%s16506_s12 + $0x68] sm:$0xff] (%p12951_p9), %v6552_v31  ;;  %v6680_v31 = vld [vmem:[%s13690_s15 + $0x268] sm:$0xff] (%p12951_p9) }
 0x3e6   : > { %10011 = vst.msk [vmem:[%s14286_s16 + $0x730] sm:$0xff] %vm770_vm0, %v5774_v35  ;;  %v12385_v27 = vpop.f32.mrf.mxu0  ;;  %6555 = vst [vmem:[%s16506_s12 + $0x70] sm:$0xff] (%p12951_p9), %v6554_v5  ;;  %v6556_v35 = vld [vmem:[%s13690_s15 + $0x78] sm:$0xff] (%p12951_p9)  ;;  %v6682_v5 = vld [vmem:[%s13690_s15 + $0x270] sm:$0xff] (%p12951_p9) }
 0x3e7   : > { %v12513_v16 = vpop.f32.mrf.mxu1  ;;  %9934 = vst.msk [vmem:[%s13695_s30 + $0x748] sm:$0xff] %vm770_vm0, %v12385_v27  ;;  %v6558_v27 = vld [vmem:[%s13690_s15 + $0x80] sm:$0xff] (%p12951_p9)  ;;  %6557 = vst [vmem:[%s16506_s12 + $0x78] sm:$0xff] (%p12951_p9), %v6556_v35  ;;  %v6684_v35 = vld [vmem:[%s13690_s15 + $0x278] sm:$0xff] (%p12951_p9) }
 0x3e8   : > { %10014 = vst.msk [vmem:[%s14286_s16 + $0x748] sm:$0xff] %vm770_vm0, %v12513_v16  ;;  %v5317_v38 = vpop.f32.mrf.mxu0  ;;  %v6560_v16 = vld [vmem:[%s13690_s15 + $0x88] sm:$0xff] (%p12951_p9)  ;;  %6559 = vst [vmem:[%s16506_s12 + $0x80] sm:$0xff] (%p12951_p9), %v6558_v27  ;;  %v6686_v27 = vld [vmem:[%s13690_s15 + $0x280] sm:$0xff] (%p12951_p9) }
 0x3e9   : > { %v5784_v28 = vpop.f32.mrf.mxu1  ;;  %9933 = vst.msk [vmem:[%s13695_s30 + $0x740] sm:$0xff] %vm770_vm0, %v5317_v38  ;;  %6561 = vst [vmem:[%s16506_s12 + $0x88] sm:$0xff] (%p12951_p9), %v6560_v16  ;;  %v6562_v38 = vld [vmem:[%s13690_s15 + $0x90] sm:$0xff] (%p12951_p9)  ;;  %v6688_v16 = vld [vmem:[%s13690_s15 + $0x288] sm:$0xff] (%p12951_p9) }
 0x3ea   : > { %10013 = vst.msk [vmem:[%s14286_s16 + $0x740] sm:$0xff] %vm770_vm0, %v5784_v28  ;;  %v12388_v10 = vpop.f32.mrf.mxu0  ;;  %v6564_v28 = vld [vmem:[%s13690_s15 + $0x98] sm:$0xff] (%p12951_p9)  ;;  %6563 = vst [vmem:[%s16506_s12 + $0x90] sm:$0xff] (%p12951_p9), %v6562_v38  ;;  %v6690_v38 = vld [vmem:[%s13690_s15 + $0x290] sm:$0xff] (%p12951_p9) }
 0x3eb   : > { %v12516_v49 = vpop.f32.mrf.mxu1  ;;  %9936 = vst.msk [vmem:[%s13695_s30 + $0x758] sm:$0xff] %vm770_vm0, %v12388_v10  ;;  %v6566_v10 = vld [vmem:[%s13690_s15 + $0xa0] sm:$0xff] (%p12951_p9)  ;;  %6565 = vst [vmem:[%s16506_s12 + $0x98] sm:$0xff] (%p12951_p9), %v6564_v28  ;;  %v6692_v28 = vld [vmem:[%s13690_s15 + $0x298] sm:$0xff] (%p12951_p9) }
 0x3ec   : > { %10016 = vst.msk [vmem:[%s14286_s16 + $0x758] sm:$0xff] %vm770_vm0, %v12516_v49  ;;  %v5327_v8 = vpop.f32.mrf.mxu0  ;;  %6567 = vst [vmem:[%s16506_s12 + $0xa0] sm:$0xff] (%p12951_p9), %v6566_v10  ;;  %v6568_v49 = vld [vmem:[%s13690_s15 + $0xa8] sm:$0xff] (%p12951_p9)  ;;  %v6694_v10 = vld [vmem:[%s13690_s15 + $0x2a0] sm:$0xff] (%p12951_p9) }
 0x3ed   : > { %v5794_v9 = vpop.f32.mrf.mxu1  ;;  %9935 = vst.msk [vmem:[%s13695_s30 + $0x750] sm:$0xff] %vm770_vm0, %v5327_v8  ;;  %v6570_v8 = vld [vmem:[%s13690_s15 + $0xb0] sm:$0xff] (%p12951_p9)  ;;  %6569 = vst [vmem:[%s16506_s12 + $0xa8] sm:$0xff] (%p12951_p9), %v6568_v49  ;;  %v6696_v49 = vld [vmem:[%s13690_s15 + $0x2a8] sm:$0xff] (%p12951_p9) }
 0x3ee   : > { %10015 = vst.msk [vmem:[%s14286_s16 + $0x750] sm:$0xff] %vm770_vm0, %v5794_v9  ;;  %v12391_v47 = vpop.f32.mrf.mxu0  ;;  %v6572_v9 = vld [vmem:[%s13690_s15 + $0xb8] sm:$0xff] (%p12951_p9)  ;;  %6571 = vst [vmem:[%s16506_s12 + $0xb0] sm:$0xff] (%p12951_p9), %v6570_v8  ;;  %v6698_v8 = vld [vmem:[%s13690_s15 + $0x2b0] sm:$0xff] (%p12951_p9) }
 0x3ef   : > { %v12519_v63 = vpop.f32.mrf.mxu1  ;;  %9938 = vst.msk [vmem:[%s13695_s30 + $0x768] sm:$0xff] %vm770_vm0, %v12391_v47  ;;  %6573 = vst [vmem:[%s16506_s12 + $0xb8] sm:$0xff] (%p12951_p9), %v6572_v9  ;;  %v6574_v47 = vld [vmem:[%s13690_s15 + $0xc0] sm:$0xff] (%p12951_p9)  ;;  %v6700_v9 = vld [vmem:[%s13690_s15 + $0x2b8] sm:$0xff] (%p12951_p9) }
 0x3f0   : > { %10018 = vst.msk [vmem:[%s14286_s16 + $0x768] sm:$0xff] %vm770_vm0, %v12519_v63  ;;  %v5337_v62 = vpop.f32.mrf.mxu0  ;;  %v6576_v63 = vld [vmem:[%s13690_s15 + $0xc8] sm:$0xff] (%p12951_p9)  ;;  %6575 = vst [vmem:[%s16506_s12 + $0xc0] sm:$0xff] (%p12951_p9), %v6574_v47  ;;  %v6702_v47 = vld [vmem:[%s13690_s15 + $0x2c0] sm:$0xff] (%p12951_p9) }
 0x3f1   : > { %v5804_v32 = vpop.f32.mrf.mxu1  ;;  %9937 = vst.msk [vmem:[%s13695_s30 + $0x760] sm:$0xff] %vm770_vm0, %v5337_v62  ;;  %v6578_v62 = vld [vmem:[%s13690_s15 + $0xd0] sm:$0xff] (%p12951_p9)  ;;  %6577 = vst [vmem:[%s16506_s12 + $0xc8] sm:$0xff] (%p12951_p9), %v6576_v63  ;;  %v6704_v63 = vld [vmem:[%s13690_s15 + $0x2c8] sm:$0xff] (%p12951_p9) }
 0x3f2   : > { %10017 = vst.msk [vmem:[%s14286_s16 + $0x760] sm:$0xff] %vm770_vm0, %v5804_v32  ;;  %v12394_v14 = vpop.f32.mrf.mxu0  ;;  %6579 = vst [vmem:[%s16506_s12 + $0xd0] sm:$0xff] (%p12951_p9), %v6578_v62  ;;  %v6580_v32 = vld [vmem:[%s13690_s15 + $0xd8] sm:$0xff] (%p12951_p9)  ;;  %v6706_v62 = vld [vmem:[%s13690_s15 + $0x2d0] sm:$0xff] (%p12951_p9) }
 0x3f3   : > { %v12522_v0 = vpop.f32.mrf.mxu1  ;;  %9940 = vst.msk [vmem:[%s13695_s30 + $0x778] sm:$0xff] %vm770_vm0, %v12394_v14  ;;  %v6582_v14 = vld [vmem:[%s13690_s15 + $0xe0] sm:$0xff] (%p12951_p9)  ;;  %6581 = vst [vmem:[%s16506_s12 + $0xd8] sm:$0xff] (%p12951_p9), %v6580_v32  ;;  %v6708_v32 = vld [vmem:[%s13690_s15 + $0x2d8] sm:$0xff] (%p12951_p9) }
 0x3f4   : > { %10020 = vst.msk [vmem:[%s14286_s16 + $0x778] sm:$0xff] %vm770_vm0, %v12522_v0  ;;  %v5347_v42 = vpop.f32.mrf.mxu0  ;;  %v6584_v0 = vld [vmem:[%s13690_s15 + $0xe8] sm:$0xff] (%p12951_p9)  ;;  %6583 = vst [vmem:[%s16506_s12 + $0xe0] sm:$0xff] (%p12951_p9), %v6582_v14  ;;  %v6710_v14 = vld [vmem:[%s13690_s15 + $0x2e0] sm:$0xff] (%p12951_p9) }
 0x3f5   : > { %v5814_v55 = vpop.f32.mrf.mxu1  ;;  %9939 = vst.msk [vmem:[%s13695_s30 + $0x770] sm:$0xff] %vm770_vm0, %v5347_v42  ;;  %6585 = vst [vmem:[%s16506_s12 + $0xe8] sm:$0xff] (%p12951_p9), %v6584_v0  ;;  %v6586_v42 = vld [vmem:[%s13690_s15 + $0xf0] sm:$0xff] (%p12951_p9)  ;;  %v6712_v0 = vld [vmem:[%s13690_s15 + $0x2e8] sm:$0xff] (%p12951_p9) }
 0x3f6   : > { %10019 = vst.msk [vmem:[%s14286_s16 + $0x770] sm:$0xff] %vm770_vm0, %v5814_v55  ;;  %v12397_v2 = vpop.f32.mrf.mxu0  ;;  %v6588_v55 = vld [vmem:[%s13690_s15 + $0xf8] sm:$0xff] (%p12951_p9)  ;;  %6587 = vst [vmem:[%s16506_s12 + $0xf0] sm:$0xff] (%p12951_p9), %v6586_v42  ;;  %v6714_v42 = vld [vmem:[%s13690_s15 + $0x2f0] sm:$0xff] (%p12951_p9) }
 0x3f7   : > { %v12525_v60 = vpop.f32.mrf.mxu1  ;;  %9942 = vst.msk [vmem:[%s13695_s30 + $0x788] sm:$0xff] %vm770_vm0, %v12397_v2  ;;  %v6590_v2 = vld [vmem:[%s13690_s15 + $0x100] sm:$0xff] (%p12951_p9)  ;;  %6589 = vst [vmem:[%s16506_s12 + $0xf8] sm:$0xff] (%p12951_p9), %v6588_v55  ;;  %v6716_v55 = vld [vmem:[%s13690_s15 + $0x2f8] sm:$0xff] (%p12951_p9) }
 0x3f8   : > { %10022 = vst.msk [vmem:[%s14286_s16 + $0x788] sm:$0xff] %vm770_vm0, %v12525_v60  ;;  %v5357_v6 = vpop.f32.mrf.mxu0  ;;  %6591 = vst [vmem:[%s16506_s12 + $0x100] sm:$0xff] (%p12951_p9), %v6590_v2  ;;  %v6592_v60 = vld [vmem:[%s13690_s15 + $0x108] sm:$0xff] (%p12951_p9)  ;;  %v6718_v2 = vld [vmem:[%s13690_s15 + $0x300] sm:$0xff] (%p12951_p9) }
 0x3f9   : > { %v5824_v1 = vpop.f32.mrf.mxu1  ;;  %9941 = vst.msk [vmem:[%s13695_s30 + $0x780] sm:$0xff] %vm770_vm0, %v5357_v6  ;;  %v6594_v6 = vld [vmem:[%s13690_s15 + $0x110] sm:$0xff] (%p12951_p9)  ;;  %6593 = vst [vmem:[%s16506_s12 + $0x108] sm:$0xff] (%p12951_p9), %v6592_v60  ;;  %v6720_v60 = vld [vmem:[%s13690_s15 + $0x308] sm:$0xff] (%p12951_p9) }
 0x3fa   : > { %10021 = vst.msk [vmem:[%s14286_s16 + $0x780] sm:$0xff] %vm770_vm0, %v5824_v1  ;;  %v12400_v36 = vpop.f32.mrf.mxu0  ;;  %v6596_v1 = vld [vmem:[%s13690_s15 + $0x118] sm:$0xff] (%p12951_p9)  ;;  %6595 = vst [vmem:[%s16506_s12 + $0x110] sm:$0xff] (%p12951_p9), %v6594_v6  ;;  %v6722_v6 = vld [vmem:[%s13690_s15 + $0x310] sm:$0xff] (%p12951_p9) }
 0x3fb   : > { %v12528_v58 = vpop.f32.mrf.mxu1  ;;  %9944 = vst.msk [vmem:[%s13695_s30 + $0x798] sm:$0xff] %vm770_vm0, %v12400_v36  ;;  %6597 = vst [vmem:[%s16506_s12 + $0x118] sm:$0xff] (%p12951_p9), %v6596_v1  ;;  %v6598_v36 = vld [vmem:[%s13690_s15 + $0x120] sm:$0xff] (%p12951_p9)  ;;  %v6724_v1 = vld [vmem:[%s13690_s15 + $0x318] sm:$0xff] (%p12951_p9) }
 0x3fc   : > { %10024 = vst.msk [vmem:[%s14286_s16 + $0x798] sm:$0xff] %vm770_vm0, %v12528_v58  ;;  %v5367_v45 = vpop.f32.mrf.mxu0  ;;  %v6600_v58 = vld [vmem:[%s13690_s15 + $0x128] sm:$0xff] (%p12951_p9)  ;;  %6599 = vst [vmem:[%s16506_s12 + $0x120] sm:$0xff] (%p12951_p9), %v6598_v36  ;;  %v6726_v36 = vld [vmem:[%s13690_s15 + $0x320] sm:$0xff] (%p12951_p9) }
 0x3fd   : > { %v5834_v24 = vpop.f32.mrf.mxu1  ;;  %9943 = vst.msk [vmem:[%s13695_s30 + $0x790] sm:$0xff] %vm770_vm0, %v5367_v45  ;;  %v6602_v45 = vld [vmem:[%s13690_s15 + $0x130] sm:$0xff] (%p12951_p9)  ;;  %6601 = vst [vmem:[%s16506_s12 + $0x128] sm:$0xff] (%p12951_p9), %v6600_v58  ;;  %v6728_v58 = vld [vmem:[%s13690_s15 + $0x328] sm:$0xff] (%p12951_p9) }
 0x3fe   : > { %10023 = vst.msk [vmem:[%s14286_s16 + $0x790] sm:$0xff] %vm770_vm0, %v5834_v24  ;;  %v12403_v59 = vpop.f32.mrf.mxu0  ;;  %6603 = vst [vmem:[%s16506_s12 + $0x130] sm:$0xff] (%p12951_p9), %v6602_v45  ;;  %v6604_v24 = vld [vmem:[%s13690_s15 + $0x138] sm:$0xff] (%p12951_p9)  ;;  %v6730_v45 = vld [vmem:[%s13690_s15 + $0x330] sm:$0xff] (%p12951_p9) }
 0x3ff   : > { %v12531_v54 = vpop.f32.mrf.mxu1  ;;  %9946 = vst.msk [vmem:[%s13695_s30 + $0x7a8] sm:$0xff] %vm770_vm0, %v12403_v59  ;;  %v6606_v59 = vld [vmem:[%s13690_s15 + $0x140] sm:$0xff] (%p12951_p9)  ;;  %6605 = vst [vmem:[%s16506_s12 + $0x138] sm:$0xff] (%p12951_p9), %v6604_v24  ;;  %v6732_v24 = vld [vmem:[%s13690_s15 + $0x338] sm:$0xff] (%p12951_p9) }
 0x400   : > { %10026 = vst.msk [vmem:[%s14286_s16 + $0x7a8] sm:$0xff] %vm770_vm0, %v12531_v54  ;;  %v5377_v29 = vpop.f32.mrf.mxu0  ;;  %v6608_v54 = vld [vmem:[%s13690_s15 + $0x148] sm:$0xff] (%p12951_p9)  ;;  %6607 = vst [vmem:[%s16506_s12 + $0x140] sm:$0xff] (%p12951_p9), %v6606_v59  ;;  %v6734_v59 = vld [vmem:[%s13690_s15 + $0x340] sm:$0xff] (%p12951_p9) }
 0x401   : > { %v5844_v19 = vpop.f32.mrf.mxu1  ;;  %9945 = vst.msk [vmem:[%s13695_s30 + $0x7a0] sm:$0xff] %vm770_vm0, %v5377_v29  ;;  %6609 = vst [vmem:[%s16506_s12 + $0x148] sm:$0xff] (%p12951_p9), %v6608_v54  ;;  %v6610_v29 = vld [vmem:[%s13690_s15 + $0x150] sm:$0xff] (%p12951_p9)  ;;  %v6736_v54 = vld [vmem:[%s13690_s15 + $0x348] sm:$0xff] (%p12951_p9) }
 0x402   : > { %10025 = vst.msk [vmem:[%s14286_s16 + $0x7a0] sm:$0xff] %vm770_vm0, %v5844_v19  ;;  %v12406_v50 = vpop.f32.mrf.mxu0  ;;  %v6612_v19 = vld [vmem:[%s13690_s15 + $0x158] sm:$0xff] (%p12951_p9)  ;;  %6611 = vst [vmem:[%s16506_s12 + $0x150] sm:$0xff] (%p12951_p9), %v6610_v29  ;;  %v6738_v29 = vld [vmem:[%s13690_s15 + $0x350] sm:$0xff] (%p12951_p9) }
 0x403   : > { %v12534_v12 = vpop.f32.mrf.mxu1  ;;  %9948 = vst.msk [vmem:[%s13695_s30 + $0x7b8] sm:$0xff] %vm770_vm0, %v12406_v50  ;;  %v6614_v50 = vld [vmem:[%s13690_s15 + $0x160] sm:$0xff] (%p12951_p9)  ;;  %6613 = vst [vmem:[%s16506_s12 + $0x158] sm:$0xff] (%p12951_p9), %v6612_v19  ;;  %v6740_v19 = vld [vmem:[%s13690_s15 + $0x358] sm:$0xff] (%p12951_p9) }
 0x404   : > { %10028 = vst.msk [vmem:[%s14286_s16 + $0x7b8] sm:$0xff] %vm770_vm0, %v12534_v12  ;;  %v5387_v44 = vpop.f32.mrf.mxu0  ;;  %6615 = vst [vmem:[%s16506_s12 + $0x160] sm:$0xff] (%p12951_p9), %v6614_v50  ;;  %v6616_v12 = vld [vmem:[%s13690_s15 + $0x168] sm:$0xff] (%p12951_p9)  ;;  %v6742_v50 = vld [vmem:[%s13690_s15 + $0x360] sm:$0xff] (%p12951_p9) }
 0x405   : > { %v5854_v56 = vpop.f32.mrf.mxu1  ;;  %9947 = vst.msk [vmem:[%s13695_s30 + $0x7b0] sm:$0xff] %vm770_vm0, %v5387_v44  ;;  %v6618_v44 = vld [vmem:[%s13690_s15 + $0x170] sm:$0xff] (%p12951_p9)  ;;  %6617 = vst [vmem:[%s16506_s12 + $0x168] sm:$0xff] (%p12951_p9), %v6616_v12  ;;  %v6744_v12 = vld [vmem:[%s13690_s15 + $0x368] sm:$0xff] (%p12951_p9) }
 0x406   : > { %10027 = vst.msk [vmem:[%s14286_s16 + $0x7b0] sm:$0xff] %vm770_vm0, %v5854_v56  ;;  %v12409_v22 = vpop.f32.mrf.mxu0  ;;  %v6620_v56 = vld [vmem:[%s13690_s15 + $0x178] sm:$0xff] (%p12951_p9)  ;;  %6619 = vst [vmem:[%s16506_s12 + $0x170] sm:$0xff] (%p12951_p9), %v6618_v44  ;;  %v6746_v44 = vld [vmem:[%s13690_s15 + $0x370] sm:$0xff] (%p12951_p9) }
 0x407   : > { %v12537_v3 = vpop.f32.mrf.mxu1  ;;  %9950 = vst.msk [vmem:[%s13695_s30 + $0x7c8] sm:$0xff] %vm770_vm0, %v12409_v22  ;;  %6621 = vst [vmem:[%s16506_s12 + $0x178] sm:$0xff] (%p12951_p9), %v6620_v56  ;;  %v6622_v22 = vld [vmem:[%s13690_s15 + $0x180] sm:$0xff] (%p12951_p9)  ;;  %v6748_v56 = vld [vmem:[%s13690_s15 + $0x378] sm:$0xff] (%p12951_p9) }
 0x408   : > { %10030 = vst.msk [vmem:[%s14286_s16 + $0x7c8] sm:$0xff] %vm770_vm0, %v12537_v3  ;;  %v5397_v33 = vpop.f32.mrf.mxu0  ;;  %v6624_v3 = vld [vmem:[%s13690_s15 + $0x188] sm:$0xff] (%p12951_p9)  ;;  %6623 = vst [vmem:[%s16506_s12 + $0x180] sm:$0xff] (%p12951_p9), %v6622_v22  ;;  %v6750_v22 = vld [vmem:[%s13690_s15 + $0x380] sm:$0xff] (%p12951_p9) }
 0x409   : > { %v5864_v61 = vpop.f32.mrf.mxu1  ;;  %9949 = vst.msk [vmem:[%s13695_s30 + $0x7c0] sm:$0xff] %vm770_vm0, %v5397_v33  ;;  %v6626_v33 = vld [vmem:[%s13690_s15 + $0x190] sm:$0xff] (%p12951_p9)  ;;  %6625 = vst [vmem:[%s16506_s12 + $0x188] sm:$0xff] (%p12951_p9), %v6624_v3  ;;  %v6752_v3 = vld [vmem:[%s13690_s15 + $0x388] sm:$0xff] (%p12951_p9) }
 0x40a   : > { %10029 = vst.msk [vmem:[%s14286_s16 + $0x7c0] sm:$0xff] %vm770_vm0, %v5864_v61  ;;  %v12412_v13 = vpop.f32.mrf.mxu0  ;;  %6627 = vst [vmem:[%s16506_s12 + $0x190] sm:$0xff] (%p12951_p9), %v6626_v33  ;;  %v6628_v61 = vld [vmem:[%s13690_s15 + $0x198] sm:$0xff] (%p12951_p9)  ;;  %v6754_v33 = vld [vmem:[%s13690_s15 + $0x390] sm:$0xff] (%p12951_p9) }
 0x40b   : > { %v12540_v51 = vpop.f32.mrf.mxu1  ;;  %9952 = vst.msk [vmem:[%s13695_s30 + $0x7d8] sm:$0xff] %vm770_vm0, %v12412_v13  ;;  %v6630_v13 = vld [vmem:[%s13690_s15 + $0x1a0] sm:$0xff] (%p12951_p9)  ;;  %6629 = vst [vmem:[%s16506_s12 + $0x198] sm:$0xff] (%p12951_p9), %v6628_v61  ;;  %v6756_v61 = vld [vmem:[%s13690_s15 + $0x398] sm:$0xff] (%p12951_p9) }
 0x40c   : > { %10032 = vst.msk [vmem:[%s14286_s16 + $0x7d8] sm:$0xff] %vm770_vm0, %v12540_v51  ;;  %v5407_v48 = vpop.f32.mrf.mxu0  ;;  %v6632_v51 = vld [vmem:[%s13690_s15 + $0x1a8] sm:$0xff] (%p12951_p9)  ;;  %6631 = vst [vmem:[%s16506_s12 + $0x1a0] sm:$0xff] (%p12951_p9), %v6630_v13  ;;  %v6758_v13 = vld [vmem:[%s13690_s15 + $0x3a0] sm:$0xff] (%p12951_p9) }
 0x40d   : > { %v5874_v43 = vpop.f32.mrf.mxu1  ;;  %9951 = vst.msk [vmem:[%s13695_s30 + $0x7d0] sm:$0xff] %vm770_vm0, %v5407_v48  ;;  %6633 = vst [vmem:[%s16506_s12 + $0x1a8] sm:$0xff] (%p12951_p9), %v6632_v51  ;;  %v6634_v48 = vld [vmem:[%s13690_s15 + $0x1b0] sm:$0xff] (%p12951_p9)  ;;  %v6760_v51 = vld [vmem:[%s13690_s15 + $0x3a8] sm:$0xff] (%p12951_p9) }
 0x40e   : > { %10031 = vst.msk [vmem:[%s14286_s16 + $0x7d0] sm:$0xff] %vm770_vm0, %v5874_v43  ;;  %v12415_v7 = vpop.f32.mrf.mxu0  ;;  %v6636_v43 = vld [vmem:[%s13690_s15 + $0x1b8] sm:$0xff] (%p12951_p9)  ;;  %6635 = vst [vmem:[%s16506_s12 + $0x1b0] sm:$0xff] (%p12951_p9), %v6634_v48  ;;  %v6762_v48 = vld [vmem:[%s13690_s15 + $0x3b0] sm:$0xff] (%p12951_p9) }
 0x40f   : > { %v12543_v4 = vpop.f32.mrf.mxu1  ;;  %9954 = vst.msk [vmem:[%s13695_s30 + $0x7e8] sm:$0xff] %vm770_vm0, %v12415_v7  ;;  %v6638_v7 = vld [vmem:[%s13690_s15 + $0x1c0] sm:$0xff] (%p12951_p9)  ;;  %6637 = vst [vmem:[%s16506_s12 + $0x1b8] sm:$0xff] (%p12951_p9), %v6636_v43  ;;  %v6764_v43 = vld [vmem:[%s13690_s15 + $0x3b8] sm:$0xff] (%p12951_p9) }
 0x410   : > { %10034 = vst.msk [vmem:[%s14286_s16 + $0x7e8] sm:$0xff] %vm770_vm0, %v12543_v4  ;;  %v5417_v30 = vpop.f32.mrf.mxu0  ;;  %6639 = vst [vmem:[%s16506_s12 + $0x1c0] sm:$0xff] (%p12951_p9), %v6638_v7  ;;  %v6640_v4 = vld [vmem:[%s13690_s15 + $0x1c8] sm:$0xff] (%p12951_p9)  ;;  %v6766_v7 = vld [vmem:[%s13690_s15 + $0x3c0] sm:$0xff] (%p12951_p9) }
 0x411   : > { %v5884_v40 = vpop.f32.mrf.mxu1  ;;  %9953 = vst.msk [vmem:[%s13695_s30 + $0x7e0] sm:$0xff] %vm770_vm0, %v5417_v30  ;;  %v6642_v30 = vld [vmem:[%s13690_s15 + $0x1d0] sm:$0xff] (%p12951_p9)  ;;  %6641 = vst [vmem:[%s16506_s12 + $0x1c8] sm:$0xff] (%p12951_p9), %v6640_v4  ;;  %v6768_v4 = vld [vmem:[%s13690_s15 + $0x3c8] sm:$0xff] (%p12951_p9) }
 0x412   : > { %10033 = vst.msk [vmem:[%s14286_s16 + $0x7e0] sm:$0xff] %vm770_vm0, %v5884_v40  ;;  %v12418_v17 = vpop.f32.mrf.mxu0  ;;  %5982 = sbr.rel (!%p12951_p9) target bundleno = 1144 (0x478), region = 44  ;;  %v6644_v40 = vld [vmem:[%s13690_s15 + $0x1d8] sm:$0xff] (%p12951_p9)  ;;  %6643 = vst [vmem:[%s16506_s12 + $0x1d0] sm:$0xff] (%p12951_p9), %v6642_v30  ;;  %v6770_v30 = vld [vmem:[%s13690_s15 + $0x3d0] sm:$0xff] (%p12951_p9) }
 0x413   : > { %v12546_v25 = vpop.f32.mrf.mxu1  ;;  %9956 = vst.msk [vmem:[%s13695_s30 + $0x7f8] sm:$0xff] %vm770_vm0, %v12418_v17  ;;  %6645 = vst [vmem:[%s16506_s12 + $0x1d8] sm:$0xff] (%p12951_p9), %v6644_v40  ;;  %v6646_v17 = vld [vmem:[%s13690_s15 + $0x1e0] sm:$0xff] (%p12951_p9)  ;;  %v6772_v40 = vld [vmem:[%s13690_s15 + $0x3d8] sm:$0xff] (%p12951_p9) }
 0x414   : > { %10036 = vst.msk [vmem:[%s14286_s16 + $0x7f8] sm:$0xff] %vm770_vm0, %v12546_v25  ;;  %v5427_v11 = vpop.f32.mrf.mxu0  ;;  %v6648_v25 = vld [vmem:[%s13690_s15 + $0x1e8] sm:$0xff] (%p12951_p9)  ;;  %6647 = vst [vmem:[%s16506_s12 + $0x1e0] sm:$0xff] (%p12951_p9), %v6646_v17  ;;  %v6774_v17 = vld [vmem:[%s13690_s15 + $0x3e0] sm:$0xff] (%p12951_p9) }
 0x415   : > { %v5894_v21 = vpop.f32.mrf.mxu1  ;;  %9955 = vst.msk [vmem:[%s13695_s30 + $0x7f0] sm:$0xff] %vm770_vm0, %v5427_v11  ;;  %v6650_v11 = vld [vmem:[%s13690_s15 + $0x1f0] sm:$0xff] (%p12951_p9)  ;;  %6649 = vst [vmem:[%s16506_s12 + $0x1e8] sm:$0xff] (%p12951_p9), %v6648_v25  ;;  %v6776_v25 = vld [vmem:[%s13690_s15 + $0x3e8] sm:$0xff] (%p12951_p9) }
 0x416   : > { %10035 = vst.msk [vmem:[%s14286_s16 + $0x7f0] sm:$0xff] %vm770_vm0, %v5894_v21  ;;  %6651 = vst [vmem:[%s16506_s12 + $0x1f0] sm:$0xff] (%p12951_p9), %v6650_v11  ;;  %v6652_v21 = vld [vmem:[%s13690_s15 + $0x1f8] sm:$0xff] (%p12951_p9)  ;;  %v6778_v11 = vld [vmem:[%s13690_s15 + $0x3f0] sm:$0xff] (%p12951_p9) }
 0x417   : > { %6653 = vst [vmem:[%s16506_s12 + $0x1f8] sm:$0xff] %v6652_v21  ;;  %6655 = vst [vmem:[%s16506_s12 + $0x400] sm:$0xff] %v6654_v34  ;;  %v6780_v21 = vld [vmem:[%s13690_s15 + $0x3f8] sm:$0xff]  ;;  %v6782_v34 = vld [vmem:[%s13690_s15 + $0x400] sm:$0xff] }
 0x418   : > { %6657 = vst [vmem:[%s16506_s12 + $0x408] sm:$0xff] %v6656_v53  ;;  %6659 = vst [vmem:[%s16506_s12 + $0x410] sm:$0xff] %v6658_v57  ;;  %v6784_v53 = vld [vmem:[%s13690_s15 + $0x408] sm:$0xff]  ;;  %v6786_v57 = vld [vmem:[%s13690_s15 + $0x410] sm:$0xff] }
 0x419   : > { %6661 = vst [vmem:[%s16506_s12 + $0x418] sm:$0xff] %v6660_v46  ;;  %6663 = vst [vmem:[%s16506_s12 + $0x420] sm:$0xff] %v6662_v23  ;;  %v6788_v46 = vld [vmem:[%s13690_s15 + $0x418] sm:$0xff]  ;;  %v6790_v23 = vld [vmem:[%s13690_s15 + $0x420] sm:$0xff] }
 0x41a   : > { %6665 = vst [vmem:[%s16506_s12 + $0x428] sm:$0xff] %v6664_v39  ;;  %6667 = vst [vmem:[%s16506_s12 + $0x430] sm:$0xff] %v6666_v52  ;;  %v6792_v39 = vld [vmem:[%s13690_s15 + $0x428] sm:$0xff]  ;;  %v6794_v52 = vld [vmem:[%s13690_s15 + $0x430] sm:$0xff] }
 0x41b   : > { %6669 = vst [vmem:[%s16506_s12 + $0x438] sm:$0xff] %v6668_v15  ;;  %6671 = vst [vmem:[%s16506_s12 + $0x440] sm:$0xff] %v6670_v18  ;;  %v6796_v15 = vld [vmem:[%s13690_s15 + $0x438] sm:$0xff]  ;;  %v6798_v18 = vld [vmem:[%s13690_s15 + $0x440] sm:$0xff] }
 0x41c   : > { %6673 = vst [vmem:[%s16506_s12 + $0x448] sm:$0xff] %v6672_v41  ;;  %6675 = vst [vmem:[%s16506_s12 + $0x450] sm:$0xff] %v6674_v20  ;;  %v6800_v41 = vld [vmem:[%s13690_s15 + $0x448] sm:$0xff]  ;;  %v6802_v20 = vld [vmem:[%s13690_s15 + $0x450] sm:$0xff] }
 0x41d   : > { %6677 = vst [vmem:[%s16506_s12 + $0x458] sm:$0xff] %v6676_v26  ;;  %6679 = vst [vmem:[%s16506_s12 + $0x460] sm:$0xff] %v6678_v37  ;;  %v6804_v26 = vld [vmem:[%s13690_s15 + $0x458] sm:$0xff]  ;;  %v6806_v37 = vld [vmem:[%s13690_s15 + $0x460] sm:$0xff] }
 0x41e   : > { %6681 = vst [vmem:[%s16506_s12 + $0x468] sm:$0xff] %v6680_v31  ;;  %6683 = vst [vmem:[%s16506_s12 + $0x470] sm:$0xff] %v6682_v5  ;;  %v6808_v31 = vld [vmem:[%s13690_s15 + $0x468] sm:$0xff]  ;;  %v6810_v5 = vld [vmem:[%s13690_s15 + $0x470] sm:$0xff] }
 0x41f   : > { %6685 = vst [vmem:[%s16506_s12 + $0x478] sm:$0xff] %v6684_v35  ;;  %6687 = vst [vmem:[%s16506_s12 + $0x480] sm:$0xff] %v6686_v27  ;;  %v6812_v35 = vld [vmem:[%s13690_s15 + $0x478] sm:$0xff]  ;;  %v6814_v27 = vld [vmem:[%s13690_s15 + $0x480] sm:$0xff] }
 0x420   : > { %6689 = vst [vmem:[%s16506_s12 + $0x488] sm:$0xff] %v6688_v16  ;;  %6691 = vst [vmem:[%s16506_s12 + $0x490] sm:$0xff] %v6690_v38  ;;  %v6816_v16 = vld [vmem:[%s13690_s15 + $0x488] sm:$0xff]  ;;  %v6818_v38 = vld [vmem:[%s13690_s15 + $0x490] sm:$0xff] }
 0x421   : > { %6693 = vst [vmem:[%s16506_s12 + $0x498] sm:$0xff] %v6692_v28  ;;  %6695 = vst [vmem:[%s16506_s12 + $0x4a0] sm:$0xff] %v6694_v10  ;;  %v6820_v28 = vld [vmem:[%s13690_s15 + $0x498] sm:$0xff]  ;;  %v6822_v10 = vld [vmem:[%s13690_s15 + $0x4a0] sm:$0xff] }
 0x422   : > { %6697 = vst [vmem:[%s16506_s12 + $0x4a8] sm:$0xff] %v6696_v49  ;;  %6699 = vst [vmem:[%s16506_s12 + $0x4b0] sm:$0xff] %v6698_v8  ;;  %v6824_v49 = vld [vmem:[%s13690_s15 + $0x4a8] sm:$0xff]  ;;  %v6826_v8 = vld [vmem:[%s13690_s15 + $0x4b0] sm:$0xff] }
 0x423   : > { %6701 = vst [vmem:[%s16506_s12 + $0x4b8] sm:$0xff] %v6700_v9  ;;  %6703 = vst [vmem:[%s16506_s12 + $0x4c0] sm:$0xff] %v6702_v47  ;;  %v6828_v9 = vld [vmem:[%s13690_s15 + $0x4b8] sm:$0xff]  ;;  %v6830_v47 = vld [vmem:[%s13690_s15 + $0x4c0] sm:$0xff] }
 0x424   : > { %6705 = vst [vmem:[%s16506_s12 + $0x4c8] sm:$0xff] %v6704_v63  ;;  %6707 = vst [vmem:[%s16506_s12 + $0x4d0] sm:$0xff] %v6706_v62  ;;  %v6832_v63 = vld [vmem:[%s13690_s15 + $0x4c8] sm:$0xff]  ;;  %v6834_v62 = vld [vmem:[%s13690_s15 + $0x4d0] sm:$0xff] }
 0x425   : > { %6709 = vst [vmem:[%s16506_s12 + $0x4d8] sm:$0xff] %v6708_v32  ;;  %6711 = vst [vmem:[%s16506_s12 + $0x4e0] sm:$0xff] %v6710_v14  ;;  %v6836_v32 = vld [vmem:[%s13690_s15 + $0x4d8] sm:$0xff]  ;;  %v6838_v14 = vld [vmem:[%s13690_s15 + $0x4e0] sm:$0xff] }
 0x426   : > { %6713 = vst [vmem:[%s16506_s12 + $0x4e8] sm:$0xff] %v6712_v0  ;;  %6715 = vst [vmem:[%s16506_s12 + $0x4f0] sm:$0xff] %v6714_v42  ;;  %v6840_v0 = vld [vmem:[%s13690_s15 + $0x4e8] sm:$0xff]  ;;  %v6842_v42 = vld [vmem:[%s13690_s15 + $0x4f0] sm:$0xff] }
 0x427   : > { %6717 = vst [vmem:[%s16506_s12 + $0x4f8] sm:$0xff] %v6716_v55  ;;  %6719 = vst [vmem:[%s16506_s12 + $0x500] sm:$0xff] %v6718_v2  ;;  %v6844_v55 = vld [vmem:[%s13690_s15 + $0x4f8] sm:$0xff]  ;;  %v6846_v2 = vld [vmem:[%s13690_s15 + $0x500] sm:$0xff] }
 0x428   : > { %6721 = vst [vmem:[%s16506_s12 + $0x508] sm:$0xff] %v6720_v60  ;;  %6723 = vst [vmem:[%s16506_s12 + $0x510] sm:$0xff] %v6722_v6  ;;  %v6848_v60 = vld [vmem:[%s13690_s15 + $0x508] sm:$0xff]  ;;  %v6850_v6 = vld [vmem:[%s13690_s15 + $0x510] sm:$0xff] }
 0x429   : > { %6725 = vst [vmem:[%s16506_s12 + $0x518] sm:$0xff] %v6724_v1  ;;  %6727 = vst [vmem:[%s16506_s12 + $0x520] sm:$0xff] %v6726_v36  ;;  %v6852_v1 = vld [vmem:[%s13690_s15 + $0x518] sm:$0xff]  ;;  %v6854_v36 = vld [vmem:[%s13690_s15 + $0x520] sm:$0xff] }
 0x42a   : > { %6729 = vst [vmem:[%s16506_s12 + $0x528] sm:$0xff] %v6728_v58  ;;  %6731 = vst [vmem:[%s16506_s12 + $0x530] sm:$0xff] %v6730_v45  ;;  %v6856_v58 = vld [vmem:[%s13690_s15 + $0x528] sm:$0xff]  ;;  %v6858_v45 = vld [vmem:[%s13690_s15 + $0x530] sm:$0xff] }
 0x42b   : > { %6733 = vst [vmem:[%s16506_s12 + $0x538] sm:$0xff] %v6732_v24  ;;  %6735 = vst [vmem:[%s16506_s12 + $0x540] sm:$0xff] %v6734_v59  ;;  %v6860_v24 = vld [vmem:[%s13690_s15 + $0x538] sm:$0xff]  ;;  %v6862_v59 = vld [vmem:[%s13690_s15 + $0x540] sm:$0xff] }
 0x42c   : > { %6737 = vst [vmem:[%s16506_s12 + $0x548] sm:$0xff] %v6736_v54  ;;  %6739 = vst [vmem:[%s16506_s12 + $0x550] sm:$0xff] %v6738_v29  ;;  %v6864_v54 = vld [vmem:[%s13690_s15 + $0x548] sm:$0xff]  ;;  %v6866_v29 = vld [vmem:[%s13690_s15 + $0x550] sm:$0xff] }
 0x42d   : > { %6741 = vst [vmem:[%s16506_s12 + $0x558] sm:$0xff] %v6740_v19  ;;  %6743 = vst [vmem:[%s16506_s12 + $0x560] sm:$0xff] %v6742_v50  ;;  %v6868_v19 = vld [vmem:[%s13690_s15 + $0x558] sm:$0xff]  ;;  %v6870_v50 = vld [vmem:[%s13690_s15 + $0x560] sm:$0xff] }
 0x42e   : > { %6745 = vst [vmem:[%s16506_s12 + $0x568] sm:$0xff] %v6744_v12  ;;  %6747 = vst [vmem:[%s16506_s12 + $0x570] sm:$0xff] %v6746_v44  ;;  %v6872_v12 = vld [vmem:[%s13690_s15 + $0x568] sm:$0xff]  ;;  %v6874_v44 = vld [vmem:[%s13690_s15 + $0x570] sm:$0xff] }
 0x42f   : > { %6749 = vst [vmem:[%s16506_s12 + $0x578] sm:$0xff] %v6748_v56  ;;  %6751 = vst [vmem:[%s16506_s12 + $0x580] sm:$0xff] %v6750_v22  ;;  %v6876_v56 = vld [vmem:[%s13690_s15 + $0x578] sm:$0xff]  ;;  %v6878_v22 = vld [vmem:[%s13690_s15 + $0x580] sm:$0xff] }
 0x430   : > { %6753 = vst [vmem:[%s16506_s12 + $0x588] sm:$0xff] %v6752_v3  ;;  %6755 = vst [vmem:[%s16506_s12 + $0x590] sm:$0xff] %v6754_v33  ;;  %v6880_v3 = vld [vmem:[%s13690_s15 + $0x588] sm:$0xff]  ;;  %v6882_v33 = vld [vmem:[%s13690_s15 + $0x590] sm:$0xff] }
 0x431   : > { %6757 = vst [vmem:[%s16506_s12 + $0x598] sm:$0xff] %v6756_v61  ;;  %6759 = vst [vmem:[%s16506_s12 + $0x5a0] sm:$0xff] %v6758_v13  ;;  %v6884_v61 = vld [vmem:[%s13690_s15 + $0x598] sm:$0xff]  ;;  %v6886_v13 = vld [vmem:[%s13690_s15 + $0x5a0] sm:$0xff] }
 0x432   : > { %6761 = vst [vmem:[%s16506_s12 + $0x5a8] sm:$0xff] %v6760_v51  ;;  %6763 = vst [vmem:[%s16506_s12 + $0x5b0] sm:$0xff] %v6762_v48  ;;  %v6888_v51 = vld [vmem:[%s13690_s15 + $0x5a8] sm:$0xff]  ;;  %v6890_v48 = vld [vmem:[%s13690_s15 + $0x5b0] sm:$0xff] }
 0x433   : > { %6765 = vst [vmem:[%s16506_s12 + $0x5b8] sm:$0xff] %v6764_v43  ;;  %6767 = vst [vmem:[%s16506_s12 + $0x5c0] sm:$0xff] %v6766_v7  ;;  %v6892_v43 = vld [vmem:[%s13690_s15 + $0x5b8] sm:$0xff]  ;;  %v6894_v7 = vld [vmem:[%s13690_s15 + $0x5c0] sm:$0xff] }
 0x434   : > { %6769 = vst [vmem:[%s16506_s12 + $0x5c8] sm:$0xff] %v6768_v4  ;;  %6771 = vst [vmem:[%s16506_s12 + $0x5d0] sm:$0xff] %v6770_v30  ;;  %v6896_v4 = vld [vmem:[%s13690_s15 + $0x5c8] sm:$0xff]  ;;  %v6898_v30 = vld [vmem:[%s13690_s15 + $0x5d0] sm:$0xff] }
 0x435   : > { %6773 = vst [vmem:[%s16506_s12 + $0x5d8] sm:$0xff] %v6772_v40  ;;  %6775 = vst [vmem:[%s16506_s12 + $0x5e0] sm:$0xff] %v6774_v17  ;;  %v6900_v40 = vld [vmem:[%s13690_s15 + $0x5d8] sm:$0xff]  ;;  %v6902_v17 = vld [vmem:[%s13690_s15 + $0x5e0] sm:$0xff] }
 0x436   : > { %6777 = vst [vmem:[%s16506_s12 + $0x5e8] sm:$0xff] %v6776_v25  ;;  %6779 = vst [vmem:[%s16506_s12 + $0x5f0] sm:$0xff] %v6778_v11  ;;  %v6904_v25 = vld [vmem:[%s13690_s15 + $0x5e8] sm:$0xff]  ;;  %v6906_v11 = vld [vmem:[%s13690_s15 + $0x5f0] sm:$0xff] }
 0x437   : > { %6781 = vst [vmem:[%s16506_s12 + $0x5f8] sm:$0xff] %v6780_v21  ;;  %6783 = vst [vmem:[%s16506_s12 + $0x800] sm:$0xff] %v6782_v34  ;;  %v6908_v21 = vld [vmem:[%s13690_s15 + $0x5f8] sm:$0xff]  ;;  %v6910_v34 = vld [vmem:[%s13690_s15 + $0x600] sm:$0xff] }
 0x438   : > { %6785 = vst [vmem:[%s16506_s12 + $0x808] sm:$0xff] %v6784_v53  ;;  %6787 = vst [vmem:[%s16506_s12 + $0x810] sm:$0xff] %v6786_v57  ;;  %v6912_v53 = vld [vmem:[%s13690_s15 + $0x608] sm:$0xff]  ;;  %v6914_v57 = vld [vmem:[%s13690_s15 + $0x610] sm:$0xff] }
 0x439   : > { %6789 = vst [vmem:[%s16506_s12 + $0x818] sm:$0xff] %v6788_v46  ;;  %6791 = vst [vmem:[%s16506_s12 + $0x820] sm:$0xff] %v6790_v23  ;;  %v6916_v46 = vld [vmem:[%s13690_s15 + $0x618] sm:$0xff]  ;;  %v6918_v23 = vld [vmem:[%s13690_s15 + $0x620] sm:$0xff] }
 0x43a   : > { %6793 = vst [vmem:[%s16506_s12 + $0x828] sm:$0xff] %v6792_v39  ;;  %6795 = vst [vmem:[%s16506_s12 + $0x830] sm:$0xff] %v6794_v52  ;;  %v6920_v39 = vld [vmem:[%s13690_s15 + $0x628] sm:$0xff]  ;;  %v6922_v52 = vld [vmem:[%s13690_s15 + $0x630] sm:$0xff] }
 0x43b   : > { %6797 = vst [vmem:[%s16506_s12 + $0x838] sm:$0xff] %v6796_v15  ;;  %6799 = vst [vmem:[%s16506_s12 + $0x840] sm:$0xff] %v6798_v18  ;;  %v6924_v15 = vld [vmem:[%s13690_s15 + $0x638] sm:$0xff]  ;;  %v6926_v18 = vld [vmem:[%s13690_s15 + $0x640] sm:$0xff] }
 0x43c   : > { %6801 = vst [vmem:[%s16506_s12 + $0x848] sm:$0xff] %v6800_v41  ;;  %6803 = vst [vmem:[%s16506_s12 + $0x850] sm:$0xff] %v6802_v20  ;;  %v6928_v41 = vld [vmem:[%s13690_s15 + $0x648] sm:$0xff]  ;;  %v6930_v20 = vld [vmem:[%s13690_s15 + $0x650] sm:$0xff] }
 0x43d   : > { %6805 = vst [vmem:[%s16506_s12 + $0x858] sm:$0xff] %v6804_v26  ;;  %6807 = vst [vmem:[%s16506_s12 + $0x860] sm:$0xff] %v6806_v37  ;;  %v6932_v26 = vld [vmem:[%s13690_s15 + $0x658] sm:$0xff]  ;;  %v6934_v37 = vld [vmem:[%s13690_s15 + $0x660] sm:$0xff] }
 0x43e   : > { %6809 = vst [vmem:[%s16506_s12 + $0x868] sm:$0xff] %v6808_v31  ;;  %6811 = vst [vmem:[%s16506_s12 + $0x870] sm:$0xff] %v6810_v5  ;;  %v6936_v31 = vld [vmem:[%s13690_s15 + $0x668] sm:$0xff]  ;;  %v6938_v5 = vld [vmem:[%s13690_s15 + $0x670] sm:$0xff] }
 0x43f   : > { %6813 = vst [vmem:[%s16506_s12 + $0x878] sm:$0xff] %v6812_v35  ;;  %6815 = vst [vmem:[%s16506_s12 + $0x880] sm:$0xff] %v6814_v27  ;;  %v6940_v35 = vld [vmem:[%s13690_s15 + $0x678] sm:$0xff]  ;;  %v6942_v27 = vld [vmem:[%s13690_s15 + $0x680] sm:$0xff] }
 0x440   : > { %6817 = vst [vmem:[%s16506_s12 + $0x888] sm:$0xff] %v6816_v16  ;;  %6819 = vst [vmem:[%s16506_s12 + $0x890] sm:$0xff] %v6818_v38  ;;  %v6944_v16 = vld [vmem:[%s13690_s15 + $0x688] sm:$0xff]  ;;  %v6946_v38 = vld [vmem:[%s13690_s15 + $0x690] sm:$0xff] }
 0x441   : > { %6821 = vst [vmem:[%s16506_s12 + $0x898] sm:$0xff] %v6820_v28  ;;  %6823 = vst [vmem:[%s16506_s12 + $0x8a0] sm:$0xff] %v6822_v10  ;;  %v6948_v28 = vld [vmem:[%s13690_s15 + $0x698] sm:$0xff]  ;;  %v6950_v10 = vld [vmem:[%s13690_s15 + $0x6a0] sm:$0xff] }
 0x442   : > { %6825 = vst [vmem:[%s16506_s12 + $0x8a8] sm:$0xff] %v6824_v49  ;;  %6827 = vst [vmem:[%s16506_s12 + $0x8b0] sm:$0xff] %v6826_v8  ;;  %v6952_v49 = vld [vmem:[%s13690_s15 + $0x6a8] sm:$0xff]  ;;  %v6954_v8 = vld [vmem:[%s13690_s15 + $0x6b0] sm:$0xff] }
 0x443   : > { %6829 = vst [vmem:[%s16506_s12 + $0x8b8] sm:$0xff] %v6828_v9  ;;  %6831 = vst [vmem:[%s16506_s12 + $0x8c0] sm:$0xff] %v6830_v47  ;;  %v6956_v9 = vld [vmem:[%s13690_s15 + $0x6b8] sm:$0xff]  ;;  %v6958_v47 = vld [vmem:[%s13690_s15 + $0x6c0] sm:$0xff] }
 0x444   : > { %6833 = vst [vmem:[%s16506_s12 + $0x8c8] sm:$0xff] %v6832_v63  ;;  %6835 = vst [vmem:[%s16506_s12 + $0x8d0] sm:$0xff] %v6834_v62  ;;  %v6960_v63 = vld [vmem:[%s13690_s15 + $0x6c8] sm:$0xff]  ;;  %v6962_v62 = vld [vmem:[%s13690_s15 + $0x6d0] sm:$0xff] }
 0x445   : > { %6837 = vst [vmem:[%s16506_s12 + $0x8d8] sm:$0xff] %v6836_v32  ;;  %6839 = vst [vmem:[%s16506_s12 + $0x8e0] sm:$0xff] %v6838_v14  ;;  %v6964_v32 = vld [vmem:[%s13690_s15 + $0x6d8] sm:$0xff]  ;;  %v6966_v14 = vld [vmem:[%s13690_s15 + $0x6e0] sm:$0xff] }
 0x446   : > { %6841 = vst [vmem:[%s16506_s12 + $0x8e8] sm:$0xff] %v6840_v0  ;;  %6843 = vst [vmem:[%s16506_s12 + $0x8f0] sm:$0xff] %v6842_v42  ;;  %v6968_v0 = vld [vmem:[%s13690_s15 + $0x6e8] sm:$0xff]  ;;  %v6970_v42 = vld [vmem:[%s13690_s15 + $0x6f0] sm:$0xff] }
 0x447   : > { %6845 = vst [vmem:[%s16506_s12 + $0x8f8] sm:$0xff] %v6844_v55  ;;  %6847 = vst [vmem:[%s16506_s12 + $0x900] sm:$0xff] %v6846_v2  ;;  %v6972_v55 = vld [vmem:[%s13690_s15 + $0x6f8] sm:$0xff]  ;;  %v6974_v2 = vld [vmem:[%s13690_s15 + $0x700] sm:$0xff] }
 0x448   : > { %6849 = vst [vmem:[%s16506_s12 + $0x908] sm:$0xff] %v6848_v60  ;;  %6851 = vst [vmem:[%s16506_s12 + $0x910] sm:$0xff] %v6850_v6  ;;  %v6976_v60 = vld [vmem:[%s13690_s15 + $0x708] sm:$0xff]  ;;  %v6978_v6 = vld [vmem:[%s13690_s15 + $0x710] sm:$0xff] }
 0x449   : > { %6853 = vst [vmem:[%s16506_s12 + $0x918] sm:$0xff] %v6852_v1  ;;  %6855 = vst [vmem:[%s16506_s12 + $0x920] sm:$0xff] %v6854_v36  ;;  %v6980_v1 = vld [vmem:[%s13690_s15 + $0x718] sm:$0xff]  ;;  %v6982_v36 = vld [vmem:[%s13690_s15 + $0x720] sm:$0xff] }
 0x44a   : > { %6857 = vst [vmem:[%s16506_s12 + $0x928] sm:$0xff] %v6856_v58  ;;  %6859 = vst [vmem:[%s16506_s12 + $0x930] sm:$0xff] %v6858_v45  ;;  %v6984_v58 = vld [vmem:[%s13690_s15 + $0x728] sm:$0xff]  ;;  %v6986_v45 = vld [vmem:[%s13690_s15 + $0x730] sm:$0xff] }
 0x44b   : > { %6861 = vst [vmem:[%s16506_s12 + $0x938] sm:$0xff] %v6860_v24  ;;  %6863 = vst [vmem:[%s16506_s12 + $0x940] sm:$0xff] %v6862_v59  ;;  %v6988_v24 = vld [vmem:[%s13690_s15 + $0x738] sm:$0xff]  ;;  %v6990_v59 = vld [vmem:[%s13690_s15 + $0x740] sm:$0xff] }
 0x44c   : > { %6865 = vst [vmem:[%s16506_s12 + $0x948] sm:$0xff] %v6864_v54  ;;  %6867 = vst [vmem:[%s16506_s12 + $0x950] sm:$0xff] %v6866_v29  ;;  %v6992_v54 = vld [vmem:[%s13690_s15 + $0x748] sm:$0xff]  ;;  %v6994_v29 = vld [vmem:[%s13690_s15 + $0x750] sm:$0xff] }
 0x44d   : > { %6869 = vst [vmem:[%s16506_s12 + $0x958] sm:$0xff] %v6868_v19  ;;  %6871 = vst [vmem:[%s16506_s12 + $0x960] sm:$0xff] %v6870_v50  ;;  %v6996_v19 = vld [vmem:[%s13690_s15 + $0x758] sm:$0xff]  ;;  %v6998_v50 = vld [vmem:[%s13690_s15 + $0x760] sm:$0xff] }
 0x44e   : > { %6873 = vst [vmem:[%s16506_s12 + $0x968] sm:$0xff] %v6872_v12  ;;  %6875 = vst [vmem:[%s16506_s12 + $0x970] sm:$0xff] %v6874_v44  ;;  %v7000_v12 = vld [vmem:[%s13690_s15 + $0x768] sm:$0xff]  ;;  %v7002_v44 = vld [vmem:[%s13690_s15 + $0x770] sm:$0xff] }
 0x44f   : > { %6877 = vst [vmem:[%s16506_s12 + $0x978] sm:$0xff] %v6876_v56  ;;  %6879 = vst [vmem:[%s16506_s12 + $0x980] sm:$0xff] %v6878_v22  ;;  %v7004_v56 = vld [vmem:[%s13690_s15 + $0x778] sm:$0xff]  ;;  %v7006_v22 = vld [vmem:[%s13690_s15 + $0x780] sm:$0xff] }
 0x450   : > { %6881 = vst [vmem:[%s16506_s12 + $0x988] sm:$0xff] %v6880_v3  ;;  %6883 = vst [vmem:[%s16506_s12 + $0x990] sm:$0xff] %v6882_v33  ;;  %v7008_v3 = vld [vmem:[%s13690_s15 + $0x788] sm:$0xff]  ;;  %v7010_v33 = vld [vmem:[%s13690_s15 + $0x790] sm:$0xff] }
 0x451   : > { %6885 = vst [vmem:[%s16506_s12 + $0x998] sm:$0xff] %v6884_v61  ;;  %6887 = vst [vmem:[%s16506_s12 + $0x9a0] sm:$0xff] %v6886_v13  ;;  %v7012_v61 = vld [vmem:[%s13690_s15 + $0x798] sm:$0xff]  ;;  %v7014_v13 = vld [vmem:[%s13690_s15 + $0x7a0] sm:$0xff] }
 0x452   : > { %6889 = vst [vmem:[%s16506_s12 + $0x9a8] sm:$0xff] %v6888_v51  ;;  %6891 = vst [vmem:[%s16506_s12 + $0x9b0] sm:$0xff] %v6890_v48  ;;  %v7016_v51 = vld [vmem:[%s13690_s15 + $0x7a8] sm:$0xff]  ;;  %v7018_v48 = vld [vmem:[%s13690_s15 + $0x7b0] sm:$0xff] }
 0x453   : > { %6893 = vst [vmem:[%s16506_s12 + $0x9b8] sm:$0xff] %v6892_v43  ;;  %6895 = vst [vmem:[%s16506_s12 + $0x9c0] sm:$0xff] %v6894_v7  ;;  %v7020_v43 = vld [vmem:[%s13690_s15 + $0x7b8] sm:$0xff]  ;;  %v7022_v7 = vld [vmem:[%s13690_s15 + $0x7c0] sm:$0xff] }
 0x454   : > { %6897 = vst [vmem:[%s16506_s12 + $0x9c8] sm:$0xff] %v6896_v4  ;;  %6899 = vst [vmem:[%s16506_s12 + $0x9d0] sm:$0xff] %v6898_v30  ;;  %v7024_v4 = vld [vmem:[%s13690_s15 + $0x7c8] sm:$0xff]  ;;  %v7026_v30 = vld [vmem:[%s13690_s15 + $0x7d0] sm:$0xff] }
 0x455   : > { %6901 = vst [vmem:[%s16506_s12 + $0x9d8] sm:$0xff] %v6900_v40  ;;  %6903 = vst [vmem:[%s16506_s12 + $0x9e0] sm:$0xff] %v6902_v17  ;;  %v7028_v40 = vld [vmem:[%s13690_s15 + $0x7d8] sm:$0xff]  ;;  %v7030_v17 = vld [vmem:[%s13690_s15 + $0x7e0] sm:$0xff] }
 0x456   : > { %6905 = vst [vmem:[%s16506_s12 + $0x9e8] sm:$0xff] %v6904_v25  ;;  %6907 = vst [vmem:[%s16506_s12 + $0x9f0] sm:$0xff] %v6906_v11  ;;  %v7032_v25 = vld [vmem:[%s13690_s15 + $0x7e8] sm:$0xff]  ;;  %v7034_v11 = vld [vmem:[%s13690_s15 + $0x7f0] sm:$0xff] }
 0x457   : > { %6909 = vst [vmem:[%s16506_s12 + $0x9f8] sm:$0xff] %v6908_v21  ;;  %6911 = vst [vmem:[%s16506_s12 + $0xc00] sm:$0xff] %v6910_v34  ;;  %v7036_v21 = vld [vmem:[%s13690_s15 + $0x7f8] sm:$0xff] }
 0x458   : > { %6913 = vst [vmem:[%s16506_s12 + $0xc08] sm:$0xff] %v6912_v53  ;;  %6915 = vst [vmem:[%s16506_s12 + $0xc10] sm:$0xff] %v6914_v57 }
 0x459   : > { %6917 = vst [vmem:[%s16506_s12 + $0xc18] sm:$0xff] %v6916_v46  ;;  %6919 = vst [vmem:[%s16506_s12 + $0xc20] sm:$0xff] %v6918_v23 }
 0x45a   : > { %6921 = vst [vmem:[%s16506_s12 + $0xc28] sm:$0xff] %v6920_v39  ;;  %6923 = vst [vmem:[%s16506_s12 + $0xc30] sm:$0xff] %v6922_v52 }
 0x45b   : > { %6925 = vst [vmem:[%s16506_s12 + $0xc38] sm:$0xff] %v6924_v15  ;;  %6927 = vst [vmem:[%s16506_s12 + $0xc40] sm:$0xff] %v6926_v18 }
 0x45c   : > { %6929 = vst [vmem:[%s16506_s12 + $0xc48] sm:$0xff] %v6928_v41  ;;  %6931 = vst [vmem:[%s16506_s12 + $0xc50] sm:$0xff] %v6930_v20 }
 0x45d   : > { %6933 = vst [vmem:[%s16506_s12 + $0xc58] sm:$0xff] %v6932_v26  ;;  %6935 = vst [vmem:[%s16506_s12 + $0xc60] sm:$0xff] %v6934_v37 }
 0x45e   : > { %6937 = vst [vmem:[%s16506_s12 + $0xc68] sm:$0xff] %v6936_v31  ;;  %6939 = vst [vmem:[%s16506_s12 + $0xc70] sm:$0xff] %v6938_v5 }
 0x45f   : > { %6941 = vst [vmem:[%s16506_s12 + $0xc78] sm:$0xff] %v6940_v35  ;;  %6943 = vst [vmem:[%s16506_s12 + $0xc80] sm:$0xff] %v6942_v27 }
 0x460   : > { %6945 = vst [vmem:[%s16506_s12 + $0xc88] sm:$0xff] %v6944_v16  ;;  %6947 = vst [vmem:[%s16506_s12 + $0xc90] sm:$0xff] %v6946_v38 }
 0x461   : > { %6949 = vst [vmem:[%s16506_s12 + $0xc98] sm:$0xff] %v6948_v28  ;;  %6951 = vst [vmem:[%s16506_s12 + $0xca0] sm:$0xff] %v6950_v10 }
 0x462   : > { %6953 = vst [vmem:[%s16506_s12 + $0xca8] sm:$0xff] %v6952_v49  ;;  %6955 = vst [vmem:[%s16506_s12 + $0xcb0] sm:$0xff] %v6954_v8 }
 0x463   : > { %6957 = vst [vmem:[%s16506_s12 + $0xcb8] sm:$0xff] %v6956_v9  ;;  %6959 = vst [vmem:[%s16506_s12 + $0xcc0] sm:$0xff] %v6958_v47 }
 0x464   : > { %6961 = vst [vmem:[%s16506_s12 + $0xcc8] sm:$0xff] %v6960_v63  ;;  %6963 = vst [vmem:[%s16506_s12 + $0xcd0] sm:$0xff] %v6962_v62 }
 0x465   : > { %6965 = vst [vmem:[%s16506_s12 + $0xcd8] sm:$0xff] %v6964_v32  ;;  %6967 = vst [vmem:[%s16506_s12 + $0xce0] sm:$0xff] %v6966_v14 }
 0x466   : > { %6969 = vst [vmem:[%s16506_s12 + $0xce8] sm:$0xff] %v6968_v0  ;;  %6971 = vst [vmem:[%s16506_s12 + $0xcf0] sm:$0xff] %v6970_v42 }
 0x467   : > { %6973 = vst [vmem:[%s16506_s12 + $0xcf8] sm:$0xff] %v6972_v55  ;;  %6975 = vst [vmem:[%s16506_s12 + $0xd00] sm:$0xff] %v6974_v2 }
 0x468   : > { %6977 = vst [vmem:[%s16506_s12 + $0xd08] sm:$0xff] %v6976_v60  ;;  %6979 = vst [vmem:[%s16506_s12 + $0xd10] sm:$0xff] %v6978_v6 }
 0x469   : > { %6981 = vst [vmem:[%s16506_s12 + $0xd18] sm:$0xff] %v6980_v1  ;;  %6983 = vst [vmem:[%s16506_s12 + $0xd20] sm:$0xff] %v6982_v36 }
 0x46a   : > { %6985 = vst [vmem:[%s16506_s12 + $0xd28] sm:$0xff] %v6984_v58  ;;  %6987 = vst [vmem:[%s16506_s12 + $0xd30] sm:$0xff] %v6986_v45 }
 0x46b   : > { %6989 = vst [vmem:[%s16506_s12 + $0xd38] sm:$0xff] %v6988_v24  ;;  %6991 = vst [vmem:[%s16506_s12 + $0xd40] sm:$0xff] %v6990_v59 }
 0x46c   : > { %6993 = vst [vmem:[%s16506_s12 + $0xd48] sm:$0xff] %v6992_v54  ;;  %6995 = vst [vmem:[%s16506_s12 + $0xd50] sm:$0xff] %v6994_v29 }
 0x46d   : > { %6997 = vst [vmem:[%s16506_s12 + $0xd58] sm:$0xff] %v6996_v19  ;;  %6999 = vst [vmem:[%s16506_s12 + $0xd60] sm:$0xff] %v6998_v50 }
 0x46e   : > { %7001 = vst [vmem:[%s16506_s12 + $0xd68] sm:$0xff] %v7000_v12  ;;  %7003 = vst [vmem:[%s16506_s12 + $0xd70] sm:$0xff] %v7002_v44 }
 0x46f   : > { %7005 = vst [vmem:[%s16506_s12 + $0xd78] sm:$0xff] %v7004_v56  ;;  %7007 = vst [vmem:[%s16506_s12 + $0xd80] sm:$0xff] %v7006_v22 }
 0x470   : > { %7009 = vst [vmem:[%s16506_s12 + $0xd88] sm:$0xff] %v7008_v3  ;;  %7011 = vst [vmem:[%s16506_s12 + $0xd90] sm:$0xff] %v7010_v33 }
 0x471   : > { %7013 = vst [vmem:[%s16506_s12 + $0xd98] sm:$0xff] %v7012_v61  ;;  %7015 = vst [vmem:[%s16506_s12 + $0xda0] sm:$0xff] %v7014_v13 }
 0x472   : > { %7017 = vst [vmem:[%s16506_s12 + $0xda8] sm:$0xff] %v7016_v51  ;;  %7019 = vst [vmem:[%s16506_s12 + $0xdb0] sm:$0xff] %v7018_v48 }
 0x473   : > { %7021 = vst [vmem:[%s16506_s12 + $0xdb8] sm:$0xff] %v7020_v43  ;;  %7023 = vst [vmem:[%s16506_s12 + $0xdc0] sm:$0xff] %v7022_v7 }
 0x474   : > { %7025 = vst [vmem:[%s16506_s12 + $0xdc8] sm:$0xff] %v7024_v4  ;;  %7027 = vst [vmem:[%s16506_s12 + $0xdd0] sm:$0xff] %v7026_v30 }
 0x475   : > { %7029 = vst [vmem:[%s16506_s12 + $0xdd8] sm:$0xff] %v7028_v40  ;;  %7031 = vst [vmem:[%s16506_s12 + $0xde0] sm:$0xff] %v7030_v17 }
 0x476   : > { %7033 = vst [vmem:[%s16506_s12 + $0xde8] sm:$0xff] %v7032_v25  ;;  %7035 = vst [vmem:[%s16506_s12 + $0xdf0] sm:$0xff] %v7034_v11 }
 0x477   : > { %7037 = vst [vmem:[%s16506_s12 + $0xdf8] sm:$0xff] %v7036_v21 }
 0x478 PF: > { %7043 = sbr.rel (!%p12951_p9) target bundleno = 1277 (0x4fd), region = 82  ;;  %s10043_s8 = sshll.u32 (%p12951_p9), %s12826_s24, 6  ;;  %v7587_v34 = vld [vmem:[%s13695_s30] sm:$0xff] (%p12951_p9)  ;;  %v7589_v53 = vld [vmem:[%s13695_s30 + $0x8] sm:$0xff] (%p12951_p9)  ;;  %v7591_v57 = vld [vmem:[%s13695_s30 + $0x10] sm:$0xff] (%p12951_p9) }
 0x479   : > { %s10044_s15 = sshll.u32 (%p12951_p9), %s12830_s25, 9  ;;  %v7593_v46 = vld [vmem:[%s13695_s30 + $0x18] sm:$0xff] (%p12951_p9)  ;;  %v7595_v23 = vld [vmem:[%s13695_s30 + $0x20] sm:$0xff] (%p12951_p9)  ;;  %v7597_v39 = vld [vmem:[%s13695_s30 + $0x28] sm:$0xff] (%p12951_p9) }
 0x47a   : > { %s7046_s13 = sadd.s32 (%p12951_p9), %s10044_s15, %s10043_s8  ;;  %v7599_v52 = vld [vmem:[%s13695_s30 + $0x30] sm:$0xff] (%p12951_p9)  ;;  %v7601_v15 = vld [vmem:[%s13695_s30 + $0x38] sm:$0xff] (%p12951_p9)  ;;  %v7603_v18 = vld [vmem:[%s13695_s30 + $0x40] sm:$0xff] (%p12951_p9) }
 0x47b   : > { %s10045_s7 = sshll.u32 (%p12951_p9), %s7046_s13, 3  ;;  %v7605_v41 = vld [vmem:[%s13695_s30 + $0x48] sm:$0xff] (%p12951_p9)  ;;  %v7607_v20 = vld [vmem:[%s13695_s30 + $0x50] sm:$0xff] (%p12951_p9)  ;;  %v7609_v26 = vld [vmem:[%s13695_s30 + $0x58] sm:$0xff] (%p12951_p9) }
 0x47c   : > { %s17027_s19 = scalar_lea.vmem (%p12951_p9), %s18082_s5, %s10045_s7  ;;  %v7611_v37 = vld [vmem:[%s13695_s30 + $0x60] sm:$0xff] (%p12951_p9)  ;;  %v7613_v31 = vld [vmem:[%s13695_s30 + $0x68] sm:$0xff] (%p12951_p9)  ;;  %v7615_v5 = vld [vmem:[%s13695_s30 + $0x70] sm:$0xff] (%p12951_p9) }
 0x47d   : > { %7588 = vst [vmem:[%s17027_s19] sm:$0xff] %v7587_v34  ;;  %7590 = vst [vmem:[%s17027_s19 + $0x8] sm:$0xff] %v7589_v53  ;;  %v7617_v35 = vld [vmem:[%s13695_s30 + $0x78] sm:$0xff]  ;;  %v7619_v27 = vld [vmem:[%s13695_s30 + $0x80] sm:$0xff] }
 0x47e   : > { %7592 = vst [vmem:[%s17027_s19 + $0x10] sm:$0xff] %v7591_v57  ;;  %7594 = vst [vmem:[%s17027_s19 + $0x18] sm:$0xff] %v7593_v46  ;;  %v7621_v16 = vld [vmem:[%s13695_s30 + $0x88] sm:$0xff]  ;;  %v7623_v38 = vld [vmem:[%s13695_s30 + $0x90] sm:$0xff] }
 0x47f   : > { %7596 = vst [vmem:[%s17027_s19 + $0x20] sm:$0xff] %v7595_v23  ;;  %7598 = vst [vmem:[%s17027_s19 + $0x28] sm:$0xff] %v7597_v39  ;;  %v7625_v28 = vld [vmem:[%s13695_s30 + $0x98] sm:$0xff]  ;;  %v7627_v10 = vld [vmem:[%s13695_s30 + $0xa0] sm:$0xff] }
 0x480   : > { %7600 = vst [vmem:[%s17027_s19 + $0x30] sm:$0xff] %v7599_v52  ;;  %7602 = vst [vmem:[%s17027_s19 + $0x38] sm:$0xff] %v7601_v15  ;;  %v7629_v49 = vld [vmem:[%s13695_s30 + $0xa8] sm:$0xff]  ;;  %v7631_v8 = vld [vmem:[%s13695_s30 + $0xb0] sm:$0xff] }
 0x481   : > { %7604 = vst [vmem:[%s17027_s19 + $0x40] sm:$0xff] %v7603_v18  ;;  %7606 = vst [vmem:[%s17027_s19 + $0x48] sm:$0xff] %v7605_v41  ;;  %v7633_v9 = vld [vmem:[%s13695_s30 + $0xb8] sm:$0xff]  ;;  %v7635_v47 = vld [vmem:[%s13695_s30 + $0xc0] sm:$0xff] }
 0x482   : > { %7608 = vst [vmem:[%s17027_s19 + $0x50] sm:$0xff] %v7607_v20  ;;  %7610 = vst [vmem:[%s17027_s19 + $0x58] sm:$0xff] %v7609_v26  ;;  %v7637_v63 = vld [vmem:[%s13695_s30 + $0xc8] sm:$0xff]  ;;  %v7639_v62 = vld [vmem:[%s13695_s30 + $0xd0] sm:$0xff] }
 0x483   : > { %7612 = vst [vmem:[%s17027_s19 + $0x60] sm:$0xff] %v7611_v37  ;;  %7614 = vst [vmem:[%s17027_s19 + $0x68] sm:$0xff] %v7613_v31  ;;  %v7641_v32 = vld [vmem:[%s13695_s30 + $0xd8] sm:$0xff]  ;;  %v7643_v14 = vld [vmem:[%s13695_s30 + $0xe0] sm:$0xff] }
 0x484   : > { %7616 = vst [vmem:[%s17027_s19 + $0x70] sm:$0xff] %v7615_v5  ;;  %7618 = vst [vmem:[%s17027_s19 + $0x78] sm:$0xff] %v7617_v35  ;;  %v7645_v0 = vld [vmem:[%s13695_s30 + $0xe8] sm:$0xff]  ;;  %v7647_v42 = vld [vmem:[%s13695_s30 + $0xf0] sm:$0xff] }
 0x485   : > { %7620 = vst [vmem:[%s17027_s19 + $0x80] sm:$0xff] %v7619_v27  ;;  %7622 = vst [vmem:[%s17027_s19 + $0x88] sm:$0xff] %v7621_v16  ;;  %v7649_v55 = vld [vmem:[%s13695_s30 + $0xf8] sm:$0xff]  ;;  %v7651_v2 = vld [vmem:[%s13695_s30 + $0x100] sm:$0xff] }
 0x486   : > { %7624 = vst [vmem:[%s17027_s19 + $0x90] sm:$0xff] %v7623_v38  ;;  %7626 = vst [vmem:[%s17027_s19 + $0x98] sm:$0xff] %v7625_v28  ;;  %v7653_v60 = vld [vmem:[%s13695_s30 + $0x108] sm:$0xff]  ;;  %v7655_v6 = vld [vmem:[%s13695_s30 + $0x110] sm:$0xff] }
 0x487   : > { %7628 = vst [vmem:[%s17027_s19 + $0xa0] sm:$0xff] %v7627_v10  ;;  %7630 = vst [vmem:[%s17027_s19 + $0xa8] sm:$0xff] %v7629_v49  ;;  %v7657_v1 = vld [vmem:[%s13695_s30 + $0x118] sm:$0xff]  ;;  %v7659_v36 = vld [vmem:[%s13695_s30 + $0x120] sm:$0xff] }
 0x488   : > { %7632 = vst [vmem:[%s17027_s19 + $0xb0] sm:$0xff] %v7631_v8  ;;  %7634 = vst [vmem:[%s17027_s19 + $0xb8] sm:$0xff] %v7633_v9  ;;  %v7661_v58 = vld [vmem:[%s13695_s30 + $0x128] sm:$0xff]  ;;  %v7663_v45 = vld [vmem:[%s13695_s30 + $0x130] sm:$0xff] }
 0x489   : > { %7636 = vst [vmem:[%s17027_s19 + $0xc0] sm:$0xff] %v7635_v47  ;;  %7638 = vst [vmem:[%s17027_s19 + $0xc8] sm:$0xff] %v7637_v63  ;;  %v7665_v24 = vld [vmem:[%s13695_s30 + $0x138] sm:$0xff]  ;;  %v7667_v59 = vld [vmem:[%s13695_s30 + $0x140] sm:$0xff] }
 0x48a   : > { %7640 = vst [vmem:[%s17027_s19 + $0xd0] sm:$0xff] %v7639_v62  ;;  %7642 = vst [vmem:[%s17027_s19 + $0xd8] sm:$0xff] %v7641_v32  ;;  %v7669_v54 = vld [vmem:[%s13695_s30 + $0x148] sm:$0xff]  ;;  %v7671_v29 = vld [vmem:[%s13695_s30 + $0x150] sm:$0xff] }
 0x48b   : > { %7644 = vst [vmem:[%s17027_s19 + $0xe0] sm:$0xff] %v7643_v14  ;;  %7646 = vst [vmem:[%s17027_s19 + $0xe8] sm:$0xff] %v7645_v0  ;;  %v7673_v19 = vld [vmem:[%s13695_s30 + $0x158] sm:$0xff]  ;;  %v7675_v50 = vld [vmem:[%s13695_s30 + $0x160] sm:$0xff] }
 0x48c   : > { %7648 = vst [vmem:[%s17027_s19 + $0xf0] sm:$0xff] %v7647_v42  ;;  %7650 = vst [vmem:[%s17027_s19 + $0xf8] sm:$0xff] %v7649_v55  ;;  %v7677_v12 = vld [vmem:[%s13695_s30 + $0x168] sm:$0xff]  ;;  %v7679_v44 = vld [vmem:[%s13695_s30 + $0x170] sm:$0xff] }
 0x48d   : > { %7652 = vst [vmem:[%s17027_s19 + $0x100] sm:$0xff] %v7651_v2  ;;  %7654 = vst [vmem:[%s17027_s19 + $0x108] sm:$0xff] %v7653_v60  ;;  %v7681_v56 = vld [vmem:[%s13695_s30 + $0x178] sm:$0xff]  ;;  %v7683_v22 = vld [vmem:[%s13695_s30 + $0x180] sm:$0xff] }
 0x48e   : > { %7656 = vst [vmem:[%s17027_s19 + $0x110] sm:$0xff] %v7655_v6  ;;  %7658 = vst [vmem:[%s17027_s19 + $0x118] sm:$0xff] %v7657_v1  ;;  %v7685_v3 = vld [vmem:[%s13695_s30 + $0x188] sm:$0xff]  ;;  %v7687_v33 = vld [vmem:[%s13695_s30 + $0x190] sm:$0xff] }
 0x48f   : > { %7660 = vst [vmem:[%s17027_s19 + $0x120] sm:$0xff] %v7659_v36  ;;  %7662 = vst [vmem:[%s17027_s19 + $0x128] sm:$0xff] %v7661_v58  ;;  %v7689_v61 = vld [vmem:[%s13695_s30 + $0x198] sm:$0xff]  ;;  %v7691_v13 = vld [vmem:[%s13695_s30 + $0x1a0] sm:$0xff] }
 0x490   : > { %7664 = vst [vmem:[%s17027_s19 + $0x130] sm:$0xff] %v7663_v45  ;;  %7666 = vst [vmem:[%s17027_s19 + $0x138] sm:$0xff] %v7665_v24  ;;  %v7693_v51 = vld [vmem:[%s13695_s30 + $0x1a8] sm:$0xff]  ;;  %v7695_v48 = vld [vmem:[%s13695_s30 + $0x1b0] sm:$0xff] }
 0x491   : > { %7668 = vst [vmem:[%s17027_s19 + $0x140] sm:$0xff] %v7667_v59  ;;  %7670 = vst [vmem:[%s17027_s19 + $0x148] sm:$0xff] %v7669_v54  ;;  %v7697_v43 = vld [vmem:[%s13695_s30 + $0x1b8] sm:$0xff]  ;;  %v7699_v7 = vld [vmem:[%s13695_s30 + $0x1c0] sm:$0xff] }
 0x492   : > { %7672 = vst [vmem:[%s17027_s19 + $0x150] sm:$0xff] %v7671_v29  ;;  %7674 = vst [vmem:[%s17027_s19 + $0x158] sm:$0xff] %v7673_v19  ;;  %v7701_v4 = vld [vmem:[%s13695_s30 + $0x1c8] sm:$0xff]  ;;  %v7703_v30 = vld [vmem:[%s13695_s30 + $0x1d0] sm:$0xff] }
 0x493   : > { %7676 = vst [vmem:[%s17027_s19 + $0x160] sm:$0xff] %v7675_v50  ;;  %7678 = vst [vmem:[%s17027_s19 + $0x168] sm:$0xff] %v7677_v12  ;;  %v7705_v40 = vld [vmem:[%s13695_s30 + $0x1d8] sm:$0xff]  ;;  %v7707_v17 = vld [vmem:[%s13695_s30 + $0x1e0] sm:$0xff] }
 0x494   : > { %7680 = vst [vmem:[%s17027_s19 + $0x170] sm:$0xff] %v7679_v44  ;;  %7682 = vst [vmem:[%s17027_s19 + $0x178] sm:$0xff] %v7681_v56  ;;  %v7709_v25 = vld [vmem:[%s13695_s30 + $0x1e8] sm:$0xff]  ;;  %v7711_v11 = vld [vmem:[%s13695_s30 + $0x1f0] sm:$0xff] }
 0x495   : > { %7684 = vst [vmem:[%s17027_s19 + $0x180] sm:$0xff] %v7683_v22  ;;  %7686 = vst [vmem:[%s17027_s19 + $0x188] sm:$0xff] %v7685_v3  ;;  %v7713_v21 = vld [vmem:[%s13695_s30 + $0x1f8] sm:$0xff]  ;;  %v7715_v34 = vld [vmem:[%s13695_s30 + $0x200] sm:$0xff] }
 0x496   : > { %7688 = vst [vmem:[%s17027_s19 + $0x190] sm:$0xff] %v7687_v33  ;;  %7690 = vst [vmem:[%s17027_s19 + $0x198] sm:$0xff] %v7689_v61  ;;  %v7717_v53 = vld [vmem:[%s13695_s30 + $0x208] sm:$0xff]  ;;  %v7719_v57 = vld [vmem:[%s13695_s30 + $0x210] sm:$0xff] }
 0x497   : > { %7692 = vst [vmem:[%s17027_s19 + $0x1a0] sm:$0xff] %v7691_v13  ;;  %7694 = vst [vmem:[%s17027_s19 + $0x1a8] sm:$0xff] %v7693_v51  ;;  %v7721_v46 = vld [vmem:[%s13695_s30 + $0x218] sm:$0xff]  ;;  %v7723_v23 = vld [vmem:[%s13695_s30 + $0x220] sm:$0xff] }
 0x498   : > { %7696 = vst [vmem:[%s17027_s19 + $0x1b0] sm:$0xff] %v7695_v48  ;;  %7698 = vst [vmem:[%s17027_s19 + $0x1b8] sm:$0xff] %v7697_v43  ;;  %v7725_v39 = vld [vmem:[%s13695_s30 + $0x228] sm:$0xff]  ;;  %v7727_v52 = vld [vmem:[%s13695_s30 + $0x230] sm:$0xff] }
 0x499   : > { %7700 = vst [vmem:[%s17027_s19 + $0x1c0] sm:$0xff] %v7699_v7  ;;  %7702 = vst [vmem:[%s17027_s19 + $0x1c8] sm:$0xff] %v7701_v4  ;;  %v7729_v15 = vld [vmem:[%s13695_s30 + $0x238] sm:$0xff]  ;;  %v7731_v18 = vld [vmem:[%s13695_s30 + $0x240] sm:$0xff] }
 0x49a   : > { %7704 = vst [vmem:[%s17027_s19 + $0x1d0] sm:$0xff] %v7703_v30  ;;  %7706 = vst [vmem:[%s17027_s19 + $0x1d8] sm:$0xff] %v7705_v40  ;;  %v7733_v41 = vld [vmem:[%s13695_s30 + $0x248] sm:$0xff]  ;;  %v7735_v20 = vld [vmem:[%s13695_s30 + $0x250] sm:$0xff] }
 0x49b   : > { %7708 = vst [vmem:[%s17027_s19 + $0x1e0] sm:$0xff] %v7707_v17  ;;  %7710 = vst [vmem:[%s17027_s19 + $0x1e8] sm:$0xff] %v7709_v25  ;;  %v7737_v26 = vld [vmem:[%s13695_s30 + $0x258] sm:$0xff]  ;;  %v7739_v37 = vld [vmem:[%s13695_s30 + $0x260] sm:$0xff] }
 0x49c   : > { %7712 = vst [vmem:[%s17027_s19 + $0x1f0] sm:$0xff] %v7711_v11  ;;  %7714 = vst [vmem:[%s17027_s19 + $0x1f8] sm:$0xff] %v7713_v21  ;;  %v7741_v31 = vld [vmem:[%s13695_s30 + $0x268] sm:$0xff]  ;;  %v7743_v5 = vld [vmem:[%s13695_s30 + $0x270] sm:$0xff] }
 0x49d   : > { %7716 = vst [vmem:[%s17027_s19 + $0x400] sm:$0xff] %v7715_v34  ;;  %7718 = vst [vmem:[%s17027_s19 + $0x408] sm:$0xff] %v7717_v53  ;;  %v7745_v35 = vld [vmem:[%s13695_s30 + $0x278] sm:$0xff]  ;;  %v7747_v27 = vld [vmem:[%s13695_s30 + $0x280] sm:$0xff] }
 0x49e   : > { %7720 = vst [vmem:[%s17027_s19 + $0x410] sm:$0xff] %v7719_v57  ;;  %7722 = vst [vmem:[%s17027_s19 + $0x418] sm:$0xff] %v7721_v46  ;;  %v7749_v16 = vld [vmem:[%s13695_s30 + $0x288] sm:$0xff]  ;;  %v7751_v38 = vld [vmem:[%s13695_s30 + $0x290] sm:$0xff] }
 0x49f   : > { %7724 = vst [vmem:[%s17027_s19 + $0x420] sm:$0xff] %v7723_v23  ;;  %7726 = vst [vmem:[%s17027_s19 + $0x428] sm:$0xff] %v7725_v39  ;;  %v7753_v28 = vld [vmem:[%s13695_s30 + $0x298] sm:$0xff]  ;;  %v7755_v10 = vld [vmem:[%s13695_s30 + $0x2a0] sm:$0xff] }
 0x4a0   : > { %7728 = vst [vmem:[%s17027_s19 + $0x430] sm:$0xff] %v7727_v52  ;;  %7730 = vst [vmem:[%s17027_s19 + $0x438] sm:$0xff] %v7729_v15  ;;  %v7757_v49 = vld [vmem:[%s13695_s30 + $0x2a8] sm:$0xff]  ;;  %v7759_v8 = vld [vmem:[%s13695_s30 + $0x2b0] sm:$0xff] }
 0x4a1   : > { %7732 = vst [vmem:[%s17027_s19 + $0x440] sm:$0xff] %v7731_v18  ;;  %7734 = vst [vmem:[%s17027_s19 + $0x448] sm:$0xff] %v7733_v41  ;;  %v7761_v9 = vld [vmem:[%s13695_s30 + $0x2b8] sm:$0xff]  ;;  %v7763_v47 = vld [vmem:[%s13695_s30 + $0x2c0] sm:$0xff] }
 0x4a2   : > { %7736 = vst [vmem:[%s17027_s19 + $0x450] sm:$0xff] %v7735_v20  ;;  %7738 = vst [vmem:[%s17027_s19 + $0x458] sm:$0xff] %v7737_v26  ;;  %v7765_v63 = vld [vmem:[%s13695_s30 + $0x2c8] sm:$0xff]  ;;  %v7767_v62 = vld [vmem:[%s13695_s30 + $0x2d0] sm:$0xff] }
 0x4a3   : > { %7740 = vst [vmem:[%s17027_s19 + $0x460] sm:$0xff] %v7739_v37  ;;  %7742 = vst [vmem:[%s17027_s19 + $0x468] sm:$0xff] %v7741_v31  ;;  %v7769_v32 = vld [vmem:[%s13695_s30 + $0x2d8] sm:$0xff]  ;;  %v7771_v14 = vld [vmem:[%s13695_s30 + $0x2e0] sm:$0xff] }
 0x4a4   : > { %7744 = vst [vmem:[%s17027_s19 + $0x470] sm:$0xff] %v7743_v5  ;;  %7746 = vst [vmem:[%s17027_s19 + $0x478] sm:$0xff] %v7745_v35  ;;  %v7773_v0 = vld [vmem:[%s13695_s30 + $0x2e8] sm:$0xff]  ;;  %v7775_v42 = vld [vmem:[%s13695_s30 + $0x2f0] sm:$0xff] }
 0x4a5   : > { %7748 = vst [vmem:[%s17027_s19 + $0x480] sm:$0xff] %v7747_v27  ;;  %7750 = vst [vmem:[%s17027_s19 + $0x488] sm:$0xff] %v7749_v16  ;;  %v7777_v55 = vld [vmem:[%s13695_s30 + $0x2f8] sm:$0xff]  ;;  %v7779_v2 = vld [vmem:[%s13695_s30 + $0x300] sm:$0xff] }
 0x4a6   : > { %7752 = vst [vmem:[%s17027_s19 + $0x490] sm:$0xff] %v7751_v38  ;;  %7754 = vst [vmem:[%s17027_s19 + $0x498] sm:$0xff] %v7753_v28  ;;  %v7781_v60 = vld [vmem:[%s13695_s30 + $0x308] sm:$0xff]  ;;  %v7783_v6 = vld [vmem:[%s13695_s30 + $0x310] sm:$0xff] }
 0x4a7   : > { %7756 = vst [vmem:[%s17027_s19 + $0x4a0] sm:$0xff] %v7755_v10  ;;  %7758 = vst [vmem:[%s17027_s19 + $0x4a8] sm:$0xff] %v7757_v49  ;;  %v7785_v1 = vld [vmem:[%s13695_s30 + $0x318] sm:$0xff]  ;;  %v7787_v36 = vld [vmem:[%s13695_s30 + $0x320] sm:$0xff] }
 0x4a8   : > { %7760 = vst [vmem:[%s17027_s19 + $0x4b0] sm:$0xff] %v7759_v8  ;;  %7762 = vst [vmem:[%s17027_s19 + $0x4b8] sm:$0xff] %v7761_v9  ;;  %v7789_v58 = vld [vmem:[%s13695_s30 + $0x328] sm:$0xff]  ;;  %v7791_v45 = vld [vmem:[%s13695_s30 + $0x330] sm:$0xff] }
 0x4a9   : > { %7764 = vst [vmem:[%s17027_s19 + $0x4c0] sm:$0xff] %v7763_v47  ;;  %7766 = vst [vmem:[%s17027_s19 + $0x4c8] sm:$0xff] %v7765_v63  ;;  %v7793_v24 = vld [vmem:[%s13695_s30 + $0x338] sm:$0xff]  ;;  %v7795_v59 = vld [vmem:[%s13695_s30 + $0x340] sm:$0xff] }
 0x4aa   : > { %7768 = vst [vmem:[%s17027_s19 + $0x4d0] sm:$0xff] %v7767_v62  ;;  %7770 = vst [vmem:[%s17027_s19 + $0x4d8] sm:$0xff] %v7769_v32  ;;  %v7797_v54 = vld [vmem:[%s13695_s30 + $0x348] sm:$0xff]  ;;  %v7799_v29 = vld [vmem:[%s13695_s30 + $0x350] sm:$0xff] }
 0x4ab   : > { %7772 = vst [vmem:[%s17027_s19 + $0x4e0] sm:$0xff] %v7771_v14  ;;  %7774 = vst [vmem:[%s17027_s19 + $0x4e8] sm:$0xff] %v7773_v0  ;;  %v7801_v19 = vld [vmem:[%s13695_s30 + $0x358] sm:$0xff]  ;;  %v7803_v50 = vld [vmem:[%s13695_s30 + $0x360] sm:$0xff] }
 0x4ac   : > { %7776 = vst [vmem:[%s17027_s19 + $0x4f0] sm:$0xff] %v7775_v42  ;;  %7778 = vst [vmem:[%s17027_s19 + $0x4f8] sm:$0xff] %v7777_v55  ;;  %v7805_v12 = vld [vmem:[%s13695_s30 + $0x368] sm:$0xff]  ;;  %v7807_v44 = vld [vmem:[%s13695_s30 + $0x370] sm:$0xff] }
 0x4ad   : > { %7780 = vst [vmem:[%s17027_s19 + $0x500] sm:$0xff] %v7779_v2  ;;  %7782 = vst [vmem:[%s17027_s19 + $0x508] sm:$0xff] %v7781_v60  ;;  %v7809_v56 = vld [vmem:[%s13695_s30 + $0x378] sm:$0xff]  ;;  %v7811_v22 = vld [vmem:[%s13695_s30 + $0x380] sm:$0xff] }
 0x4ae   : > { %7784 = vst [vmem:[%s17027_s19 + $0x510] sm:$0xff] %v7783_v6  ;;  %7786 = vst [vmem:[%s17027_s19 + $0x518] sm:$0xff] %v7785_v1  ;;  %v7813_v3 = vld [vmem:[%s13695_s30 + $0x388] sm:$0xff]  ;;  %v7815_v33 = vld [vmem:[%s13695_s30 + $0x390] sm:$0xff] }
 0x4af   : > { %7788 = vst [vmem:[%s17027_s19 + $0x520] sm:$0xff] %v7787_v36  ;;  %7790 = vst [vmem:[%s17027_s19 + $0x528] sm:$0xff] %v7789_v58  ;;  %v7817_v61 = vld [vmem:[%s13695_s30 + $0x398] sm:$0xff]  ;;  %v7819_v13 = vld [vmem:[%s13695_s30 + $0x3a0] sm:$0xff] }
 0x4b0   : > { %7792 = vst [vmem:[%s17027_s19 + $0x530] sm:$0xff] %v7791_v45  ;;  %7794 = vst [vmem:[%s17027_s19 + $0x538] sm:$0xff] %v7793_v24  ;;  %v7821_v51 = vld [vmem:[%s13695_s30 + $0x3a8] sm:$0xff]  ;;  %v7823_v48 = vld [vmem:[%s13695_s30 + $0x3b0] sm:$0xff] }
 0x4b1   : > { %7796 = vst [vmem:[%s17027_s19 + $0x540] sm:$0xff] %v7795_v59  ;;  %7798 = vst [vmem:[%s17027_s19 + $0x548] sm:$0xff] %v7797_v54  ;;  %v7825_v43 = vld [vmem:[%s13695_s30 + $0x3b8] sm:$0xff]  ;;  %v7827_v7 = vld [vmem:[%s13695_s30 + $0x3c0] sm:$0xff] }
 0x4b2   : > { %7800 = vst [vmem:[%s17027_s19 + $0x550] sm:$0xff] %v7799_v29  ;;  %7802 = vst [vmem:[%s17027_s19 + $0x558] sm:$0xff] %v7801_v19  ;;  %v7829_v4 = vld [vmem:[%s13695_s30 + $0x3c8] sm:$0xff]  ;;  %v7831_v30 = vld [vmem:[%s13695_s30 + $0x3d0] sm:$0xff] }
 0x4b3   : > { %7804 = vst [vmem:[%s17027_s19 + $0x560] sm:$0xff] %v7803_v50  ;;  %7806 = vst [vmem:[%s17027_s19 + $0x568] sm:$0xff] %v7805_v12  ;;  %v7833_v40 = vld [vmem:[%s13695_s30 + $0x3d8] sm:$0xff]  ;;  %v7835_v17 = vld [vmem:[%s13695_s30 + $0x3e0] sm:$0xff] }
 0x4b4   : > { %7808 = vst [vmem:[%s17027_s19 + $0x570] sm:$0xff] %v7807_v44  ;;  %7810 = vst [vmem:[%s17027_s19 + $0x578] sm:$0xff] %v7809_v56  ;;  %v7837_v25 = vld [vmem:[%s13695_s30 + $0x3e8] sm:$0xff]  ;;  %v7839_v11 = vld [vmem:[%s13695_s30 + $0x3f0] sm:$0xff] }
 0x4b5   : > { %7812 = vst [vmem:[%s17027_s19 + $0x580] sm:$0xff] %v7811_v22  ;;  %7814 = vst [vmem:[%s17027_s19 + $0x588] sm:$0xff] %v7813_v3  ;;  %v7841_v21 = vld [vmem:[%s13695_s30 + $0x3f8] sm:$0xff]  ;;  %v7843_v34 = vld [vmem:[%s13695_s30 + $0x400] sm:$0xff] }
 0x4b6   : > { %7816 = vst [vmem:[%s17027_s19 + $0x590] sm:$0xff] %v7815_v33  ;;  %7818 = vst [vmem:[%s17027_s19 + $0x598] sm:$0xff] %v7817_v61  ;;  %v7845_v53 = vld [vmem:[%s13695_s30 + $0x408] sm:$0xff]  ;;  %v7847_v57 = vld [vmem:[%s13695_s30 + $0x410] sm:$0xff] }
 0x4b7   : > { %7820 = vst [vmem:[%s17027_s19 + $0x5a0] sm:$0xff] %v7819_v13  ;;  %7822 = vst [vmem:[%s17027_s19 + $0x5a8] sm:$0xff] %v7821_v51  ;;  %v7849_v46 = vld [vmem:[%s13695_s30 + $0x418] sm:$0xff]  ;;  %v7851_v23 = vld [vmem:[%s13695_s30 + $0x420] sm:$0xff] }
 0x4b8   : > { %7824 = vst [vmem:[%s17027_s19 + $0x5b0] sm:$0xff] %v7823_v48  ;;  %7826 = vst [vmem:[%s17027_s19 + $0x5b8] sm:$0xff] %v7825_v43  ;;  %v7853_v39 = vld [vmem:[%s13695_s30 + $0x428] sm:$0xff]  ;;  %v7855_v52 = vld [vmem:[%s13695_s30 + $0x430] sm:$0xff] }
 0x4b9   : > { %7828 = vst [vmem:[%s17027_s19 + $0x5c0] sm:$0xff] %v7827_v7  ;;  %7830 = vst [vmem:[%s17027_s19 + $0x5c8] sm:$0xff] %v7829_v4  ;;  %v7857_v15 = vld [vmem:[%s13695_s30 + $0x438] sm:$0xff]  ;;  %v7859_v18 = vld [vmem:[%s13695_s30 + $0x440] sm:$0xff] }
 0x4ba   : > { %7832 = vst [vmem:[%s17027_s19 + $0x5d0] sm:$0xff] %v7831_v30  ;;  %7834 = vst [vmem:[%s17027_s19 + $0x5d8] sm:$0xff] %v7833_v40  ;;  %v7861_v41 = vld [vmem:[%s13695_s30 + $0x448] sm:$0xff]  ;;  %v7863_v20 = vld [vmem:[%s13695_s30 + $0x450] sm:$0xff] }
 0x4bb   : > { %7836 = vst [vmem:[%s17027_s19 + $0x5e0] sm:$0xff] %v7835_v17  ;;  %7838 = vst [vmem:[%s17027_s19 + $0x5e8] sm:$0xff] %v7837_v25  ;;  %v7865_v26 = vld [vmem:[%s13695_s30 + $0x458] sm:$0xff]  ;;  %v7867_v37 = vld [vmem:[%s13695_s30 + $0x460] sm:$0xff] }
 0x4bc   : > { %7840 = vst [vmem:[%s17027_s19 + $0x5f0] sm:$0xff] %v7839_v11  ;;  %7842 = vst [vmem:[%s17027_s19 + $0x5f8] sm:$0xff] %v7841_v21  ;;  %v7869_v31 = vld [vmem:[%s13695_s30 + $0x468] sm:$0xff]  ;;  %v7871_v5 = vld [vmem:[%s13695_s30 + $0x470] sm:$0xff] }
 0x4bd   : > { %7844 = vst [vmem:[%s17027_s19 + $0x800] sm:$0xff] %v7843_v34  ;;  %7846 = vst [vmem:[%s17027_s19 + $0x808] sm:$0xff] %v7845_v53  ;;  %v7873_v35 = vld [vmem:[%s13695_s30 + $0x478] sm:$0xff]  ;;  %v7875_v27 = vld [vmem:[%s13695_s30 + $0x480] sm:$0xff] }
 0x4be   : > { %7848 = vst [vmem:[%s17027_s19 + $0x810] sm:$0xff] %v7847_v57  ;;  %7850 = vst [vmem:[%s17027_s19 + $0x818] sm:$0xff] %v7849_v46  ;;  %v7877_v16 = vld [vmem:[%s13695_s30 + $0x488] sm:$0xff]  ;;  %v7879_v38 = vld [vmem:[%s13695_s30 + $0x490] sm:$0xff] }
 0x4bf   : > { %7852 = vst [vmem:[%s17027_s19 + $0x820] sm:$0xff] %v7851_v23  ;;  %7854 = vst [vmem:[%s17027_s19 + $0x828] sm:$0xff] %v7853_v39  ;;  %v7881_v28 = vld [vmem:[%s13695_s30 + $0x498] sm:$0xff]  ;;  %v7883_v10 = vld [vmem:[%s13695_s30 + $0x4a0] sm:$0xff] }
 0x4c0   : > { %7856 = vst [vmem:[%s17027_s19 + $0x830] sm:$0xff] %v7855_v52  ;;  %7858 = vst [vmem:[%s17027_s19 + $0x838] sm:$0xff] %v7857_v15  ;;  %v7885_v49 = vld [vmem:[%s13695_s30 + $0x4a8] sm:$0xff]  ;;  %v7887_v8 = vld [vmem:[%s13695_s30 + $0x4b0] sm:$0xff] }
 0x4c1   : > { %7860 = vst [vmem:[%s17027_s19 + $0x840] sm:$0xff] %v7859_v18  ;;  %7862 = vst [vmem:[%s17027_s19 + $0x848] sm:$0xff] %v7861_v41  ;;  %v7889_v9 = vld [vmem:[%s13695_s30 + $0x4b8] sm:$0xff]  ;;  %v7891_v47 = vld [vmem:[%s13695_s30 + $0x4c0] sm:$0xff] }
 0x4c2   : > { %7864 = vst [vmem:[%s17027_s19 + $0x850] sm:$0xff] %v7863_v20  ;;  %7866 = vst [vmem:[%s17027_s19 + $0x858] sm:$0xff] %v7865_v26  ;;  %v7893_v63 = vld [vmem:[%s13695_s30 + $0x4c8] sm:$0xff]  ;;  %v7895_v62 = vld [vmem:[%s13695_s30 + $0x4d0] sm:$0xff] }
 0x4c3   : > { %7868 = vst [vmem:[%s17027_s19 + $0x860] sm:$0xff] %v7867_v37  ;;  %7870 = vst [vmem:[%s17027_s19 + $0x868] sm:$0xff] %v7869_v31  ;;  %v7897_v32 = vld [vmem:[%s13695_s30 + $0x4d8] sm:$0xff]  ;;  %v7899_v14 = vld [vmem:[%s13695_s30 + $0x4e0] sm:$0xff] }
 0x4c4   : > { %7872 = vst [vmem:[%s17027_s19 + $0x870] sm:$0xff] %v7871_v5  ;;  %7874 = vst [vmem:[%s17027_s19 + $0x878] sm:$0xff] %v7873_v35  ;;  %v7901_v0 = vld [vmem:[%s13695_s30 + $0x4e8] sm:$0xff]  ;;  %v7903_v42 = vld [vmem:[%s13695_s30 + $0x4f0] sm:$0xff] }
 0x4c5   : > { %7876 = vst [vmem:[%s17027_s19 + $0x880] sm:$0xff] %v7875_v27  ;;  %7878 = vst [vmem:[%s17027_s19 + $0x888] sm:$0xff] %v7877_v16  ;;  %v7905_v55 = vld [vmem:[%s13695_s30 + $0x4f8] sm:$0xff]  ;;  %v7907_v2 = vld [vmem:[%s13695_s30 + $0x500] sm:$0xff] }
 0x4c6   : > { %7880 = vst [vmem:[%s17027_s19 + $0x890] sm:$0xff] %v7879_v38  ;;  %7882 = vst [vmem:[%s17027_s19 + $0x898] sm:$0xff] %v7881_v28  ;;  %v7909_v60 = vld [vmem:[%s13695_s30 + $0x508] sm:$0xff]  ;;  %v7911_v6 = vld [vmem:[%s13695_s30 + $0x510] sm:$0xff] }
 0x4c7   : > { %7884 = vst [vmem:[%s17027_s19 + $0x8a0] sm:$0xff] %v7883_v10  ;;  %7886 = vst [vmem:[%s17027_s19 + $0x8a8] sm:$0xff] %v7885_v49  ;;  %v7913_v1 = vld [vmem:[%s13695_s30 + $0x518] sm:$0xff]  ;;  %v7915_v36 = vld [vmem:[%s13695_s30 + $0x520] sm:$0xff] }
 0x4c8   : > { %7888 = vst [vmem:[%s17027_s19 + $0x8b0] sm:$0xff] %v7887_v8  ;;  %7890 = vst [vmem:[%s17027_s19 + $0x8b8] sm:$0xff] %v7889_v9  ;;  %v7917_v58 = vld [vmem:[%s13695_s30 + $0x528] sm:$0xff]  ;;  %v7919_v45 = vld [vmem:[%s13695_s30 + $0x530] sm:$0xff] }
 0x4c9   : > { %7892 = vst [vmem:[%s17027_s19 + $0x8c0] sm:$0xff] %v7891_v47  ;;  %7894 = vst [vmem:[%s17027_s19 + $0x8c8] sm:$0xff] %v7893_v63  ;;  %v7921_v24 = vld [vmem:[%s13695_s30 + $0x538] sm:$0xff]  ;;  %v7923_v59 = vld [vmem:[%s13695_s30 + $0x540] sm:$0xff] }
 0x4ca   : > { %7896 = vst [vmem:[%s17027_s19 + $0x8d0] sm:$0xff] %v7895_v62  ;;  %7898 = vst [vmem:[%s17027_s19 + $0x8d8] sm:$0xff] %v7897_v32  ;;  %v7925_v54 = vld [vmem:[%s13695_s30 + $0x548] sm:$0xff]  ;;  %v7927_v29 = vld [vmem:[%s13695_s30 + $0x550] sm:$0xff] }
 0x4cb   : > { %7900 = vst [vmem:[%s17027_s19 + $0x8e0] sm:$0xff] %v7899_v14  ;;  %7902 = vst [vmem:[%s17027_s19 + $0x8e8] sm:$0xff] %v7901_v0  ;;  %v7929_v19 = vld [vmem:[%s13695_s30 + $0x558] sm:$0xff]  ;;  %v7931_v50 = vld [vmem:[%s13695_s30 + $0x560] sm:$0xff] }
 0x4cc   : > { %7904 = vst [vmem:[%s17027_s19 + $0x8f0] sm:$0xff] %v7903_v42  ;;  %7906 = vst [vmem:[%s17027_s19 + $0x8f8] sm:$0xff] %v7905_v55  ;;  %v7933_v12 = vld [vmem:[%s13695_s30 + $0x568] sm:$0xff]  ;;  %v7935_v44 = vld [vmem:[%s13695_s30 + $0x570] sm:$0xff] }
 0x4cd   : > { %7908 = vst [vmem:[%s17027_s19 + $0x900] sm:$0xff] %v7907_v2  ;;  %7910 = vst [vmem:[%s17027_s19 + $0x908] sm:$0xff] %v7909_v60  ;;  %v7937_v56 = vld [vmem:[%s13695_s30 + $0x578] sm:$0xff]  ;;  %v7939_v22 = vld [vmem:[%s13695_s30 + $0x580] sm:$0xff] }
 0x4ce   : > { %7912 = vst [vmem:[%s17027_s19 + $0x910] sm:$0xff] %v7911_v6  ;;  %7914 = vst [vmem:[%s17027_s19 + $0x918] sm:$0xff] %v7913_v1  ;;  %v7941_v3 = vld [vmem:[%s13695_s30 + $0x588] sm:$0xff]  ;;  %v7943_v33 = vld [vmem:[%s13695_s30 + $0x590] sm:$0xff] }
 0x4cf   : > { %7916 = vst [vmem:[%s17027_s19 + $0x920] sm:$0xff] %v7915_v36  ;;  %7918 = vst [vmem:[%s17027_s19 + $0x928] sm:$0xff] %v7917_v58  ;;  %v7945_v61 = vld [vmem:[%s13695_s30 + $0x598] sm:$0xff]  ;;  %v7947_v13 = vld [vmem:[%s13695_s30 + $0x5a0] sm:$0xff] }
 0x4d0   : > { %7920 = vst [vmem:[%s17027_s19 + $0x930] sm:$0xff] %v7919_v45  ;;  %7922 = vst [vmem:[%s17027_s19 + $0x938] sm:$0xff] %v7921_v24  ;;  %v7949_v51 = vld [vmem:[%s13695_s30 + $0x5a8] sm:$0xff]  ;;  %v7951_v48 = vld [vmem:[%s13695_s30 + $0x5b0] sm:$0xff] }
 0x4d1   : > { %7924 = vst [vmem:[%s17027_s19 + $0x940] sm:$0xff] %v7923_v59  ;;  %7926 = vst [vmem:[%s17027_s19 + $0x948] sm:$0xff] %v7925_v54  ;;  %v7953_v43 = vld [vmem:[%s13695_s30 + $0x5b8] sm:$0xff]  ;;  %v7955_v7 = vld [vmem:[%s13695_s30 + $0x5c0] sm:$0xff] }
 0x4d2   : > { %7928 = vst [vmem:[%s17027_s19 + $0x950] sm:$0xff] %v7927_v29  ;;  %7930 = vst [vmem:[%s17027_s19 + $0x958] sm:$0xff] %v7929_v19  ;;  %v7957_v4 = vld [vmem:[%s13695_s30 + $0x5c8] sm:$0xff]  ;;  %v7959_v30 = vld [vmem:[%s13695_s30 + $0x5d0] sm:$0xff] }
 0x4d3   : > { %7932 = vst [vmem:[%s17027_s19 + $0x960] sm:$0xff] %v7931_v50  ;;  %7934 = vst [vmem:[%s17027_s19 + $0x968] sm:$0xff] %v7933_v12  ;;  %v7961_v40 = vld [vmem:[%s13695_s30 + $0x5d8] sm:$0xff]  ;;  %v7963_v17 = vld [vmem:[%s13695_s30 + $0x5e0] sm:$0xff] }
 0x4d4   : > { %7936 = vst [vmem:[%s17027_s19 + $0x970] sm:$0xff] %v7935_v44  ;;  %7938 = vst [vmem:[%s17027_s19 + $0x978] sm:$0xff] %v7937_v56  ;;  %v7965_v25 = vld [vmem:[%s13695_s30 + $0x5e8] sm:$0xff]  ;;  %v7967_v11 = vld [vmem:[%s13695_s30 + $0x5f0] sm:$0xff] }
 0x4d5   : > { %7940 = vst [vmem:[%s17027_s19 + $0x980] sm:$0xff] %v7939_v22  ;;  %7942 = vst [vmem:[%s17027_s19 + $0x988] sm:$0xff] %v7941_v3  ;;  %v7969_v21 = vld [vmem:[%s13695_s30 + $0x5f8] sm:$0xff]  ;;  %v7971_v34 = vld [vmem:[%s13695_s30 + $0x600] sm:$0xff] }
 0x4d6   : > { %7944 = vst [vmem:[%s17027_s19 + $0x990] sm:$0xff] %v7943_v33  ;;  %7946 = vst [vmem:[%s17027_s19 + $0x998] sm:$0xff] %v7945_v61  ;;  %v7973_v53 = vld [vmem:[%s13695_s30 + $0x608] sm:$0xff]  ;;  %v7975_v57 = vld [vmem:[%s13695_s30 + $0x610] sm:$0xff] }
 0x4d7   : > { %7948 = vst [vmem:[%s17027_s19 + $0x9a0] sm:$0xff] %v7947_v13  ;;  %7950 = vst [vmem:[%s17027_s19 + $0x9a8] sm:$0xff] %v7949_v51  ;;  %v7977_v46 = vld [vmem:[%s13695_s30 + $0x618] sm:$0xff]  ;;  %v7979_v23 = vld [vmem:[%s13695_s30 + $0x620] sm:$0xff] }
 0x4d8   : > { %7952 = vst [vmem:[%s17027_s19 + $0x9b0] sm:$0xff] %v7951_v48  ;;  %7954 = vst [vmem:[%s17027_s19 + $0x9b8] sm:$0xff] %v7953_v43  ;;  %v7981_v39 = vld [vmem:[%s13695_s30 + $0x628] sm:$0xff]  ;;  %v7983_v52 = vld [vmem:[%s13695_s30 + $0x630] sm:$0xff] }
 0x4d9   : > { %7956 = vst [vmem:[%s17027_s19 + $0x9c0] sm:$0xff] %v7955_v7  ;;  %7958 = vst [vmem:[%s17027_s19 + $0x9c8] sm:$0xff] %v7957_v4  ;;  %v7985_v15 = vld [vmem:[%s13695_s30 + $0x638] sm:$0xff]  ;;  %v7987_v18 = vld [vmem:[%s13695_s30 + $0x640] sm:$0xff] }
 0x4da   : > { %7960 = vst [vmem:[%s17027_s19 + $0x9d0] sm:$0xff] %v7959_v30  ;;  %7962 = vst [vmem:[%s17027_s19 + $0x9d8] sm:$0xff] %v7961_v40  ;;  %v7989_v41 = vld [vmem:[%s13695_s30 + $0x648] sm:$0xff]  ;;  %v7991_v20 = vld [vmem:[%s13695_s30 + $0x650] sm:$0xff] }
 0x4db   : > { %7964 = vst [vmem:[%s17027_s19 + $0x9e0] sm:$0xff] %v7963_v17  ;;  %7966 = vst [vmem:[%s17027_s19 + $0x9e8] sm:$0xff] %v7965_v25  ;;  %v7993_v26 = vld [vmem:[%s13695_s30 + $0x658] sm:$0xff]  ;;  %v7995_v37 = vld [vmem:[%s13695_s30 + $0x660] sm:$0xff] }
 0x4dc   : > { %7968 = vst [vmem:[%s17027_s19 + $0x9f0] sm:$0xff] %v7967_v11  ;;  %7970 = vst [vmem:[%s17027_s19 + $0x9f8] sm:$0xff] %v7969_v21  ;;  %v7997_v31 = vld [vmem:[%s13695_s30 + $0x668] sm:$0xff]  ;;  %v7999_v5 = vld [vmem:[%s13695_s30 + $0x670] sm:$0xff] }
 0x4dd   : > { %7972 = vst [vmem:[%s17027_s19 + $0xc00] sm:$0xff] %v7971_v34  ;;  %7974 = vst [vmem:[%s17027_s19 + $0xc08] sm:$0xff] %v7973_v53  ;;  %v8001_v35 = vld [vmem:[%s13695_s30 + $0x678] sm:$0xff]  ;;  %v8003_v27 = vld [vmem:[%s13695_s30 + $0x680] sm:$0xff] }
 0x4de   : > { %7976 = vst [vmem:[%s17027_s19 + $0xc10] sm:$0xff] %v7975_v57  ;;  %7978 = vst [vmem:[%s17027_s19 + $0xc18] sm:$0xff] %v7977_v46  ;;  %v8005_v16 = vld [vmem:[%s13695_s30 + $0x688] sm:$0xff]  ;;  %v8007_v38 = vld [vmem:[%s13695_s30 + $0x690] sm:$0xff] }
 0x4df   : > { %7980 = vst [vmem:[%s17027_s19 + $0xc20] sm:$0xff] %v7979_v23  ;;  %7982 = vst [vmem:[%s17027_s19 + $0xc28] sm:$0xff] %v7981_v39  ;;  %v8009_v28 = vld [vmem:[%s13695_s30 + $0x698] sm:$0xff]  ;;  %v8011_v10 = vld [vmem:[%s13695_s30 + $0x6a0] sm:$0xff] }
 0x4e0   : > { %7984 = vst [vmem:[%s17027_s19 + $0xc30] sm:$0xff] %v7983_v52  ;;  %7986 = vst [vmem:[%s17027_s19 + $0xc38] sm:$0xff] %v7985_v15  ;;  %v8013_v49 = vld [vmem:[%s13695_s30 + $0x6a8] sm:$0xff]  ;;  %v8015_v8 = vld [vmem:[%s13695_s30 + $0x6b0] sm:$0xff] }
 0x4e1   : > { %7988 = vst [vmem:[%s17027_s19 + $0xc40] sm:$0xff] %v7987_v18  ;;  %7990 = vst [vmem:[%s17027_s19 + $0xc48] sm:$0xff] %v7989_v41  ;;  %v8017_v9 = vld [vmem:[%s13695_s30 + $0x6b8] sm:$0xff]  ;;  %v8019_v47 = vld [vmem:[%s13695_s30 + $0x6c0] sm:$0xff] }
 0x4e2   : > { %7992 = vst [vmem:[%s17027_s19 + $0xc50] sm:$0xff] %v7991_v20  ;;  %7994 = vst [vmem:[%s17027_s19 + $0xc58] sm:$0xff] %v7993_v26  ;;  %v8021_v63 = vld [vmem:[%s13695_s30 + $0x6c8] sm:$0xff]  ;;  %v8023_v62 = vld [vmem:[%s13695_s30 + $0x6d0] sm:$0xff] }
 0x4e3   : > { %7996 = vst [vmem:[%s17027_s19 + $0xc60] sm:$0xff] %v7995_v37  ;;  %7998 = vst [vmem:[%s17027_s19 + $0xc68] sm:$0xff] %v7997_v31  ;;  %v8025_v32 = vld [vmem:[%s13695_s30 + $0x6d8] sm:$0xff]  ;;  %v8027_v14 = vld [vmem:[%s13695_s30 + $0x6e0] sm:$0xff] }
 0x4e4   : > { %8000 = vst [vmem:[%s17027_s19 + $0xc70] sm:$0xff] %v7999_v5  ;;  %8002 = vst [vmem:[%s17027_s19 + $0xc78] sm:$0xff] %v8001_v35  ;;  %v8029_v0 = vld [vmem:[%s13695_s30 + $0x6e8] sm:$0xff]  ;;  %v8031_v42 = vld [vmem:[%s13695_s30 + $0x6f0] sm:$0xff] }
 0x4e5   : > { %8004 = vst [vmem:[%s17027_s19 + $0xc80] sm:$0xff] %v8003_v27  ;;  %8006 = vst [vmem:[%s17027_s19 + $0xc88] sm:$0xff] %v8005_v16  ;;  %v8033_v55 = vld [vmem:[%s13695_s30 + $0x6f8] sm:$0xff]  ;;  %v8035_v2 = vld [vmem:[%s13695_s30 + $0x700] sm:$0xff] }
 0x4e6   : > { %8008 = vst [vmem:[%s17027_s19 + $0xc90] sm:$0xff] %v8007_v38  ;;  %8010 = vst [vmem:[%s17027_s19 + $0xc98] sm:$0xff] %v8009_v28  ;;  %v8037_v60 = vld [vmem:[%s13695_s30 + $0x708] sm:$0xff]  ;;  %v8039_v6 = vld [vmem:[%s13695_s30 + $0x710] sm:$0xff] }
 0x4e7   : > { %8012 = vst [vmem:[%s17027_s19 + $0xca0] sm:$0xff] %v8011_v10  ;;  %8014 = vst [vmem:[%s17027_s19 + $0xca8] sm:$0xff] %v8013_v49  ;;  %v8041_v1 = vld [vmem:[%s13695_s30 + $0x718] sm:$0xff]  ;;  %v8043_v36 = vld [vmem:[%s13695_s30 + $0x720] sm:$0xff] }
 0x4e8   : > { %8016 = vst [vmem:[%s17027_s19 + $0xcb0] sm:$0xff] %v8015_v8  ;;  %8018 = vst [vmem:[%s17027_s19 + $0xcb8] sm:$0xff] %v8017_v9  ;;  %v8045_v58 = vld [vmem:[%s13695_s30 + $0x728] sm:$0xff]  ;;  %v8047_v45 = vld [vmem:[%s13695_s30 + $0x730] sm:$0xff] }
 0x4e9   : > { %8020 = vst [vmem:[%s17027_s19 + $0xcc0] sm:$0xff] %v8019_v47  ;;  %8022 = vst [vmem:[%s17027_s19 + $0xcc8] sm:$0xff] %v8021_v63  ;;  %v8049_v24 = vld [vmem:[%s13695_s30 + $0x738] sm:$0xff]  ;;  %v8051_v59 = vld [vmem:[%s13695_s30 + $0x740] sm:$0xff] }
 0x4ea   : > { %8024 = vst [vmem:[%s17027_s19 + $0xcd0] sm:$0xff] %v8023_v62  ;;  %8026 = vst [vmem:[%s17027_s19 + $0xcd8] sm:$0xff] %v8025_v32  ;;  %v8053_v54 = vld [vmem:[%s13695_s30 + $0x748] sm:$0xff]  ;;  %v8055_v29 = vld [vmem:[%s13695_s30 + $0x750] sm:$0xff] }
 0x4eb   : > { %8028 = vst [vmem:[%s17027_s19 + $0xce0] sm:$0xff] %v8027_v14  ;;  %8030 = vst [vmem:[%s17027_s19 + $0xce8] sm:$0xff] %v8029_v0  ;;  %v8057_v19 = vld [vmem:[%s13695_s30 + $0x758] sm:$0xff]  ;;  %v8059_v50 = vld [vmem:[%s13695_s30 + $0x760] sm:$0xff] }
 0x4ec   : > { %8032 = vst [vmem:[%s17027_s19 + $0xcf0] sm:$0xff] %v8031_v42  ;;  %8034 = vst [vmem:[%s17027_s19 + $0xcf8] sm:$0xff] %v8033_v55  ;;  %v8061_v12 = vld [vmem:[%s13695_s30 + $0x768] sm:$0xff]  ;;  %v8063_v44 = vld [vmem:[%s13695_s30 + $0x770] sm:$0xff] }
 0x4ed   : > { %8036 = vst [vmem:[%s17027_s19 + $0xd00] sm:$0xff] %v8035_v2  ;;  %8038 = vst [vmem:[%s17027_s19 + $0xd08] sm:$0xff] %v8037_v60  ;;  %v8065_v56 = vld [vmem:[%s13695_s30 + $0x778] sm:$0xff]  ;;  %v8067_v22 = vld [vmem:[%s13695_s30 + $0x780] sm:$0xff] }
 0x4ee   : > { %8040 = vst [vmem:[%s17027_s19 + $0xd10] sm:$0xff] %v8039_v6  ;;  %8042 = vst [vmem:[%s17027_s19 + $0xd18] sm:$0xff] %v8041_v1  ;;  %v8069_v3 = vld [vmem:[%s13695_s30 + $0x788] sm:$0xff]  ;;  %v8071_v33 = vld [vmem:[%s13695_s30 + $0x790] sm:$0xff] }
 0x4ef   : > { %8044 = vst [vmem:[%s17027_s19 + $0xd20] sm:$0xff] %v8043_v36  ;;  %8046 = vst [vmem:[%s17027_s19 + $0xd28] sm:$0xff] %v8045_v58  ;;  %v8073_v61 = vld [vmem:[%s13695_s30 + $0x798] sm:$0xff]  ;;  %v8075_v13 = vld [vmem:[%s13695_s30 + $0x7a0] sm:$0xff] }
 0x4f0   : > { %8048 = vst [vmem:[%s17027_s19 + $0xd30] sm:$0xff] %v8047_v45  ;;  %8050 = vst [vmem:[%s17027_s19 + $0xd38] sm:$0xff] %v8049_v24  ;;  %v8077_v51 = vld [vmem:[%s13695_s30 + $0x7a8] sm:$0xff]  ;;  %v8079_v48 = vld [vmem:[%s13695_s30 + $0x7b0] sm:$0xff] }
 0x4f1   : > { %8052 = vst [vmem:[%s17027_s19 + $0xd40] sm:$0xff] %v8051_v59  ;;  %8054 = vst [vmem:[%s17027_s19 + $0xd48] sm:$0xff] %v8053_v54  ;;  %v8081_v43 = vld [vmem:[%s13695_s30 + $0x7b8] sm:$0xff]  ;;  %v8083_v7 = vld [vmem:[%s13695_s30 + $0x7c0] sm:$0xff] }
 0x4f2   : > { %8056 = vst [vmem:[%s17027_s19 + $0xd50] sm:$0xff] %v8055_v29  ;;  %8058 = vst [vmem:[%s17027_s19 + $0xd58] sm:$0xff] %v8057_v19  ;;  %v8085_v4 = vld [vmem:[%s13695_s30 + $0x7c8] sm:$0xff]  ;;  %v8087_v30 = vld [vmem:[%s13695_s30 + $0x7d0] sm:$0xff] }
 0x4f3   : > { %8060 = vst [vmem:[%s17027_s19 + $0xd60] sm:$0xff] %v8059_v50  ;;  %8062 = vst [vmem:[%s17027_s19 + $0xd68] sm:$0xff] %v8061_v12  ;;  %v8089_v40 = vld [vmem:[%s13695_s30 + $0x7d8] sm:$0xff]  ;;  %v8091_v17 = vld [vmem:[%s13695_s30 + $0x7e0] sm:$0xff] }
 0x4f4   : > { %8064 = vst [vmem:[%s17027_s19 + $0xd70] sm:$0xff] %v8063_v44  ;;  %8066 = vst [vmem:[%s17027_s19 + $0xd78] sm:$0xff] %v8065_v56  ;;  %v8093_v25 = vld [vmem:[%s13695_s30 + $0x7e8] sm:$0xff]  ;;  %v8095_v11 = vld [vmem:[%s13695_s30 + $0x7f0] sm:$0xff] }
 0x4f5   : > { %8068 = vst [vmem:[%s17027_s19 + $0xd80] sm:$0xff] %v8067_v22  ;;  %8070 = vst [vmem:[%s17027_s19 + $0xd88] sm:$0xff] %v8069_v3  ;;  %v8097_v21 = vld [vmem:[%s13695_s30 + $0x7f8] sm:$0xff] }
 0x4f6   : > { %8072 = vst [vmem:[%s17027_s19 + $0xd90] sm:$0xff] %v8071_v33  ;;  %8074 = vst [vmem:[%s17027_s19 + $0xd98] sm:$0xff] %v8073_v61 }
 0x4f7   : > { %8076 = vst [vmem:[%s17027_s19 + $0xda0] sm:$0xff] %v8075_v13  ;;  %8078 = vst [vmem:[%s17027_s19 + $0xda8] sm:$0xff] %v8077_v51 }
 0x4f8   : > { %8080 = vst [vmem:[%s17027_s19 + $0xdb0] sm:$0xff] %v8079_v48  ;;  %8082 = vst [vmem:[%s17027_s19 + $0xdb8] sm:$0xff] %v8081_v43 }
 0x4f9   : > { %8084 = vst [vmem:[%s17027_s19 + $0xdc0] sm:$0xff] %v8083_v7  ;;  %8086 = vst [vmem:[%s17027_s19 + $0xdc8] sm:$0xff] %v8085_v4 }
 0x4fa   : > { %8088 = vst [vmem:[%s17027_s19 + $0xdd0] sm:$0xff] %v8087_v30  ;;  %8090 = vst [vmem:[%s17027_s19 + $0xdd8] sm:$0xff] %v8089_v40 }
 0x4fb   : > { %8092 = vst [vmem:[%s17027_s19 + $0xde0] sm:$0xff] %v8091_v17  ;;  %8094 = vst [vmem:[%s17027_s19 + $0xde8] sm:$0xff] %v8093_v25 }
 0x4fc   : > { %8096 = vst [vmem:[%s17027_s19 + $0xdf0] sm:$0xff] %v8095_v11  ;;  %8098 = vst [vmem:[%s17027_s19 + $0xdf8] sm:$0xff] %v8097_v21 }
 0x4fd PF: > { %8104 = sbr.rel (!%p12951_p9) target bundleno = 1413 (0x585), region = 120  ;;  %s10046_s9 = sshll.u32 (%p12951_p9), %s12826_s24, 6  ;;  %v8648_v34 = vld [vmem:[%s14286_s16] sm:$0xff] (%p12951_p9)  ;;  %v8650_v53 = vld [vmem:[%s14286_s16 + $0x8] sm:$0xff] (%p12951_p9)  ;;  %v8652_v57 = vld [vmem:[%s14286_s16 + $0x10] sm:$0xff] (%p12951_p9) }
 0x4fe   : > { %s10047_s30 = sshll.u32 (%p12951_p9), %s12830_s25, 9  ;;  %v8654_v46 = vld [vmem:[%s14286_s16 + $0x18] sm:$0xff] (%p12951_p9)  ;;  %v8656_v23 = vld [vmem:[%s14286_s16 + $0x20] sm:$0xff] (%p12951_p9)  ;;  %v8658_v39 = vld [vmem:[%s14286_s16 + $0x28] sm:$0xff] (%p12951_p9)  ;;  %s18165_s6 = sld [smem:[#allocation18_spill]] (%p12951_p9) }
 0x4ff   : > { %s8107_s14 = sadd.s32 (%p12951_p9), %s10047_s30, %s10046_s9  ;;  %v8660_v52 = vld [vmem:[%s14286_s16 + $0x30] sm:$0xff] (%p12951_p9)  ;;  %v8662_v15 = vld [vmem:[%s14286_s16 + $0x38] sm:$0xff] (%p12951_p9)  ;;  %v8664_v18 = vld [vmem:[%s14286_s16 + $0x40] sm:$0xff] (%p12951_p9) }
 0x500   : > { %s10048_s10 = sshll.u32 (%p12951_p9), %s8107_s14, 3  ;;  %v8666_v41 = vld [vmem:[%s14286_s16 + $0x48] sm:$0xff] (%p12951_p9)  ;;  %v8668_v20 = vld [vmem:[%s14286_s16 + $0x50] sm:$0xff] (%p12951_p9)  ;;  %v8670_v26 = vld [vmem:[%s14286_s16 + $0x58] sm:$0xff] (%p12951_p9) }
 0x501   : > { %v8672_v37 = vld [vmem:[%s14286_s16 + $0x60] sm:$0xff] (%p12951_p9)  ;;  %v8674_v31 = vld [vmem:[%s14286_s16 + $0x68] sm:$0xff] (%p12951_p9)  ;;  %v8676_v5 = vld [vmem:[%s14286_s16 + $0x70] sm:$0xff] (%p12951_p9) }
 0x502   : > { %v8678_v35 = vld [vmem:[%s14286_s16 + $0x78] sm:$0xff]  ;;  %v8680_v27 = vld [vmem:[%s14286_s16 + $0x80] sm:$0xff]  ;;  %v8682_v16 = vld [vmem:[%s14286_s16 + $0x88] sm:$0xff] }
 0x503   : > { %v8684_v38 = vld [vmem:[%s14286_s16 + $0x90] sm:$0xff]  ;;  %v8686_v28 = vld [vmem:[%s14286_s16 + $0x98] sm:$0xff]  ;;  %v8688_v10 = vld [vmem:[%s14286_s16 + $0xa0] sm:$0xff] }
 0x504   : > { %s17548_s29 = scalar_lea.vmem %s18165_s6, %s10048_s10  ;;  %v8690_v49 = vld [vmem:[%s14286_s16 + $0xa8] sm:$0xff]  ;;  %v8692_v8 = vld [vmem:[%s14286_s16 + $0xb0] sm:$0xff]  ;;  %v8694_v9 = vld [vmem:[%s14286_s16 + $0xb8] sm:$0xff] }
 0x505   : > { %8649 = vst [vmem:[%s17548_s29] sm:$0xff] %v8648_v34  ;;  %8651 = vst [vmem:[%s17548_s29 + $0x8] sm:$0xff] %v8650_v53  ;;  %v8696_v47 = vld [vmem:[%s14286_s16 + $0xc0] sm:$0xff]  ;;  %v8698_v63 = vld [vmem:[%s14286_s16 + $0xc8] sm:$0xff] }
 0x506   : > { %8653 = vst [vmem:[%s17548_s29 + $0x10] sm:$0xff] %v8652_v57  ;;  %8655 = vst [vmem:[%s17548_s29 + $0x18] sm:$0xff] %v8654_v46  ;;  %v8700_v62 = vld [vmem:[%s14286_s16 + $0xd0] sm:$0xff]  ;;  %v8702_v32 = vld [vmem:[%s14286_s16 + $0xd8] sm:$0xff] }
 0x507   : > { %8657 = vst [vmem:[%s17548_s29 + $0x20] sm:$0xff] %v8656_v23  ;;  %8659 = vst [vmem:[%s17548_s29 + $0x28] sm:$0xff] %v8658_v39  ;;  %v8704_v14 = vld [vmem:[%s14286_s16 + $0xe0] sm:$0xff]  ;;  %v8706_v0 = vld [vmem:[%s14286_s16 + $0xe8] sm:$0xff] }
 0x508   : > { %8661 = vst [vmem:[%s17548_s29 + $0x30] sm:$0xff] %v8660_v52  ;;  %8663 = vst [vmem:[%s17548_s29 + $0x38] sm:$0xff] %v8662_v15  ;;  %v8708_v42 = vld [vmem:[%s14286_s16 + $0xf0] sm:$0xff]  ;;  %v8710_v55 = vld [vmem:[%s14286_s16 + $0xf8] sm:$0xff] }
 0x509   : > { %8665 = vst [vmem:[%s17548_s29 + $0x40] sm:$0xff] %v8664_v18  ;;  %8667 = vst [vmem:[%s17548_s29 + $0x48] sm:$0xff] %v8666_v41  ;;  %v8712_v2 = vld [vmem:[%s14286_s16 + $0x100] sm:$0xff]  ;;  %v8714_v60 = vld [vmem:[%s14286_s16 + $0x108] sm:$0xff] }
 0x50a   : > { %8669 = vst [vmem:[%s17548_s29 + $0x50] sm:$0xff] %v8668_v20  ;;  %8671 = vst [vmem:[%s17548_s29 + $0x58] sm:$0xff] %v8670_v26  ;;  %v8716_v6 = vld [vmem:[%s14286_s16 + $0x110] sm:$0xff]  ;;  %v8718_v1 = vld [vmem:[%s14286_s16 + $0x118] sm:$0xff] }
 0x50b   : > { %8673 = vst [vmem:[%s17548_s29 + $0x60] sm:$0xff] %v8672_v37  ;;  %8675 = vst [vmem:[%s17548_s29 + $0x68] sm:$0xff] %v8674_v31  ;;  %v8720_v36 = vld [vmem:[%s14286_s16 + $0x120] sm:$0xff]  ;;  %v8722_v58 = vld [vmem:[%s14286_s16 + $0x128] sm:$0xff] }
 0x50c   : > { %8677 = vst [vmem:[%s17548_s29 + $0x70] sm:$0xff] %v8676_v5  ;;  %8679 = vst [vmem:[%s17548_s29 + $0x78] sm:$0xff] %v8678_v35  ;;  %v8724_v45 = vld [vmem:[%s14286_s16 + $0x130] sm:$0xff]  ;;  %v8726_v24 = vld [vmem:[%s14286_s16 + $0x138] sm:$0xff] }
 0x50d   : > { %8681 = vst [vmem:[%s17548_s29 + $0x80] sm:$0xff] %v8680_v27  ;;  %8683 = vst [vmem:[%s17548_s29 + $0x88] sm:$0xff] %v8682_v16  ;;  %v8728_v59 = vld [vmem:[%s14286_s16 + $0x140] sm:$0xff]  ;;  %v8730_v54 = vld [vmem:[%s14286_s16 + $0x148] sm:$0xff] }
 0x50e   : > { %8685 = vst [vmem:[%s17548_s29 + $0x90] sm:$0xff] %v8684_v38  ;;  %8687 = vst [vmem:[%s17548_s29 + $0x98] sm:$0xff] %v8686_v28  ;;  %v8732_v29 = vld [vmem:[%s14286_s16 + $0x150] sm:$0xff]  ;;  %v8734_v19 = vld [vmem:[%s14286_s16 + $0x158] sm:$0xff] }
 0x50f   : > { %8689 = vst [vmem:[%s17548_s29 + $0xa0] sm:$0xff] %v8688_v10  ;;  %8691 = vst [vmem:[%s17548_s29 + $0xa8] sm:$0xff] %v8690_v49  ;;  %v8736_v50 = vld [vmem:[%s14286_s16 + $0x160] sm:$0xff]  ;;  %v8738_v12 = vld [vmem:[%s14286_s16 + $0x168] sm:$0xff] }
 0x510   : > { %8693 = vst [vmem:[%s17548_s29 + $0xb0] sm:$0xff] %v8692_v8  ;;  %8695 = vst [vmem:[%s17548_s29 + $0xb8] sm:$0xff] %v8694_v9  ;;  %v8740_v44 = vld [vmem:[%s14286_s16 + $0x170] sm:$0xff]  ;;  %v8742_v56 = vld [vmem:[%s14286_s16 + $0x178] sm:$0xff] }
 0x511   : > { %8697 = vst [vmem:[%s17548_s29 + $0xc0] sm:$0xff] %v8696_v47  ;;  %8699 = vst [vmem:[%s17548_s29 + $0xc8] sm:$0xff] %v8698_v63  ;;  %v8744_v22 = vld [vmem:[%s14286_s16 + $0x180] sm:$0xff]  ;;  %v8746_v3 = vld [vmem:[%s14286_s16 + $0x188] sm:$0xff] }
 0x512   : > { %8701 = vst [vmem:[%s17548_s29 + $0xd0] sm:$0xff] %v8700_v62  ;;  %8703 = vst [vmem:[%s17548_s29 + $0xd8] sm:$0xff] %v8702_v32  ;;  %v8748_v33 = vld [vmem:[%s14286_s16 + $0x190] sm:$0xff]  ;;  %v8750_v61 = vld [vmem:[%s14286_s16 + $0x198] sm:$0xff] }
 0x513   : > { %8705 = vst [vmem:[%s17548_s29 + $0xe0] sm:$0xff] %v8704_v14  ;;  %8707 = vst [vmem:[%s17548_s29 + $0xe8] sm:$0xff] %v8706_v0  ;;  %v8752_v13 = vld [vmem:[%s14286_s16 + $0x1a0] sm:$0xff]  ;;  %v8754_v51 = vld [vmem:[%s14286_s16 + $0x1a8] sm:$0xff] }
 0x514   : > { %8709 = vst [vmem:[%s17548_s29 + $0xf0] sm:$0xff] %v8708_v42  ;;  %8711 = vst [vmem:[%s17548_s29 + $0xf8] sm:$0xff] %v8710_v55  ;;  %v8756_v48 = vld [vmem:[%s14286_s16 + $0x1b0] sm:$0xff]  ;;  %v8758_v43 = vld [vmem:[%s14286_s16 + $0x1b8] sm:$0xff] }
 0x515   : > { %8713 = vst [vmem:[%s17548_s29 + $0x100] sm:$0xff] %v8712_v2  ;;  %8715 = vst [vmem:[%s17548_s29 + $0x108] sm:$0xff] %v8714_v60  ;;  %v8760_v7 = vld [vmem:[%s14286_s16 + $0x1c0] sm:$0xff]  ;;  %v8762_v4 = vld [vmem:[%s14286_s16 + $0x1c8] sm:$0xff] }
 0x516   : > { %8717 = vst [vmem:[%s17548_s29 + $0x110] sm:$0xff] %v8716_v6  ;;  %8719 = vst [vmem:[%s17548_s29 + $0x118] sm:$0xff] %v8718_v1  ;;  %v8764_v30 = vld [vmem:[%s14286_s16 + $0x1d0] sm:$0xff]  ;;  %v8766_v40 = vld [vmem:[%s14286_s16 + $0x1d8] sm:$0xff] }
 0x517   : > { %8721 = vst [vmem:[%s17548_s29 + $0x120] sm:$0xff] %v8720_v36  ;;  %8723 = vst [vmem:[%s17548_s29 + $0x128] sm:$0xff] %v8722_v58  ;;  %v8768_v17 = vld [vmem:[%s14286_s16 + $0x1e0] sm:$0xff]  ;;  %v8770_v25 = vld [vmem:[%s14286_s16 + $0x1e8] sm:$0xff] }
 0x518   : > { %8725 = vst [vmem:[%s17548_s29 + $0x130] sm:$0xff] %v8724_v45  ;;  %8727 = vst [vmem:[%s17548_s29 + $0x138] sm:$0xff] %v8726_v24  ;;  %v8772_v11 = vld [vmem:[%s14286_s16 + $0x1f0] sm:$0xff]  ;;  %v8774_v21 = vld [vmem:[%s14286_s16 + $0x1f8] sm:$0xff] }
 0x519   : > { %8729 = vst [vmem:[%s17548_s29 + $0x140] sm:$0xff] %v8728_v59  ;;  %8731 = vst [vmem:[%s17548_s29 + $0x148] sm:$0xff] %v8730_v54  ;;  %v8776_v34 = vld [vmem:[%s14286_s16 + $0x200] sm:$0xff]  ;;  %v8778_v53 = vld [vmem:[%s14286_s16 + $0x208] sm:$0xff] }
 0x51a   : > { %8733 = vst [vmem:[%s17548_s29 + $0x150] sm:$0xff] %v8732_v29  ;;  %8735 = vst [vmem:[%s17548_s29 + $0x158] sm:$0xff] %v8734_v19  ;;  %v8780_v57 = vld [vmem:[%s14286_s16 + $0x210] sm:$0xff]  ;;  %v8782_v46 = vld [vmem:[%s14286_s16 + $0x218] sm:$0xff] }
 0x51b   : > { %8737 = vst [vmem:[%s17548_s29 + $0x160] sm:$0xff] %v8736_v50  ;;  %8739 = vst [vmem:[%s17548_s29 + $0x168] sm:$0xff] %v8738_v12  ;;  %v8784_v23 = vld [vmem:[%s14286_s16 + $0x220] sm:$0xff]  ;;  %v8786_v39 = vld [vmem:[%s14286_s16 + $0x228] sm:$0xff] }
 0x51c   : > { %8741 = vst [vmem:[%s17548_s29 + $0x170] sm:$0xff] %v8740_v44  ;;  %8743 = vst [vmem:[%s17548_s29 + $0x178] sm:$0xff] %v8742_v56  ;;  %v8788_v52 = vld [vmem:[%s14286_s16 + $0x230] sm:$0xff]  ;;  %v8790_v15 = vld [vmem:[%s14286_s16 + $0x238] sm:$0xff] }
 0x51d   : > { %8745 = vst [vmem:[%s17548_s29 + $0x180] sm:$0xff] %v8744_v22  ;;  %8747 = vst [vmem:[%s17548_s29 + $0x188] sm:$0xff] %v8746_v3  ;;  %v8792_v18 = vld [vmem:[%s14286_s16 + $0x240] sm:$0xff]  ;;  %v8794_v41 = vld [vmem:[%s14286_s16 + $0x248] sm:$0xff] }
 0x51e   : > { %8749 = vst [vmem:[%s17548_s29 + $0x190] sm:$0xff] %v8748_v33  ;;  %8751 = vst [vmem:[%s17548_s29 + $0x198] sm:$0xff] %v8750_v61  ;;  %v8796_v20 = vld [vmem:[%s14286_s16 + $0x250] sm:$0xff]  ;;  %v8798_v26 = vld [vmem:[%s14286_s16 + $0x258] sm:$0xff] }
 0x51f   : > { %8753 = vst [vmem:[%s17548_s29 + $0x1a0] sm:$0xff] %v8752_v13  ;;  %8755 = vst [vmem:[%s17548_s29 + $0x1a8] sm:$0xff] %v8754_v51  ;;  %v8800_v37 = vld [vmem:[%s14286_s16 + $0x260] sm:$0xff]  ;;  %v8802_v31 = vld [vmem:[%s14286_s16 + $0x268] sm:$0xff] }
 0x520   : > { %8757 = vst [vmem:[%s17548_s29 + $0x1b0] sm:$0xff] %v8756_v48  ;;  %8759 = vst [vmem:[%s17548_s29 + $0x1b8] sm:$0xff] %v8758_v43  ;;  %v8804_v5 = vld [vmem:[%s14286_s16 + $0x270] sm:$0xff]  ;;  %v8806_v35 = vld [vmem:[%s14286_s16 + $0x278] sm:$0xff] }
 0x521   : > { %8761 = vst [vmem:[%s17548_s29 + $0x1c0] sm:$0xff] %v8760_v7  ;;  %8763 = vst [vmem:[%s17548_s29 + $0x1c8] sm:$0xff] %v8762_v4  ;;  %v8808_v27 = vld [vmem:[%s14286_s16 + $0x280] sm:$0xff]  ;;  %v8810_v16 = vld [vmem:[%s14286_s16 + $0x288] sm:$0xff] }
 0x522   : > { %8765 = vst [vmem:[%s17548_s29 + $0x1d0] sm:$0xff] %v8764_v30  ;;  %8767 = vst [vmem:[%s17548_s29 + $0x1d8] sm:$0xff] %v8766_v40  ;;  %v8812_v38 = vld [vmem:[%s14286_s16 + $0x290] sm:$0xff]  ;;  %v8814_v28 = vld [vmem:[%s14286_s16 + $0x298] sm:$0xff] }
 0x523   : > { %8769 = vst [vmem:[%s17548_s29 + $0x1e0] sm:$0xff] %v8768_v17  ;;  %8771 = vst [vmem:[%s17548_s29 + $0x1e8] sm:$0xff] %v8770_v25  ;;  %v8816_v10 = vld [vmem:[%s14286_s16 + $0x2a0] sm:$0xff]  ;;  %v8818_v49 = vld [vmem:[%s14286_s16 + $0x2a8] sm:$0xff] }
 0x524   : > { %8773 = vst [vmem:[%s17548_s29 + $0x1f0] sm:$0xff] %v8772_v11  ;;  %8775 = vst [vmem:[%s17548_s29 + $0x1f8] sm:$0xff] %v8774_v21  ;;  %v8820_v8 = vld [vmem:[%s14286_s16 + $0x2b0] sm:$0xff]  ;;  %v8822_v9 = vld [vmem:[%s14286_s16 + $0x2b8] sm:$0xff] }
 0x525   : > { %8777 = vst [vmem:[%s17548_s29 + $0x400] sm:$0xff] %v8776_v34  ;;  %8779 = vst [vmem:[%s17548_s29 + $0x408] sm:$0xff] %v8778_v53  ;;  %v8824_v47 = vld [vmem:[%s14286_s16 + $0x2c0] sm:$0xff]  ;;  %v8826_v63 = vld [vmem:[%s14286_s16 + $0x2c8] sm:$0xff] }
 0x526   : > { %8781 = vst [vmem:[%s17548_s29 + $0x410] sm:$0xff] %v8780_v57  ;;  %8783 = vst [vmem:[%s17548_s29 + $0x418] sm:$0xff] %v8782_v46  ;;  %v8828_v62 = vld [vmem:[%s14286_s16 + $0x2d0] sm:$0xff]  ;;  %v8830_v32 = vld [vmem:[%s14286_s16 + $0x2d8] sm:$0xff] }
 0x527   : > { %8785 = vst [vmem:[%s17548_s29 + $0x420] sm:$0xff] %v8784_v23  ;;  %8787 = vst [vmem:[%s17548_s29 + $0x428] sm:$0xff] %v8786_v39  ;;  %v8832_v14 = vld [vmem:[%s14286_s16 + $0x2e0] sm:$0xff]  ;;  %v8834_v0 = vld [vmem:[%s14286_s16 + $0x2e8] sm:$0xff] }
 0x528   : > { %8789 = vst [vmem:[%s17548_s29 + $0x430] sm:$0xff] %v8788_v52  ;;  %8791 = vst [vmem:[%s17548_s29 + $0x438] sm:$0xff] %v8790_v15  ;;  %v8836_v42 = vld [vmem:[%s14286_s16 + $0x2f0] sm:$0xff]  ;;  %v8838_v55 = vld [vmem:[%s14286_s16 + $0x2f8] sm:$0xff] }
 0x529   : > { %8793 = vst [vmem:[%s17548_s29 + $0x440] sm:$0xff] %v8792_v18  ;;  %8795 = vst [vmem:[%s17548_s29 + $0x448] sm:$0xff] %v8794_v41  ;;  %v8840_v2 = vld [vmem:[%s14286_s16 + $0x300] sm:$0xff]  ;;  %v8842_v60 = vld [vmem:[%s14286_s16 + $0x308] sm:$0xff] }
 0x52a   : > { %8797 = vst [vmem:[%s17548_s29 + $0x450] sm:$0xff] %v8796_v20  ;;  %8799 = vst [vmem:[%s17548_s29 + $0x458] sm:$0xff] %v8798_v26  ;;  %v8844_v6 = vld [vmem:[%s14286_s16 + $0x310] sm:$0xff]  ;;  %v8846_v1 = vld [vmem:[%s14286_s16 + $0x318] sm:$0xff] }
 0x52b   : > { %8801 = vst [vmem:[%s17548_s29 + $0x460] sm:$0xff] %v8800_v37  ;;  %8803 = vst [vmem:[%s17548_s29 + $0x468] sm:$0xff] %v8802_v31  ;;  %v8848_v36 = vld [vmem:[%s14286_s16 + $0x320] sm:$0xff]  ;;  %v8850_v58 = vld [vmem:[%s14286_s16 + $0x328] sm:$0xff] }
 0x52c   : > { %8805 = vst [vmem:[%s17548_s29 + $0x470] sm:$0xff] %v8804_v5  ;;  %8807 = vst [vmem:[%s17548_s29 + $0x478] sm:$0xff] %v8806_v35  ;;  %v8852_v45 = vld [vmem:[%s14286_s16 + $0x330] sm:$0xff]  ;;  %v8854_v24 = vld [vmem:[%s14286_s16 + $0x338] sm:$0xff] }
 0x52d   : > { %8809 = vst [vmem:[%s17548_s29 + $0x480] sm:$0xff] %v8808_v27  ;;  %8811 = vst [vmem:[%s17548_s29 + $0x488] sm:$0xff] %v8810_v16  ;;  %v8856_v59 = vld [vmem:[%s14286_s16 + $0x340] sm:$0xff]  ;;  %v8858_v54 = vld [vmem:[%s14286_s16 + $0x348] sm:$0xff] }
 0x52e   : > { %8813 = vst [vmem:[%s17548_s29 + $0x490] sm:$0xff] %v8812_v38  ;;  %8815 = vst [vmem:[%s17548_s29 + $0x498] sm:$0xff] %v8814_v28  ;;  %v8860_v29 = vld [vmem:[%s14286_s16 + $0x350] sm:$0xff]  ;;  %v8862_v19 = vld [vmem:[%s14286_s16 + $0x358] sm:$0xff] }
 0x52f   : > { %8817 = vst [vmem:[%s17548_s29 + $0x4a0] sm:$0xff] %v8816_v10  ;;  %8819 = vst [vmem:[%s17548_s29 + $0x4a8] sm:$0xff] %v8818_v49  ;;  %v8864_v50 = vld [vmem:[%s14286_s16 + $0x360] sm:$0xff]  ;;  %v8866_v12 = vld [vmem:[%s14286_s16 + $0x368] sm:$0xff] }
 0x530   : > { %8821 = vst [vmem:[%s17548_s29 + $0x4b0] sm:$0xff] %v8820_v8  ;;  %8823 = vst [vmem:[%s17548_s29 + $0x4b8] sm:$0xff] %v8822_v9  ;;  %v8868_v44 = vld [vmem:[%s14286_s16 + $0x370] sm:$0xff]  ;;  %v8870_v56 = vld [vmem:[%s14286_s16 + $0x378] sm:$0xff] }
 0x531   : > { %8825 = vst [vmem:[%s17548_s29 + $0x4c0] sm:$0xff] %v8824_v47  ;;  %8827 = vst [vmem:[%s17548_s29 + $0x4c8] sm:$0xff] %v8826_v63  ;;  %v8872_v22 = vld [vmem:[%s14286_s16 + $0x380] sm:$0xff]  ;;  %v8874_v3 = vld [vmem:[%s14286_s16 + $0x388] sm:$0xff] }
 0x532   : > { %8829 = vst [vmem:[%s17548_s29 + $0x4d0] sm:$0xff] %v8828_v62  ;;  %8831 = vst [vmem:[%s17548_s29 + $0x4d8] sm:$0xff] %v8830_v32  ;;  %v8876_v33 = vld [vmem:[%s14286_s16 + $0x390] sm:$0xff]  ;;  %v8878_v61 = vld [vmem:[%s14286_s16 + $0x398] sm:$0xff] }
 0x533   : > { %8833 = vst [vmem:[%s17548_s29 + $0x4e0] sm:$0xff] %v8832_v14  ;;  %8835 = vst [vmem:[%s17548_s29 + $0x4e8] sm:$0xff] %v8834_v0  ;;  %v8880_v13 = vld [vmem:[%s14286_s16 + $0x3a0] sm:$0xff]  ;;  %v8882_v51 = vld [vmem:[%s14286_s16 + $0x3a8] sm:$0xff] }
 0x534   : > { %8837 = vst [vmem:[%s17548_s29 + $0x4f0] sm:$0xff] %v8836_v42  ;;  %8839 = vst [vmem:[%s17548_s29 + $0x4f8] sm:$0xff] %v8838_v55  ;;  %v8884_v48 = vld [vmem:[%s14286_s16 + $0x3b0] sm:$0xff]  ;;  %v8886_v43 = vld [vmem:[%s14286_s16 + $0x3b8] sm:$0xff] }
 0x535   : > { %8841 = vst [vmem:[%s17548_s29 + $0x500] sm:$0xff] %v8840_v2  ;;  %8843 = vst [vmem:[%s17548_s29 + $0x508] sm:$0xff] %v8842_v60  ;;  %v8888_v7 = vld [vmem:[%s14286_s16 + $0x3c0] sm:$0xff]  ;;  %v8890_v4 = vld [vmem:[%s14286_s16 + $0x3c8] sm:$0xff] }
 0x536   : > { %8845 = vst [vmem:[%s17548_s29 + $0x510] sm:$0xff] %v8844_v6  ;;  %8847 = vst [vmem:[%s17548_s29 + $0x518] sm:$0xff] %v8846_v1  ;;  %v8892_v30 = vld [vmem:[%s14286_s16 + $0x3d0] sm:$0xff]  ;;  %v8894_v40 = vld [vmem:[%s14286_s16 + $0x3d8] sm:$0xff] }
 0x537   : > { %8849 = vst [vmem:[%s17548_s29 + $0x520] sm:$0xff] %v8848_v36  ;;  %8851 = vst [vmem:[%s17548_s29 + $0x528] sm:$0xff] %v8850_v58  ;;  %v8896_v17 = vld [vmem:[%s14286_s16 + $0x3e0] sm:$0xff]  ;;  %v8898_v25 = vld [vmem:[%s14286_s16 + $0x3e8] sm:$0xff] }
 0x538   : > { %8853 = vst [vmem:[%s17548_s29 + $0x530] sm:$0xff] %v8852_v45  ;;  %8855 = vst [vmem:[%s17548_s29 + $0x538] sm:$0xff] %v8854_v24  ;;  %v8900_v11 = vld [vmem:[%s14286_s16 + $0x3f0] sm:$0xff]  ;;  %v8902_v21 = vld [vmem:[%s14286_s16 + $0x3f8] sm:$0xff] }
 0x539   : > { %8857 = vst [vmem:[%s17548_s29 + $0x540] sm:$0xff] %v8856_v59  ;;  %8859 = vst [vmem:[%s17548_s29 + $0x548] sm:$0xff] %v8858_v54  ;;  %v8904_v34 = vld [vmem:[%s14286_s16 + $0x400] sm:$0xff]  ;;  %v8906_v53 = vld [vmem:[%s14286_s16 + $0x408] sm:$0xff] }
 0x53a   : > { %8861 = vst [vmem:[%s17548_s29 + $0x550] sm:$0xff] %v8860_v29  ;;  %8863 = vst [vmem:[%s17548_s29 + $0x558] sm:$0xff] %v8862_v19  ;;  %v8908_v57 = vld [vmem:[%s14286_s16 + $0x410] sm:$0xff]  ;;  %v8910_v46 = vld [vmem:[%s14286_s16 + $0x418] sm:$0xff] }
 0x53b   : > { %8865 = vst [vmem:[%s17548_s29 + $0x560] sm:$0xff] %v8864_v50  ;;  %8867 = vst [vmem:[%s17548_s29 + $0x568] sm:$0xff] %v8866_v12  ;;  %v8912_v23 = vld [vmem:[%s14286_s16 + $0x420] sm:$0xff]  ;;  %v8914_v39 = vld [vmem:[%s14286_s16 + $0x428] sm:$0xff] }
 0x53c   : > { %8869 = vst [vmem:[%s17548_s29 + $0x570] sm:$0xff] %v8868_v44  ;;  %8871 = vst [vmem:[%s17548_s29 + $0x578] sm:$0xff] %v8870_v56  ;;  %v8916_v52 = vld [vmem:[%s14286_s16 + $0x430] sm:$0xff]  ;;  %v8918_v15 = vld [vmem:[%s14286_s16 + $0x438] sm:$0xff] }
 0x53d   : > { %8873 = vst [vmem:[%s17548_s29 + $0x580] sm:$0xff] %v8872_v22  ;;  %8875 = vst [vmem:[%s17548_s29 + $0x588] sm:$0xff] %v8874_v3  ;;  %v8920_v18 = vld [vmem:[%s14286_s16 + $0x440] sm:$0xff]  ;;  %v8922_v41 = vld [vmem:[%s14286_s16 + $0x448] sm:$0xff] }
 0x53e   : > { %8877 = vst [vmem:[%s17548_s29 + $0x590] sm:$0xff] %v8876_v33  ;;  %8879 = vst [vmem:[%s17548_s29 + $0x598] sm:$0xff] %v8878_v61  ;;  %v8924_v20 = vld [vmem:[%s14286_s16 + $0x450] sm:$0xff]  ;;  %v8926_v26 = vld [vmem:[%s14286_s16 + $0x458] sm:$0xff] }
 0x53f   : > { %8881 = vst [vmem:[%s17548_s29 + $0x5a0] sm:$0xff] %v8880_v13  ;;  %8883 = vst [vmem:[%s17548_s29 + $0x5a8] sm:$0xff] %v8882_v51  ;;  %v8928_v37 = vld [vmem:[%s14286_s16 + $0x460] sm:$0xff]  ;;  %v8930_v31 = vld [vmem:[%s14286_s16 + $0x468] sm:$0xff] }
 0x540   : > { %8885 = vst [vmem:[%s17548_s29 + $0x5b0] sm:$0xff] %v8884_v48  ;;  %8887 = vst [vmem:[%s17548_s29 + $0x5b8] sm:$0xff] %v8886_v43  ;;  %v8932_v5 = vld [vmem:[%s14286_s16 + $0x470] sm:$0xff]  ;;  %v8934_v35 = vld [vmem:[%s14286_s16 + $0x478] sm:$0xff] }
 0x541   : > { %8889 = vst [vmem:[%s17548_s29 + $0x5c0] sm:$0xff] %v8888_v7  ;;  %8891 = vst [vmem:[%s17548_s29 + $0x5c8] sm:$0xff] %v8890_v4  ;;  %v8936_v27 = vld [vmem:[%s14286_s16 + $0x480] sm:$0xff]  ;;  %v8938_v16 = vld [vmem:[%s14286_s16 + $0x488] sm:$0xff] }
 0x542   : > { %8893 = vst [vmem:[%s17548_s29 + $0x5d0] sm:$0xff] %v8892_v30  ;;  %8895 = vst [vmem:[%s17548_s29 + $0x5d8] sm:$0xff] %v8894_v40  ;;  %v8940_v38 = vld [vmem:[%s14286_s16 + $0x490] sm:$0xff]  ;;  %v8942_v28 = vld [vmem:[%s14286_s16 + $0x498] sm:$0xff] }
 0x543   : > { %8897 = vst [vmem:[%s17548_s29 + $0x5e0] sm:$0xff] %v8896_v17  ;;  %8899 = vst [vmem:[%s17548_s29 + $0x5e8] sm:$0xff] %v8898_v25  ;;  %v8944_v10 = vld [vmem:[%s14286_s16 + $0x4a0] sm:$0xff]  ;;  %v8946_v49 = vld [vmem:[%s14286_s16 + $0x4a8] sm:$0xff] }
 0x544   : > { %8901 = vst [vmem:[%s17548_s29 + $0x5f0] sm:$0xff] %v8900_v11  ;;  %8903 = vst [vmem:[%s17548_s29 + $0x5f8] sm:$0xff] %v8902_v21  ;;  %v8948_v8 = vld [vmem:[%s14286_s16 + $0x4b0] sm:$0xff]  ;;  %v8950_v9 = vld [vmem:[%s14286_s16 + $0x4b8] sm:$0xff] }
 0x545   : > { %8905 = vst [vmem:[%s17548_s29 + $0x800] sm:$0xff] %v8904_v34  ;;  %8907 = vst [vmem:[%s17548_s29 + $0x808] sm:$0xff] %v8906_v53  ;;  %v8952_v47 = vld [vmem:[%s14286_s16 + $0x4c0] sm:$0xff]  ;;  %v8954_v63 = vld [vmem:[%s14286_s16 + $0x4c8] sm:$0xff] }
 0x546   : > { %8909 = vst [vmem:[%s17548_s29 + $0x810] sm:$0xff] %v8908_v57  ;;  %8911 = vst [vmem:[%s17548_s29 + $0x818] sm:$0xff] %v8910_v46  ;;  %v8956_v62 = vld [vmem:[%s14286_s16 + $0x4d0] sm:$0xff]  ;;  %v8958_v32 = vld [vmem:[%s14286_s16 + $0x4d8] sm:$0xff] }
 0x547   : > { %8913 = vst [vmem:[%s17548_s29 + $0x820] sm:$0xff] %v8912_v23  ;;  %8915 = vst [vmem:[%s17548_s29 + $0x828] sm:$0xff] %v8914_v39  ;;  %v8960_v14 = vld [vmem:[%s14286_s16 + $0x4e0] sm:$0xff]  ;;  %v8962_v0 = vld [vmem:[%s14286_s16 + $0x4e8] sm:$0xff] }
 0x548   : > { %8917 = vst [vmem:[%s17548_s29 + $0x830] sm:$0xff] %v8916_v52  ;;  %8919 = vst [vmem:[%s17548_s29 + $0x838] sm:$0xff] %v8918_v15  ;;  %v8964_v42 = vld [vmem:[%s14286_s16 + $0x4f0] sm:$0xff]  ;;  %v8966_v55 = vld [vmem:[%s14286_s16 + $0x4f8] sm:$0xff] }
 0x549   : > { %8921 = vst [vmem:[%s17548_s29 + $0x840] sm:$0xff] %v8920_v18  ;;  %8923 = vst [vmem:[%s17548_s29 + $0x848] sm:$0xff] %v8922_v41  ;;  %v8968_v2 = vld [vmem:[%s14286_s16 + $0x500] sm:$0xff]  ;;  %v8970_v60 = vld [vmem:[%s14286_s16 + $0x508] sm:$0xff] }
 0x54a   : > { %8925 = vst [vmem:[%s17548_s29 + $0x850] sm:$0xff] %v8924_v20  ;;  %8927 = vst [vmem:[%s17548_s29 + $0x858] sm:$0xff] %v8926_v26  ;;  %v8972_v6 = vld [vmem:[%s14286_s16 + $0x510] sm:$0xff]  ;;  %v8974_v1 = vld [vmem:[%s14286_s16 + $0x518] sm:$0xff] }
 0x54b   : > { %8929 = vst [vmem:[%s17548_s29 + $0x860] sm:$0xff] %v8928_v37  ;;  %8931 = vst [vmem:[%s17548_s29 + $0x868] sm:$0xff] %v8930_v31  ;;  %v8976_v36 = vld [vmem:[%s14286_s16 + $0x520] sm:$0xff]  ;;  %v8978_v58 = vld [vmem:[%s14286_s16 + $0x528] sm:$0xff] }
 0x54c   : > { %8933 = vst [vmem:[%s17548_s29 + $0x870] sm:$0xff] %v8932_v5  ;;  %8935 = vst [vmem:[%s17548_s29 + $0x878] sm:$0xff] %v8934_v35  ;;  %v8980_v45 = vld [vmem:[%s14286_s16 + $0x530] sm:$0xff]  ;;  %v8982_v24 = vld [vmem:[%s14286_s16 + $0x538] sm:$0xff] }
 0x54d   : > { %8937 = vst [vmem:[%s17548_s29 + $0x880] sm:$0xff] %v8936_v27  ;;  %8939 = vst [vmem:[%s17548_s29 + $0x888] sm:$0xff] %v8938_v16  ;;  %v8984_v59 = vld [vmem:[%s14286_s16 + $0x540] sm:$0xff]  ;;  %v8986_v54 = vld [vmem:[%s14286_s16 + $0x548] sm:$0xff] }
 0x54e   : > { %8941 = vst [vmem:[%s17548_s29 + $0x890] sm:$0xff] %v8940_v38  ;;  %8943 = vst [vmem:[%s17548_s29 + $0x898] sm:$0xff] %v8942_v28  ;;  %v8988_v29 = vld [vmem:[%s14286_s16 + $0x550] sm:$0xff]  ;;  %v8990_v19 = vld [vmem:[%s14286_s16 + $0x558] sm:$0xff] }
 0x54f   : > { %8945 = vst [vmem:[%s17548_s29 + $0x8a0] sm:$0xff] %v8944_v10  ;;  %8947 = vst [vmem:[%s17548_s29 + $0x8a8] sm:$0xff] %v8946_v49  ;;  %v8992_v50 = vld [vmem:[%s14286_s16 + $0x560] sm:$0xff]  ;;  %v8994_v12 = vld [vmem:[%s14286_s16 + $0x568] sm:$0xff] }
 0x550   : > { %8949 = vst [vmem:[%s17548_s29 + $0x8b0] sm:$0xff] %v8948_v8  ;;  %8951 = vst [vmem:[%s17548_s29 + $0x8b8] sm:$0xff] %v8950_v9  ;;  %v8996_v44 = vld [vmem:[%s14286_s16 + $0x570] sm:$0xff]  ;;  %v8998_v56 = vld [vmem:[%s14286_s16 + $0x578] sm:$0xff] }
 0x551   : > { %8953 = vst [vmem:[%s17548_s29 + $0x8c0] sm:$0xff] %v8952_v47  ;;  %8955 = vst [vmem:[%s17548_s29 + $0x8c8] sm:$0xff] %v8954_v63  ;;  %v9000_v22 = vld [vmem:[%s14286_s16 + $0x580] sm:$0xff]  ;;  %v9002_v3 = vld [vmem:[%s14286_s16 + $0x588] sm:$0xff] }
 0x552   : > { %8957 = vst [vmem:[%s17548_s29 + $0x8d0] sm:$0xff] %v8956_v62  ;;  %8959 = vst [vmem:[%s17548_s29 + $0x8d8] sm:$0xff] %v8958_v32  ;;  %v9004_v33 = vld [vmem:[%s14286_s16 + $0x590] sm:$0xff]  ;;  %v9006_v61 = vld [vmem:[%s14286_s16 + $0x598] sm:$0xff] }
 0x553   : > { %8961 = vst [vmem:[%s17548_s29 + $0x8e0] sm:$0xff] %v8960_v14  ;;  %8963 = vst [vmem:[%s17548_s29 + $0x8e8] sm:$0xff] %v8962_v0  ;;  %v9008_v13 = vld [vmem:[%s14286_s16 + $0x5a0] sm:$0xff]  ;;  %v9010_v51 = vld [vmem:[%s14286_s16 + $0x5a8] sm:$0xff] }
 0x554   : > { %8965 = vst [vmem:[%s17548_s29 + $0x8f0] sm:$0xff] %v8964_v42  ;;  %8967 = vst [vmem:[%s17548_s29 + $0x8f8] sm:$0xff] %v8966_v55  ;;  %v9012_v48 = vld [vmem:[%s14286_s16 + $0x5b0] sm:$0xff]  ;;  %v9014_v43 = vld [vmem:[%s14286_s16 + $0x5b8] sm:$0xff] }
 0x555   : > { %8969 = vst [vmem:[%s17548_s29 + $0x900] sm:$0xff] %v8968_v2  ;;  %8971 = vst [vmem:[%s17548_s29 + $0x908] sm:$0xff] %v8970_v60  ;;  %v9016_v7 = vld [vmem:[%s14286_s16 + $0x5c0] sm:$0xff]  ;;  %v9018_v4 = vld [vmem:[%s14286_s16 + $0x5c8] sm:$0xff] }
 0x556   : > { %8973 = vst [vmem:[%s17548_s29 + $0x910] sm:$0xff] %v8972_v6  ;;  %8975 = vst [vmem:[%s17548_s29 + $0x918] sm:$0xff] %v8974_v1  ;;  %v9020_v30 = vld [vmem:[%s14286_s16 + $0x5d0] sm:$0xff]  ;;  %v9022_v40 = vld [vmem:[%s14286_s16 + $0x5d8] sm:$0xff] }
 0x557   : > { %8977 = vst [vmem:[%s17548_s29 + $0x920] sm:$0xff] %v8976_v36  ;;  %8979 = vst [vmem:[%s17548_s29 + $0x928] sm:$0xff] %v8978_v58  ;;  %v9024_v17 = vld [vmem:[%s14286_s16 + $0x5e0] sm:$0xff]  ;;  %v9026_v25 = vld [vmem:[%s14286_s16 + $0x5e8] sm:$0xff] }
 0x558   : > { %8981 = vst [vmem:[%s17548_s29 + $0x930] sm:$0xff] %v8980_v45  ;;  %8983 = vst [vmem:[%s17548_s29 + $0x938] sm:$0xff] %v8982_v24  ;;  %v9028_v11 = vld [vmem:[%s14286_s16 + $0x5f0] sm:$0xff]  ;;  %v9030_v21 = vld [vmem:[%s14286_s16 + $0x5f8] sm:$0xff] }
 0x559   : > { %8985 = vst [vmem:[%s17548_s29 + $0x940] sm:$0xff] %v8984_v59  ;;  %8987 = vst [vmem:[%s17548_s29 + $0x948] sm:$0xff] %v8986_v54  ;;  %v9032_v34 = vld [vmem:[%s14286_s16 + $0x600] sm:$0xff]  ;;  %v9034_v53 = vld [vmem:[%s14286_s16 + $0x608] sm:$0xff] }
 0x55a   : > { %8989 = vst [vmem:[%s17548_s29 + $0x950] sm:$0xff] %v8988_v29  ;;  %8991 = vst [vmem:[%s17548_s29 + $0x958] sm:$0xff] %v8990_v19  ;;  %v9036_v57 = vld [vmem:[%s14286_s16 + $0x610] sm:$0xff]  ;;  %v9038_v46 = vld [vmem:[%s14286_s16 + $0x618] sm:$0xff] }
 0x55b   : > { %8993 = vst [vmem:[%s17548_s29 + $0x960] sm:$0xff] %v8992_v50  ;;  %8995 = vst [vmem:[%s17548_s29 + $0x968] sm:$0xff] %v8994_v12  ;;  %v9040_v23 = vld [vmem:[%s14286_s16 + $0x620] sm:$0xff]  ;;  %v9042_v39 = vld [vmem:[%s14286_s16 + $0x628] sm:$0xff] }
 0x55c   : > { %8997 = vst [vmem:[%s17548_s29 + $0x970] sm:$0xff] %v8996_v44  ;;  %8999 = vst [vmem:[%s17548_s29 + $0x978] sm:$0xff] %v8998_v56  ;;  %v9044_v52 = vld [vmem:[%s14286_s16 + $0x630] sm:$0xff]  ;;  %v9046_v15 = vld [vmem:[%s14286_s16 + $0x638] sm:$0xff] }
 0x55d   : > { %9001 = vst [vmem:[%s17548_s29 + $0x980] sm:$0xff] %v9000_v22  ;;  %9003 = vst [vmem:[%s17548_s29 + $0x988] sm:$0xff] %v9002_v3  ;;  %v9048_v18 = vld [vmem:[%s14286_s16 + $0x640] sm:$0xff]  ;;  %v9050_v41 = vld [vmem:[%s14286_s16 + $0x648] sm:$0xff] }
 0x55e   : > { %9005 = vst [vmem:[%s17548_s29 + $0x990] sm:$0xff] %v9004_v33  ;;  %9007 = vst [vmem:[%s17548_s29 + $0x998] sm:$0xff] %v9006_v61  ;;  %v9052_v20 = vld [vmem:[%s14286_s16 + $0x650] sm:$0xff]  ;;  %v9054_v26 = vld [vmem:[%s14286_s16 + $0x658] sm:$0xff] }
 0x55f   : > { %9009 = vst [vmem:[%s17548_s29 + $0x9a0] sm:$0xff] %v9008_v13  ;;  %9011 = vst [vmem:[%s17548_s29 + $0x9a8] sm:$0xff] %v9010_v51  ;;  %v9056_v37 = vld [vmem:[%s14286_s16 + $0x660] sm:$0xff]  ;;  %v9058_v31 = vld [vmem:[%s14286_s16 + $0x668] sm:$0xff] }
 0x560   : > { %9013 = vst [vmem:[%s17548_s29 + $0x9b0] sm:$0xff] %v9012_v48  ;;  %9015 = vst [vmem:[%s17548_s29 + $0x9b8] sm:$0xff] %v9014_v43  ;;  %v9060_v5 = vld [vmem:[%s14286_s16 + $0x670] sm:$0xff]  ;;  %v9062_v35 = vld [vmem:[%s14286_s16 + $0x678] sm:$0xff] }
 0x561   : > { %9017 = vst [vmem:[%s17548_s29 + $0x9c0] sm:$0xff] %v9016_v7  ;;  %9019 = vst [vmem:[%s17548_s29 + $0x9c8] sm:$0xff] %v9018_v4  ;;  %v9064_v27 = vld [vmem:[%s14286_s16 + $0x680] sm:$0xff]  ;;  %v9066_v16 = vld [vmem:[%s14286_s16 + $0x688] sm:$0xff] }
 0x562   : > { %9021 = vst [vmem:[%s17548_s29 + $0x9d0] sm:$0xff] %v9020_v30  ;;  %9023 = vst [vmem:[%s17548_s29 + $0x9d8] sm:$0xff] %v9022_v40  ;;  %v9068_v38 = vld [vmem:[%s14286_s16 + $0x690] sm:$0xff]  ;;  %v9070_v28 = vld [vmem:[%s14286_s16 + $0x698] sm:$0xff] }
 0x563   : > { %9025 = vst [vmem:[%s17548_s29 + $0x9e0] sm:$0xff] %v9024_v17  ;;  %9027 = vst [vmem:[%s17548_s29 + $0x9e8] sm:$0xff] %v9026_v25  ;;  %v9072_v10 = vld [vmem:[%s14286_s16 + $0x6a0] sm:$0xff]  ;;  %v9074_v49 = vld [vmem:[%s14286_s16 + $0x6a8] sm:$0xff] }
 0x564   : > { %9029 = vst [vmem:[%s17548_s29 + $0x9f0] sm:$0xff] %v9028_v11  ;;  %9031 = vst [vmem:[%s17548_s29 + $0x9f8] sm:$0xff] %v9030_v21  ;;  %v9076_v8 = vld [vmem:[%s14286_s16 + $0x6b0] sm:$0xff]  ;;  %v9078_v9 = vld [vmem:[%s14286_s16 + $0x6b8] sm:$0xff] }
 0x565   : > { %9033 = vst [vmem:[%s17548_s29 + $0xc00] sm:$0xff] %v9032_v34  ;;  %9035 = vst [vmem:[%s17548_s29 + $0xc08] sm:$0xff] %v9034_v53  ;;  %v9080_v47 = vld [vmem:[%s14286_s16 + $0x6c0] sm:$0xff]  ;;  %v9082_v63 = vld [vmem:[%s14286_s16 + $0x6c8] sm:$0xff] }
 0x566   : > { %9037 = vst [vmem:[%s17548_s29 + $0xc10] sm:$0xff] %v9036_v57  ;;  %9039 = vst [vmem:[%s17548_s29 + $0xc18] sm:$0xff] %v9038_v46  ;;  %v9084_v62 = vld [vmem:[%s14286_s16 + $0x6d0] sm:$0xff]  ;;  %v9086_v32 = vld [vmem:[%s14286_s16 + $0x6d8] sm:$0xff] }
 0x567   : > { %9041 = vst [vmem:[%s17548_s29 + $0xc20] sm:$0xff] %v9040_v23  ;;  %9043 = vst [vmem:[%s17548_s29 + $0xc28] sm:$0xff] %v9042_v39  ;;  %v9088_v14 = vld [vmem:[%s14286_s16 + $0x6e0] sm:$0xff]  ;;  %v9090_v0 = vld [vmem:[%s14286_s16 + $0x6e8] sm:$0xff] }
 0x568   : > { %9045 = vst [vmem:[%s17548_s29 + $0xc30] sm:$0xff] %v9044_v52  ;;  %9047 = vst [vmem:[%s17548_s29 + $0xc38] sm:$0xff] %v9046_v15  ;;  %v9092_v42 = vld [vmem:[%s14286_s16 + $0x6f0] sm:$0xff]  ;;  %v9094_v55 = vld [vmem:[%s14286_s16 + $0x6f8] sm:$0xff] }
 0x569   : > { %9049 = vst [vmem:[%s17548_s29 + $0xc40] sm:$0xff] %v9048_v18  ;;  %9051 = vst [vmem:[%s17548_s29 + $0xc48] sm:$0xff] %v9050_v41  ;;  %v9096_v2 = vld [vmem:[%s14286_s16 + $0x700] sm:$0xff]  ;;  %v9098_v60 = vld [vmem:[%s14286_s16 + $0x708] sm:$0xff] }
 0x56a   : > { %9053 = vst [vmem:[%s17548_s29 + $0xc50] sm:$0xff] %v9052_v20  ;;  %9055 = vst [vmem:[%s17548_s29 + $0xc58] sm:$0xff] %v9054_v26  ;;  %v9100_v6 = vld [vmem:[%s14286_s16 + $0x710] sm:$0xff]  ;;  %v9102_v1 = vld [vmem:[%s14286_s16 + $0x718] sm:$0xff] }
 0x56b   : > { %9057 = vst [vmem:[%s17548_s29 + $0xc60] sm:$0xff] %v9056_v37  ;;  %9059 = vst [vmem:[%s17548_s29 + $0xc68] sm:$0xff] %v9058_v31  ;;  %v9104_v36 = vld [vmem:[%s14286_s16 + $0x720] sm:$0xff]  ;;  %v9106_v58 = vld [vmem:[%s14286_s16 + $0x728] sm:$0xff] }
 0x56c   : > { %9061 = vst [vmem:[%s17548_s29 + $0xc70] sm:$0xff] %v9060_v5  ;;  %9063 = vst [vmem:[%s17548_s29 + $0xc78] sm:$0xff] %v9062_v35  ;;  %v9108_v45 = vld [vmem:[%s14286_s16 + $0x730] sm:$0xff]  ;;  %v9110_v24 = vld [vmem:[%s14286_s16 + $0x738] sm:$0xff] }
 0x56d   : > { %9065 = vst [vmem:[%s17548_s29 + $0xc80] sm:$0xff] %v9064_v27  ;;  %9067 = vst [vmem:[%s17548_s29 + $0xc88] sm:$0xff] %v9066_v16  ;;  %v9112_v59 = vld [vmem:[%s14286_s16 + $0x740] sm:$0xff]  ;;  %v9114_v54 = vld [vmem:[%s14286_s16 + $0x748] sm:$0xff] }
 0x56e   : > { %9069 = vst [vmem:[%s17548_s29 + $0xc90] sm:$0xff] %v9068_v38  ;;  %9071 = vst [vmem:[%s17548_s29 + $0xc98] sm:$0xff] %v9070_v28  ;;  %v9116_v29 = vld [vmem:[%s14286_s16 + $0x750] sm:$0xff]  ;;  %v9118_v19 = vld [vmem:[%s14286_s16 + $0x758] sm:$0xff] }
 0x56f   : > { %9073 = vst [vmem:[%s17548_s29 + $0xca0] sm:$0xff] %v9072_v10  ;;  %9075 = vst [vmem:[%s17548_s29 + $0xca8] sm:$0xff] %v9074_v49  ;;  %v9120_v50 = vld [vmem:[%s14286_s16 + $0x760] sm:$0xff]  ;;  %v9122_v12 = vld [vmem:[%s14286_s16 + $0x768] sm:$0xff] }
 0x570   : > { %9077 = vst [vmem:[%s17548_s29 + $0xcb0] sm:$0xff] %v9076_v8  ;;  %9079 = vst [vmem:[%s17548_s29 + $0xcb8] sm:$0xff] %v9078_v9  ;;  %v9124_v44 = vld [vmem:[%s14286_s16 + $0x770] sm:$0xff]  ;;  %v9126_v56 = vld [vmem:[%s14286_s16 + $0x778] sm:$0xff] }
 0x571   : > { %9081 = vst [vmem:[%s17548_s29 + $0xcc0] sm:$0xff] %v9080_v47  ;;  %9083 = vst [vmem:[%s17548_s29 + $0xcc8] sm:$0xff] %v9082_v63  ;;  %v9128_v22 = vld [vmem:[%s14286_s16 + $0x780] sm:$0xff]  ;;  %v9130_v3 = vld [vmem:[%s14286_s16 + $0x788] sm:$0xff] }
 0x572   : > { %9085 = vst [vmem:[%s17548_s29 + $0xcd0] sm:$0xff] %v9084_v62  ;;  %9087 = vst [vmem:[%s17548_s29 + $0xcd8] sm:$0xff] %v9086_v32  ;;  %v9132_v33 = vld [vmem:[%s14286_s16 + $0x790] sm:$0xff]  ;;  %v9134_v61 = vld [vmem:[%s14286_s16 + $0x798] sm:$0xff] }
 0x573   : > { %9089 = vst [vmem:[%s17548_s29 + $0xce0] sm:$0xff] %v9088_v14  ;;  %9091 = vst [vmem:[%s17548_s29 + $0xce8] sm:$0xff] %v9090_v0  ;;  %v9136_v13 = vld [vmem:[%s14286_s16 + $0x7a0] sm:$0xff]  ;;  %v9138_v51 = vld [vmem:[%s14286_s16 + $0x7a8] sm:$0xff] }
 0x574   : > { %9093 = vst [vmem:[%s17548_s29 + $0xcf0] sm:$0xff] %v9092_v42  ;;  %9095 = vst [vmem:[%s17548_s29 + $0xcf8] sm:$0xff] %v9094_v55  ;;  %v9140_v48 = vld [vmem:[%s14286_s16 + $0x7b0] sm:$0xff]  ;;  %v9142_v43 = vld [vmem:[%s14286_s16 + $0x7b8] sm:$0xff] }
 0x575   : > { %9097 = vst [vmem:[%s17548_s29 + $0xd00] sm:$0xff] %v9096_v2  ;;  %9099 = vst [vmem:[%s17548_s29 + $0xd08] sm:$0xff] %v9098_v60  ;;  %v9144_v7 = vld [vmem:[%s14286_s16 + $0x7c0] sm:$0xff]  ;;  %v9146_v4 = vld [vmem:[%s14286_s16 + $0x7c8] sm:$0xff] }
 0x576   : > { %9101 = vst [vmem:[%s17548_s29 + $0xd10] sm:$0xff] %v9100_v6  ;;  %9103 = vst [vmem:[%s17548_s29 + $0xd18] sm:$0xff] %v9102_v1  ;;  %v9148_v30 = vld [vmem:[%s14286_s16 + $0x7d0] sm:$0xff]  ;;  %v9150_v40 = vld [vmem:[%s14286_s16 + $0x7d8] sm:$0xff] }
 0x577   : > { %9105 = vst [vmem:[%s17548_s29 + $0xd20] sm:$0xff] %v9104_v36  ;;  %9107 = vst [vmem:[%s17548_s29 + $0xd28] sm:$0xff] %v9106_v58  ;;  %v9152_v17 = vld [vmem:[%s14286_s16 + $0x7e0] sm:$0xff]  ;;  %v9154_v25 = vld [vmem:[%s14286_s16 + $0x7e8] sm:$0xff] }
 0x578   : > { %9109 = vst [vmem:[%s17548_s29 + $0xd30] sm:$0xff] %v9108_v45  ;;  %9111 = vst [vmem:[%s17548_s29 + $0xd38] sm:$0xff] %v9110_v24  ;;  %v9156_v11 = vld [vmem:[%s14286_s16 + $0x7f0] sm:$0xff]  ;;  %v9158_v21 = vld [vmem:[%s14286_s16 + $0x7f8] sm:$0xff] }
 0x579   : > { %9113 = vst [vmem:[%s17548_s29 + $0xd40] sm:$0xff] %v9112_v59  ;;  %9115 = vst [vmem:[%s17548_s29 + $0xd48] sm:$0xff] %v9114_v54 }
 0x57a   : > { %9117 = vst [vmem:[%s17548_s29 + $0xd50] sm:$0xff] %v9116_v29  ;;  %9119 = vst [vmem:[%s17548_s29 + $0xd58] sm:$0xff] %v9118_v19 }
 0x57b   : > { %9121 = vst [vmem:[%s17548_s29 + $0xd60] sm:$0xff] %v9120_v50  ;;  %9123 = vst [vmem:[%s17548_s29 + $0xd68] sm:$0xff] %v9122_v12 }
 0x57c   : > { %9125 = vst [vmem:[%s17548_s29 + $0xd70] sm:$0xff] %v9124_v44  ;;  %9127 = vst [vmem:[%s17548_s29 + $0xd78] sm:$0xff] %v9126_v56 }
 0x57d   : > { %9129 = vst [vmem:[%s17548_s29 + $0xd80] sm:$0xff] %v9128_v22  ;;  %9131 = vst [vmem:[%s17548_s29 + $0xd88] sm:$0xff] %v9130_v3 }
 0x57e   : > { %9133 = vst [vmem:[%s17548_s29 + $0xd90] sm:$0xff] %v9132_v33  ;;  %9135 = vst [vmem:[%s17548_s29 + $0xd98] sm:$0xff] %v9134_v61 }
 0x57f   : > { %9137 = vst [vmem:[%s17548_s29 + $0xda0] sm:$0xff] %v9136_v13  ;;  %9139 = vst [vmem:[%s17548_s29 + $0xda8] sm:$0xff] %v9138_v51 }
 0x580   : > { %9141 = vst [vmem:[%s17548_s29 + $0xdb0] sm:$0xff] %v9140_v48  ;;  %9143 = vst [vmem:[%s17548_s29 + $0xdb8] sm:$0xff] %v9142_v43 }
 0x581   : > { %9145 = vst [vmem:[%s17548_s29 + $0xdc0] sm:$0xff] %v9144_v7  ;;  %9147 = vst [vmem:[%s17548_s29 + $0xdc8] sm:$0xff] %v9146_v4 }
 0x582   : > { %9149 = vst [vmem:[%s17548_s29 + $0xdd0] sm:$0xff] %v9148_v30  ;;  %9151 = vst [vmem:[%s17548_s29 + $0xdd8] sm:$0xff] %v9150_v40 }
 0x583   : > { %9153 = vst [vmem:[%s17548_s29 + $0xde0] sm:$0xff] %v9152_v17  ;;  %9155 = vst [vmem:[%s17548_s29 + $0xde8] sm:$0xff] %v9154_v25 }
 0x584   : > { %9157 = vst [vmem:[%s17548_s29 + $0xdf0] sm:$0xff] %v9156_v11  ;;  %9159 = vst [vmem:[%s17548_s29 + $0xdf8] sm:$0xff] %v9158_v21 }
 0x585 PF: > { %s20_s28 = sadd.s32 1, %s12842_s28   ;;  %s18166_s12 = sld [smem:[#allocation8_spill]] }
 0x586   : > { %p17_p7 = scmp.ge.s32.totalorder %s20_s28, 6   ;;  %s18167_s8 = sld [smem:[#allocation9_spill]] }
 0x587   : > { %s18168_s21 = smov %s12818_s22  ;;  %s18169_s22 = smov %s12822_s23 }
 0x588   : > { %s18170_s23 = smov %s12959_s17  ;;  %s18171_s24 = smov %s12834_s26 }
 0x589   : > { %s18172_s25 = smov %s12838_s27  ;;  %19 = sbr.rel (!%p17_p7) target bundleno = 7 (0x7), region = 232 }
 0x58b   : > { %s18173_s26 = smov %s18166_s12 }
 0x58c   : > { %s18174_s27 = smov %s18167_s8 }
 0x58e   :  { %9189 = vsyncpa [#allocation3], 1 }
 0x58f   :  { %9191 = vsyncpa [#allocation3 + $0x1], 1 }

</bundles_post_ra>
